<compile_context>
chip_gen: v7x
topology: tpu7x:2x2x1
jax: 0.10.0
libtpu: 0.0.40
codegen_flags: <defaults>
</compile_context>

<pallas_src>
import functools

import jax
import jax.numpy as jnp
import numpy as np
from jax import lax
from jax.experimental import pallas as pl
from jax.experimental.pallas import tpu as pltpu


# MXU input dtype. float32 matches the PyTorch reference; jnp.bfloat16 is the
# fast MXU path on v6e/v7x (accumulation stays f32 either way).
COMPUTE_DTYPE = jnp.float32


# ------------------------------ fused kernel ------------------------------- #

def _fused_kernel(p_ref, w1_ref, b1_ref, w2_ref, b2_ref, sel_ref,
                  wf1_ref, bf1_ref, wf2_ref, bf2_ref, o_ref, *, compute_dtype):
    f32 = jnp.float32
    patches = p_ref[0]                                            # (48, 225)

    # conv1 + bias + ReLU -> h1: 16 channels (sublanes) x 225 = 15*15 (lanes).
    h1 = jnp.dot(w1_ref[...], patches, preferred_element_type=f32)
    h1 = jnp.maximum(h1 + b1_ref[...], 0.0).astype(compute_dtype)

    # conv2: gather the 16 (kh, kw)-shifted views of h1 with constant 0/1
    # selection matrices (exact, on the MXU), stack along the contraction dim,
    # then one matmul against the packed (32, 256) conv2 weights.
    shifted = [
        jnp.dot(h1, sel_ref[t], preferred_element_type=f32).astype(compute_dtype)
        for t in range(16)
    ]
    g = jnp.concatenate(shifted, axis=0)                          # (256, 144)
    h2 = jnp.dot(w2_ref[...], g, preferred_element_type=f32)
    h2 = jnp.maximum(h2 + b2_ref[...], 0.0).astype(compute_dtype)  # (32, 144)
    # h2 is already in torch NCHW-flatten order: row = channel, col = y*12 + x.

    # fc1 (outputs padded 100 -> 128) + ReLU: accumulate channel-by-channel so
    # the (32, 144) activation never needs an in-kernel flatten/relayout.
    z1 = jnp.zeros((1, 128), f32)
    for c in range(32):
        z1 = z1 + jnp.dot(h2[c:c + 1, :], wf1_ref[c],
                          preferred_element_type=f32)
    z1 = jnp.maximum(z1 + bf1_ref[...], 0.0).astype(compute_dtype)

    # fc2 (outputs padded 10 -> 128; real logits are the first 10 lanes).
    z2 = jnp.dot(z1, wf2_ref[...], preferred_element_type=f32) + bf2_ref[...]
    o_ref[0] = z2.astype(o_ref.dtype)


def _fused_forward_pallas(prepped, patches):
    B = patches.shape[0]
    kernel = functools.partial(_fused_kernel,
                               compute_dtype=prepped["w1"].dtype)
    out = pl.pallas_call(
        kernel,
        out_shape=jax.ShapeDtypeStruct((B, 1, 128), jnp.float32),
        grid=(B,),
        in_specs=[
            pl.BlockSpec((1, 48, 225), lambda i: (i, 0, 0)),      # per-image patches
            pl.BlockSpec((16, 48), lambda i: (0, 0)),             # conv1 weights
            pl.BlockSpec((16, 1), lambda i: (0, 0)),              # conv1 bias
            pl.BlockSpec((32, 256), lambda i: (0, 0)),            # conv2 weights
            pl.BlockSpec((32, 1), lambda i: (0, 0)),              # conv2 bias
            pl.BlockSpec((16, 225, 144), lambda i: (0, 0, 0)),    # conv2 gather mats
            pl.BlockSpec((32, 144, 128), lambda i: (0, 0, 0)),    # fc1 weights (padded)
            pl.BlockSpec((1, 128), lambda i: (0, 0)),             # fc1 bias (padded)
            pl.BlockSpec((128, 128), lambda i: (0, 0)),           # fc2 weights (padded)
            pl.BlockSpec((1, 128), lambda i: (0, 0)),             # fc2 bias (padded)
        ],
        out_specs=pl.BlockSpec((1, 1, 128), lambda i: (i, 0, 0)),
        compiler_params=pltpu.CompilerParams(
            dimension_semantics=("parallel",),        # shard batch across TCs on v7x
            vmem_limit_bytes=32 * 1024 * 1024,        # explicit; ~10 MiB actually used
        ),
    )(patches, prepped["w1"], prepped["b1"], prepped["w2"], prepped["b2"],
      prepped["sel"], prepped["wf1"], prepped["bf1"], prepped["wf2"],
      prepped["bf2"])
    return out[:, 0, :10]


# ------------------------------ wrapper glue -------------------------------- #

def _conv1_patches(x, dtype):
    """(B,3,32,32) NCHW -> (B,48,225) im2col for the 4x4 / stride-2 conv.

    Row order is (kh, kw, c) to match the packed conv1 weights; column order is
    y*15 + x."""
    B = x.shape[0]
    cols = []
    for kh in range(4):
        for kw in range(4):
            cols.append(x[:, :, kh:kh + 29:2, kw:kw + 29:2])      # (B, 3, 15, 15)
    p = jnp.stack(cols, axis=1)                                   # (B, 16, 3, 15, 15)
    return p.reshape(B, 48, 225).astype(dtype)


def cifar_small_convnet_forward(prepped, x):
    """Nominal forward (epsilon_w = epsilon_b = epsilon_a = 0), NCHW input."""
    patches = _conv1_patches(x, prepped["w1"].dtype)
    return _fused_forward_pallas(prepped, patches)


# ------------------------------ parameters --------------------------------- #

def init_params(key):
    """Deterministic synthetic parameters (PyTorch-like uniform fan-in init)."""
    ks = jax.random.split(key, 8)

    def u(k, shape, fan_in):
        bound = 1.0 / (fan_in ** 0.5)
        return jax.random.uniform(k, shape, jnp.float32, -bound, bound)

    return {
        "conv1_w": u(ks[0], (16, 3, 4, 4), 3 * 4 * 4),
        "conv1_b": u(ks[1], (16,), 3 * 4 * 4),
        "conv2_w": u(ks[2], (32, 16, 4, 4), 16 * 4 * 4),
        "conv2_b": u(ks[3], (32,), 16 * 4 * 4),
        "fc1_w":   u(ks[4], (100, 12 * 12 * 32), 12 * 12 * 32),
        "fc1_b":   u(ks[5], (100,), 12 * 12 * 32),
        "fc2_w":   u(ks[6], (10, 100), 100),
        "fc2_b":   u(ks[7], (10,), 100),
    }


def _conv2_select_matrices(dtype):
    """0/1 gather matrices: (h1 @ sel[kh*4+kw])[c, y*12+x] = h1[c, (y+kh)*15+(x+kw)]."""
    sel = np.zeros((16, 225, 144), dtype=np.float32)
    for kh in range(4):
        for kw in range(4):
            t = kh * 4 + kw
            for y in range(12):
                for x in range(12):
                    sel[t, (y + kh) * 15 + (x + kw), y * 12 + x] = 1.0
    return jnp.asarray(sel, dtype=dtype)


def prepare_params(params, compute_dtype=COMPUTE_DTYPE):
    """One-time packing of PyTorch-layout weights into kernel layouts (outside jit)."""
    # TODO(synk): RobustConv2d / RobustLinear `non_negative` weight transform is
    # not defined in the provided source; the nominal (epsilon=0) forward with
    # raw weights is implemented here.
    w1 = params["conv1_w"].transpose(0, 2, 3, 1).reshape(16, 48)      # (O, kh*kw*C)
    w2 = params["conv2_w"].transpose(0, 2, 3, 1).reshape(32, 256)     # (O, kh*kw*C)
    wf1 = params["fc1_w"].reshape(100, 32, 144).transpose(1, 2, 0)    # (C, H*W, 100)
    wf1 = jnp.pad(wf1, ((0, 0), (0, 0), (0, 28)))                     # N: 100 -> 128
    wf2 = jnp.pad(params["fc2_w"].T, ((0, 28), (0, 118)))             # (128, 128)
    return {
        "w1": w1.astype(compute_dtype),
        "b1": params["conv1_b"].reshape(16, 1),
        "w2": w2.astype(compute_dtype),
        "b2": params["conv2_b"].reshape(32, 1),
        "sel": _conv2_select_matrices(compute_dtype),
        "wf1": wf1.astype(compute_dtype),
        "bf1": jnp.pad(params["fc1_b"], (0, 28)).reshape(1, 128),
        "wf2": wf2.astype(compute_dtype),
        "bf2": jnp.pad(params["fc2_b"], (0, 118)).reshape(1, 128),
    }


# ------------------------- pure-JAX reference check ------------------------- #

def reference_forward(params, x):
    dn = ("NCHW", "OIHW", "NCHW")
    hi = lax.Precision.HIGHEST
    y = lax.conv_general_dilated(x, params["conv1_w"], (2, 2), "VALID",
                                 dimension_numbers=dn, precision=hi)
    y = jnp.maximum(y + params["conv1_b"].reshape(1, -1, 1, 1), 0.0)
    y = lax.conv_general_dilated(y, params["conv2_w"], (1, 1), "VALID",
                                 dimension_numbers=dn, precision=hi)
    y = jnp.maximum(y + params["conv2_b"].reshape(1, -1, 1, 1), 0.0)
    y = y.reshape(x.shape[0], -1)
    y = jnp.maximum(jnp.dot(y, params["fc1_w"].T, precision=hi) + params["fc1_b"], 0.0)
    return jnp.dot(y, params["fc2_w"].T, precision=hi) + params["fc2_b"]


# ----------------------------------- main ----------------------------------- #

if __name__ == "__main__":
    key = jax.random.PRNGKey(0)
    k_x, k_p = jax.random.split(key)

    # CIFAR-sized input is required by the fc1 dimension (12 * 12 * 32).
    x = jax.random.normal(k_x, (2, 3, 32, 32), dtype=jnp.float32)
    params = init_params(k_p)
    prepped = prepare_params(params)          # one-time weight packing

    fwd = jax.jit(cifar_small_convnet_forward)
    out = jax.block_until_ready(fwd(prepped, x))

    assert out.shape == (2, 10), out.shape
    assert out.dtype == jnp.float32, out.dtype

    if COMPUTE_DTYPE == jnp.float32:
        ref = jax.block_until_ready(reference_forward(params, x))
        max_err = float(jnp.max(jnp.abs(out - ref)))
        assert jnp.allclose(out, ref, rtol=1e-2, atol=1e-2), max_err

    print("KERNEL_OK")
</pallas_src>

<mosaic_0001>
module attributes {stable_mosaic.version = 11 : i64} {
  func.func @_fused_kernel(%arg0: i32, %arg1: memref<1x48x225xf32, #tpu.memory_space<vmem>>, %arg2: memref<16x48xf32, #tpu.memory_space<vmem>>, %arg3: memref<16x1xf32, #tpu.memory_space<vmem>>, %arg4: memref<32x256xf32, #tpu.memory_space<vmem>>, %arg5: memref<32x1xf32, #tpu.memory_space<vmem>>, %arg6: memref<16x225x144xf32, #tpu.memory_space<vmem>>, %arg7: memref<32x144x128xf32, #tpu.memory_space<vmem>>, %arg8: memref<1x128xf32, #tpu.memory_space<vmem>>, %arg9: memref<128x128xf32, #tpu.memory_space<vmem>>, %arg10: memref<1x128xf32, #tpu.memory_space<vmem>>, %arg11: memref<1x1x128xf32, #tpu.memory_space<vmem>>) attributes {dimension_semantics = [#tpu.dimension_semantics<parallel>], iteration_bounds = array<i64: 2>, scalar_prefetch = 0 : i64, scratch_operands = 0 : i64, tpu.core_type = #tpu.core_type<tc>, window_params = [{transform_indices = @transform_0, window_bounds = array<i64: 1, 48, 225>}, {pipeline_mode = #tpu.pipeline_mode<synchronous>, transform_indices = @transform_1, window_bounds = array<i64: 16, 48>}, {pipeline_mode = #tpu.pipeline_mode<synchronous>, transform_indices = @transform_2, window_bounds = array<i64: 16, 1>}, {pipeline_mode = #tpu.pipeline_mode<synchronous>, transform_indices = @transform_3, window_bounds = array<i64: 32, 256>}, {pipeline_mode = #tpu.pipeline_mode<synchronous>, transform_indices = @transform_4, window_bounds = array<i64: 32, 1>}, {pipeline_mode = #tpu.pipeline_mode<synchronous>, transform_indices = @transform_5, window_bounds = array<i64: 16, 225, 144>}, {pipeline_mode = #tpu.pipeline_mode<synchronous>, transform_indices = @transform_6, window_bounds = array<i64: 32, 144, 128>}, {pipeline_mode = #tpu.pipeline_mode<synchronous>, transform_indices = @transform_7, window_bounds = array<i64: 1, 128>}, {pipeline_mode = #tpu.pipeline_mode<synchronous>, transform_indices = @transform_8, window_bounds = array<i64: 128, 128>}, {pipeline_mode = #tpu.pipeline_mode<synchronous>, transform_indices = @transform_9, window_bounds = array<i64: 1, 128>}, {transform_indices = @transform_10, window_bounds = array<i64: 1, 1, 128>}]} {
    %c0 = arith.constant 0 : index
    %c0_0 = arith.constant 0 : index
    %c0_1 = arith.constant 0 : index
    %0 = vector.load %arg1[%c0, %c0_0, %c0_1] : memref<1x48x225xf32, #tpu.memory_space<vmem>>, vector<1x48x225xf32>
    %1 = vector.shape_cast %0 : vector<1x48x225xf32> to vector<48x225xf32>
    %c0_2 = arith.constant 0 : index
    %c0_3 = arith.constant 0 : index
    %2 = vector.load %arg2[%c0_2, %c0_3] : memref<16x48xf32, #tpu.memory_space<vmem>>, vector<16x48xf32>
    %cst = arith.constant dense<0.000000e+00> : vector<16x225xf32>
    %3 = tpu.matmul %2, %1, %cst {dimension_numbers = #tpu.dot_dimension_numbers<[1], [0], [0], [1], [0, 0, 1, 1], [], []>} : vector<16x48xf32>, vector<48x225xf32>, vector<16x225xf32> -> vector<16x225xf32>
    %c0_4 = arith.constant 0 : index
    %c0_5 = arith.constant 0 : index
    %4 = vector.load %arg3[%c0_4, %c0_5] : memref<16x1xf32, #tpu.memory_space<vmem>>, vector<16x1xf32>
    %5 = vector.broadcast %4 : vector<16x1xf32> to vector<16x225xf32>
    %6 = arith.addf %3, %5 : vector<16x225xf32>
    %cst_6 = arith.constant 0.000000e+00 : f32
    %7 = vector.broadcast %cst_6 : f32 to vector<16x225xf32>
    %8 = arith.maximumf %6, %7 : vector<16x225xf32>
    %c0_7 = arith.constant 0 : index
    %c0_8 = arith.constant 0 : index
    %c0_9 = arith.constant 0 : index
    %9 = vector.load %arg6[%c0_7, %c0_8, %c0_9] : memref<16x225x144xf32, #tpu.memory_space<vmem>>, vector<1x225x144xf32>
    %10 = vector.shape_cast %9 : vector<1x225x144xf32> to vector<225x144xf32>
    %cst_10 = arith.constant dense<0.000000e+00> : vector<16x144xf32>
    %11 = tpu.matmul %8, %10, %cst_10 {dimension_numbers = #tpu.dot_dimension_numbers<[1], [0], [0], [1], [0, 0, 1, 1], [], []>} : vector<16x225xf32>, vector<225x144xf32>, vector<16x144xf32> -> vector<16x144xf32>
    %c1 = arith.constant 1 : index
    %c0_11 = arith.constant 0 : index
    %c0_12 = arith.constant 0 : index
    %12 = vector.load %arg6[%c1, %c0_11, %c0_12] : memref<16x225x144xf32, #tpu.memory_space<vmem>>, vector<1x225x144xf32>
    %13 = vector.shape_cast %12 : vector<1x225x144xf32> to vector<225x144xf32>
    %cst_13 = arith.constant dense<0.000000e+00> : vector<16x144xf32>
    %14 = tpu.matmul %8, %13, %cst_13 {dimension_numbers = #tpu.dot_dimension_numbers<[1], [0], [0], [1], [0, 0, 1, 1], [], []>} : vector<16x225xf32>, vector<225x144xf32>, vector<16x144xf32> -> vector<16x144xf32>
    %c2 = arith.constant 2 : index
    %c0_14 = arith.constant 0 : index
    %c0_15 = arith.constant 0 : index
    %15 = vector.load %arg6[%c2, %c0_14, %c0_15] : memref<16x225x144xf32, #tpu.memory_space<vmem>>, vector<1x225x144xf32>
    %16 = vector.shape_cast %15 : vector<1x225x144xf32> to vector<225x144xf32>
    %cst_16 = arith.constant dense<0.000000e+00> : vector<16x144xf32>
    %17 = tpu.matmul %8, %16, %cst_16 {dimension_numbers = #tpu.dot_dimension_numbers<[1], [0], [0], [1], [0, 0, 1, 1], [], []>} : vector<16x225xf32>, vector<225x144xf32>, vector<16x144xf32> -> vector<16x144xf32>
    %c3 = arith.constant 3 : index
    %c0_17 = arith.constant 0 : index
    %c0_18 = arith.constant 0 : index
    %18 = vector.load %arg6[%c3, %c0_17, %c0_18] : memref<16x225x144xf32, #tpu.memory_space<vmem>>, vector<1x225x144xf32>
    %19 = vector.shape_cast %18 : vector<1x225x144xf32> to vector<225x144xf32>
    %cst_19 = arith.constant dense<0.000000e+00> : vector<16x144xf32>
    %20 = tpu.matmul %8, %19, %cst_19 {dimension_numbers = #tpu.dot_dimension_numbers<[1], [0], [0], [1], [0, 0, 1, 1], [], []>} : vector<16x225xf32>, vector<225x144xf32>, vector<16x144xf32> -> vector<16x144xf32>
    %c4 = arith.constant 4 : index
    %c0_20 = arith.constant 0 : index
    %c0_21 = arith.constant 0 : index
    %21 = vector.load %arg6[%c4, %c0_20, %c0_21] : memref<16x225x144xf32, #tpu.memory_space<vmem>>, vector<1x225x144xf32>
    %22 = vector.shape_cast %21 : vector<1x225x144xf32> to vector<225x144xf32>
    %cst_22 = arith.constant dense<0.000000e+00> : vector<16x144xf32>
    %23 = tpu.matmul %8, %22, %cst_22 {dimension_numbers = #tpu.dot_dimension_numbers<[1], [0], [0], [1], [0, 0, 1, 1], [], []>} : vector<16x225xf32>, vector<225x144xf32>, vector<16x144xf32> -> vector<16x144xf32>
    %c5 = arith.constant 5 : index
    %c0_23 = arith.constant 0 : index
    %c0_24 = arith.constant 0 : index
    %24 = vector.load %arg6[%c5, %c0_23, %c0_24] : memref<16x225x144xf32, #tpu.memory_space<vmem>>, vector<1x225x144xf32>
    %25 = vector.shape_cast %24 : vector<1x225x144xf32> to vector<225x144xf32>
    %cst_25 = arith.constant dense<0.000000e+00> : vector<16x144xf32>
    %26 = tpu.matmul %8, %25, %cst_25 {dimension_numbers = #tpu.dot_dimension_numbers<[1], [0], [0], [1], [0, 0, 1, 1], [], []>} : vector<16x225xf32>, vector<225x144xf32>, vector<16x144xf32> -> vector<16x144xf32>
    %c6 = arith.constant 6 : index
    %c0_26 = arith.constant 0 : index
    %c0_27 = arith.constant 0 : index
    %27 = vector.load %arg6[%c6, %c0_26, %c0_27] : memref<16x225x144xf32, #tpu.memory_space<vmem>>, vector<1x225x144xf32>
    %28 = vector.shape_cast %27 : vector<1x225x144xf32> to vector<225x144xf32>
    %cst_28 = arith.constant dense<0.000000e+00> : vector<16x144xf32>
    %29 = tpu.matmul %8, %28, %cst_28 {dimension_numbers = #tpu.dot_dimension_numbers<[1], [0], [0], [1], [0, 0, 1, 1], [], []>} : vector<16x225xf32>, vector<225x144xf32>, vector<16x144xf32> -> vector<16x144xf32>
    %c7 = arith.constant 7 : index
    %c0_29 = arith.constant 0 : index
    %c0_30 = arith.constant 0 : index
    %30 = vector.load %arg6[%c7, %c0_29, %c0_30] : memref<16x225x144xf32, #tpu.memory_space<vmem>>, vector<1x225x144xf32>
    %31 = vector.shape_cast %30 : vector<1x225x144xf32> to vector<225x144xf32>
    %cst_31 = arith.constant dense<0.000000e+00> : vector<16x144xf32>
    %32 = tpu.matmul %8, %31, %cst_31 {dimension_numbers = #tpu.dot_dimension_numbers<[1], [0], [0], [1], [0, 0, 1, 1], [], []>} : vector<16x225xf32>, vector<225x144xf32>, vector<16x144xf32> -> vector<16x144xf32>
    %c8 = arith.constant 8 : index
    %c0_32 = arith.constant 0 : index
    %c0_33 = arith.constant 0 : index
    %33 = vector.load %arg6[%c8, %c0_32, %c0_33] : memref<16x225x144xf32, #tpu.memory_space<vmem>>, vector<1x225x144xf32>
    %34 = vector.shape_cast %33 : vector<1x225x144xf32> to vector<225x144xf32>
    %cst_34 = arith.constant dense<0.000000e+00> : vector<16x144xf32>
    %35 = tpu.matmul %8, %34, %cst_34 {dimension_numbers = #tpu.dot_dimension_numbers<[1], [0], [0], [1], [0, 0, 1, 1], [], []>} : vector<16x225xf32>, vector<225x144xf32>, vector<16x144xf32> -> vector<16x144xf32>
    %c9 = arith.constant 9 : index
    %c0_35 = arith.constant 0 : index
    %c0_36 = arith.constant 0 : index
    %36 = vector.load %arg6[%c9, %c0_35, %c0_36] : memref<16x225x144xf32, #tpu.memory_space<vmem>>, vector<1x225x144xf32>
    %37 = vector.shape_cast %36 : vector<1x225x144xf32> to vector<225x144xf32>
    %cst_37 = arith.constant dense<0.000000e+00> : vector<16x144xf32>
    %38 = tpu.matmul %8, %37, %cst_37 {dimension_numbers = #tpu.dot_dimension_numbers<[1], [0], [0], [1], [0, 0, 1, 1], [], []>} : vector<16x225xf32>, vector<225x144xf32>, vector<16x144xf32> -> vector<16x144xf32>
    %c10 = arith.constant 10 : index
    %c0_38 = arith.constant 0 : index
    %c0_39 = arith.constant 0 : index
    %39 = vector.load %arg6[%c10, %c0_38, %c0_39] : memref<16x225x144xf32, #tpu.memory_space<vmem>>, vector<1x225x144xf32>
    %40 = vector.shape_cast %39 : vector<1x225x144xf32> to vector<225x144xf32>
    %cst_40 = arith.constant dense<0.000000e+00> : vector<16x144xf32>
    %41 = tpu.matmul %8, %40, %cst_40 {dimension_numbers = #tpu.dot_dimension_numbers<[1], [0], [0], [1], [0, 0, 1, 1], [], []>} : vector<16x225xf32>, vector<225x144xf32>, vector<16x144xf32> -> vector<16x144xf32>
    %c11 = arith.constant 11 : index
    %c0_41 = arith.constant 0 : index
    %c0_42 = arith.constant 0 : index
    %42 = vector.load %arg6[%c11, %c0_41, %c0_42] : memref<16x225x144xf32, #tpu.memory_space<vmem>>, vector<1x225x144xf32>
    %43 = vector.shape_cast %42 : vector<1x225x144xf32> to vector<225x144xf32>
    %cst_43 = arith.constant dense<0.000000e+00> : vector<16x144xf32>
    %44 = tpu.matmul %8, %43, %cst_43 {dimension_numbers = #tpu.dot_dimension_numbers<[1], [0], [0], [1], [0, 0, 1, 1], [], []>} : vector<16x225xf32>, vector<225x144xf32>, vector<16x144xf32> -> vector<16x144xf32>
    %c12 = arith.constant 12 : index
    %c0_44 = arith.constant 0 : index
    %c0_45 = arith.constant 0 : index
    %45 = vector.load %arg6[%c12, %c0_44, %c0_45] : memref<16x225x144xf32, #tpu.memory_space<vmem>>, vector<1x225x144xf32>
    %46 = vector.shape_cast %45 : vector<1x225x144xf32> to vector<225x144xf32>
    %cst_46 = arith.constant dense<0.000000e+00> : vector<16x144xf32>
    %47 = tpu.matmul %8, %46, %cst_46 {dimension_numbers = #tpu.dot_dimension_numbers<[1], [0], [0], [1], [0, 0, 1, 1], [], []>} : vector<16x225xf32>, vector<225x144xf32>, vector<16x144xf32> -> vector<16x144xf32>
    %c13 = arith.constant 13 : index
    %c0_47 = arith.constant 0 : index
    %c0_48 = arith.constant 0 : index
    %48 = vector.load %arg6[%c13, %c0_47, %c0_48] : memref<16x225x144xf32, #tpu.memory_space<vmem>>, vector<1x225x144xf32>
    %49 = vector.shape_cast %48 : vector<1x225x144xf32> to vector<225x144xf32>
    %cst_49 = arith.constant dense<0.000000e+00> : vector<16x144xf32>
    %50 = tpu.matmul %8, %49, %cst_49 {dimension_numbers = #tpu.dot_dimension_numbers<[1], [0], [0], [1], [0, 0, 1, 1], [], []>} : vector<16x225xf32>, vector<225x144xf32>, vector<16x144xf32> -> vector<16x144xf32>
    %c14 = arith.constant 14 : index
    %c0_50 = arith.constant 0 : index
    %c0_51 = arith.constant 0 : index
    %51 = vector.load %arg6[%c14, %c0_50, %c0_51] : memref<16x225x144xf32, #tpu.memory_space<vmem>>, vector<1x225x144xf32>
    %52 = vector.shape_cast %51 : vector<1x225x144xf32> to vector<225x144xf32>
    %cst_52 = arith.constant dense<0.000000e+00> : vector<16x144xf32>
    %53 = tpu.matmul %8, %52, %cst_52 {dimension_numbers = #tpu.dot_dimension_numbers<[1], [0], [0], [1], [0, 0, 1, 1], [], []>} : vector<16x225xf32>, vector<225x144xf32>, vector<16x144xf32> -> vector<16x144xf32>
    %c15 = arith.constant 15 : index
    %c0_53 = arith.constant 0 : index
    %c0_54 = arith.constant 0 : index
    %54 = vector.load %arg6[%c15, %c0_53, %c0_54] : memref<16x225x144xf32, #tpu.memory_space<vmem>>, vector<1x225x144xf32>
    %55 = vector.shape_cast %54 : vector<1x225x144xf32> to vector<225x144xf32>
    %cst_55 = arith.constant dense<0.000000e+00> : vector<16x144xf32>
    %56 = tpu.matmul %8, %55, %cst_55 {dimension_numbers = #tpu.dot_dimension_numbers<[1], [0], [0], [1], [0, 0, 1, 1], [], []>} : vector<16x225xf32>, vector<225x144xf32>, vector<16x144xf32> -> vector<16x144xf32>
    %57 = tpu.concatenate %11, %14, %17, %20, %23, %26, %29, %32, %35, %38, %41, %44, %47, %50, %53, %56 in 0 : vector<16x144xf32>, vector<16x144xf32>, vector<16x144xf32>, vector<16x144xf32>, vector<16x144xf32>, vector<16x144xf32>, vector<16x144xf32>, vector<16x144xf32>, vector<16x144xf32>, vector<16x144xf32>, vector<16x144xf32>, vector<16x144xf32>, vector<16x144xf32>, vector<16x144xf32>, vector<16x144xf32>, vector<16x144xf32> -> vector<256x144xf32>
    %c0_56 = arith.constant 0 : index
    %c0_57 = arith.constant 0 : index
    %58 = vector.load %arg4[%c0_56, %c0_57] : memref<32x256xf32, #tpu.memory_space<vmem>>, vector<32x256xf32>
    %cst_58 = arith.constant dense<0.000000e+00> : vector<32x144xf32>
    %59 = tpu.matmul %58, %57, %cst_58 {dimension_numbers = #tpu.dot_dimension_numbers<[1], [0], [0], [1], [0, 0, 1, 1], [], []>} : vector<32x256xf32>, vector<256x144xf32>, vector<32x144xf32> -> vector<32x144xf32>
    %c0_59 = arith.constant 0 : index
    %c0_60 = arith.constant 0 : index
    %60 = vector.load %arg5[%c0_59, %c0_60] : memref<32x1xf32, #tpu.memory_space<vmem>>, vector<32x1xf32>
    %61 = vector.broadcast %60 : vector<32x1xf32> to vector<32x144xf32>
    %62 = arith.addf %59, %61 : vector<32x144xf32>
    %cst_61 = arith.constant 0.000000e+00 : f32
    %63 = vector.broadcast %cst_61 : f32 to vector<32x144xf32>
    %64 = arith.maximumf %62, %63 : vector<32x144xf32>
    %cst_62 = arith.constant 0.000000e+00 : f32
    %65 = vector.broadcast %cst_62 : f32 to vector<1x128xf32>
    %66 = vector.extract_strided_slice %64 {offsets = [0, 0], sizes = [1, 144], strides = [1, 1]} : vector<32x144xf32> to vector<1x144xf32>
    %c0_63 = arith.constant 0 : index
    %c0_64 = arith.constant 0 : index
    %c0_65 = arith.constant 0 : index
    %67 = vector.load %arg7[%c0_63, %c0_64, %c0_65] : memref<32x144x128xf32, #tpu.memory_space<vmem>>, vector<1x144x128xf32>
    %68 = vector.shape_cast %67 : vector<1x144x128xf32> to vector<144x128xf32>
    %cst_66 = arith.constant dense<0.000000e+00> : vector<1x128xf32>
    %69 = tpu.matmul %66, %68, %cst_66 {dimension_numbers = #tpu.dot_dimension_numbers<[1], [0], [0], [1], [0, 0, 1, 1], [], []>} : vector<1x144xf32>, vector<144x128xf32>, vector<1x128xf32> -> vector<1x128xf32>
    %70 = arith.addf %65, %69 : vector<1x128xf32>
    %71 = vector.extract_strided_slice %64 {offsets = [1, 0], sizes = [1, 144], strides = [1, 1]} : vector<32x144xf32> to vector<1x144xf32>
    %c1_67 = arith.constant 1 : index
    %c0_68 = arith.constant 0 : index
    %c0_69 = arith.constant 0 : index
    %72 = vector.load %arg7[%c1_67, %c0_68, %c0_69] : memref<32x144x128xf32, #tpu.memory_space<vmem>>, vector<1x144x128xf32>
    %73 = vector.shape_cast %72 : vector<1x144x128xf32> to vector<144x128xf32>
    %cst_70 = arith.constant dense<0.000000e+00> : vector<1x128xf32>
    %74 = tpu.matmul %71, %73, %cst_70 {dimension_numbers = #tpu.dot_dimension_numbers<[1], [0], [0], [1], [0, 0, 1, 1], [], []>} : vector<1x144xf32>, vector<144x128xf32>, vector<1x128xf32> -> vector<1x128xf32>
    %75 = arith.addf %70, %74 : vector<1x128xf32>
    %76 = vector.extract_strided_slice %64 {offsets = [2, 0], sizes = [1, 144], strides = [1, 1]} : vector<32x144xf32> to vector<1x144xf32>
    %c2_71 = arith.constant 2 : index
    %c0_72 = arith.constant 0 : index
    %c0_73 = arith.constant 0 : index
    %77 = vector.load %arg7[%c2_71, %c0_72, %c0_73] : memref<32x144x128xf32, #tpu.memory_space<vmem>>, vector<1x144x128xf32>
    %78 = vector.shape_cast %77 : vector<1x144x128xf32> to vector<144x128xf32>
    %cst_74 = arith.constant dense<0.000000e+00> : vector<1x128xf32>
    %79 = tpu.matmul %76, %78, %cst_74 {dimension_numbers = #tpu.dot_dimension_numbers<[1], [0], [0], [1], [0, 0, 1, 1], [], []>} : vector<1x144xf32>, vector<144x128xf32>, vector<1x128xf32> -> vector<1x128xf32>
    %80 = arith.addf %75, %79 : vector<1x128xf32>
    %81 = vector.extract_strided_slice %64 {offsets = [3, 0], sizes = [1, 144], strides = [1, 1]} : vector<32x144xf32> to vector<1x144xf32>
    %c3_75 = arith.constant 3 : index
    %c0_76 = arith.constant 0 : index
    %c0_77 = arith.constant 0 : index
    %82 = vector.load %arg7[%c3_75, %c0_76, %c0_77] : memref<32x144x128xf32, #tpu.memory_space<vmem>>, vector<1x144x128xf32>
    %83 = vector.shape_cast %82 : vector<1x144x128xf32> to vector<144x128xf32>
    %cst_78 = arith.constant dense<0.000000e+00> : vector<1x128xf32>
    %84 = tpu.matmul %81, %83, %cst_78 {dimension_numbers = #tpu.dot_dimension_numbers<[1], [0], [0], [1], [0, 0, 1, 1], [], []>} : vector<1x144xf32>, vector<144x128xf32>, vector<1x128xf32> -> vector<1x128xf32>
    %85 = arith.addf %80, %84 : vector<1x128xf32>
    %86 = vector.extract_strided_slice %64 {offsets = [4, 0], sizes = [1, 144], strides = [1, 1]} : vector<32x144xf32> to vector<1x144xf32>
    %c4_79 = arith.constant 4 : index
    %c0_80 = arith.constant 0 : index
    %c0_81 = arith.constant 0 : index
    %87 = vector.load %arg7[%c4_79, %c0_80, %c0_81] : memref<32x144x128xf32, #tpu.memory_space<vmem>>, vector<1x144x128xf32>
    %88 = vector.shape_cast %87 : vector<1x144x128xf32> to vector<144x128xf32>
    %cst_82 = arith.constant dense<0.000000e+00> : vector<1x128xf32>
    %89 = tpu.matmul %86, %88, %cst_82 {dimension_numbers = #tpu.dot_dimension_numbers<[1], [0], [0], [1], [0, 0, 1, 1], [], []>} : vector<1x144xf32>, vector<144x128xf32>, vector<1x128xf32> -> vector<1x128xf32>
    %90 = arith.addf %85, %89 : vector<1x128xf32>
    %91 = vector.extract_strided_slice %64 {offsets = [5, 0], sizes = [1, 144], strides = [1, 1]} : vector<32x144xf32> to vector<1x144xf32>
    %c5_83 = arith.constant 5 : index
    %c0_84 = arith.constant 0 : index
    %c0_85 = arith.constant 0 : index
    %92 = vector.load %arg7[%c5_83, %c0_84, %c0_85] : memref<32x144x128xf32, #tpu.memory_space<vmem>>, vector<1x144x128xf32>
    %93 = vector.shape_cast %92 : vector<1x144x128xf32> to vector<144x128xf32>
    %cst_86 = arith.constant dense<0.000000e+00> : vector<1x128xf32>
    %94 = tpu.matmul %91, %93, %cst_86 {dimension_numbers = #tpu.dot_dimension_numbers<[1], [0], [0], [1], [0, 0, 1, 1], [], []>} : vector<1x144xf32>, vector<144x128xf32>, vector<1x128xf32> -> vector<1x128xf32>
    %95 = arith.addf %90, %94 : vector<1x128xf32>
    %96 = vector.extract_strided_slice %64 {offsets = [6, 0], sizes = [1, 144], strides = [1, 1]} : vector<32x144xf32> to vector<1x144xf32>
    %c6_87 = arith.constant 6 : index
    %c0_88 = arith.constant 0 : index
    %c0_89 = arith.constant 0 : index
    %97 = vector.load %arg7[%c6_87, %c0_88, %c0_89] : memref<32x144x128xf32, #tpu.memory_space<vmem>>, vector<1x144x128xf32>
    %98 = vector.shape_cast %97 : vector<1x144x128xf32> to vector<144x128xf32>
    %cst_90 = arith.constant dense<0.000000e+00> : vector<1x128xf32>
    %99 = tpu.matmul %96, %98, %cst_90 {dimension_numbers = #tpu.dot_dimension_numbers<[1], [0], [0], [1], [0, 0, 1, 1], [], []>} : vector<1x144xf32>, vector<144x128xf32>, vector<1x128xf32> -> vector<1x128xf32>
    %100 = arith.addf %95, %99 : vector<1x128xf32>
    %101 = vector.extract_strided_slice %64 {offsets = [7, 0], sizes = [1, 144], strides = [1, 1]} : vector<32x144xf32> to vector<1x144xf32>
    %c7_91 = arith.constant 7 : index
    %c0_92 = arith.constant 0 : index
    %c0_93 = arith.constant 0 : index
    %102 = vector.load %arg7[%c7_91, %c0_92, %c0_93] : memref<32x144x128xf32, #tpu.memory_space<vmem>>, vector<1x144x128xf32>
    %103 = vector.shape_cast %102 : vector<1x144x128xf32> to vector<144x128xf32>
    %cst_94 = arith.constant dense<0.000000e+00> : vector<1x128xf32>
    %104 = tpu.matmul %101, %103, %cst_94 {dimension_numbers = #tpu.dot_dimension_numbers<[1], [0], [0], [1], [0, 0, 1, 1], [], []>} : vector<1x144xf32>, vector<144x128xf32>, vector<1x128xf32> -> vector<1x128xf32>
    %105 = arith.addf %100, %104 : vector<1x128xf32>
    %106 = vector.extract_strided_slice %64 {offsets = [8, 0], sizes = [1, 144], strides = [1, 1]} : vector<32x144xf32> to vector<1x144xf32>
    %c8_95 = arith.constant 8 : index
    %c0_96 = arith.constant 0 : index
    %c0_97 = arith.constant 0 : index
    %107 = vector.load %arg7[%c8_95, %c0_96, %c0_97] : memref<32x144x128xf32, #tpu.memory_space<vmem>>, vector<1x144x128xf32>
    %108 = vector.shape_cast %107 : vector<1x144x128xf32> to vector<144x128xf32>
    %cst_98 = arith.constant dense<0.000000e+00> : vector<1x128xf32>
    %109 = tpu.matmul %106, %108, %cst_98 {dimension_numbers = #tpu.dot_dimension_numbers<[1], [0], [0], [1], [0, 0, 1, 1], [], []>} : vector<1x144xf32>, vector<144x128xf32>, vector<1x128xf32> -> vector<1x128xf32>
    %110 = arith.addf %105, %109 : vector<1x128xf32>
    %111 = vector.extract_strided_slice %64 {offsets = [9, 0], sizes = [1, 144], strides = [1, 1]} : vector<32x144xf32> to vector<1x144xf32>
    %c9_99 = arith.constant 9 : index
    %c0_100 = arith.constant 0 : index
    %c0_101 = arith.constant 0 : index
    %112 = vector.load %arg7[%c9_99, %c0_100, %c0_101] : memref<32x144x128xf32, #tpu.memory_space<vmem>>, vector<1x144x128xf32>
    %113 = vector.shape_cast %112 : vector<1x144x128xf32> to vector<144x128xf32>
    %cst_102 = arith.constant dense<0.000000e+00> : vector<1x128xf32>
    %114 = tpu.matmul %111, %113, %cst_102 {dimension_numbers = #tpu.dot_dimension_numbers<[1], [0], [0], [1], [0, 0, 1, 1], [], []>} : vector<1x144xf32>, vector<144x128xf32>, vector<1x128xf32> -> vector<1x128xf32>
    %115 = arith.addf %110, %114 : vector<1x128xf32>
    %116 = vector.extract_strided_slice %64 {offsets = [10, 0], sizes = [1, 144], strides = [1, 1]} : vector<32x144xf32> to vector<1x144xf32>
    %c10_103 = arith.constant 10 : index
    %c0_104 = arith.constant 0 : index
    %c0_105 = arith.constant 0 : index
    %117 = vector.load %arg7[%c10_103, %c0_104, %c0_105] : memref<32x144x128xf32, #tpu.memory_space<vmem>>, vector<1x144x128xf32>
    %118 = vector.shape_cast %117 : vector<1x144x128xf32> to vector<144x128xf32>
    %cst_106 = arith.constant dense<0.000000e+00> : vector<1x128xf32>
    %119 = tpu.matmul %116, %118, %cst_106 {dimension_numbers = #tpu.dot_dimension_numbers<[1], [0], [0], [1], [0, 0, 1, 1], [], []>} : vector<1x144xf32>, vector<144x128xf32>, vector<1x128xf32> -> vector<1x128xf32>
    %120 = arith.addf %115, %119 : vector<1x128xf32>
    %121 = vector.extract_strided_slice %64 {offsets = [11, 0], sizes = [1, 144], strides = [1, 1]} : vector<32x144xf32> to vector<1x144xf32>
    %c11_107 = arith.constant 11 : index
    %c0_108 = arith.constant 0 : index
    %c0_109 = arith.constant 0 : index
    %122 = vector.load %arg7[%c11_107, %c0_108, %c0_109] : memref<32x144x128xf32, #tpu.memory_space<vmem>>, vector<1x144x128xf32>
    %123 = vector.shape_cast %122 : vector<1x144x128xf32> to vector<144x128xf32>
    %cst_110 = arith.constant dense<0.000000e+00> : vector<1x128xf32>
    %124 = tpu.matmul %121, %123, %cst_110 {dimension_numbers = #tpu.dot_dimension_numbers<[1], [0], [0], [1], [0, 0, 1, 1], [], []>} : vector<1x144xf32>, vector<144x128xf32>, vector<1x128xf32> -> vector<1x128xf32>
    %125 = arith.addf %120, %124 : vector<1x128xf32>
    %126 = vector.extract_strided_slice %64 {offsets = [12, 0], sizes = [1, 144], strides = [1, 1]} : vector<32x144xf32> to vector<1x144xf32>
    %c12_111 = arith.constant 12 : index
    %c0_112 = arith.constant 0 : index
    %c0_113 = arith.constant 0 : index
    %127 = vector.load %arg7[%c12_111, %c0_112, %c0_113] : memref<32x144x128xf32, #tpu.memory_space<vmem>>, vector<1x144x128xf32>
    %128 = vector.shape_cast %127 : vector<1x144x128xf32> to vector<144x128xf32>
    %cst_114 = arith.constant dense<0.000000e+00> : vector<1x128xf32>
    %129 = tpu.matmul %126, %128, %cst_114 {dimension_numbers = #tpu.dot_dimension_numbers<[1], [0], [0], [1], [0, 0, 1, 1], [], []>} : vector<1x144xf32>, vector<144x128xf32>, vector<1x128xf32> -> vector<1x128xf32>
    %130 = arith.addf %125, %129 : vector<1x128xf32>
    %131 = vector.extract_strided_slice %64 {offsets = [13, 0], sizes = [1, 144], strides = [1, 1]} : vector<32x144xf32> to vector<1x144xf32>
    %c13_115 = arith.constant 13 : index
    %c0_116 = arith.constant 0 : index
    %c0_117 = arith.constant 0 : index
    %132 = vector.load %arg7[%c13_115, %c0_116, %c0_117] : memref<32x144x128xf32, #tpu.memory_space<vmem>>, vector<1x144x128xf32>
    %133 = vector.shape_cast %132 : vector<1x144x128xf32> to vector<144x128xf32>
    %cst_118 = arith.constant dense<0.000000e+00> : vector<1x128xf32>
    %134 = tpu.matmul %131, %133, %cst_118 {dimension_numbers = #tpu.dot_dimension_numbers<[1], [0], [0], [1], [0, 0, 1, 1], [], []>} : vector<1x144xf32>, vector<144x128xf32>, vector<1x128xf32> -> vector<1x128xf32>
    %135 = arith.addf %130, %134 : vector<1x128xf32>
    %136 = vector.extract_strided_slice %64 {offsets = [14, 0], sizes = [1, 144], strides = [1, 1]} : vector<32x144xf32> to vector<1x144xf32>
    %c14_119 = arith.constant 14 : index
    %c0_120 = arith.constant 0 : index
    %c0_121 = arith.constant 0 : index
    %137 = vector.load %arg7[%c14_119, %c0_120, %c0_121] : memref<32x144x128xf32, #tpu.memory_space<vmem>>, vector<1x144x128xf32>
    %138 = vector.shape_cast %137 : vector<1x144x128xf32> to vector<144x128xf32>
    %cst_122 = arith.constant dense<0.000000e+00> : vector<1x128xf32>
    %139 = tpu.matmul %136, %138, %cst_122 {dimension_numbers = #tpu.dot_dimension_numbers<[1], [0], [0], [1], [0, 0, 1, 1], [], []>} : vector<1x144xf32>, vector<144x128xf32>, vector<1x128xf32> -> vector<1x128xf32>
    %140 = arith.addf %135, %139 : vector<1x128xf32>
    %141 = vector.extract_strided_slice %64 {offsets = [15, 0], sizes = [1, 144], strides = [1, 1]} : vector<32x144xf32> to vector<1x144xf32>
    %c15_123 = arith.constant 15 : index
    %c0_124 = arith.constant 0 : index
    %c0_125 = arith.constant 0 : index
    %142 = vector.load %arg7[%c15_123, %c0_124, %c0_125] : memref<32x144x128xf32, #tpu.memory_space<vmem>>, vector<1x144x128xf32>
    %143 = vector.shape_cast %142 : vector<1x144x128xf32> to vector<144x128xf32>
    %cst_126 = arith.constant dense<0.000000e+00> : vector<1x128xf32>
    %144 = tpu.matmul %141, %143, %cst_126 {dimension_numbers = #tpu.dot_dimension_numbers<[1], [0], [0], [1], [0, 0, 1, 1], [], []>} : vector<1x144xf32>, vector<144x128xf32>, vector<1x128xf32> -> vector<1x128xf32>
    %145 = arith.addf %140, %144 : vector<1x128xf32>
    %146 = vector.extract_strided_slice %64 {offsets = [16, 0], sizes = [1, 144], strides = [1, 1]} : vector<32x144xf32> to vector<1x144xf32>
    %c16 = arith.constant 16 : index
    %c0_127 = arith.constant 0 : index
    %c0_128 = arith.constant 0 : index
    %147 = vector.load %arg7[%c16, %c0_127, %c0_128] : memref<32x144x128xf32, #tpu.memory_space<vmem>>, vector<1x144x128xf32>
    %148 = vector.shape_cast %147 : vector<1x144x128xf32> to vector<144x128xf32>
    %cst_129 = arith.constant dense<0.000000e+00> : vector<1x128xf32>
    %149 = tpu.matmul %146, %148, %cst_129 {dimension_numbers = #tpu.dot_dimension_numbers<[1], [0], [0], [1], [0, 0, 1, 1], [], []>} : vector<1x144xf32>, vector<144x128xf32>, vector<1x128xf32> -> vector<1x128xf32>
    %150 = arith.addf %145, %149 : vector<1x128xf32>
    %151 = vector.extract_strided_slice %64 {offsets = [17, 0], sizes = [1, 144], strides = [1, 1]} : vector<32x144xf32> to vector<1x144xf32>
    %c17 = arith.constant 17 : index
    %c0_130 = arith.constant 0 : index
    %c0_131 = arith.constant 0 : index
    %152 = vector.load %arg7[%c17, %c0_130, %c0_131] : memref<32x144x128xf32, #tpu.memory_space<vmem>>, vector<1x144x128xf32>
    %153 = vector.shape_cast %152 : vector<1x144x128xf32> to vector<144x128xf32>
    %cst_132 = arith.constant dense<0.000000e+00> : vector<1x128xf32>
    %154 = tpu.matmul %151, %153, %cst_132 {dimension_numbers = #tpu.dot_dimension_numbers<[1], [0], [0], [1], [0, 0, 1, 1], [], []>} : vector<1x144xf32>, vector<144x128xf32>, vector<1x128xf32> -> vector<1x128xf32>
    %155 = arith.addf %150, %154 : vector<1x128xf32>
    %156 = vector.extract_strided_slice %64 {offsets = [18, 0], sizes = [1, 144], strides = [1, 1]} : vector<32x144xf32> to vector<1x144xf32>
    %c18 = arith.constant 18 : index
    %c0_133 = arith.constant 0 : index
    %c0_134 = arith.constant 0 : index
    %157 = vector.load %arg7[%c18, %c0_133, %c0_134] : memref<32x144x128xf32, #tpu.memory_space<vmem>>, vector<1x144x128xf32>
    %158 = vector.shape_cast %157 : vector<1x144x128xf32> to vector<144x128xf32>
    %cst_135 = arith.constant dense<0.000000e+00> : vector<1x128xf32>
    %159 = tpu.matmul %156, %158, %cst_135 {dimension_numbers = #tpu.dot_dimension_numbers<[1], [0], [0], [1], [0, 0, 1, 1], [], []>} : vector<1x144xf32>, vector<144x128xf32>, vector<1x128xf32> -> vector<1x128xf32>
    %160 = arith.addf %155, %159 : vector<1x128xf32>
    %161 = vector.extract_strided_slice %64 {offsets = [19, 0], sizes = [1, 144], strides = [1, 1]} : vector<32x144xf32> to vector<1x144xf32>
    %c19 = arith.constant 19 : index
    %c0_136 = arith.constant 0 : index
    %c0_137 = arith.constant 0 : index
    %162 = vector.load %arg7[%c19, %c0_136, %c0_137] : memref<32x144x128xf32, #tpu.memory_space<vmem>>, vector<1x144x128xf32>
    %163 = vector.shape_cast %162 : vector<1x144x128xf32> to vector<144x128xf32>
    %cst_138 = arith.constant dense<0.000000e+00> : vector<1x128xf32>
    %164 = tpu.matmul %161, %163, %cst_138 {dimension_numbers = #tpu.dot_dimension_numbers<[1], [0], [0], [1], [0, 0, 1, 1], [], []>} : vector<1x144xf32>, vector<144x128xf32>, vector<1x128xf32> -> vector<1x128xf32>
    %165 = arith.addf %160, %164 : vector<1x128xf32>
    %166 = vector.extract_strided_slice %64 {offsets = [20, 0], sizes = [1, 144], strides = [1, 1]} : vector<32x144xf32> to vector<1x144xf32>
    %c20 = arith.constant 20 : index
    %c0_139 = arith.constant 0 : index
    %c0_140 = arith.constant 0 : index
    %167 = vector.load %arg7[%c20, %c0_139, %c0_140] : memref<32x144x128xf32, #tpu.memory_space<vmem>>, vector<1x144x128xf32>
    %168 = vector.shape_cast %167 : vector<1x144x128xf32> to vector<144x128xf32>
    %cst_141 = arith.constant dense<0.000000e+00> : vector<1x128xf32>
    %169 = tpu.matmul %166, %168, %cst_141 {dimension_numbers = #tpu.dot_dimension_numbers<[1], [0], [0], [1], [0, 0, 1, 1], [], []>} : vector<1x144xf32>, vector<144x128xf32>, vector<1x128xf32> -> vector<1x128xf32>
    %170 = arith.addf %165, %169 : vector<1x128xf32>
    %171 = vector.extract_strided_slice %64 {offsets = [21, 0], sizes = [1, 144], strides = [1, 1]} : vector<32x144xf32> to vector<1x144xf32>
    %c21 = arith.constant 21 : index
    %c0_142 = arith.constant 0 : index
    %c0_143 = arith.constant 0 : index
    %172 = vector.load %arg7[%c21, %c0_142, %c0_143] : memref<32x144x128xf32, #tpu.memory_space<vmem>>, vector<1x144x128xf32>
    %173 = vector.shape_cast %172 : vector<1x144x128xf32> to vector<144x128xf32>
    %cst_144 = arith.constant dense<0.000000e+00> : vector<1x128xf32>
    %174 = tpu.matmul %171, %173, %cst_144 {dimension_numbers = #tpu.dot_dimension_numbers<[1], [0], [0], [1], [0, 0, 1, 1], [], []>} : vector<1x144xf32>, vector<144x128xf32>, vector<1x128xf32> -> vector<1x128xf32>
    %175 = arith.addf %170, %174 : vector<1x128xf32>
    %176 = vector.extract_strided_slice %64 {offsets = [22, 0], sizes = [1, 144], strides = [1, 1]} : vector<32x144xf32> to vector<1x144xf32>
    %c22 = arith.constant 22 : index
    %c0_145 = arith.constant 0 : index
    %c0_146 = arith.constant 0 : index
    %177 = vector.load %arg7[%c22, %c0_145, %c0_146] : memref<32x144x128xf32, #tpu.memory_space<vmem>>, vector<1x144x128xf32>
    %178 = vector.shape_cast %177 : vector<1x144x128xf32> to vector<144x128xf32>
    %cst_147 = arith.constant dense<0.000000e+00> : vector<1x128xf32>
    %179 = tpu.matmul %176, %178, %cst_147 {dimension_numbers = #tpu.dot_dimension_numbers<[1], [0], [0], [1], [0, 0, 1, 1], [], []>} : vector<1x144xf32>, vector<144x128xf32>, vector<1x128xf32> -> vector<1x128xf32>
    %180 = arith.addf %175, %179 : vector<1x128xf32>
    %181 = vector.extract_strided_slice %64 {offsets = [23, 0], sizes = [1, 144], strides = [1, 1]} : vector<32x144xf32> to vector<1x144xf32>
    %c23 = arith.constant 23 : index
    %c0_148 = arith.constant 0 : index
    %c0_149 = arith.constant 0 : index
    %182 = vector.load %arg7[%c23, %c0_148, %c0_149] : memref<32x144x128xf32, #tpu.memory_space<vmem>>, vector<1x144x128xf32>
    %183 = vector.shape_cast %182 : vector<1x144x128xf32> to vector<144x128xf32>
    %cst_150 = arith.constant dense<0.000000e+00> : vector<1x128xf32>
    %184 = tpu.matmul %181, %183, %cst_150 {dimension_numbers = #tpu.dot_dimension_numbers<[1], [0], [0], [1], [0, 0, 1, 1], [], []>} : vector<1x144xf32>, vector<144x128xf32>, vector<1x128xf32> -> vector<1x128xf32>
    %185 = arith.addf %180, %184 : vector<1x128xf32>
    %186 = vector.extract_strided_slice %64 {offsets = [24, 0], sizes = [1, 144], strides = [1, 1]} : vector<32x144xf32> to vector<1x144xf32>
    %c24 = arith.constant 24 : index
    %c0_151 = arith.constant 0 : index
    %c0_152 = arith.constant 0 : index
    %187 = vector.load %arg7[%c24, %c0_151, %c0_152] : memref<32x144x128xf32, #tpu.memory_space<vmem>>, vector<1x144x128xf32>
    %188 = vector.shape_cast %187 : vector<1x144x128xf32> to vector<144x128xf32>
    %cst_153 = arith.constant dense<0.000000e+00> : vector<1x128xf32>
    %189 = tpu.matmul %186, %188, %cst_153 {dimension_numbers = #tpu.dot_dimension_numbers<[1], [0], [0], [1], [0, 0, 1, 1], [], []>} : vector<1x144xf32>, vector<144x128xf32>, vector<1x128xf32> -> vector<1x128xf32>
    %190 = arith.addf %185, %189 : vector<1x128xf32>
    %191 = vector.extract_strided_slice %64 {offsets = [25, 0], sizes = [1, 144], strides = [1, 1]} : vector<32x144xf32> to vector<1x144xf32>
    %c25 = arith.constant 25 : index
    %c0_154 = arith.constant 0 : index
    %c0_155 = arith.constant 0 : index
    %192 = vector.load %arg7[%c25, %c0_154, %c0_155] : memref<32x144x128xf32, #tpu.memory_space<vmem>>, vector<1x144x128xf32>
    %193 = vector.shape_cast %192 : vector<1x144x128xf32> to vector<144x128xf32>
    %cst_156 = arith.constant dense<0.000000e+00> : vector<1x128xf32>
    %194 = tpu.matmul %191, %193, %cst_156 {dimension_numbers = #tpu.dot_dimension_numbers<[1], [0], [0], [1], [0, 0, 1, 1], [], []>} : vector<1x144xf32>, vector<144x128xf32>, vector<1x128xf32> -> vector<1x128xf32>
    %195 = arith.addf %190, %194 : vector<1x128xf32>
    %196 = vector.extract_strided_slice %64 {offsets = [26, 0], sizes = [1, 144], strides = [1, 1]} : vector<32x144xf32> to vector<1x144xf32>
    %c26 = arith.constant 26 : index
    %c0_157 = arith.constant 0 : index
    %c0_158 = arith.constant 0 : index
    %197 = vector.load %arg7[%c26, %c0_157, %c0_158] : memref<32x144x128xf32, #tpu.memory_space<vmem>>, vector<1x144x128xf32>
    %198 = vector.shape_cast %197 : vector<1x144x128xf32> to vector<144x128xf32>
    %cst_159 = arith.constant dense<0.000000e+00> : vector<1x128xf32>
    %199 = tpu.matmul %196, %198, %cst_159 {dimension_numbers = #tpu.dot_dimension_numbers<[1], [0], [0], [1], [0, 0, 1, 1], [], []>} : vector<1x144xf32>, vector<144x128xf32>, vector<1x128xf32> -> vector<1x128xf32>
    %200 = arith.addf %195, %199 : vector<1x128xf32>
    %201 = vector.extract_strided_slice %64 {offsets = [27, 0], sizes = [1, 144], strides = [1, 1]} : vector<32x144xf32> to vector<1x144xf32>
    %c27 = arith.constant 27 : index
    %c0_160 = arith.constant 0 : index
    %c0_161 = arith.constant 0 : index
    %202 = vector.load %arg7[%c27, %c0_160, %c0_161] : memref<32x144x128xf32, #tpu.memory_space<vmem>>, vector<1x144x128xf32>
    %203 = vector.shape_cast %202 : vector<1x144x128xf32> to vector<144x128xf32>
    %cst_162 = arith.constant dense<0.000000e+00> : vector<1x128xf32>
    %204 = tpu.matmul %201, %203, %cst_162 {dimension_numbers = #tpu.dot_dimension_numbers<[1], [0], [0], [1], [0, 0, 1, 1], [], []>} : vector<1x144xf32>, vector<144x128xf32>, vector<1x128xf32> -> vector<1x128xf32>
    %205 = arith.addf %200, %204 : vector<1x128xf32>
    %206 = vector.extract_strided_slice %64 {offsets = [28, 0], sizes = [1, 144], strides = [1, 1]} : vector<32x144xf32> to vector<1x144xf32>
    %c28 = arith.constant 28 : index
    %c0_163 = arith.constant 0 : index
    %c0_164 = arith.constant 0 : index
    %207 = vector.load %arg7[%c28, %c0_163, %c0_164] : memref<32x144x128xf32, #tpu.memory_space<vmem>>, vector<1x144x128xf32>
    %208 = vector.shape_cast %207 : vector<1x144x128xf32> to vector<144x128xf32>
    %cst_165 = arith.constant dense<0.000000e+00> : vector<1x128xf32>
    %209 = tpu.matmul %206, %208, %cst_165 {dimension_numbers = #tpu.dot_dimension_numbers<[1], [0], [0], [1], [0, 0, 1, 1], [], []>} : vector<1x144xf32>, vector<144x128xf32>, vector<1x128xf32> -> vector<1x128xf32>
    %210 = arith.addf %205, %209 : vector<1x128xf32>
    %211 = vector.extract_strided_slice %64 {offsets = [29, 0], sizes = [1, 144], strides = [1, 1]} : vector<32x144xf32> to vector<1x144xf32>
    %c29 = arith.constant 29 : index
    %c0_166 = arith.constant 0 : index
    %c0_167 = arith.constant 0 : index
    %212 = vector.load %arg7[%c29, %c0_166, %c0_167] : memref<32x144x128xf32, #tpu.memory_space<vmem>>, vector<1x144x128xf32>
    %213 = vector.shape_cast %212 : vector<1x144x128xf32> to vector<144x128xf32>
    %cst_168 = arith.constant dense<0.000000e+00> : vector<1x128xf32>
    %214 = tpu.matmul %211, %213, %cst_168 {dimension_numbers = #tpu.dot_dimension_numbers<[1], [0], [0], [1], [0, 0, 1, 1], [], []>} : vector<1x144xf32>, vector<144x128xf32>, vector<1x128xf32> -> vector<1x128xf32>
    %215 = arith.addf %210, %214 : vector<1x128xf32>
    %216 = vector.extract_strided_slice %64 {offsets = [30, 0], sizes = [1, 144], strides = [1, 1]} : vector<32x144xf32> to vector<1x144xf32>
    %c30 = arith.constant 30 : index
    %c0_169 = arith.constant 0 : index
    %c0_170 = arith.constant 0 : index
    %217 = vector.load %arg7[%c30, %c0_169, %c0_170] : memref<32x144x128xf32, #tpu.memory_space<vmem>>, vector<1x144x128xf32>
    %218 = vector.shape_cast %217 : vector<1x144x128xf32> to vector<144x128xf32>
    %cst_171 = arith.constant dense<0.000000e+00> : vector<1x128xf32>
    %219 = tpu.matmul %216, %218, %cst_171 {dimension_numbers = #tpu.dot_dimension_numbers<[1], [0], [0], [1], [0, 0, 1, 1], [], []>} : vector<1x144xf32>, vector<144x128xf32>, vector<1x128xf32> -> vector<1x128xf32>
    %220 = arith.addf %215, %219 : vector<1x128xf32>
    %221 = vector.extract_strided_slice %64 {offsets = [31, 0], sizes = [1, 144], strides = [1, 1]} : vector<32x144xf32> to vector<1x144xf32>
    %c31 = arith.constant 31 : index
    %c0_172 = arith.constant 0 : index
    %c0_173 = arith.constant 0 : index
    %222 = vector.load %arg7[%c31, %c0_172, %c0_173] : memref<32x144x128xf32, #tpu.memory_space<vmem>>, vector<1x144x128xf32>
    %223 = vector.shape_cast %222 : vector<1x144x128xf32> to vector<144x128xf32>
    %cst_174 = arith.constant dense<0.000000e+00> : vector<1x128xf32>
    %224 = tpu.matmul %221, %223, %cst_174 {dimension_numbers = #tpu.dot_dimension_numbers<[1], [0], [0], [1], [0, 0, 1, 1], [], []>} : vector<1x144xf32>, vector<144x128xf32>, vector<1x128xf32> -> vector<1x128xf32>
    %225 = arith.addf %220, %224 : vector<1x128xf32>
    %c0_175 = arith.constant 0 : index
    %c0_176 = arith.constant 0 : index
    %226 = vector.load %arg8[%c0_175, %c0_176] : memref<1x128xf32, #tpu.memory_space<vmem>>, vector<1x128xf32>
    %227 = arith.addf %225, %226 : vector<1x128xf32>
    %cst_177 = arith.constant 0.000000e+00 : f32
    %228 = vector.broadcast %cst_177 : f32 to vector<1x128xf32>
    %229 = arith.maximumf %227, %228 : vector<1x128xf32>
    %c0_178 = arith.constant 0 : index
    %c0_179 = arith.constant 0 : index
    %230 = vector.load %arg9[%c0_178, %c0_179] : memref<128x128xf32, #tpu.memory_space<vmem>>, vector<128x128xf32>
    %cst_180 = arith.constant dense<0.000000e+00> : vector<1x128xf32>
    %231 = tpu.matmul %229, %230, %cst_180 {dimension_numbers = #tpu.dot_dimension_numbers<[1], [0], [0], [1], [0, 0, 1, 1], [], []>} : vector<1x128xf32>, vector<128x128xf32>, vector<1x128xf32> -> vector<1x128xf32>
    %c0_181 = arith.constant 0 : index
    %c0_182 = arith.constant 0 : index
    %232 = vector.load %arg10[%c0_181, %c0_182] : memref<1x128xf32, #tpu.memory_space<vmem>>, vector<1x128xf32>
    %233 = arith.addf %231, %232 : vector<1x128xf32>
    %c0_183 = arith.constant 0 : index
    %c0_184 = arith.constant 0 : index
    %c0_185 = arith.constant 0 : index
    %234 = vector.load %arg11[%c0_183, %c0_184, %c0_185] : memref<1x1x128xf32, #tpu.memory_space<vmem>>, vector<1x1x128xf32>
    %235 = vector.shape_cast %234 : vector<1x1x128xf32> to vector<1x128xf32>
    %236 = vector.shape_cast %233 : vector<1x128xf32> to vector<1x1x128xf32>
    tpu.vector_store %arg11[%c0_183, %c0_184, %c0_185], %236 {strides = array<i32>} : memref<1x1x128xf32, #tpu.memory_space<vmem>>, vector<1x1x128xf32>,
    return
  }
  func.func @transform_0(%arg0: i32) -> (i32, i32, i32) {
    %c0_i32 = arith.constant 0 : i32
    %c0_i32_0 = arith.constant 0 : i32
    %c0_i32_1 = arith.constant 0 : i32
    return %arg0, %c0_i32, %c0_i32_0 : i32, i32, i32
  }
  func.func @transform_1(%arg0: i32) -> (i32, i32) {
    %c0_i32 = arith.constant 0 : i32
    %c0_i32_0 = arith.constant 0 : i32
    %c0_i32_1 = arith.constant 0 : i32
    return %c0_i32, %c0_i32_0 : i32, i32
  }
  func.func @transform_2(%arg0: i32) -> (i32, i32) {
    %c0_i32 = arith.constant 0 : i32
    %c0_i32_0 = arith.constant 0 : i32
    %c0_i32_1 = arith.constant 0 : i32
    return %c0_i32, %c0_i32_0 : i32, i32
  }
  func.func @transform_3(%arg0: i32) -> (i32, i32) {
    %c0_i32 = arith.constant 0 : i32
    %c0_i32_0 = arith.constant 0 : i32
    %c0_i32_1 = arith.constant 0 : i32
    return %c0_i32, %c0_i32_0 : i32, i32
  }
  func.func @transform_4(%arg0: i32) -> (i32, i32) {
    %c0_i32 = arith.constant 0 : i32
    %c0_i32_0 = arith.constant 0 : i32
    %c0_i32_1 = arith.constant 0 : i32
    return %c0_i32, %c0_i32_0 : i32, i32
  }
  func.func @transform_5(%arg0: i32) -> (i32, i32, i32) {
    %c0_i32 = arith.constant 0 : i32
    %c0_i32_0 = arith.constant 0 : i32
    %c0_i32_1 = arith.constant 0 : i32
    %c0_i32_2 = arith.constant 0 : i32
    return %c0_i32, %c0_i32_0, %c0_i32_1 : i32, i32, i32
  }
  func.func @transform_6(%arg0: i32) -> (i32, i32, i32) {
    %c0_i32 = arith.constant 0 : i32
    %c0_i32_0 = arith.constant 0 : i32
    %c0_i32_1 = arith.constant 0 : i32
    %c0_i32_2 = arith.constant 0 : i32
    return %c0_i32, %c0_i32_0, %c0_i32_1 : i32, i32, i32
  }
  func.func @transform_7(%arg0: i32) -> (i32, i32) {
    %c0_i32 = arith.constant 0 : i32
    %c0_i32_0 = arith.constant 0 : i32
    %c0_i32_1 = arith.constant 0 : i32
    return %c0_i32, %c0_i32_0 : i32, i32
  }
  func.func @transform_8(%arg0: i32) -> (i32, i32) {
    %c0_i32 = arith.constant 0 : i32
    %c0_i32_0 = arith.constant 0 : i32
    %c0_i32_1 = arith.constant 0 : i32
    return %c0_i32, %c0_i32_0 : i32, i32
  }
  func.func @transform_9(%arg0: i32) -> (i32, i32) {
    %c0_i32 = arith.constant 0 : i32
    %c0_i32_0 = arith.constant 0 : i32
    %c0_i32_1 = arith.constant 0 : i32
    return %c0_i32, %c0_i32_0 : i32, i32
  }
  func.func @transform_10(%arg0: i32) -> (i32, i32, i32) {
    %c0_i32 = arith.constant 0 : i32
    %c0_i32_0 = arith.constant 0 : i32
    %c0_i32_1 = arith.constant 0 : i32
    return %arg0, %c0_i32, %c0_i32_0 : i32, i32, i32
  }
}

</mosaic_0001>

<bundles_post_ra>
// kernel: cifar_small_convnet_forward.1
= control target key start
LH: loop header
LB: loop body
LE: loop exit
PB: predicated region body
PF: predicated region fallthrough
CT: control target
= control target key end

     0   :  { %15 = vsyncpa [#allocation3], 0  ;;  %s15190_s0 = inlined_call_operand.vmem [shape: f32[2,48,225], index: 0, kind: input, shape index: {}]   ;;  %s15191_s1 = inlined_call_operand.vmem [shape: f32[16,48], index: 1, kind: input, shape index: {}]   ;;  %s15192_s2 = inlined_call_operand.vmem [shape: f32[16,1], index: 2, kind: input, shape index: {}]   ;;  %s15193_s3 = inlined_call_operand.vmem [shape: f32[32,256], index: 3, kind: input, shape index: {}]   ;;  %s15194_s4 = inlined_call_operand.vmem [shape: f32[32,1], index: 4, kind: input, shape index: {}]   ;;  %s15195_s5 = inlined_call_operand.vmem [shape: f32[16,225,144], index: 5, kind: input, shape index: {}]   ;;  %s15196_s6 = inlined_call_operand.vmem [shape: f32[32,144,128], index: 6, kind: input, shape index: {}]   ;;  %s15197_s7 = inlined_call_operand.vmem [shape: f32[1,128], index: 7, kind: input, shape index: {}]   ;;  %s15198_s8 = inlined_call_operand.vmem [shape: f32[128,128], index: 8, kind: input, shape index: {}]   ;;  %s15199_s9 = inlined_call_operand.vmem [shape: f32[1,128], index: 9, kind: input, shape index: {}]   ;;  %s15200_s10 = inlined_call_operand.hbm [shape: f32[2,1,128], index: 10, kind: output, shape index: {}]  }
   0x1   :  { %17 = vsyncpa [#allocation3 + $0x1], 0  ;;  %s9688_s13 = smov 0   ;;  %s9690_s14 = smov 0  }
   0x2   :  { %s9692_s15 = smov 0   ;;  %s9694_s16 = smov 0  }
   0x3 LB: > { %s9709_s17 = sadd.s32 4294967295, %s9626_s16   ;;  %s6072_s18 = sadd.s32 4294967294, %s9626_s16   ;;  %s9626_s16 = sphi %s9694_s16, %s15216_s16   ;;  %s9622_s15 = sphi %s9692_s15, %s15215_s15   ;;  %s9618_s14 = sphi %s9690_s14, %s15214_s14   ;;  %s9614_s13 = sphi %s9688_s13, %s15213_s13  }
   0x4   : > { %s9713_s19 = sadd.s32 1, %s9626_s16   ;;  %s245_s20 = sadd.s32 1, %s9622_s15 }
   0x5   : > { %s242_s21 = ssub.s32 %s9626_s16, %s9713_s19  ;;  %p255_p0 = scmp.ne.s32.totalorder %s9622_s15, %s9618_s14 }
   0x6   : > { %p243_p1 = scmp.eq.s32.totalorder %s242_s21, 0  ;;  %p256_p2 = scmp.eq.s32.totalorder %s9709_s17, 1 }
   0x7   : > { %p261_p3 = scmp.ne.s32.totalorder %s9618_s14, %s9614_s13  ;;  %p262_p4 = scmp.eq.s32.totalorder %s6072_s18, 1 }
   0x8   : > { %s9724_s22 = scalar_select %p243_p1, %s9622_s15, %s245_s20  }
   0x9   : > { %p9726_p5 = por %p256_p2, %p255_p0  ;;  %p9730_p6 = por %p262_p4, %p261_p3 }
   0xa   : > { %15202 = sst [smem:[#allocation5_spill]] %s9724_s22  ;;  %p6075_p7 = scmp.ge.s32.totalorder %s9626_s16, 1 }
   0xb   : > { %p315_p8 = scmp.lt.s32.totalorder %s9626_s16, 3 }
   0xd   : > { %p316_p9 = pnand %p6075_p7, %p315_p8 }
   0xe   : > { %p352_p10 = scmp.lt.s32.totalorder (!%p316_p9), %s9709_s17, 1  ;;  %v15201_v0 = vmov (!%p316_p9), 0.0   ;;  %v9629_v1 = vmov (!%p316_p9), 0   ;;  %v371_v2 = vld [vmem:[%s15192_s2] sm:$0xff] (!%p316_p9)  ;;  %v472_v3 = vld [vmem:[%s15195_s5 + $0x8] sm:$0xff] (!%p316_p9)  ;;  %v474_v4 = vld [vmem:[%s15195_s5 + $0x18] sm:$0xff] (!%p316_p9) }
   0xf   : > { %319 = sbr.rel (%p316_p9) target bundleno = 2147 (0x863), region = 60  ;;  %454 = vmatprep.mubr.f32.mxu0 (!%p316_p9), %v15201_v0  ;;  %9562 = vset.pattern.permute.xlu0 (!%p316_p9), %v9629_v1  ;;  %v372_v5 = vld [vmem:[%s15192_s2 + $0x8] sm:$0xff] (!%p316_p9)  ;;  %v7670_v6 = vpack.c.bf16 (!%p316_p9), %v474_v4, %v472_v3  ;;  %v471_v7 = vld [vmem:[%s15195_s5] sm:$0xff] (!%p316_p9)  ;;  %v473_v8 = vld [vmem:[%s15195_s5 + $0x10] sm:$0xff] (!%p316_p9)  ;;  %vm383_vm0 = vcmask (!%p316_p9), 392192   ;;  %vm536_vm1 = vcmask (!%p316_p9), 1040384  }
  0x10   : > { %375 = vperm.xlu0 (!%p316_p9), %9562, %v371_v2   ;;  %9563 = vset.pattern.permute.xlu1 (!%p316_p9), %v9629_v1  ;;  %v7672_v9 = vpack.c.bf16 (!%p316_p9), %v473_v8, %v471_v7  ;;  %v476_v10 = vld [vmem:[%s15195_s5 + $0x28] sm:$0xff] (!%p316_p9)  ;;  %v478_v11 = vld [vmem:[%s15195_s5 + $0x38] sm:$0xff] (!%p316_p9)  ;;  %v2760_v12 = vld [vmem:[%s15194_s4 + $0x10] sm:$0xff] (!%p316_p9)  ;;  %vm529_vm2 = vcmask (!%p316_p9), 793600   ;;  %vm2921_vm3 = vcmask (!%p316_p9), 130048   ;;  %vm9631_vm4 = vmmov (!%p316_p9), 0  }
  0x11   : > { %7671 = vmatprep.subr.bf16.mxu1 (!%p316_p9), %v7670_v6  ;;  %v7674_v13 = vpack.c.bf16 (!%p316_p9), %v478_v11, %v476_v10  ;;  %v475_v14 = vld [vmem:[%s15195_s5 + $0x20] sm:$0xff] (!%p316_p9)  ;;  %v477_v15 = vld [vmem:[%s15195_s5 + $0x30] sm:$0xff] (!%p316_p9)  ;;  %v480_v31 = vld [vmem:[%s15195_s5 + $0x48] sm:$0xff] (!%p316_p9)  ;;  %s350_s18 = sand.u32 (!%p316_p9), 1, %s9618_s14   ;;  %s7603_s21 = sshll.u32 (!%p316_p9), %s9709_s17, 4 }
  0x12   : > { %7673 = vmatpush1.bf16.msra.mxu1 (!%p316_p9), %v7672_v9  ;;  %v7676_v19 = vpack.c.bf16 (!%p316_p9), %v477_v15, %v475_v14  ;;  %v482_v32 = vld [vmem:[%s15195_s5 + $0x58] sm:$0xff] (!%p316_p9)  ;;  %v479_v37 = vld [vmem:[%s15195_s5 + $0x40] sm:$0xff] (!%p316_p9)  ;;  %v6086_v39 = vld [vmem:[%s15195_s5 + $0x1e8] sm:$0xff] (!%p316_p9)  ;;  %s351_s25 = scalar_lea.vmem (!%p316_p9), [#allocation2], %s350_s18  ;;  %s6005_s30 = scalar_lea.sflag (!%p316_p9), [#allocation3], %s350_s18 }
  0x13   : > { %7675 = vmatprep.subr.bf16.mxu1 (!%p316_p9), %v7674_v13  ;;  %v7678_v36 = vpack.c.bf16 (!%p316_p9), %v482_v32, %v480_v31  ;;  %v6084_v38 = vld [vmem:[%s15195_s5 + $0x1d8] sm:$0xff] (!%p316_p9)  ;;  %v481_v40 = vld [vmem:[%s15195_s5 + $0x50] sm:$0xff] (!%p316_p9)  ;;  %v484_v42 = vld [vmem:[%s15195_s5 + $0x68] sm:$0xff] (!%p316_p9)  ;;  %s6017_s26 = sshll.u32 (!%p316_p9), %s351_s25, 4  ;;  %s15150_s26 = int_to_ptr.vmem [resolvable:$true] %s6017_s26 }
  0x14   : > { %380 = vperm.xlu0 (!%p316_p9), %9562, %v372_v5   ;;  %v7680_v41 = vpack.c.bf16 (!%p316_p9), %v481_v40, %v479_v37  ;;  %v486_v43 = vld [vmem:[%s15195_s5 + $0x78] sm:$0xff] (!%p316_p9)  ;;  %v483_v46 = vld [vmem:[%s15195_s5 + $0x60] sm:$0xff] (!%p316_p9)  ;;  %v485_v47 = vld [vmem:[%s15195_s5 + $0x70] sm:$0xff] (!%p316_p9)  ;;  %v7726_v48 = vpack.c.bf16 (!%p316_p9), %v6086_v39, %v6084_v38  ;;  %s9564_s11 = scalar_lea.vmem (!%p316_p9), %s15150_s26, 16 }
  0x15   : > { %v7682_v45 = vpack.c.bf16 (!%p316_p9), %v486_v43, %v484_v42  ;;  %v6083_v49 = vld [vmem:[%s15195_s5 + $0x1d0] sm:$0xff] (!%p316_p9)  ;;  %v6085_v50 = vld [vmem:[%s15195_s5 + $0x1e0] sm:$0xff] (!%p316_p9)  ;;  %v7684_v51 = vpack.c.bf16 (!%p316_p9), %v485_v47, %v483_v46  ;;  %v488_v52 = vld [vmem:[%s15195_s5 + $0x88] sm:$0xff] (!%p316_p9)  ;;  %p9565_p11 = scmp.ne.s32.totalorder (!%p316_p9), %s15150_s26, %s9564_s11 }
  0x16   : > { %s353_s27 = scalar_select %p352_p10, %s9709_s17, 1  ;;  %7677 = vmatpush1.bf16.msra.mxu1 %v7676_v19  ;;  %v6088_v53 = vld [vmem:[%s15195_s5 + $0x1f8] sm:$0xff]  ;;  %v6090_v54 = vld [vmem:[%s15195_s5 + $0x208] sm:$0xff]  ;;  %v487_v57 = vld [vmem:[%s15195_s5 + $0x80] sm:$0xff]  ;;  %v7728_v60 = vpack.c.bf16 %v6085_v50, %v6083_v49 }
  0x17   : > { %7679 = vmatprep.subr.bf16.mxu1 %v7678_v36  ;;  %v490_v55 = vld [vmem:[%s15195_s5 + $0x98] sm:$0xff]  ;;  %v489_v58 = vld [vmem:[%s15195_s5 + $0x90] sm:$0xff]  ;;  %v369_v59 = vld [vmem:[%s15191_s1] sm:$0xff]  ;;  %v7730_v63 = vpack.c.bf16 %v6090_v54, %v6088_v53  ;;  %p9566_p12 = pnand %p9565_p11, %p9726_p5  ;;  %s9632_s17 = smov [#allocation2]  }
  0x18   : > { %s9518_s28 = smul.u32 96, %s353_s27  ;;  %2774 = vperm.xlu0 %9562, %v2760_v12   ;;  %v7686_v56 = vpack.c.bf16 %v490_v55, %v488_v52  ;;  %v492_v61 = vld [vmem:[%s15195_s5 + $0xa8] sm:$0xff]  ;;  %v494_v62 = vld [vmem:[%s15195_s5 + $0xb8] sm:$0xff]  ;;  %v6087_v1 = vld [vmem:[%s15195_s5 + $0x1f0] sm:$0xff]  ;;  %v7688_v4 = vpack.c.bf16 %v489_v58, %v487_v57  ;;  %s9568_s12 = sshll.u32 %s9632_s17, 4  ;;  %s9569_s12 = int_to_ptr.vmem [resolvable:$false] %s9568_s12 }
  0x19   : > { %v6089_v2 = vld [vmem:[%s15195_s5 + $0x200] sm:$0xff]  ;;  %v6092_v3 = vld [vmem:[%s15195_s5 + $0x218] sm:$0xff]  ;;  %v6094_v5 = vld [vmem:[%s15195_s5 + $0x228] sm:$0xff]  ;;  %v7690_v6 = vpack.c.bf16 %v494_v62, %v492_v61  ;;  %p9567_p13 = pneg %p9566_p12  ;;  %s9570_s27 = scalar_lea.vmem %s9569_s12, 32 }
  0x1a   : > { %s9766_s20 = scalar_lea.vmem %s15190_s0, %s9518_s28  ;;  %7681 = vmatpush1.bf16.msra.mxu1 %v7680_v41  ;;  %v491_v7 = vld [vmem:[%s15195_s5 + $0xa0] sm:$0xff]  ;;  %v493_v8 = vld [vmem:[%s15195_s5 + $0xb0] sm:$0xff]  ;;  %v496_v9 = vld [vmem:[%s15195_s5 + $0xc8] sm:$0xff]  ;;  %v7732_v12 = vpack.c.bf16 %v6089_v2, %v6087_v1  ;;  %v7734_v13 = vpack.c.bf16 %v6094_v5, %v6092_v3  ;;  %p9571_p0 = scmp.lt.s32.totalorder %s15150_s26, %s9569_s12 }
  0x1b   : > { %v358_v16 = vld [vmem:[%s9766_s20 + $0x8] sm:$0xff]  ;;  %v360_v17 = vld [vmem:[%s9766_s20 + $0x18] sm:$0xff]  ;;  %v357_v18 = vld [vmem:[%s9766_s20] sm:$0xff]  ;;  %7683 = vmatprep.subr.bf16.mxu1 %v7682_v45  ;;  %p9572_p1 = scmp.lt.s32.totalorder %s9570_s27, %s9564_s11 }
  0x1c   : > { %v7658_v20 = vpack.c.bf16 %v360_v17, %v358_v16  ;;  %v359_v21 = vld [vmem:[%s9766_s20 + $0x10] sm:$0xff]  ;;  %v362_v22 = vld [vmem:[%s9766_s20 + $0x28] sm:$0xff]  ;;  %v364_v23 = vld [vmem:[%s9766_s20 + $0x38] sm:$0xff]  ;;  %v7692_v17 = vpack.c.bf16 %v493_v8, %v491_v7 }
  0x1d   : > { %v7660_v24 = vpack.c.bf16 %v359_v21, %v357_v18  ;;  %v7662_v25 = vpack.c.bf16 %v364_v23, %v362_v22  ;;  %v361_v26 = vld [vmem:[%s9766_s20 + $0x20] sm:$0xff]  ;;  %v363_v27 = vld [vmem:[%s9766_s20 + $0x30] sm:$0xff]  ;;  %v366_v28 = vld [vmem:[%s9766_s20 + $0x48] sm:$0xff]  ;;  %p9573_p2 = por %p9572_p1, %p9571_p0 }
  0x1e   : > { %7659 = vmatprep.subr.bf16.mxu0 %v7658_v20  ;;  %v368_v29 = vld [vmem:[%s9766_s20 + $0x58] sm:$0xff]  ;;  %v7664_v30 = vpack.c.bf16 %v363_v27, %v361_v26  ;;  %v365_v34 = vld [vmem:[%s9766_s20 + $0x40] sm:$0xff]  ;;  %v367_v35 = vld [vmem:[%s9766_s20 + $0x50] sm:$0xff]  ;;  %7685 = vmatpush1.bf16.msra.mxu1 %v7684_v51  ;;  %s15148_s20 = scalar_lea.hbm %s15200_s10, %s7603_s21 }
  0x1f   : > { %7661 = vmatpush1.bf16.msra.mxu0 %v7660_v24  ;;  %v7666_v33 = vpack.c.bf16 %v368_v29, %v366_v28  ;;  %v7668_v44 = vpack.c.bf16 %v367_v35, %v365_v34  ;;  %7687 = vmatprep.subr.bf16.mxu1 %v7686_v56  ;;  %v498_v10 = vld [vmem:[%s15195_s5 + $0xd8] sm:$0xff]  ;;  %v370_v11 = vld [vmem:[%s15191_s1 + $0x8] sm:$0xff]  ;;  %v6091_v14 = vld [vmem:[%s15195_s5 + $0x210] sm:$0xff]  ;;  %p9574_p3 = pnand %p9573_p2, %p9567_p13 }
  0x20   : > { %7663 = vmatprep.subr.bf16.mxu0 %v7662_v25  ;;  %v6093_v15 = vld [vmem:[%s15195_s5 + $0x220] sm:$0xff]  ;;  %v6096_v16 = vld [vmem:[%s15195_s5 + $0x238] sm:$0xff]  ;;  %v6098_v18 = vld [vmem:[%s15195_s5 + $0x248] sm:$0xff]  ;;  %v7694_v19 = vpack.c.bf16 %v498_v10, %v496_v9 }
  0x21   : > { %v495_v20 = vld [vmem:[%s15195_s5 + $0xc0] sm:$0xff]  ;;  %v497_v21 = vld [vmem:[%s15195_s5 + $0xd0] sm:$0xff]  ;;  %v500_v22 = vld [vmem:[%s15195_s5 + $0xe8] sm:$0xff]  ;;  %v7736_v24 = vpack.c.bf16 %v6093_v15, %v6091_v14  ;;  %v7738_v25 = vpack.c.bf16 %v6098_v18, %v6096_v16 }
  0x22   : > { %7689 = vmatpush1.bf16.msra.mxu1 %v7688_v4  ;;  %v502_v23 = vld [vmem:[%s15195_s5 + $0xf8] sm:$0xff]  ;;  %v6095_v26 = vld [vmem:[%s15195_s5 + $0x230] sm:$0xff]  ;;  %v6097_v27 = vld [vmem:[%s15195_s5 + $0x240] sm:$0xff]  ;;  %v7696_v29 = vpack.c.bf16 %v497_v21, %v495_v20 }
  0x23   : > { %7665 = vmatpush1.bf16.msra.mxu0 %v7664_v30  ;;  %7691 = vmatprep.subr.bf16.mxu1 %v7690_v6  ;;  %v6100_v28 = vld [vmem:[%s15195_s5 + $0x258] sm:$0xff]  ;;  %v6102_v30 = vld [vmem:[%s15195_s5 + $0x268] sm:$0xff]  ;;  %v7698_v31 = vpack.c.bf16 %v502_v23, %v500_v22  ;;  %v499_v32 = vld [vmem:[%s15195_s5 + $0xe0] sm:$0xff]  ;;  %v7740_v36 = vpack.c.bf16 %v6097_v27, %v6095_v26 }
  0x24   : > { %7667 = vmatprep.subr.bf16.mxu0 %v7666_v33  ;;  %v501_v33 = vld [vmem:[%s15195_s5 + $0xf0] sm:$0xff]  ;;  %v504_v34 = vld [vmem:[%s15195_s5 + $0x108] sm:$0xff]  ;;  %v506_v35 = vld [vmem:[%s15195_s5 + $0x118] sm:$0xff]  ;;  %v7742_v37 = vpack.c.bf16 %v6102_v30, %v6100_v28 }
  0x25   : > { %v6099_v38 = vld [vmem:[%s15195_s5 + $0x250] sm:$0xff]  ;;  %v6101_v39 = vld [vmem:[%s15195_s5 + $0x260] sm:$0xff]  ;;  %v6104_v40 = vld [vmem:[%s15195_s5 + $0x278] sm:$0xff]  ;;  %v7700_v41 = vpack.c.bf16 %v501_v33, %v499_v32  ;;  %v7702_v43 = vpack.c.bf16 %v506_v35, %v504_v34 }
  0x26   : > { %7693 = vmatpush1.bf16.msra.mxu1 %v7692_v17  ;;  %v6106_v42 = vld [vmem:[%s15195_s5 + $0x288] sm:$0xff]  ;;  %v505_v45 = vld [vmem:[%s15195_s5 + $0x110] sm:$0xff]  ;;  %v510_v47 = vld [vmem:[%s15195_s5 + $0x138] sm:$0xff] }
  0x27   : > { %7669 = vmatpush1.bf16.msra.mxu0 %v7668_v44  ;;  %7695 = vmatprep.subr.bf16.mxu1 %v7694_v19  ;;  %v503_v44 = vld [vmem:[%s15195_s5 + $0x100] sm:$0xff]  ;;  %v508_v46 = vld [vmem:[%s15195_s5 + $0x128] sm:$0xff]  ;;  %v7746_v49 = vpack.c.bf16 %v6106_v42, %v6104_v40  ;;  %v6103_v50 = vld [vmem:[%s15195_s5 + $0x270] sm:$0xff] }
  0x28   : > { %7727 = vmatprep.subr.bf16.mxu0 %v7726_v48  ;;  %v7744_v48 = vpack.c.bf16 %v6101_v39, %v6099_v38  ;;  %v6105_v51 = vld [vmem:[%s15195_s5 + $0x280] sm:$0xff]  ;;  %v6108_v52 = vld [vmem:[%s15195_s5 + $0x298] sm:$0xff]  ;;  %v7704_v53 = vpack.c.bf16 %v505_v45, %v503_v44  ;;  %v6110_v54 = vld [vmem:[%s15195_s5 + $0x2a8] sm:$0xff]  ;;  %v7706_v55 = vpack.c.bf16 %v510_v47, %v508_v46 }
  0x29   : > { %v507_v56 = vld [vmem:[%s15195_s5 + $0x120] sm:$0xff]  ;;  %v509_v57 = vld [vmem:[%s15195_s5 + $0x130] sm:$0xff]  ;;  %v512_v58 = vld [vmem:[%s15195_s5 + $0x148] sm:$0xff]  ;;  %v7750_v61 = vpack.c.bf16 %v6110_v54, %v6108_v52 }
  0x2a   : > { %6077 = vmatmul.mubr.msk.f32.vlgmr.msra.gmra.mrb[0].mxu0 %vm383_vm0, %v369_v59  ;;  %7697 = vmatpush1.bf16.msra.mxu1 %v7696_v29  ;;  %v514_v59 = vld [vmem:[%s15195_s5 + $0x158] sm:$0xff]  ;;  %v6107_v62 = vld [vmem:[%s15195_s5 + $0x290] sm:$0xff]  ;;  %v7708_v2 = vpack.c.bf16 %v509_v57, %v507_v56  ;;  %v6114_v3 = vld [vmem:[%s15195_s5 + $0x2c8] sm:$0xff] }
  0x2b   : > { %460 = vmatprep.mubr.f32.mxu0 %v15201_v0  ;;  %7729 = vmatpush1.bf16.msra.mxu0 %v7728_v60  ;;  %v7748_v60 = vpack.c.bf16 %v6105_v51, %v6103_v50  ;;  %v6112_v1 = vld [vmem:[%s15195_s5 + $0x2b8] sm:$0xff]  ;;  %v7710_v4 = vpack.c.bf16 %v514_v59, %v512_v58  ;;  %v511_v5 = vld [vmem:[%s15195_s5 + $0x140] sm:$0xff]  ;;  %v513_v6 = vld [vmem:[%s15195_s5 + $0x150] sm:$0xff] }
  0x2c   : > { %7731 = vmatprep.subr.bf16.mxu0 %v7730_v63  ;;  %7699 = vmatprep.subr.bf16.mxu1 %v7698_v31  ;;  %v6109_v63 = vld [vmem:[%s15195_s5 + $0x2a0] sm:$0xff]  ;;  %v516_v7 = vld [vmem:[%s15195_s5 + $0x168] sm:$0xff]  ;;  %v518_v8 = vld [vmem:[%s15195_s5 + $0x178] sm:$0xff]  ;;  %v7754_v10 = vpack.c.bf16 %v6114_v3, %v6112_v1  ;;  %v7712_v14 = vpack.c.bf16 %v513_v6, %v511_v5 }
  0x2d   : > { %v7752_v9 = vpack.c.bf16 %v6109_v63, %v6107_v62  ;;  %v6118_v15 = vld [vmem:[%s15195_s5 + $0x2e8] sm:$0xff]  ;;  %v7714_v16 = vpack.c.bf16 %v518_v8, %v516_v7  ;;  %v515_v17 = vld [vmem:[%s15195_s5 + $0x160] sm:$0xff]  ;;  %v517_v18 = vld [vmem:[%s15195_s5 + $0x170] sm:$0xff] }
  0x2e   : > { %6078 = vmatmul.mubr.msk.f32.gmra.mrb[2].mxu0 %vm383_vm0, %v370_v11  ;;  %7701 = vmatpush1.bf16.msra.mxu1 %v7700_v41  ;;  %v6111_v11 = vld [vmem:[%s15195_s5 + $0x2b0] sm:$0xff]  ;;  %v520_v19 = vld [vmem:[%s15195_s5 + $0x188] sm:$0xff]  ;;  %v522_v20 = vld [vmem:[%s15195_s5 + $0x198] sm:$0xff]  ;;  %v7716_v26 = vpack.c.bf16 %v517_v18, %v515_v17 }
  0x2f   : > { %7733 = vmatpush1.bf16.msra.mxu0 %v7732_v12  ;;  %7703 = vmatprep.subr.bf16.mxu1 %v7702_v43  ;;  %v6113_v12 = vld [vmem:[%s15195_s5 + $0x2c0] sm:$0xff]  ;;  %v6115_v23 = vld [vmem:[%s15195_s5 + $0x2d0] sm:$0xff]  ;;  %v6122_v27 = vld [vmem:[%s15195_s5 + $0x308] sm:$0xff]  ;;  %v7718_v28 = vpack.c.bf16 %v522_v20, %v520_v19 }
  0x30   : > { %7735 = vmatprep.subr.bf16.mxu0 %v7734_v13  ;;  %v6116_v13 = vld [vmem:[%s15195_s5 + $0x2d8] sm:$0xff]  ;;  %v7756_v21 = vpack.c.bf16 %v6113_v12, %v6111_v11  ;;  %v519_v29 = vld [vmem:[%s15195_s5 + $0x180] sm:$0xff]  ;;  %v521_v30 = vld [vmem:[%s15195_s5 + $0x190] sm:$0xff] }
  0x31   : > { %v7758_v22 = vpack.c.bf16 %v6118_v15, %v6116_v13  ;;  %v6119_v33 = vld [vmem:[%s15195_s5 + $0x2f0] sm:$0xff]  ;;  %v6121_v34 = vld [vmem:[%s15195_s5 + $0x300] sm:$0xff]  ;;  %v7720_v35 = vpack.c.bf16 %v521_v30, %v519_v29  ;;  %v6128_v42 = vld [vmem:[%s15195_s5 + $0x338] sm:$0xff] }
  0x32   : > { %7705 = vmatpush1.bf16.msra.mxu1 %v7704_v53  ;;  %v7764_v38 = vpack.c.bf16 %v6121_v34, %v6119_v33  ;;  %v6123_v40 = vld [vmem:[%s15195_s5 + $0x310] sm:$0xff]  ;;  %v6125_v41 = vld [vmem:[%s15195_s5 + $0x320] sm:$0xff]  ;;  %v6130_v43 = vld [vmem:[%s15195_s5 + $0x348] sm:$0xff] }
  0x33   : > { %7737 = vmatpush1.bf16.msra.mxu0 %v7736_v24  ;;  %7707 = vmatprep.subr.bf16.mxu1 %v7706_v55  ;;  %v6117_v24 = vld [vmem:[%s15195_s5 + $0x2e0] sm:$0xff]  ;;  %v7768_v44 = vpack.c.bf16 %v6125_v41, %v6123_v40  ;;  %v7770_v45 = vpack.c.bf16 %v6130_v43, %v6128_v42  ;;  %v6127_v46 = vld [vmem:[%s15195_s5 + $0x330] sm:$0xff]  ;;  %v524_v55 = vld [vmem:[%s15195_s5 + $0x1a8] sm:$0xff] }
  0x34   : > { %7739 = vmatprep.subr.bf16.mxu0 %v7738_v25  ;;  %v6120_v25 = vld [vmem:[%s15195_s5 + $0x2f8] sm:$0xff]  ;;  %v7760_v31 = vpack.c.bf16 %v6117_v24, %v6115_v23  ;;  %v6129_v47 = vld [vmem:[%s15195_s5 + $0x340] sm:$0xff]  ;;  %v6131_v52 = vld [vmem:[%s15195_s5 + $0x350] sm:$0xff] }
  0x35   : > { %v7762_v32 = vpack.c.bf16 %v6122_v27, %v6120_v25  ;;  %v7772_v50 = vpack.c.bf16 %v6129_v47, %v6127_v46  ;;  %v6133_v53 = vld [vmem:[%s15195_s5 + $0x360] sm:$0xff]  ;;  %v526_v56 = vld [vmem:[%s15195_s5 + $0x1b8] sm:$0xff]  ;;  %v6138_v59 = vld [vmem:[%s15195_s5 + $0x388] sm:$0xff] }
  0x36   : > { %7709 = vmatpush1.bf16.msra.mxu1 %v7708_v2  ;;  %v7776_v54 = vpack.c.bf16 %v6133_v53, %v6131_v52  ;;  %v6136_v57 = vld [vmem:[%s15195_s5 + $0x378] sm:$0xff]  ;;  %v7722_v58 = vpack.c.bf16 %v526_v56, %v524_v55  ;;  %v6135_v1 = vld [vmem:[%s15195_s5 + $0x370] sm:$0xff]  ;;  %v6137_v2 = vld [vmem:[%s15195_s5 + $0x380] sm:$0xff] }
  0x37   : > { %7741 = vmatpush1.bf16.msra.mxu0 %v7740_v36  ;;  %7711 = vmatprep.subr.bf16.mxu1 %v7710_v4  ;;  %v6124_v36 = vld [vmem:[%s15195_s5 + $0x318] sm:$0xff]  ;;  %v7778_v62 = vpack.c.bf16 %v6138_v59, %v6136_v57  ;;  %v7780_v3 = vpack.c.bf16 %v6137_v2, %v6135_v1  ;;  %v528_v4 = vld [vmem:[%s15195_s5 + $0x1c8] sm:$0x1]  ;;  %v527_v7 = vld [vmem:[%s15195_s5 + $0x1c0] sm:$0x1] }
  0x38   : > { %7743 = vmatprep.subr.bf16.mxu0 %v7742_v37  ;;  %v6126_v37 = vld [vmem:[%s15195_s5 + $0x328] sm:$0xff]  ;;  %v6140_v5 = vld [vmem:[%s15195_s5 + $0x398] sm:$0x1]  ;;  %v6139_v8 = vld [vmem:[%s15195_s5 + $0x390] sm:$0x1] }
  0x39   : > { %v7766_v39 = vpack.c.bf16 %v6126_v37, %v6124_v36  ;;  %v6146_v6 = vld [vmem:[%s15195_s5 + $0x3a8] sm:$0xff]  ;;  %v6208_v11 = vld [vmem:[%s15195_s5 + $0x578] sm:$0xff]  ;;  %v6147_v17 = vld [vmem:[%s15195_s5 + $0x3b0] sm:$0xff] }
  0x3a   : > { %7713 = vmatpush1.bf16.msra.mxu1 %v7712_v14  ;;  %v6210_v12 = vld [vmem:[%s15195_s5 + $0x588] sm:$0xff]  ;;  %v6207_v20 = vld [vmem:[%s15195_s5 + $0x570] sm:$0xff]  ;;  %v6152_v24 = vld [vmem:[%s15195_s5 + $0x3d8] sm:$0xff] }
  0x3b   : > { %7745 = vmatpush1.bf16.msra.mxu0 %v7744_v48  ;;  %7715 = vmatprep.subr.bf16.mxu1 %v7714_v16  ;;  %v6132_v48 = vld [vmem:[%s15195_s5 + $0x358] sm:$0xff]  ;;  %v7838_v13 = vpack.c.bf16 %v6210_v12, %v6208_v11  ;;  %v6145_v16 = vld [vmem:[%s15195_s5 + $0x3a0] sm:$0xff]  ;;  %v6154_v42 = vld [vmem:[%s15195_s5 + $0x3e8] sm:$0xff] }
  0x3c   : > { %7747 = vmatprep.subr.bf16.mxu0 %v7746_v49  ;;  %v6134_v49 = vld [vmem:[%s15195_s5 + $0x368] sm:$0xff]  ;;  %v6212_v25 = vld [vmem:[%s15195_s5 + $0x598] sm:$0xff]  ;;  %v7784_v30 = vpack.c.bf16 %v6147_v17, %v6145_v16  ;;  %v6213_v40 = vld [vmem:[%s15195_s5 + $0x5a0] sm:$0xff] }
  0x3d   : > { %v7774_v51 = vpack.c.bf16 %v6134_v49, %v6132_v48  ;;  %v6156_v43 = vld [vmem:[%s15195_s5 + $0x3f8] sm:$0xff]  ;;  %v6153_v49 = vld [vmem:[%s15195_s5 + $0x3e0] sm:$0xff]  ;;  %v6215_v52 = vld [vmem:[%s15195_s5 + $0x5b0] sm:$0xff] }
  0x3e   : > { %7717 = vmatpush1.bf16.msra.mxu1 %v7716_v26  ;;  %v6214_v26 = vld [vmem:[%s15195_s5 + $0x5a8] sm:$0xff]  ;;  %v6217_v53 = vld [vmem:[%s15195_s5 + $0x5c0] sm:$0xff]  ;;  %v7790_v55 = vpack.c.bf16 %v6156_v43, %v6154_v42  ;;  %v6160_v57 = vld [vmem:[%s15195_s5 + $0x418] sm:$0xff] }
  0x3f   : > { %7749 = vmatpush1.bf16.msra.mxu0 %v7748_v60  ;;  %7719 = vmatprep.subr.bf16.mxu1 %v7718_v28  ;;  %v523_v60 = vld [vmem:[%s15195_s5 + $0x1a0] sm:$0xff]  ;;  %v7842_v37 = vpack.c.bf16 %v6214_v26, %v6212_v25  ;;  %v6222_v59 = vld [vmem:[%s15195_s5 + $0x5e8] sm:$0xff]  ;;  %v6163_v12 = vld [vmem:[%s15195_s5 + $0x430] sm:$0xff] }
  0x40   : > { %7751 = vmatprep.subr.bf16.mxu0 %v7750_v61  ;;  %v525_v61 = vld [vmem:[%s15195_s5 + $0x1b0] sm:$0xff]  ;;  %v6161_v11 = vld [vmem:[%s15195_s5 + $0x420] sm:$0xff]  ;;  %v6166_v17 = vld [vmem:[%s15195_s5 + $0x448] sm:$0xff] }
  0x41   : > { %v7724_v63 = vpack.c.bf16 %v525_v61, %v523_v60  ;;  %v7848_v61 = vpack.c.bf16 %v6217_v53, %v6215_v52  ;;  %v6225_v16 = vld [vmem:[%s15195_s5 + $0x600] sm:$0xff]  ;;  %v6174_v43 = vld [vmem:[%s15195_s5 + $0x488] sm:$0xff]  ;;  %v6175_v52 = vld [vmem:[%s15195_s5 + $0x490] sm:$0xff] }
  0x42   : > { %7721 = vmatpush1.bf16.msra.mxu1 %v7720_v35  ;;  %v6233_v42 = vld [vmem:[%s15195_s5 + $0x640] sm:$0xff] }
  0x43   : > { %7753 = vmatpush1.bf16.msra.mxu0 %v7752_v9  ;;  %7723 = vmatprep.subr.bf16.mxu1 %v7722_v58  ;;  %v6148_v9 = vld [vmem:[%s15195_s5 + $0x3b8] sm:$0xff] }
  0x44   : > { %7755 = vmatprep.subr.bf16.mxu0 %v7754_v10  ;;  %v7782_v10 = vpack.c.bf16 %v6148_v9, %v6146_v6  ;;  %v6220_v58 = vld [vmem:[%s15195_s5 + $0x5d8] sm:$0xff] }
  0x45   : > { %v7850_v2 = vpack.c.bf16 %v6222_v59, %v6220_v58  ;;  %v6164_v6 = vld [vmem:[%s15195_s5 + $0x438] sm:$0xff] }
  0x46   : > { %7725 = vmatpush1.bf16.msra.mxu1 %v7724_v63  ;;  %v6159_v63 = vld [vmem:[%s15195_s5 + $0x410] sm:$0xff]  ;;  %v6180_v58 = vld [vmem:[%s15195_s5 + $0x4b8] sm:$0xff] }
  0x47   : > { %7757 = vmatpush1.bf16.msra.mxu0 %v7756_v21  ;;  %6079 = vmatprep.subr.msk.mxu1 %vm536_vm1, %v528_v4  ;;  %v6209_v21 = vld [vmem:[%s15195_s5 + $0x580] sm:$0xff]  ;;  %v6240_v59 = vld [vmem:[%s15195_s5 + $0x678] sm:$0xff] }
  0x48   : > { %7759 = vmatprep.subr.bf16.mxu0 %v7758_v22  ;;  %v6150_v22 = vld [vmem:[%s15195_s5 + $0x3c8] sm:$0xff]  ;;  %v6221_v4 = vld [vmem:[%s15195_s5 + $0x5e0] sm:$0xff] }
  0x49   : > { %v7786_v36 = vpack.c.bf16 %v6152_v24, %v6150_v22  ;;  %v6167_v24 = vld [vmem:[%s15195_s5 + $0x450] sm:$0xff] }
  0x4a   : > { %6080 = vmatpush1.msk.msra.mxu1 %vm536_vm1, %v527_v7  ;;  %v6224_v7 = vld [vmem:[%s15195_s5 + $0x5f8] sm:$0xff] }
  0x4b   : > { %7761 = vmatpush1.bf16.msra.mxu0 %v7760_v31  ;;  %7783 = vmatprep.subr.bf16.mxu1 %v7782_v10  ;;  %v7840_v31 = vpack.c.bf16 %v6209_v21, %v6207_v20  ;;  %v6230_v20 = vld [vmem:[%s15195_s5 + $0x628] sm:$0xff]  ;;  %v7800_v21 = vpack.c.bf16 %v6163_v12, %v6161_v11  ;;  %v6181_v12 = vld [vmem:[%s15195_s5 + $0x4c0] sm:$0xff] }
  0x4c   : > { %7763 = vmatprep.subr.bf16.mxu0 %v7762_v32  ;;  %v6149_v32 = vld [vmem:[%s15195_s5 + $0x3c0] sm:$0xff] }
  0x4f   : > { %7765 = vmatpush1.bf16.msra.mxu0 %v7764_v38  ;;  %v6151_v38 = vld [vmem:[%s15195_s5 + $0x3d0] sm:$0xff] }
  0x50   : > { %7767 = vmatprep.subr.bf16.mxu0 %v7766_v39  ;;  %v6211_v39 = vld [vmem:[%s15195_s5 + $0x590] sm:$0xff]  ;;  %v7788_v47 = vpack.c.bf16 %v6151_v38, %v6149_v32  ;;  %v6232_v32 = vld [vmem:[%s15195_s5 + $0x638] sm:$0xff] }
  0x51   : > { %v7844_v48 = vpack.c.bf16 %v6213_v40, %v6211_v39  ;;  %v6171_v38 = vld [vmem:[%s15195_s5 + $0x470] sm:$0xff] }
  0x53   : > { %7769 = vmatpush1.bf16.msra.mxu0 %v7768_v44  ;;  %v6216_v44 = vld [vmem:[%s15195_s5 + $0x5b8] sm:$0xff] }
  0x54   : > { %7771 = vmatprep.subr.bf16.mxu0 %v7770_v45  ;;  %v6218_v45 = vld [vmem:[%s15195_s5 + $0x5c8] sm:$0xff] }
  0x55   : > { %v7846_v56 = vpack.c.bf16 %v6218_v45, %v6216_v44  ;;  %v6176_v44 = vld [vmem:[%s15195_s5 + $0x498] sm:$0xff] }
  0x56   : > { %v6236_v45 = vld [vmem:[%s15195_s5 + $0x658] sm:$0xff]  ;;  %v7810_v53 = vpack.c.bf16 %v6176_v44, %v6174_v43  ;;  %v6253_v43 = vld [vmem:[%s15195_s5 + $0x6e0] sm:$0xff]  ;;  %v6194_v44 = vld [vmem:[%s15195_s5 + $0x528] sm:$0xff] }
  0x57   : > { %7773 = vmatpush1.bf16.msra.mxu0 %v7772_v50  ;;  %v6155_v50 = vld [vmem:[%s15195_s5 + $0x3f0] sm:$0xff] }
  0x58   : > { %7775 = vmatprep.subr.bf16.mxu0 %v7774_v51  ;;  %v7792_v60 = vpack.c.bf16 %v6155_v50, %v6153_v49  ;;  %v6173_v50 = vld [vmem:[%s15195_s5 + $0x480] sm:$0xff] }
  0x5b   : > { %7777 = vmatpush1.bf16.msra.mxu0 %v7776_v54  ;;  %v6158_v54 = vld [vmem:[%s15195_s5 + $0x408] sm:$0xff] }
  0x5c   : > { %7779 = vmatprep.subr.bf16.mxu0 %v7778_v62  ;;  %v6157_v62 = vld [vmem:[%s15195_s5 + $0x400] sm:$0xff]  ;;  %v7794_v1 = vpack.c.bf16 %v6160_v57, %v6158_v54  ;;  %v6178_v57 = vld [vmem:[%s15195_s5 + $0x4a8] sm:$0xff] }
  0x5d   : > { %v7796_v9 = vpack.c.bf16 %v6159_v63, %v6157_v62  ;;  %v6177_v63 = vld [vmem:[%s15195_s5 + $0x4a0] sm:$0xff] }
  0x5f   : > { %7781 = vmatpush1.bf16.msra.mxu0 %v7780_v3  ;;  %v6219_v3 = vld [vmem:[%s15195_s5 + $0x5d0] sm:$0xff] }
  0x60   : > { %6141 = vmatprep.subr.msk.mxu0 %vm536_vm1, %v6140_v5  ;;  %v6162_v5 = vld [vmem:[%s15195_s5 + $0x428] sm:$0xff]  ;;  %v7852_v10 = vpack.c.bf16 %v6221_v4, %v6219_v3  ;;  %v6239_v4 = vld [vmem:[%s15195_s5 + $0x670] sm:$0xff] }
  0x63   : > { %6142 = vmatpush1.msk.msra.mxu0 %vm536_vm1, %v6139_v8  ;;  %v6226_v8 = vld [vmem:[%s15195_s5 + $0x608] sm:$0xff] }
  0x64   : > { %7839 = vmatprep.subr.bf16.mxu0 %v7838_v13  ;;  %v7798_v13 = vpack.c.bf16 %v6164_v6, %v6162_v5  ;;  %v6241_v5 = vld [vmem:[%s15195_s5 + $0x680] sm:$0xff]  ;;  %v6182_v6 = vld [vmem:[%s15195_s5 + $0x4c8] sm:$0xff] }
  0x65   : > { %v7872_v11 = vpack.c.bf16 %v6241_v5, %v6239_v4  ;;  %v6199_v4 = vld [vmem:[%s15195_s5 + $0x550] sm:$0xff] }
  0x66   : > { %v6259_v5 = vld [vmem:[%s15195_s5 + $0x710] sm:$0xff] }
  0x8f   : > { %v376_v14 = vpop.permute.xlu0 %375 }
  0x93   : > { %v381_v27 = vpop.permute.xlu0 %380 }
  0xfd   : > { %v456_v15 = vpop.f32.mrb[0].mxu0 }
  0xfe   : > { %v457_v18 = vadd.f32 %v456_v15, %v376_v14  ;;  %v458_v19 = vpop.f32.mrb[1].mxu0  ;;  %v6223_v15 = vld [vmem:[%s15195_s5 + $0x5f0] sm:$0xff] }
  0xff   : > { %v459_v23 = vadd.f32 %v458_v19, %v376_v14  ;;  %v7854_v14 = vpack.c.bf16 %v6226_v8, %v6224_v7  ;;  %v6228_v19 = vld [vmem:[%s15195_s5 + $0x618] sm:$0xff]  ;;  %v7856_v22 = vpack.c.bf16 %v6225_v16, %v6223_v15  ;;  %v6243_v16 = vld [vmem:[%s15195_s5 + $0x690] sm:$0xff] }
 0x100   : > { %v10167_v33 = vmax.f32 %v457_v18, 0.0  ;;  %v6168_v18 = vld [vmem:[%s15195_s5 + $0x458] sm:$0xff]  ;;  %v7858_v26 = vpack.c.bf16 %v6230_v20, %v6228_v19 }
 0x101   : > { %v10162_v28 = vmax.f32 %v459_v23, 0.0  ;;  %v462_v29 = vpop.f32.mrb[2].mxu0  ;;  %v6165_v23 = vld [vmem:[%s15195_s5 + $0x440] sm:$0xff]  ;;  %v7802_v25 = vpack.c.bf16 %v6168_v18, %v6166_v17  ;;  %v6184_v7 = vld [vmem:[%s15195_s5 + $0x4d8] sm:$0xff]  ;;  %v6186_v18 = vld [vmem:[%s15195_s5 + $0x4e8] sm:$0xff] }
 0x102   : > { %v463_v34 = vadd.f32 %v462_v29, %v381_v27  ;;  %v464_v35 = vpop.f32.mrb[3].mxu0  ;;  %v6229_v29 = vld [vmem:[%s15195_s5 + $0x620] sm:$0xff]  ;;  %v6244_v8 = vld [vmem:[%s15195_s5 + $0x698] sm:$0xff] }
 0x103   : > { %v465_v41 = vadd.f32 %v464_v35, %v381_v27  ;;  %6081 = vmatprep.mubr.msk.f32.mxu1 %vm529_vm2, %v10162_v28  ;;  %6143 = vmatprep.mubr.msk.f32.mxu0 %vm529_vm2, %v10162_v28  ;;  %v6227_v27 = vld [vmem:[%s15195_s5 + $0x610] sm:$0xff]  ;;  %v7804_v35 = vpack.c.bf16 %v6167_v24, %v6165_v23  ;;  %v6245_v17 = vld [vmem:[%s15195_s5 + $0x6a0] sm:$0xff]  ;;  %v6188_v19 = vld [vmem:[%s15195_s5 + $0x4f8] sm:$0xff] }
 0x104   : > { %608 = vmatmul.mubr.f32.vlgmr.msra.gmra.mrb[0].mxu1 %v10167_v33  ;;  %750 = vmatmul.mubr.f32.vlgmr.msra.gmra.mrb[4].mxu0 %v10167_v33  ;;  %v10204_v51 = vmax.f32 %v463_v34, 0.0  ;;  %v6234_v34 = vld [vmem:[%s15195_s5 + $0x648] sm:$0xff]  ;;  %v6248_v20 = vld [vmem:[%s15195_s5 + $0x6b8] sm:$0xff]  ;;  %v7876_v23 = vpack.c.bf16 %v6245_v17, %v6243_v16  ;;  %v6185_v24 = vld [vmem:[%s15195_s5 + $0x4e0] sm:$0xff] }
 0x105   : > { %v10196_v46 = vmax.f32 %v465_v41, 0.0  ;;  %7785 = vmatpush1.bf16.msra.mxu1 %v7784_v30  ;;  %7841 = vmatpush1.bf16.msra.mxu0 %v7840_v31  ;;  %v6170_v30 = vld [vmem:[%s15195_s5 + $0x468] sm:$0xff]  ;;  %v6172_v31 = vld [vmem:[%s15195_s5 + $0x478] sm:$0xff]  ;;  %v7862_v40 = vpack.c.bf16 %v6234_v34, %v6232_v32  ;;  %v6231_v41 = vld [vmem:[%s15195_s5 + $0x630] sm:$0xff] }
 0x106   : > { %7787 = vmatprep.subr.bf16.mxu1 %v7786_v36  ;;  %7843 = vmatprep.subr.bf16.mxu0 %v7842_v37  ;;  %v7860_v36 = vpack.c.bf16 %v6229_v29, %v6227_v27  ;;  %v6169_v37 = vld [vmem:[%s15195_s5 + $0x460] sm:$0xff]  ;;  %v7806_v39 = vpack.c.bf16 %v6172_v31, %v6170_v30  ;;  %v7864_v49 = vpack.c.bf16 %v6233_v42, %v6231_v41  ;;  %v6247_v29 = vld [vmem:[%s15195_s5 + $0x6b0] sm:$0xff]  ;;  %v6190_v31 = vld [vmem:[%s15195_s5 + $0x508] sm:$0xff] }
 0x107   : > { %6082 = vmatprep.mubr.msk.f32.mxu1 %vm529_vm2, %v10196_v46  ;;  %6144 = vmatprep.mubr.msk.f32.mxu0 %vm529_vm2, %v10196_v46  ;;  %v6249_v30 = vld [vmem:[%s15195_s5 + $0x6c0] sm:$0xff]  ;;  %v6192_v32 = vld [vmem:[%s15195_s5 + $0x518] sm:$0xff]  ;;  %v6251_v42 = vld [vmem:[%s15195_s5 + $0x6d0] sm:$0xff] }
 0x108   : > { %614 = vmatmul.mubr.f32.gmra.mrb[2].mxu1 %v10204_v51  ;;  %756 = vmatmul.mubr.f32.gmra.mrb[6].mxu0 %v10204_v51  ;;  %v6252_v34 = vld [vmem:[%s15195_s5 + $0x6d8] sm:$0xff]  ;;  %v6263_v16 = vld [vmem:[%s15195_s5 + $0x730] sm:$0x1]  ;;  %v6269_v17 = vld [vmem:[%s15195_s5 + $0x740] sm:$0xff] }
 0x109   : > { %7789 = vmatpush1.bf16.msra.mxu1 %v7788_v47  ;;  %7845 = vmatpush1.bf16.msra.mxu0 %v7844_v48  ;;  %v6238_v47 = vld [vmem:[%s15195_s5 + $0x668] sm:$0xff]  ;;  %v7808_v48 = vpack.c.bf16 %v6171_v38, %v6169_v37  ;;  %v7880_v37 = vpack.c.bf16 %v6249_v30, %v6247_v29  ;;  %v6189_v38 = vld [vmem:[%s15195_s5 + $0x500] sm:$0xff] }
 0x10a   : > { %6205 = vmatprep.mubr.msk.f32.mxu1 %vm529_vm2, %v10162_v28  ;;  %6267 = vmatprep.mubr.msk.f32.mxu0 %vm529_vm2, %v10162_v28  ;;  %v7866_v54 = vpack.c.bf16 %v6238_v47, %v6236_v45  ;;  %v6196_v45 = vld [vmem:[%s15195_s5 + $0x538] sm:$0xff]  ;;  %v6273_v30 = vld [vmem:[%s15195_s5 + $0x760] sm:$0xff] }
 0x10b   : > { %7791 = vmatprep.subr.bf16.mxu1 %v7790_v55  ;;  %7847 = vmatprep.subr.bf16.mxu0 %v7846_v56  ;;  %v6235_v55 = vld [vmem:[%s15195_s5 + $0x650] sm:$0xff]  ;;  %v6237_v56 = vld [vmem:[%s15195_s5 + $0x660] sm:$0xff]  ;;  %v6256_v47 = vld [vmem:[%s15195_s5 + $0x6f8] sm:$0xff] }
 0x10c   : > { %v7868_v62 = vpack.c.bf16 %v6237_v56, %v6235_v55  ;;  %v6255_v56 = vld [vmem:[%s15195_s5 + $0x6f0] sm:$0xff] }
 0x10d   : > { %7793 = vmatpush1.bf16.msra.mxu1 %v7792_v60  ;;  %7849 = vmatpush1.bf16.msra.mxu0 %v7848_v61  ;;  %v6242_v60 = vld [vmem:[%s15195_s5 + $0x688] sm:$0xff]  ;;  %v7812_v61 = vpack.c.bf16 %v6175_v52, %v6173_v50  ;;  %v7884_v50 = vpack.c.bf16 %v6253_v43, %v6251_v42  ;;  %v6193_v52 = vld [vmem:[%s15195_s5 + $0x520] sm:$0xff] }
 0x10e   : > { %7795 = vmatprep.subr.bf16.mxu1 %v7794_v1  ;;  %7851 = vmatprep.subr.bf16.mxu0 %v7850_v2  ;;  %v6179_v1 = vld [vmem:[%s15195_s5 + $0x4b0] sm:$0xff]  ;;  %v7814_v2 = vpack.c.bf16 %v6180_v58, %v6178_v57  ;;  %v7870_v3 = vpack.c.bf16 %v6242_v60, %v6240_v59  ;;  %v6257_v57 = vld [vmem:[%s15195_s5 + $0x700] sm:$0xff]  ;;  %v6198_v58 = vld [vmem:[%s15195_s5 + $0x548] sm:$0xff] }
 0x10f   : > { %v6200_v59 = vld [vmem:[%s15195_s5 + $0x558] sm:$0xff]  ;;  %v6277_v43 = vld [vmem:[%s15195_s5 + $0x780] sm:$0xff] }
 0x110   : > { %v6260_v60 = vld [vmem:[%s15195_s5 + $0x718] sm:$0xff] }
 0x111   : > { %7797 = vmatpush1.bf16.msra.mxu1 %v7796_v9  ;;  %7853 = vmatpush1.bf16.msra.mxu0 %v7852_v10  ;;  %v6246_v9 = vld [vmem:[%s15195_s5 + $0x6a8] sm:$0xff]  ;;  %v7816_v10 = vpack.c.bf16 %v6179_v1, %v6177_v63  ;;  %v7888_v63 = vpack.c.bf16 %v6257_v57, %v6255_v56  ;;  %v6197_v1 = vld [vmem:[%s15195_s5 + $0x540] sm:$0xff] }
 0x112   : > { %7799 = vmatprep.subr.bf16.mxu1 %v7798_v13  ;;  %7855 = vmatprep.subr.bf16.mxu0 %v7854_v14  ;;  %v6183_v13 = vld [vmem:[%s15195_s5 + $0x4d0] sm:$0xff]  ;;  %v7818_v14 = vpack.c.bf16 %v6184_v7, %v6182_v6  ;;  %v7874_v15 = vpack.c.bf16 %v6246_v9, %v6244_v8  ;;  %v6261_v6 = vld [vmem:[%s15195_s5 + $0x720] sm:$0xff]  ;;  %v7836_v7 = vpack.c.bf16 %v6199_v4, %v6197_v1  ;;  %v6202_v9 = vld [vmem:[%s15195_s5 + $0x568] sm:$0x1] }
 0x113   : > { %v7892_v8 = vpack.c.bf16 %v6261_v6, %v6259_v5  ;;  %v6281_v57 = vld [vmem:[%s15195_s5 + $0x7a0] sm:$0xff]  ;;  %v6288_v1 = vld [vmem:[%s15195_s5 + $0x7d8] sm:$0xff] }
 0x114   : > { %v6285_v6 = vld [vmem:[%s15195_s5 + $0x7c0] sm:$0xff] }
 0x115   : > { %7801 = vmatpush1.bf16.msra.mxu1 %v7800_v21  ;;  %7857 = vmatpush1.bf16.msra.mxu0 %v7856_v22  ;;  %v6250_v21 = vld [vmem:[%s15195_s5 + $0x6c8] sm:$0xff]  ;;  %v7820_v22 = vpack.c.bf16 %v6183_v13, %v6181_v12  ;;  %v6272_v12 = vld [vmem:[%s15195_s5 + $0x758] sm:$0xff] }
 0x116   : > { %7803 = vmatprep.subr.bf16.mxu1 %v7802_v25  ;;  %7859 = vmatprep.subr.bf16.mxu0 %v7858_v26  ;;  %v6187_v25 = vld [vmem:[%s15195_s5 + $0x4f0] sm:$0xff]  ;;  %v7822_v26 = vpack.c.bf16 %v6188_v19, %v6186_v18  ;;  %v7878_v27 = vpack.c.bf16 %v6250_v21, %v6248_v20  ;;  %v6332_v13 = vld [vmem:[%s15195_s5 + $0x918] sm:$0xff]  ;;  %v6333_v20 = vld [vmem:[%s15195_s5 + $0x920] sm:$0xff] }
 0x117   : > { %v6271_v18 = vld [vmem:[%s15195_s5 + $0x750] sm:$0xff] }
 0x118   : > { %v6331_v19 = vld [vmem:[%s15195_s5 + $0x910] sm:$0xff] }
 0x119   : > { %7805 = vmatpush1.bf16.msra.mxu1 %v7804_v35  ;;  %7861 = vmatpush1.bf16.msra.mxu0 %v7860_v36  ;;  %v6254_v35 = vld [vmem:[%s15195_s5 + $0x6e8] sm:$0xff]  ;;  %v7824_v36 = vpack.c.bf16 %v6187_v25, %v6185_v24  ;;  %v6276_v24 = vld [vmem:[%s15195_s5 + $0x778] sm:$0xff]  ;;  %v7952_v29 = vpack.c.bf16 %v6333_v20, %v6331_v19  ;;  %v6291_v19 = vld [vmem:[%s15195_s5 + $0x7f0] sm:$0xff] }
 0x11a   : > { %7807 = vmatprep.subr.bf16.mxu1 %v7806_v39  ;;  %7863 = vmatprep.subr.bf16.mxu0 %v7862_v40  ;;  %v6191_v39 = vld [vmem:[%s15195_s5 + $0x510] sm:$0xff]  ;;  %v7826_v40 = vpack.c.bf16 %v6192_v32, %v6190_v31  ;;  %v7882_v41 = vpack.c.bf16 %v6254_v35, %v6252_v34  ;;  %v6336_v25 = vld [vmem:[%s15195_s5 + $0x938] sm:$0xff]  ;;  %v6337_v34 = vld [vmem:[%s15195_s5 + $0x940] sm:$0xff] }
 0x11b   : > { %v6275_v31 = vld [vmem:[%s15195_s5 + $0x770] sm:$0xff]  ;;  %v6278_v35 = vld [vmem:[%s15195_s5 + $0x788] sm:$0xff] }
 0x11c   : > { %v6335_v32 = vld [vmem:[%s15195_s5 + $0x930] sm:$0xff] }
 0x11d   : > { %7809 = vmatpush1.bf16.msra.mxu1 %v7808_v48  ;;  %7865 = vmatpush1.bf16.msra.mxu0 %v7864_v49  ;;  %v6258_v48 = vld [vmem:[%s15195_s5 + $0x708] sm:$0xff]  ;;  %v7828_v49 = vpack.c.bf16 %v6191_v39, %v6189_v38  ;;  %v6280_v38 = vld [vmem:[%s15195_s5 + $0x798] sm:$0xff]  ;;  %v7956_v42 = vpack.c.bf16 %v6337_v34, %v6335_v32  ;;  %v6295_v32 = vld [vmem:[%s15195_s5 + $0x810] sm:$0xff] }
 0x11e   : > { %7811 = vmatprep.subr.bf16.mxu1 %v7810_v53  ;;  %7867 = vmatprep.subr.bf16.mxu0 %v7866_v54  ;;  %v6195_v53 = vld [vmem:[%s15195_s5 + $0x530] sm:$0xff]  ;;  %v7830_v54 = vpack.c.bf16 %v6196_v45, %v6194_v44  ;;  %v7886_v55 = vpack.c.bf16 %v6258_v48, %v6256_v47  ;;  %v6340_v39 = vld [vmem:[%s15195_s5 + $0x958] sm:$0xff]  ;;  %v7902_v45 = vpack.c.bf16 %v6280_v38, %v6278_v35  ;;  %v6298_v38 = vld [vmem:[%s15195_s5 + $0x828] sm:$0xff] }
 0x11f   : > { %v6279_v44 = vld [vmem:[%s15195_s5 + $0x790] sm:$0xff] }
 0x120   : > { %v6339_v48 = vld [vmem:[%s15195_s5 + $0x950] sm:$0xff] }
 0x121   : > { %7813 = vmatpush1.bf16.msra.mxu1 %v7812_v61  ;;  %7869 = vmatpush1.bf16.msra.mxu0 %v7868_v62  ;;  %v6262_v61 = vld [vmem:[%s15195_s5 + $0x728] sm:$0xff]  ;;  %v7832_v62 = vpack.c.bf16 %v6195_v53, %v6193_v52  ;;  %v6284_v52 = vld [vmem:[%s15195_s5 + $0x7b8] sm:$0xff] }
 0x122   : > { %7815 = vmatprep.subr.bf16.mxu1 %v7814_v2  ;;  %7871 = vmatprep.subr.bf16.mxu0 %v7870_v3  ;;  %v7834_v2 = vpack.c.bf16 %v6200_v59, %v6198_v58  ;;  %v7890_v3 = vpack.c.bf16 %v6262_v61, %v6260_v60  ;;  %v6344_v53 = vld [vmem:[%s15195_s5 + $0x978] sm:$0xff]  ;;  %v6283_v58 = vld [vmem:[%s15195_s5 + $0x7b0] sm:$0xff] }
 0x123   : > { %v6343_v61 = vld [vmem:[%s15195_s5 + $0x970] sm:$0xff]  ;;  %v7908_v4 = vpack.c.bf16 %v6283_v58, %v6281_v57  ;;  %v6301_v58 = vld [vmem:[%s15195_s5 + $0x840] sm:$0xff] }
 0x125   : > { %7817 = vmatpush1.bf16.msra.mxu1 %v7816_v10  ;;  %7873 = vmatpush1.bf16.msra.mxu0 %v7872_v11  ;;  %v6264_v10 = vld [vmem:[%s15195_s5 + $0x738] sm:$0x1]  ;;  %v6270_v11 = vld [vmem:[%s15195_s5 + $0x748] sm:$0xff] }
 0x126   : > { %7819 = vmatprep.subr.bf16.mxu1 %v7818_v14  ;;  %7875 = vmatprep.subr.bf16.mxu0 %v7874_v15  ;;  %v6334_v14 = vld [vmem:[%s15195_s5 + $0x928] sm:$0xff]  ;;  %v6201_v15 = vld [vmem:[%s15195_s5 + $0x560] sm:$0x1]  ;;  %v7894_v21 = vpack.c.bf16 %v6272_v12, %v6270_v11 }
 0x127   : > { %v6349_v11 = vld [vmem:[%s15195_s5 + $0x9a0] sm:$0xff]  ;;  %v6290_v12 = vld [vmem:[%s15195_s5 + $0x7e8] sm:$0xff] }
 0x129   : > { %7821 = vmatpush1.bf16.msra.mxu1 %v7820_v22  ;;  %7877 = vmatpush1.bf16.msra.mxu0 %v7876_v23  ;;  %v7950_v22 = vpack.c.bf16 %v6334_v14, %v6332_v13  ;;  %v6274_v23 = vld [vmem:[%s15195_s5 + $0x768] sm:$0xff]  ;;  %v6292_v13 = vld [vmem:[%s15195_s5 + $0x7f8] sm:$0xff] }
 0x12a   : > { %7823 = vmatprep.subr.bf16.mxu1 %v7822_v26  ;;  %7879 = vmatprep.subr.bf16.mxu0 %v7878_v27  ;;  %v6338_v26 = vld [vmem:[%s15195_s5 + $0x948] sm:$0xff]  ;;  %v7896_v27 = vpack.c.bf16 %v6271_v18, %v6269_v17  ;;  %v6352_v14 = vld [vmem:[%s15195_s5 + $0x9b8] sm:$0xff]  ;;  %v6289_v18 = vld [vmem:[%s15195_s5 + $0x7e0] sm:$0xff]  ;;  %v7914_v20 = vpack.c.bf16 %v6292_v13, %v6290_v12 }
 0x12b   : > { %v6369_v12 = vld [vmem:[%s15195_s5 + $0xa40] sm:$0xff]  ;;  %v6310_v13 = vld [vmem:[%s15195_s5 + $0x888] sm:$0xff] }
 0x12d   : > { %7825 = vmatpush1.bf16.msra.mxu1 %v7824_v36  ;;  %7881 = vmatpush1.bf16.msra.mxu0 %v7880_v37  ;;  %v7898_v36 = vpack.c.bf16 %v6276_v24, %v6274_v23  ;;  %v7954_v37 = vpack.c.bf16 %v6338_v26, %v6336_v25  ;;  %v6353_v23 = vld [vmem:[%s15195_s5 + $0x9c0] sm:$0xff]  ;;  %v6294_v24 = vld [vmem:[%s15195_s5 + $0x808] sm:$0xff]  ;;  %v6296_v25 = vld [vmem:[%s15195_s5 + $0x818] sm:$0xff] }
 0x12e   : > { %7827 = vmatprep.subr.bf16.mxu1 %v7826_v40  ;;  %7883 = vmatprep.subr.bf16.mxu0 %v7882_v41  ;;  %v6342_v40 = vld [vmem:[%s15195_s5 + $0x968] sm:$0xff]  ;;  %v7900_v41 = vpack.c.bf16 %v6275_v31, %v6273_v30  ;;  %v6356_v26 = vld [vmem:[%s15195_s5 + $0x9d8] sm:$0xff]  ;;  %v6293_v31 = vld [vmem:[%s15195_s5 + $0x800] sm:$0xff]  ;;  %v7918_v34 = vpack.c.bf16 %v6296_v25, %v6294_v24 }
 0x12f   : > { %v7958_v47 = vpack.c.bf16 %v6342_v40, %v6340_v39  ;;  %v6300_v39 = vld [vmem:[%s15195_s5 + $0x838] sm:$0xff]  ;;  %v6373_v24 = vld [vmem:[%s15195_s5 + $0xa60] sm:$0xff]  ;;  %v6314_v25 = vld [vmem:[%s15195_s5 + $0x8a8] sm:$0xff] }
 0x130   : > { %v6360_v40 = vld [vmem:[%s15195_s5 + $0x9f8] sm:$0xff] }
 0x131   : > { %7829 = vmatpush1.bf16.msra.mxu1 %v7828_v49  ;;  %7885 = vmatpush1.bf16.msra.mxu0 %v7884_v50  ;;  %v6341_v49 = vld [vmem:[%s15195_s5 + $0x960] sm:$0xff]  ;;  %v6282_v50 = vld [vmem:[%s15195_s5 + $0x7a8] sm:$0xff] }
 0x132   : > { %7831 = vmatprep.subr.bf16.mxu1 %v7830_v54  ;;  %7887 = vmatprep.subr.bf16.mxu0 %v7886_v55  ;;  %v6346_v54 = vld [vmem:[%s15195_s5 + $0x988] sm:$0xff]  ;;  %v7904_v55 = vpack.c.bf16 %v6279_v44, %v6277_v43  ;;  %v7960_v56 = vpack.c.bf16 %v6341_v49, %v6339_v48  ;;  %v7906_v59 = vpack.c.bf16 %v6284_v52, %v6282_v50  ;;  %v6297_v44 = vld [vmem:[%s15195_s5 + $0x820] sm:$0xff]  ;;  %v6359_v49 = vld [vmem:[%s15195_s5 + $0x9f0] sm:$0xff] }
 0x133   : > { %v7962_v60 = vpack.c.bf16 %v6346_v54, %v6344_v53  ;;  %v6361_v50 = vld [vmem:[%s15195_s5 + $0xa00] sm:$0xff]  ;;  %v6302_v52 = vld [vmem:[%s15195_s5 + $0x848] sm:$0xff]  ;;  %v6304_v53 = vld [vmem:[%s15195_s5 + $0x858] sm:$0xff] }
 0x134   : > { %v6364_v54 = vld [vmem:[%s15195_s5 + $0xa18] sm:$0xff]  ;;  %v7980_v57 = vpack.c.bf16 %v6361_v50, %v6359_v49  ;;  %v6379_v50 = vld [vmem:[%s15195_s5 + $0xa90] sm:$0xff] }
 0x135   : > { %7833 = vmatpush1.bf16.msra.mxu1 %v7832_v62  ;;  %7889 = vmatpush1.bf16.msra.mxu0 %v7888_v63  ;;  %v6345_v62 = vld [vmem:[%s15195_s5 + $0x980] sm:$0xff]  ;;  %v6286_v63 = vld [vmem:[%s15195_s5 + $0x7c8] sm:$0xff] }
 0x136   : > { %7835 = vmatprep.subr.bf16.mxu1 %v7834_v2  ;;  %7891 = vmatprep.subr.bf16.mxu0 %v7890_v3  ;;  %v6348_v2 = vld [vmem:[%s15195_s5 + $0x998] sm:$0xff]  ;;  %v6350_v3 = vld [vmem:[%s15195_s5 + $0x9a8] sm:$0xff]  ;;  %v7964_v5 = vpack.c.bf16 %v6345_v62, %v6343_v61  ;;  %v6363_v62 = vld [vmem:[%s15195_s5 + $0xa10] sm:$0xff] }
 0x139   : > { %7837 = vmatpush1.bf16.msra.mxu1 %v7836_v7  ;;  %7893 = vmatpush1.bf16.msra.mxu0 %v7892_v8  ;;  %v6287_v7 = vld [vmem:[%s15195_s5 + $0x7d0] sm:$0xff]  ;;  %v7910_v8 = vpack.c.bf16 %v6288_v1, %v6286_v63  ;;  %v6365_v63 = vld [vmem:[%s15195_s5 + $0xa20] sm:$0xff]  ;;  %v6306_v1 = vld [vmem:[%s15195_s5 + $0x868] sm:$0xff] }
 0x13a   : > { %6203 = vmatprep.subr.msk.mxu1 %vm536_vm1, %v6202_v9  ;;  %6265 = vmatprep.subr.msk.mxu0 %vm536_vm1, %v6264_v10  ;;  %v7966_v9 = vpack.c.bf16 %v6350_v3, %v6348_v2  ;;  %v6347_v10 = vld [vmem:[%s15195_s5 + $0x990] sm:$0xff]  ;;  %v6308_v2 = vld [vmem:[%s15195_s5 + $0x878] sm:$0xff] }
 0x13b   : > { %v7968_v17 = vpack.c.bf16 %v6349_v11, %v6347_v10  ;;  %v6368_v3 = vld [vmem:[%s15195_s5 + $0xa38] sm:$0xff]  ;;  %v6367_v11 = vld [vmem:[%s15195_s5 + $0xa30] sm:$0xff] }
 0x13d   : > { %6204 = vmatpush1.msk.msra.mxu1 %vm536_vm1, %v6201_v15  ;;  %6266 = vmatpush1.msk.msra.mxu0 %vm536_vm1, %v6263_v16  ;;  %v6354_v15 = vld [vmem:[%s15195_s5 + $0x9c8] sm:$0xff]  ;;  %v7912_v16 = vpack.c.bf16 %v6287_v7, %v6285_v6  ;;  %v7984_v6 = vpack.c.bf16 %v6365_v63, %v6363_v62  ;;  %v6305_v7 = vld [vmem:[%s15195_s5 + $0x860] sm:$0xff]  ;;  %v6323_v62 = vld [vmem:[%s15195_s5 + $0x8f0] sm:$0xff] }
 0x13e   : > { %892 = vmatmul.mubr.f32.vlgmr.msra.gmra.mrb[4].mxu1 %v10167_v33  ;;  %1034 = vmatmul.mubr.f32.vlgmr.msra.gmra.mrb[8].mxu0 %v10167_v33  ;;  %v6383_v63 = vld [vmem:[%s15195_s5 + $0xab0] sm:$0xff] }
 0x13f   : > { %7895 = vmatprep.subr.bf16.mxu1 %v7894_v21  ;;  %7951 = vmatprep.subr.bf16.mxu0 %v7950_v22  ;;  %v7970_v21 = vpack.c.bf16 %v6354_v15, %v6352_v14  ;;  %v6351_v22 = vld [vmem:[%s15195_s5 + $0x9b0] sm:$0xff]  ;;  %v6312_v14 = vld [vmem:[%s15195_s5 + $0x898] sm:$0xff] }
 0x140   : > { %6206 = vmatprep.mubr.msk.f32.mxu1 %vm529_vm2, %v10196_v46  ;;  %6268 = vmatprep.mubr.msk.f32.mxu0 %vm529_vm2, %v10196_v46  ;;  %v7972_v30 = vpack.c.bf16 %v6353_v23, %v6351_v22  ;;  %v6372_v15 = vld [vmem:[%s15195_s5 + $0xa58] sm:$0xff]  ;;  %v6371_v23 = vld [vmem:[%s15195_s5 + $0xa50] sm:$0xff] }
 0x141   : > { %7897 = vmatpush1.bf16.msra.mxu1 %v7896_v27  ;;  %7953 = vmatpush1.bf16.msra.mxu0 %v7952_v29  ;;  %v6358_v27 = vld [vmem:[%s15195_s5 + $0x9e8] sm:$0xff]  ;;  %v7916_v29 = vpack.c.bf16 %v6291_v19, %v6289_v18  ;;  %v7988_v18 = vpack.c.bf16 %v6369_v12, %v6367_v11  ;;  %v6309_v19 = vld [vmem:[%s15195_s5 + $0x880] sm:$0xff]  ;;  %v6387_v11 = vld [vmem:[%s15195_s5 + $0xad0] sm:$0x1] }
 0x142   : > { %898 = vmatmul.mubr.f32.gmra.mrb[6].mxu1 %v10204_v51  ;;  %1040 = vmatmul.mubr.f32.gmra.mrb[10].mxu0 %v10204_v51  ;;  %v7974_v35 = vpack.c.bf16 %v6358_v27, %v6356_v26  ;;  %v6316_v26 = vld [vmem:[%s15195_s5 + $0x8b8] sm:$0xff]  ;;  %v6393_v12 = vld [vmem:[%s15195_s5 + $0xae0] sm:$0xff] }
 0x143   : > { %7899 = vmatprep.subr.bf16.mxu1 %v7898_v36  ;;  %7955 = vmatprep.subr.bf16.mxu0 %v7954_v37  ;;  %v6355_v36 = vld [vmem:[%s15195_s5 + $0x9d0] sm:$0xff]  ;;  %v6357_v37 = vld [vmem:[%s15195_s5 + $0x9e0] sm:$0xff]  ;;  %v6376_v27 = vld [vmem:[%s15195_s5 + $0xa78] sm:$0xff] }
 0x144   : > { %6329 = vmatprep.mubr.msk.f32.mxu1 %vm529_vm2, %v10162_v28  ;;  %6391 = vmatprep.mubr.msk.f32.mxu0 %vm529_vm2, %v10162_v28  ;;  %v7976_v43 = vpack.c.bf16 %v6357_v37, %v6355_v36  ;;  %v6375_v37 = vld [vmem:[%s15195_s5 + $0xa70] sm:$0xff] }
 0x145   : > { %7901 = vmatpush1.bf16.msra.mxu1 %v7900_v41  ;;  %7957 = vmatpush1.bf16.msra.mxu0 %v7956_v42  ;;  %v6362_v41 = vld [vmem:[%s15195_s5 + $0xa08] sm:$0xff]  ;;  %v7920_v42 = vpack.c.bf16 %v6295_v32, %v6293_v31  ;;  %v7992_v31 = vpack.c.bf16 %v6373_v24, %v6371_v23  ;;  %v6313_v32 = vld [vmem:[%s15195_s5 + $0x8a0] sm:$0xff] }
 0x146   : > { %7903 = vmatprep.subr.bf16.mxu1 %v7902_v45  ;;  %7959 = vmatprep.subr.bf16.mxu0 %v7958_v47  ;;  %v6299_v45 = vld [vmem:[%s15195_s5 + $0x830] sm:$0xff]  ;;  %v7922_v47 = vpack.c.bf16 %v6300_v39, %v6298_v38  ;;  %v7978_v48 = vpack.c.bf16 %v6362_v41, %v6360_v40  ;;  %v6377_v38 = vld [vmem:[%s15195_s5 + $0xa80] sm:$0xff]  ;;  %v6318_v39 = vld [vmem:[%s15195_s5 + $0x8c8] sm:$0xff] }
 0x147   : > { %v6320_v40 = vld [vmem:[%s15195_s5 + $0x8d8] sm:$0xff]  ;;  %v6397_v24 = vld [vmem:[%s15195_s5 + $0xb00] sm:$0xff] }
 0x148   : > { %v6380_v41 = vld [vmem:[%s15195_s5 + $0xa98] sm:$0xff] }
 0x149   : > { %7905 = vmatpush1.bf16.msra.mxu1 %v7904_v55  ;;  %7961 = vmatpush1.bf16.msra.mxu0 %v7960_v56  ;;  %v6366_v55 = vld [vmem:[%s15195_s5 + $0xa28] sm:$0xff]  ;;  %v7924_v56 = vpack.c.bf16 %v6299_v45, %v6297_v44  ;;  %v7996_v44 = vpack.c.bf16 %v6377_v38, %v6375_v37  ;;  %v6317_v45 = vld [vmem:[%s15195_s5 + $0x8c0] sm:$0xff] }
 0x14a   : > { %7907 = vmatprep.subr.bf16.mxu1 %v7906_v59  ;;  %7963 = vmatprep.subr.bf16.mxu0 %v7962_v60  ;;  %v6303_v59 = vld [vmem:[%s15195_s5 + $0x850] sm:$0xff]  ;;  %v7926_v60 = vpack.c.bf16 %v6304_v53, %v6302_v52  ;;  %v7982_v61 = vpack.c.bf16 %v6366_v55, %v6364_v54  ;;  %v6381_v52 = vld [vmem:[%s15195_s5 + $0xaa0] sm:$0xff]  ;;  %v6322_v53 = vld [vmem:[%s15195_s5 + $0x8e8] sm:$0xff] }
 0x14b   : > { %v6324_v54 = vld [vmem:[%s15195_s5 + $0x8f8] sm:$0xff]  ;;  %v6401_v38 = vld [vmem:[%s15195_s5 + $0xb20] sm:$0xff] }
 0x14c   : > { %v6384_v55 = vld [vmem:[%s15195_s5 + $0xab8] sm:$0xff] }
 0x14d   : > { %7909 = vmatpush1.bf16.msra.mxu1 %v7908_v4  ;;  %7965 = vmatpush1.bf16.msra.mxu0 %v7964_v5  ;;  %v6370_v4 = vld [vmem:[%s15195_s5 + $0xa48] sm:$0xff]  ;;  %v7928_v5 = vpack.c.bf16 %v6303_v59, %v6301_v58  ;;  %v8000_v58 = vpack.c.bf16 %v6381_v52, %v6379_v50  ;;  %v6321_v59 = vld [vmem:[%s15195_s5 + $0x8e0] sm:$0xff] }
 0x14e   : > { %7911 = vmatprep.subr.bf16.mxu1 %v7910_v8  ;;  %7967 = vmatprep.subr.bf16.mxu0 %v7966_v9  ;;  %v6307_v8 = vld [vmem:[%s15195_s5 + $0x870] sm:$0xff]  ;;  %v7930_v9 = vpack.c.bf16 %v6308_v2, %v6306_v1  ;;  %v7986_v10 = vpack.c.bf16 %v6370_v4, %v6368_v3  ;;  %v6385_v1 = vld [vmem:[%s15195_s5 + $0xac0] sm:$0xff]  ;;  %v7948_v2 = vpack.c.bf16 %v6323_v62, %v6321_v59  ;;  %v6326_v4 = vld [vmem:[%s15195_s5 + $0x908] sm:$0x1] }
 0x14f   : > { %v8004_v3 = vpack.c.bf16 %v6385_v1, %v6383_v63  ;;  %v6405_v52 = vld [vmem:[%s15195_s5 + $0xb40] sm:$0xff]  ;;  %v6412_v59 = vld [vmem:[%s15195_s5 + $0xb78] sm:$0xff] }
 0x150   : > { %v6409_v1 = vld [vmem:[%s15195_s5 + $0xb60] sm:$0xff] }
 0x151   : > { %7913 = vmatpush1.bf16.msra.mxu1 %v7912_v16  ;;  %7969 = vmatpush1.bf16.msra.mxu0 %v7968_v17  ;;  %v6374_v16 = vld [vmem:[%s15195_s5 + $0xa68] sm:$0xff]  ;;  %v7932_v17 = vpack.c.bf16 %v6307_v8, %v6305_v7  ;;  %v6396_v7 = vld [vmem:[%s15195_s5 + $0xaf8] sm:$0xff] }
 0x152   : > { %7915 = vmatprep.subr.bf16.mxu1 %v7914_v20  ;;  %7971 = vmatprep.subr.bf16.mxu0 %v7970_v21  ;;  %v6311_v20 = vld [vmem:[%s15195_s5 + $0x890] sm:$0xff]  ;;  %v7934_v21 = vpack.c.bf16 %v6312_v14, %v6310_v13  ;;  %v7990_v22 = vpack.c.bf16 %v6374_v16, %v6372_v15  ;;  %v6456_v8 = vld [vmem:[%s15195_s5 + $0xcb8] sm:$0xff]  ;;  %v6457_v15 = vld [vmem:[%s15195_s5 + $0xcc0] sm:$0xff] }
 0x153   : > { %v6395_v13 = vld [vmem:[%s15195_s5 + $0xaf0] sm:$0xff] }
 0x154   : > { %v6455_v14 = vld [vmem:[%s15195_s5 + $0xcb0] sm:$0xff] }
 0x155   : > { %7917 = vmatpush1.bf16.msra.mxu1 %v7916_v29  ;;  %7973 = vmatpush1.bf16.msra.mxu0 %v7972_v30  ;;  %v6378_v29 = vld [vmem:[%s15195_s5 + $0xa88] sm:$0xff]  ;;  %v7936_v30 = vpack.c.bf16 %v6311_v20, %v6309_v19  ;;  %v6400_v19 = vld [vmem:[%s15195_s5 + $0xb18] sm:$0xff]  ;;  %v8064_v23 = vpack.c.bf16 %v6457_v15, %v6455_v14  ;;  %v6415_v14 = vld [vmem:[%s15195_s5 + $0xb90] sm:$0xff] }
 0x156   : > { %7919 = vmatprep.subr.bf16.mxu1 %v7918_v34  ;;  %7975 = vmatprep.subr.bf16.mxu0 %v7974_v35  ;;  %v6315_v34 = vld [vmem:[%s15195_s5 + $0x8b0] sm:$0xff]  ;;  %v7938_v35 = vpack.c.bf16 %v6316_v26, %v6314_v25  ;;  %v7994_v36 = vpack.c.bf16 %v6378_v29, %v6376_v27  ;;  %v6460_v20 = vld [vmem:[%s15195_s5 + $0xcd8] sm:$0xff]  ;;  %v6461_v27 = vld [vmem:[%s15195_s5 + $0xce0] sm:$0xff] }
 0x157   : > { %v6399_v25 = vld [vmem:[%s15195_s5 + $0xb10] sm:$0xff]  ;;  %v6402_v29 = vld [vmem:[%s15195_s5 + $0xb28] sm:$0xff] }
 0x158   : > { %v6459_v26 = vld [vmem:[%s15195_s5 + $0xcd0] sm:$0xff] }
 0x159   : > { %7921 = vmatpush1.bf16.msra.mxu1 %v7920_v42  ;;  %7977 = vmatpush1.bf16.msra.mxu0 %v7976_v43  ;;  %v6382_v42 = vld [vmem:[%s15195_s5 + $0xaa8] sm:$0xff]  ;;  %v7940_v43 = vpack.c.bf16 %v6315_v34, %v6313_v32  ;;  %v6404_v32 = vld [vmem:[%s15195_s5 + $0xb38] sm:$0xff]  ;;  %v8068_v37 = vpack.c.bf16 %v6461_v27, %v6459_v26  ;;  %v6419_v26 = vld [vmem:[%s15195_s5 + $0xbb0] sm:$0xff] }
 0x15a   : > { %7923 = vmatprep.subr.bf16.mxu1 %v7922_v47  ;;  %7979 = vmatprep.subr.bf16.mxu0 %v7978_v48  ;;  %v6319_v47 = vld [vmem:[%s15195_s5 + $0x8d0] sm:$0xff]  ;;  %v7942_v48 = vpack.c.bf16 %v6320_v40, %v6318_v39  ;;  %v7998_v49 = vpack.c.bf16 %v6382_v42, %v6380_v41  ;;  %v6464_v34 = vld [vmem:[%s15195_s5 + $0xcf8] sm:$0xff]  ;;  %v8014_v40 = vpack.c.bf16 %v6404_v32, %v6402_v29  ;;  %v6422_v32 = vld [vmem:[%s15195_s5 + $0xbc8] sm:$0xff] }
 0x15b   : > { %v6403_v39 = vld [vmem:[%s15195_s5 + $0xb30] sm:$0xff] }
 0x15c   : > { %v6463_v42 = vld [vmem:[%s15195_s5 + $0xcf0] sm:$0xff] }
 0x15d   : > { %7925 = vmatpush1.bf16.msra.mxu1 %v7924_v56  ;;  %7981 = vmatpush1.bf16.msra.mxu0 %v7980_v57  ;;  %v6386_v56 = vld [vmem:[%s15195_s5 + $0xac8] sm:$0xff]  ;;  %v7944_v57 = vpack.c.bf16 %v6319_v47, %v6317_v45  ;;  %v6408_v45 = vld [vmem:[%s15195_s5 + $0xb58] sm:$0xff] }
 0x15e   : > { %7927 = vmatprep.subr.bf16.mxu1 %v7926_v60  ;;  %7983 = vmatprep.subr.bf16.mxu0 %v7982_v61  ;;  %v7946_v60 = vpack.c.bf16 %v6324_v54, %v6322_v53  ;;  %v8002_v61 = vpack.c.bf16 %v6386_v56, %v6384_v55  ;;  %v6468_v47 = vld [vmem:[%s15195_s5 + $0xd18] sm:$0xff]  ;;  %v6407_v53 = vld [vmem:[%s15195_s5 + $0xb50] sm:$0xff] }
 0x15f   : > { %v6467_v56 = vld [vmem:[%s15195_s5 + $0xd10] sm:$0xff]  ;;  %v8020_v62 = vpack.c.bf16 %v6407_v53, %v6405_v52  ;;  %v6425_v53 = vld [vmem:[%s15195_s5 + $0xbe0] sm:$0xff] }
 0x161   : > { %7929 = vmatpush1.bf16.msra.mxu1 %v7928_v5  ;;  %7985 = vmatpush1.bf16.msra.mxu0 %v7984_v6  ;;  %v6388_v5 = vld [vmem:[%s15195_s5 + $0xad8] sm:$0x1]  ;;  %v6394_v6 = vld [vmem:[%s15195_s5 + $0xae8] sm:$0xff] }
 0x162   : > { %7931 = vmatprep.subr.bf16.mxu1 %v7930_v9  ;;  %7987 = vmatprep.subr.bf16.mxu0 %v7986_v10  ;;  %v6458_v9 = vld [vmem:[%s15195_s5 + $0xcc8] sm:$0xff]  ;;  %v6325_v10 = vld [vmem:[%s15195_s5 + $0x900] sm:$0x1]  ;;  %v8006_v16 = vpack.c.bf16 %v6396_v7, %v6394_v6 }
 0x163   : > { %v6473_v6 = vld [vmem:[%s15195_s5 + $0xd40] sm:$0xff]  ;;  %v6414_v7 = vld [vmem:[%s15195_s5 + $0xb88] sm:$0xff] }
 0x165   : > { %7933 = vmatpush1.bf16.msra.mxu1 %v7932_v17  ;;  %7989 = vmatpush1.bf16.msra.mxu0 %v7988_v18  ;;  %v8062_v17 = vpack.c.bf16 %v6458_v9, %v6456_v8  ;;  %v6398_v18 = vld [vmem:[%s15195_s5 + $0xb08] sm:$0xff]  ;;  %v6416_v8 = vld [vmem:[%s15195_s5 + $0xb98] sm:$0xff] }
 0x166   : > { %7935 = vmatprep.subr.bf16.mxu1 %v7934_v21  ;;  %7991 = vmatprep.subr.bf16.mxu0 %v7990_v22  ;;  %v6462_v21 = vld [vmem:[%s15195_s5 + $0xce8] sm:$0xff]  ;;  %v8008_v22 = vpack.c.bf16 %v6395_v13, %v6393_v12  ;;  %v6476_v9 = vld [vmem:[%s15195_s5 + $0xd58] sm:$0xff]  ;;  %v6413_v13 = vld [vmem:[%s15195_s5 + $0xb80] sm:$0xff]  ;;  %v8026_v15 = vpack.c.bf16 %v6416_v8, %v6414_v7 }
 0x167   : > { %v6493_v7 = vld [vmem:[%s15195_s5 + $0xde0] sm:$0xff]  ;;  %v6434_v8 = vld [vmem:[%s15195_s5 + $0xc28] sm:$0xff] }
 0x169   : > { %7937 = vmatpush1.bf16.msra.mxu1 %v7936_v30  ;;  %7993 = vmatpush1.bf16.msra.mxu0 %v7992_v31  ;;  %v8010_v30 = vpack.c.bf16 %v6400_v19, %v6398_v18  ;;  %v8066_v31 = vpack.c.bf16 %v6462_v21, %v6460_v20  ;;  %v6477_v18 = vld [vmem:[%s15195_s5 + $0xd60] sm:$0xff]  ;;  %v6418_v19 = vld [vmem:[%s15195_s5 + $0xba8] sm:$0xff]  ;;  %v6420_v20 = vld [vmem:[%s15195_s5 + $0xbb8] sm:$0xff] }
 0x16a   : > { %7939 = vmatprep.subr.bf16.mxu1 %v7938_v35  ;;  %7995 = vmatprep.subr.bf16.mxu0 %v7994_v36  ;;  %v6466_v35 = vld [vmem:[%s15195_s5 + $0xd08] sm:$0xff]  ;;  %v8012_v36 = vpack.c.bf16 %v6399_v25, %v6397_v24  ;;  %v6480_v21 = vld [vmem:[%s15195_s5 + $0xd78] sm:$0xff]  ;;  %v6417_v25 = vld [vmem:[%s15195_s5 + $0xba0] sm:$0xff]  ;;  %v8030_v27 = vpack.c.bf16 %v6420_v20, %v6418_v19 }
 0x16b   : > { %v8070_v41 = vpack.c.bf16 %v6466_v35, %v6464_v34  ;;  %v6424_v34 = vld [vmem:[%s15195_s5 + $0xbd8] sm:$0xff]  ;;  %v6497_v19 = vld [vmem:[%s15195_s5 + $0xe00] sm:$0xff]  ;;  %v6438_v20 = vld [vmem:[%s15195_s5 + $0xc48] sm:$0xff] }
 0x16c   : > { %v6484_v35 = vld [vmem:[%s15195_s5 + $0xd98] sm:$0xff] }
 0x16d   : > { %7941 = vmatpush1.bf16.msra.mxu1 %v7940_v43  ;;  %7997 = vmatpush1.bf16.msra.mxu0 %v7996_v44  ;;  %v6465_v43 = vld [vmem:[%s15195_s5 + $0xd00] sm:$0xff]  ;;  %v6406_v44 = vld [vmem:[%s15195_s5 + $0xb48] sm:$0xff] }
 0x16e   : > { %7943 = vmatprep.subr.bf16.mxu1 %v7942_v48  ;;  %7999 = vmatprep.subr.bf16.mxu0 %v7998_v49  ;;  %v6470_v48 = vld [vmem:[%s15195_s5 + $0xd28] sm:$0xff]  ;;  %v8016_v49 = vpack.c.bf16 %v6403_v39, %v6401_v38  ;;  %v8072_v50 = vpack.c.bf16 %v6465_v43, %v6463_v42  ;;  %v8018_v54 = vpack.c.bf16 %v6408_v45, %v6406_v44  ;;  %v6421_v39 = vld [vmem:[%s15195_s5 + $0xbc0] sm:$0xff]  ;;  %v6483_v43 = vld [vmem:[%s15195_s5 + $0xd90] sm:$0xff] }
 0x16f   : > { %v8074_v55 = vpack.c.bf16 %v6470_v48, %v6468_v47  ;;  %v6485_v44 = vld [vmem:[%s15195_s5 + $0xda0] sm:$0xff]  ;;  %v6426_v45 = vld [vmem:[%s15195_s5 + $0xbe8] sm:$0xff]  ;;  %v6428_v47 = vld [vmem:[%s15195_s5 + $0xbf8] sm:$0xff] }
 0x170   : > { %v6488_v48 = vld [vmem:[%s15195_s5 + $0xdb8] sm:$0xff]  ;;  %v8092_v52 = vpack.c.bf16 %v6485_v44, %v6483_v43  ;;  %v6503_v44 = vld [vmem:[%s15195_s5 + $0xe30] sm:$0xff] }
 0x171   : > { %7945 = vmatpush1.bf16.msra.mxu1 %v7944_v57  ;;  %8001 = vmatpush1.bf16.msra.mxu0 %v8000_v58  ;;  %v6469_v57 = vld [vmem:[%s15195_s5 + $0xd20] sm:$0xff]  ;;  %v6410_v58 = vld [vmem:[%s15195_s5 + $0xb68] sm:$0xff] }
 0x172   : > { %7947 = vmatprep.subr.bf16.mxu1 %v7946_v60  ;;  %8003 = vmatprep.subr.bf16.mxu0 %v8002_v61  ;;  %v6472_v60 = vld [vmem:[%s15195_s5 + $0xd38] sm:$0xff]  ;;  %v6474_v61 = vld [vmem:[%s15195_s5 + $0xd48] sm:$0xff]  ;;  %v8076_v63 = vpack.c.bf16 %v6469_v57, %v6467_v56  ;;  %v6487_v57 = vld [vmem:[%s15195_s5 + $0xdb0] sm:$0xff] }
 0x175   : > { %7949 = vmatpush1.bf16.msra.mxu1 %v7948_v2  ;;  %8005 = vmatpush1.bf16.msra.mxu0 %v8004_v3  ;;  %v6411_v2 = vld [vmem:[%s15195_s5 + $0xb70] sm:$0xff]  ;;  %v8022_v3 = vpack.c.bf16 %v6412_v59, %v6410_v58  ;;  %v6489_v58 = vld [vmem:[%s15195_s5 + $0xdc0] sm:$0xff]  ;;  %v6430_v59 = vld [vmem:[%s15195_s5 + $0xc08] sm:$0xff] }
 0x176   : > { %6327 = vmatprep.subr.msk.mxu1 %vm536_vm1, %v6326_v4  ;;  %6389 = vmatprep.subr.msk.mxu0 %vm536_vm1, %v6388_v5  ;;  %v8078_v4 = vpack.c.bf16 %v6474_v61, %v6472_v60  ;;  %v6471_v5 = vld [vmem:[%s15195_s5 + $0xd30] sm:$0xff]  ;;  %v6432_v60 = vld [vmem:[%s15195_s5 + $0xc18] sm:$0xff] }
 0x177   : > { %v8080_v12 = vpack.c.bf16 %v6473_v6, %v6471_v5  ;;  %v6492_v61 = vld [vmem:[%s15195_s5 + $0xdd8] sm:$0xff]  ;;  %v6491_v6 = vld [vmem:[%s15195_s5 + $0xdd0] sm:$0xff] }
 0x179   : > { %6328 = vmatpush1.msk.msra.mxu1 %vm536_vm1, %v6325_v10  ;;  %6390 = vmatpush1.msk.msra.mxu0 %vm536_vm1, %v6387_v11  ;;  %v6478_v10 = vld [vmem:[%s15195_s5 + $0xd68] sm:$0xff]  ;;  %v8024_v11 = vpack.c.bf16 %v6411_v2, %v6409_v1  ;;  %v8096_v1 = vpack.c.bf16 %v6489_v58, %v6487_v57  ;;  %v6429_v2 = vld [vmem:[%s15195_s5 + $0xc00] sm:$0xff]  ;;  %v6447_v57 = vld [vmem:[%s15195_s5 + $0xc90] sm:$0xff] }
 0x17a   : > { %1176 = vmatmul.mubr.f32.vlgmr.msra.gmra.mrb[8].mxu1 %v10167_v33  ;;  %1318 = vmatmul.mubr.f32.vlgmr.msra.gmra.mrb[12].mxu0 %v10167_v33  ;;  %v6507_v58 = vld [vmem:[%s15195_s5 + $0xe50] sm:$0xff] }
 0x17b   : > { %8007 = vmatprep.subr.bf16.mxu1 %v8006_v16  ;;  %8063 = vmatprep.subr.bf16.mxu0 %v8062_v17  ;;  %v8082_v16 = vpack.c.bf16 %v6478_v10, %v6476_v9  ;;  %v6475_v17 = vld [vmem:[%s15195_s5 + $0xd50] sm:$0xff]  ;;  %v6436_v9 = vld [vmem:[%s15195_s5 + $0xc38] sm:$0xff] }
 0x17c   : > { %6330 = vmatprep.mubr.msk.f32.mxu1 %vm529_vm2, %v10196_v46  ;;  %6392 = vmatprep.mubr.msk.f32.mxu0 %vm529_vm2, %v10196_v46  ;;  %v8084_v24 = vpack.c.bf16 %v6477_v18, %v6475_v17  ;;  %v6496_v10 = vld [vmem:[%s15195_s5 + $0xdf8] sm:$0xff]  ;;  %v6495_v18 = vld [vmem:[%s15195_s5 + $0xdf0] sm:$0xff] }
 0x17d   : > { %8009 = vmatpush1.bf16.msra.mxu1 %v8008_v22  ;;  %8065 = vmatpush1.bf16.msra.mxu0 %v8064_v23  ;;  %v6482_v22 = vld [vmem:[%s15195_s5 + $0xd88] sm:$0xff]  ;;  %v8028_v23 = vpack.c.bf16 %v6415_v14, %v6413_v13  ;;  %v8100_v13 = vpack.c.bf16 %v6493_v7, %v6491_v6  ;;  %v6433_v14 = vld [vmem:[%s15195_s5 + $0xc20] sm:$0xff]  ;;  %v6511_v6 = vld [vmem:[%s15195_s5 + $0xe70] sm:$0x1] }
 0x17e   : > { %1182 = vmatmul.mubr.f32.gmra.mrb[10].mxu1 %v10204_v51  ;;  %1324 = vmatmul.mubr.f32.gmra.mrb[14].mxu0 %v10204_v51  ;;  %v8086_v29 = vpack.c.bf16 %v6482_v22, %v6480_v21  ;;  %v6440_v21 = vld [vmem:[%s15195_s5 + $0xc58] sm:$0xff]  ;;  %v6517_v7 = vld [vmem:[%s15195_s5 + $0xe80] sm:$0xff] }
 0x17f   : > { %8011 = vmatprep.subr.bf16.mxu1 %v8010_v30  ;;  %8067 = vmatprep.subr.bf16.mxu0 %v8066_v31  ;;  %v6479_v30 = vld [vmem:[%s15195_s5 + $0xd70] sm:$0xff]  ;;  %v6481_v31 = vld [vmem:[%s15195_s5 + $0xd80] sm:$0xff]  ;;  %v6500_v22 = vld [vmem:[%s15195_s5 + $0xe18] sm:$0xff] }
 0x180   : > { %6453 = vmatprep.mubr.msk.f32.mxu1 %vm529_vm2, %v10162_v28  ;;  %6515 = vmatprep.mubr.msk.f32.mxu0 %vm529_vm2, %v10162_v28  ;;  %v8088_v38 = vpack.c.bf16 %v6481_v31, %v6479_v30  ;;  %v6499_v31 = vld [vmem:[%s15195_s5 + $0xe10] sm:$0xff] }
 0x181   : > { %8013 = vmatpush1.bf16.msra.mxu1 %v8012_v36  ;;  %8069 = vmatpush1.bf16.msra.mxu0 %v8068_v37  ;;  %v6486_v36 = vld [vmem:[%s15195_s5 + $0xda8] sm:$0xff]  ;;  %v8032_v37 = vpack.c.bf16 %v6419_v26, %v6417_v25  ;;  %v8104_v25 = vpack.c.bf16 %v6497_v19, %v6495_v18  ;;  %v6437_v26 = vld [vmem:[%s15195_s5 + $0xc40] sm:$0xff] }
 0x182   : > { %8015 = vmatprep.subr.bf16.mxu1 %v8014_v40  ;;  %8071 = vmatprep.subr.bf16.mxu0 %v8070_v41  ;;  %v6423_v40 = vld [vmem:[%s15195_s5 + $0xbd0] sm:$0xff]  ;;  %v8034_v41 = vpack.c.bf16 %v6424_v34, %v6422_v32  ;;  %v8090_v42 = vpack.c.bf16 %v6486_v36, %v6484_v35  ;;  %v6501_v32 = vld [vmem:[%s15195_s5 + $0xe20] sm:$0xff]  ;;  %v6442_v34 = vld [vmem:[%s15195_s5 + $0xc68] sm:$0xff] }
 0x183   : > { %v6444_v35 = vld [vmem:[%s15195_s5 + $0xc78] sm:$0xff]  ;;  %v6521_v19 = vld [vmem:[%s15195_s5 + $0xea0] sm:$0xff] }
 0x184   : > { %v6504_v36 = vld [vmem:[%s15195_s5 + $0xe38] sm:$0xff] }
 0x185   : > { %8017 = vmatpush1.bf16.msra.mxu1 %v8016_v49  ;;  %8073 = vmatpush1.bf16.msra.mxu0 %v8072_v50  ;;  %v6490_v49 = vld [vmem:[%s15195_s5 + $0xdc8] sm:$0xff]  ;;  %v8036_v50 = vpack.c.bf16 %v6423_v40, %v6421_v39  ;;  %v8108_v39 = vpack.c.bf16 %v6501_v32, %v6499_v31  ;;  %v6441_v40 = vld [vmem:[%s15195_s5 + $0xc60] sm:$0xff] }
 0x186   : > { %8019 = vmatprep.subr.bf16.mxu1 %v8018_v54  ;;  %8075 = vmatprep.subr.bf16.mxu0 %v8074_v55  ;;  %v6427_v54 = vld [vmem:[%s15195_s5 + $0xbf0] sm:$0xff]  ;;  %v8038_v55 = vpack.c.bf16 %v6428_v47, %v6426_v45  ;;  %v8094_v56 = vpack.c.bf16 %v6490_v49, %v6488_v48  ;;  %v6505_v45 = vld [vmem:[%s15195_s5 + $0xe40] sm:$0xff]  ;;  %v6446_v47 = vld [vmem:[%s15195_s5 + $0xc88] sm:$0xff] }
 0x187   : > { %v6448_v48 = vld [vmem:[%s15195_s5 + $0xc98] sm:$0xff]  ;;  %v6525_v32 = vld [vmem:[%s15195_s5 + $0xec0] sm:$0xff] }
 0x188   : > { %v6508_v49 = vld [vmem:[%s15195_s5 + $0xe58] sm:$0xff] }
 0x189   : > { %8021 = vmatpush1.bf16.msra.mxu1 %v8020_v62  ;;  %8077 = vmatpush1.bf16.msra.mxu0 %v8076_v63  ;;  %v6494_v62 = vld [vmem:[%s15195_s5 + $0xde8] sm:$0xff]  ;;  %v8040_v63 = vpack.c.bf16 %v6427_v54, %v6425_v53  ;;  %v8112_v53 = vpack.c.bf16 %v6505_v45, %v6503_v44  ;;  %v6445_v54 = vld [vmem:[%s15195_s5 + $0xc80] sm:$0xff] }
 0x18a   : > { %8023 = vmatprep.subr.bf16.mxu1 %v8022_v3  ;;  %8079 = vmatprep.subr.bf16.mxu0 %v8078_v4  ;;  %v6431_v3 = vld [vmem:[%s15195_s5 + $0xc10] sm:$0xff]  ;;  %v8042_v4 = vpack.c.bf16 %v6432_v60, %v6430_v59  ;;  %v8098_v5 = vpack.c.bf16 %v6494_v62, %v6492_v61  ;;  %v6509_v59 = vld [vmem:[%s15195_s5 + $0xe60] sm:$0xff]  ;;  %v8060_v60 = vpack.c.bf16 %v6447_v57, %v6445_v54  ;;  %v6450_v62 = vld [vmem:[%s15195_s5 + $0xca8] sm:$0x1] }
 0x18b   : > { %v8116_v61 = vpack.c.bf16 %v6509_v59, %v6507_v58  ;;  %v6529_v45 = vld [vmem:[%s15195_s5 + $0xee0] sm:$0xff]  ;;  %v6536_v54 = vld [vmem:[%s15195_s5 + $0xf18] sm:$0xff] }
 0x18c   : > { %v6533_v59 = vld [vmem:[%s15195_s5 + $0xf00] sm:$0xff] }
 0x18d   : > { %8025 = vmatpush1.bf16.msra.mxu1 %v8024_v11  ;;  %8081 = vmatpush1.bf16.msra.mxu0 %v8080_v12  ;;  %v6498_v11 = vld [vmem:[%s15195_s5 + $0xe08] sm:$0xff]  ;;  %v8044_v12 = vpack.c.bf16 %v6431_v3, %v6429_v2  ;;  %v6520_v2 = vld [vmem:[%s15195_s5 + $0xe98] sm:$0xff] }
 0x18e   : > { %8027 = vmatprep.subr.bf16.mxu1 %v8026_v15  ;;  %8083 = vmatprep.subr.bf16.mxu0 %v8082_v16  ;;  %v6435_v15 = vld [vmem:[%s15195_s5 + $0xc30] sm:$0xff]  ;;  %v8046_v16 = vpack.c.bf16 %v6436_v9, %v6434_v8  ;;  %v8102_v17 = vpack.c.bf16 %v6498_v11, %v6496_v10  ;;  %v6580_v3 = vld [vmem:[%s15195_s5 + $0x1058] sm:$0xff]  ;;  %v6581_v10 = vld [vmem:[%s15195_s5 + $0x1060] sm:$0xff] }
 0x18f   : > { %v6519_v8 = vld [vmem:[%s15195_s5 + $0xe90] sm:$0xff] }
 0x190   : > { %v6579_v9 = vld [vmem:[%s15195_s5 + $0x1050] sm:$0xff] }
 0x191   : > { %8029 = vmatpush1.bf16.msra.mxu1 %v8028_v23  ;;  %8085 = vmatpush1.bf16.msra.mxu0 %v8084_v24  ;;  %v6502_v23 = vld [vmem:[%s15195_s5 + $0xe28] sm:$0xff]  ;;  %v8048_v24 = vpack.c.bf16 %v6435_v15, %v6433_v14  ;;  %v6524_v14 = vld [vmem:[%s15195_s5 + $0xeb8] sm:$0xff]  ;;  %v8176_v18 = vpack.c.bf16 %v6581_v10, %v6579_v9  ;;  %v6539_v9 = vld [vmem:[%s15195_s5 + $0xf30] sm:$0xff] }
 0x192   : > { %8031 = vmatprep.subr.bf16.mxu1 %v8030_v27  ;;  %8087 = vmatprep.subr.bf16.mxu0 %v8086_v29  ;;  %v6439_v27 = vld [vmem:[%s15195_s5 + $0xc50] sm:$0xff]  ;;  %v8050_v29 = vpack.c.bf16 %v6440_v21, %v6438_v20  ;;  %v8106_v30 = vpack.c.bf16 %v6502_v23, %v6500_v22  ;;  %v6584_v15 = vld [vmem:[%s15195_s5 + $0x1078] sm:$0xff]  ;;  %v6585_v22 = vld [vmem:[%s15195_s5 + $0x1080] sm:$0xff] }
 0x193   : > { %v6523_v20 = vld [vmem:[%s15195_s5 + $0xeb0] sm:$0xff]  ;;  %v6526_v23 = vld [vmem:[%s15195_s5 + $0xec8] sm:$0xff] }
 0x194   : > { %v6583_v21 = vld [vmem:[%s15195_s5 + $0x1070] sm:$0xff] }
 0x195   : > { %8033 = vmatpush1.bf16.msra.mxu1 %v8032_v37  ;;  %8089 = vmatpush1.bf16.msra.mxu0 %v8088_v38  ;;  %v6506_v37 = vld [vmem:[%s15195_s5 + $0xe48] sm:$0xff]  ;;  %v8052_v38 = vpack.c.bf16 %v6439_v27, %v6437_v26  ;;  %v6528_v26 = vld [vmem:[%s15195_s5 + $0xed8] sm:$0xff]  ;;  %v8180_v31 = vpack.c.bf16 %v6585_v22, %v6583_v21  ;;  %v6543_v21 = vld [vmem:[%s15195_s5 + $0xf50] sm:$0xff] }
 0x196   : > { %8035 = vmatprep.subr.bf16.mxu1 %v8034_v41  ;;  %8091 = vmatprep.subr.bf16.mxu0 %v8090_v42  ;;  %v6443_v41 = vld [vmem:[%s15195_s5 + $0xc70] sm:$0xff]  ;;  %v8054_v42 = vpack.c.bf16 %v6444_v35, %v6442_v34  ;;  %v8110_v43 = vpack.c.bf16 %v6506_v37, %v6504_v36  ;;  %v6588_v27 = vld [vmem:[%s15195_s5 + $0x1098] sm:$0xff]  ;;  %v8126_v35 = vpack.c.bf16 %v6528_v26, %v6526_v23  ;;  %v6546_v26 = vld [vmem:[%s15195_s5 + $0xf68] sm:$0xff] }
 0x197   : > { %v6527_v34 = vld [vmem:[%s15195_s5 + $0xed0] sm:$0xff] }
 0x198   : > { %v6587_v37 = vld [vmem:[%s15195_s5 + $0x1090] sm:$0xff] }
 0x199   : > { %8037 = vmatpush1.bf16.msra.mxu1 %v8036_v50  ;;  %8093 = vmatpush1.bf16.msra.mxu0 %v8092_v52  ;;  %v6510_v50 = vld [vmem:[%s15195_s5 + $0xe68] sm:$0xff]  ;;  %v8056_v52 = vpack.c.bf16 %v6443_v41, %v6441_v40  ;;  %v6532_v40 = vld [vmem:[%s15195_s5 + $0xef8] sm:$0xff] }
 0x19a   : > { %8039 = vmatprep.subr.bf16.mxu1 %v8038_v55  ;;  %8095 = vmatprep.subr.bf16.mxu0 %v8094_v56  ;;  %v8058_v55 = vpack.c.bf16 %v6448_v48, %v6446_v47  ;;  %v8114_v56 = vpack.c.bf16 %v6510_v50, %v6508_v49  ;;  %v6592_v41 = vld [vmem:[%s15195_s5 + $0x10b8] sm:$0xff]  ;;  %v6531_v47 = vld [vmem:[%s15195_s5 + $0xef0] sm:$0xff] }
 0x19b   : > { %v6591_v50 = vld [vmem:[%s15195_s5 + $0x10b0] sm:$0xff]  ;;  %v8132_v57 = vpack.c.bf16 %v6531_v47, %v6529_v45  ;;  %v6549_v47 = vld [vmem:[%s15195_s5 + $0xf80] sm:$0xff] }
 0x19d   : > { %8041 = vmatpush1.bf16.msra.mxu1 %v8040_v63  ;;  %8097 = vmatpush1.bf16.msra.mxu0 %v8096_v1  ;;  %v6512_v63 = vld [vmem:[%s15195_s5 + $0xe78] sm:$0x1]  ;;  %v6518_v1 = vld [vmem:[%s15195_s5 + $0xe88] sm:$0xff] }
 0x19e   : > { %8043 = vmatprep.subr.bf16.mxu1 %v8042_v4  ;;  %8099 = vmatprep.subr.bf16.mxu0 %v8098_v5  ;;  %v6582_v4 = vld [vmem:[%s15195_s5 + $0x1068] sm:$0xff]  ;;  %v6449_v5 = vld [vmem:[%s15195_s5 + $0xca0] sm:$0x1]  ;;  %v8118_v11 = vpack.c.bf16 %v6520_v2, %v6518_v1 }
 0x19f   : > { %v6597_v1 = vld [vmem:[%s15195_s5 + $0x10e0] sm:$0xff]  ;;  %v6538_v2 = vld [vmem:[%s15195_s5 + $0xf28] sm:$0xff] }
 0x1a1   : > { %8045 = vmatpush1.bf16.msra.mxu1 %v8044_v12  ;;  %8101 = vmatpush1.bf16.msra.mxu0 %v8100_v13  ;;  %v8174_v12 = vpack.c.bf16 %v6582_v4, %v6580_v3  ;;  %v6522_v13 = vld [vmem:[%s15195_s5 + $0xea8] sm:$0xff]  ;;  %v6540_v3 = vld [vmem:[%s15195_s5 + $0xf38] sm:$0xff] }
 0x1a2   : > { %8047 = vmatprep.subr.bf16.mxu1 %v8046_v16  ;;  %8103 = vmatprep.subr.bf16.mxu0 %v8102_v17  ;;  %v6586_v16 = vld [vmem:[%s15195_s5 + $0x1088] sm:$0xff]  ;;  %v8120_v17 = vpack.c.bf16 %v6519_v8, %v6517_v7  ;;  %v6600_v4 = vld [vmem:[%s15195_s5 + $0x10f8] sm:$0xff]  ;;  %v6537_v8 = vld [vmem:[%s15195_s5 + $0xf20] sm:$0xff]  ;;  %v8138_v10 = vpack.c.bf16 %v6540_v3, %v6538_v2 }
 0x1a3   : > { %v6617_v2 = vld [vmem:[%s15195_s5 + $0x1180] sm:$0xff]  ;;  %v6558_v3 = vld [vmem:[%s15195_s5 + $0xfc8] sm:$0xff] }
 0x1a5   : > { %8049 = vmatpush1.bf16.msra.mxu1 %v8048_v24  ;;  %8105 = vmatpush1.bf16.msra.mxu0 %v8104_v25  ;;  %v8122_v24 = vpack.c.bf16 %v6524_v14, %v6522_v13  ;;  %v8178_v25 = vpack.c.bf16 %v6586_v16, %v6584_v15  ;;  %v6601_v13 = vld [vmem:[%s15195_s5 + $0x1100] sm:$0xff]  ;;  %v6542_v14 = vld [vmem:[%s15195_s5 + $0xf48] sm:$0xff]  ;;  %v6544_v15 = vld [vmem:[%s15195_s5 + $0xf58] sm:$0xff] }
 0x1a6   : > { %8051 = vmatprep.subr.bf16.mxu1 %v8050_v29  ;;  %8107 = vmatprep.subr.bf16.mxu0 %v8106_v30  ;;  %v6590_v29 = vld [vmem:[%s15195_s5 + $0x10a8] sm:$0xff]  ;;  %v8124_v30 = vpack.c.bf16 %v6523_v20, %v6521_v19  ;;  %v6604_v16 = vld [vmem:[%s15195_s5 + $0x1118] sm:$0xff]  ;;  %v6541_v20 = vld [vmem:[%s15195_s5 + $0xf40] sm:$0xff]  ;;  %v8142_v22 = vpack.c.bf16 %v6544_v15, %v6542_v14 }
 0x1a7   : > { %v8182_v36 = vpack.c.bf16 %v6590_v29, %v6588_v27  ;;  %v6548_v27 = vld [vmem:[%s15195_s5 + $0xf78] sm:$0xff]  ;;  %v6559_v14 = vld [vmem:[%s15195_s5 + $0xfd0] sm:$0xff] }
 0x1a8   : > { %v6608_v29 = vld [vmem:[%s15195_s5 + $0x1138] sm:$0xff] }
 0x1a9   : > { %8053 = vmatpush1.bf16.msra.mxu1 %v8052_v38  ;;  %8109 = vmatpush1.bf16.msra.mxu0 %v8108_v39  ;;  %v6589_v38 = vld [vmem:[%s15195_s5 + $0x10a0] sm:$0xff]  ;;  %v6530_v39 = vld [vmem:[%s15195_s5 + $0xee8] sm:$0xff] }
 0x1aa   : > { %8055 = vmatprep.subr.bf16.mxu1 %v8054_v42  ;;  %8111 = vmatprep.subr.bf16.mxu0 %v8110_v43  ;;  %v6594_v42 = vld [vmem:[%s15195_s5 + $0x10c8] sm:$0xff]  ;;  %v8128_v43 = vpack.c.bf16 %v6527_v34, %v6525_v32  ;;  %v8184_v44 = vpack.c.bf16 %v6589_v38, %v6587_v37  ;;  %v8130_v48 = vpack.c.bf16 %v6532_v40, %v6530_v39  ;;  %v6545_v34 = vld [vmem:[%s15195_s5 + $0xf60] sm:$0xff]  ;;  %v6607_v38 = vld [vmem:[%s15195_s5 + $0x1130] sm:$0xff] }
 0x1ab   : > { %v8186_v49 = vpack.c.bf16 %v6594_v42, %v6592_v41  ;;  %v6609_v39 = vld [vmem:[%s15195_s5 + $0x1140] sm:$0xff]  ;;  %v6550_v40 = vld [vmem:[%s15195_s5 + $0xf88] sm:$0xff]  ;;  %v6552_v41 = vld [vmem:[%s15195_s5 + $0xf98] sm:$0xff] }
 0x1ac   : > { %v6612_v42 = vld [vmem:[%s15195_s5 + $0x1158] sm:$0xff]  ;;  %v8204_v45 = vpack.c.bf16 %v6609_v39, %v6607_v38  ;;  %v6623_v39 = vld [vmem:[%s15195_s5 + $0x11b0] sm:$0xff] }
 0x1ad   : > { %8057 = vmatpush1.bf16.msra.mxu1 %v8056_v52  ;;  %8113 = vmatpush1.bf16.msra.mxu0 %v8112_v53  ;;  %v6593_v52 = vld [vmem:[%s15195_s5 + $0x10c0] sm:$0xff]  ;;  %v6534_v53 = vld [vmem:[%s15195_s5 + $0xf08] sm:$0xff] }
 0x1ae   : > { %8059 = vmatprep.subr.bf16.mxu1 %v8058_v55  ;;  %8115 = vmatprep.subr.bf16.mxu0 %v8114_v56  ;;  %v6596_v55 = vld [vmem:[%s15195_s5 + $0x10d8] sm:$0xff]  ;;  %v6598_v56 = vld [vmem:[%s15195_s5 + $0x10e8] sm:$0xff]  ;;  %v8188_v58 = vpack.c.bf16 %v6593_v52, %v6591_v50  ;;  %v6611_v52 = vld [vmem:[%s15195_s5 + $0x1150] sm:$0xff] }
 0x1b1   : > { %8061 = vmatpush1.bf16.msra.mxu1 %v8060_v60  ;;  %8117 = vmatpush1.bf16.msra.mxu0 %v8116_v61  ;;  %v6535_v60 = vld [vmem:[%s15195_s5 + $0xf10] sm:$0xff]  ;;  %v8134_v61 = vpack.c.bf16 %v6536_v54, %v6534_v53  ;;  %v6613_v53 = vld [vmem:[%s15195_s5 + $0x1160] sm:$0xff]  ;;  %v6554_v54 = vld [vmem:[%s15195_s5 + $0xfa8] sm:$0xff] }
 0x1b2   : > { %6451 = vmatprep.subr.msk.mxu1 %vm536_vm1, %v6450_v62  ;;  %6513 = vmatprep.subr.msk.mxu0 %vm536_vm1, %v6512_v63  ;;  %v8190_v62 = vpack.c.bf16 %v6598_v56, %v6596_v55  ;;  %v6595_v63 = vld [vmem:[%s15195_s5 + $0x10d0] sm:$0xff]  ;;  %v6556_v55 = vld [vmem:[%s15195_s5 + $0xfb8] sm:$0xff] }
 0x1b3   : > { %v8192_v7 = vpack.c.bf16 %v6597_v1, %v6595_v63  ;;  %v6616_v56 = vld [vmem:[%s15195_s5 + $0x1178] sm:$0xff]  ;;  %v6615_v1 = vld [vmem:[%s15195_s5 + $0x1170] sm:$0xff] }
 0x1b5   : > { %6452 = vmatpush1.msk.msra.mxu1 %vm536_vm1, %v6449_v5  ;;  %6514 = vmatpush1.msk.msra.mxu0 %vm536_vm1, %v6511_v6  ;;  %v6602_v5 = vld [vmem:[%s15195_s5 + $0x1108] sm:$0xff]  ;;  %v8136_v6 = vpack.c.bf16 %v6535_v60, %v6533_v59  ;;  %v8208_v59 = vpack.c.bf16 %v6613_v53, %v6611_v52  ;;  %v6553_v60 = vld [vmem:[%s15195_s5 + $0xfa0] sm:$0xff]  ;;  %v6627_v53 = vld [vmem:[%s15195_s5 + $0x11d0] sm:$0xff] }
 0x1b6   : > { %1460 = vmatmul.mubr.f32.vlgmr.msra.gmra.mrb[12].mxu1 %v10167_v33  ;;  %1602 = vmatmul.mubr.f32.vlgmr.msra.gmra.mrb[16].mxu0 %v10167_v33 }
 0x1b7   : > { %8119 = vmatprep.subr.bf16.mxu1 %v8118_v11  ;;  %8175 = vmatprep.subr.bf16.mxu0 %v8174_v12  ;;  %v8194_v11 = vpack.c.bf16 %v6602_v5, %v6600_v4  ;;  %v6599_v12 = vld [vmem:[%s15195_s5 + $0x10f0] sm:$0xff] }
 0x1b8   : > { %6454 = vmatprep.mubr.msk.f32.mxu1 %vm529_vm2, %v10196_v46  ;;  %6516 = vmatprep.mubr.msk.f32.mxu0 %vm529_vm2, %v10196_v46  ;;  %v8196_v19 = vpack.c.bf16 %v6601_v13, %v6599_v12  ;;  %v8212_v12 = vpack.c.bf16 %v6617_v2, %v6615_v1  ;;  %v6557_v13 = vld [vmem:[%s15195_s5 + $0xfc0] sm:$0xff]  ;;  %v6571_v1 = vld [vmem:[%s15195_s5 + $0x1030] sm:$0xff] }
 0x1b9   : > { %8121 = vmatpush1.bf16.msra.mxu1 %v8120_v17  ;;  %8177 = vmatpush1.bf16.msra.mxu0 %v8176_v18  ;;  %v6606_v17 = vld [vmem:[%s15195_s5 + $0x1128] sm:$0xff]  ;;  %v8140_v18 = vpack.c.bf16 %v6539_v9, %v6537_v8  ;;  %v6631_v2 = vld [vmem:[%s15195_s5 + $0x11f0] sm:$0xff] }
 0x1ba   : > { %1466 = vmatmul.mubr.f32.gmra.mrb[14].mxu1 %v10204_v51  ;;  %1608 = vmatmul.mubr.f32.gmra.mrb[18].mxu0 %v10204_v51  ;;  %v8198_v23 = vpack.c.bf16 %v6606_v17, %v6604_v16  ;;  %v6622_v8 = vld [vmem:[%s15195_s5 + $0x11a8] sm:$0xff]  ;;  %v6619_v17 = vld [vmem:[%s15195_s5 + $0x1190] sm:$0xff] }
 0x1bb   : > { %8123 = vmatprep.subr.bf16.mxu1 %v8122_v24  ;;  %8179 = vmatprep.subr.bf16.mxu0 %v8178_v25  ;;  %v6603_v24 = vld [vmem:[%s15195_s5 + $0x1110] sm:$0xff]  ;;  %v6605_v25 = vld [vmem:[%s15195_s5 + $0x1120] sm:$0xff] }
 0x1bc   : > { %6577 = vmatprep.mubr.msk.f32.mxu1 %vm529_vm2, %v10162_v28  ;;  %6639 = vmatprep.mubr.msk.f32.mxu0 %vm529_vm2, %v10162_v28  ;;  %v8200_v32 = vpack.c.bf16 %v6605_v25, %v6603_v24  ;;  %v6626_v24 = vld [vmem:[%s15195_s5 + $0x11c8] sm:$0xff]  ;;  %v8160_v25 = vpack.c.bf16 %v6559_v14, %v6557_v13  ;;  %v6644_v13 = vld [vmem:[%s15195_s5 + $0x1238] sm:$0xff] }
 0x1bd   : > { %8125 = vmatpush1.bf16.msra.mxu1 %v8124_v30  ;;  %8181 = vmatpush1.bf16.msra.mxu0 %v8180_v31  ;;  %v6610_v30 = vld [vmem:[%s15195_s5 + $0x1148] sm:$0xff]  ;;  %v8144_v31 = vpack.c.bf16 %v6543_v21, %v6541_v20  ;;  %v6704_v14 = vld [vmem:[%s15195_s5 + $0x13f8] sm:$0xff] }
 0x1be   : > { %8127 = vmatprep.subr.bf16.mxu1 %v8126_v35  ;;  %8183 = vmatprep.subr.bf16.mxu0 %v8182_v36  ;;  %v6547_v35 = vld [vmem:[%s15195_s5 + $0xf70] sm:$0xff]  ;;  %v8146_v36 = vpack.c.bf16 %v6548_v27, %v6546_v26  ;;  %v8202_v37 = vpack.c.bf16 %v6610_v30, %v6608_v29 }
 0x1c1   : > { %8129 = vmatpush1.bf16.msra.mxu1 %v8128_v43  ;;  %8185 = vmatpush1.bf16.msra.mxu0 %v8184_v44  ;;  %v6614_v43 = vld [vmem:[%s15195_s5 + $0x1168] sm:$0xff]  ;;  %v8148_v44 = vpack.c.bf16 %v6547_v35, %v6545_v34  ;;  %v6561_v35 = vld [vmem:[%s15195_s5 + $0xfe0] sm:$0xff] }
 0x1c2   : > { %8131 = vmatprep.subr.bf16.mxu1 %v8130_v48  ;;  %8187 = vmatprep.subr.bf16.mxu0 %v8186_v49  ;;  %v6551_v48 = vld [vmem:[%s15195_s5 + $0xf90] sm:$0xff]  ;;  %v8150_v49 = vpack.c.bf16 %v6552_v41, %v6550_v40  ;;  %v8206_v50 = vpack.c.bf16 %v6614_v43, %v6612_v42  ;;  %v6625_v40 = vld [vmem:[%s15195_s5 + $0x11c0] sm:$0xff]  ;;  %v6566_v41 = vld [vmem:[%s15195_s5 + $0x1008] sm:$0xff] }
 0x1c3   : > { %v6568_v42 = vld [vmem:[%s15195_s5 + $0x1018] sm:$0xff] }
 0x1c4   : > { %v6628_v43 = vld [vmem:[%s15195_s5 + $0x11d8] sm:$0xff] }
 0x1c5   : > { %8133 = vmatpush1.bf16.msra.mxu1 %v8132_v57  ;;  %8189 = vmatpush1.bf16.msra.mxu0 %v8188_v58  ;;  %v6618_v57 = vld [vmem:[%s15195_s5 + $0x1188] sm:$0xff]  ;;  %v8152_v58 = vpack.c.bf16 %v6551_v48, %v6549_v47  ;;  %v8220_v47 = vpack.c.bf16 %v6625_v40, %v6623_v39  ;;  %v6565_v48 = vld [vmem:[%s15195_s5 + $0x1000] sm:$0xff] }
 0x1c6   : > { %8135 = vmatprep.subr.bf16.mxu1 %v8134_v61  ;;  %8191 = vmatprep.subr.bf16.mxu0 %v8190_v62  ;;  %v6555_v61 = vld [vmem:[%s15195_s5 + $0xfb0] sm:$0xff]  ;;  %v8154_v62 = vpack.c.bf16 %v6556_v55, %v6554_v54  ;;  %v8210_v63 = vpack.c.bf16 %v6618_v57, %v6616_v56  ;;  %v6629_v54 = vld [vmem:[%s15195_s5 + $0x11e0] sm:$0xff]  ;;  %v6570_v55 = vld [vmem:[%s15195_s5 + $0x1028] sm:$0xff] }
 0x1c7   : > { %v6572_v56 = vld [vmem:[%s15195_s5 + $0x1038] sm:$0xff]  ;;  %v6645_v40 = vld [vmem:[%s15195_s5 + $0x1240] sm:$0xff] }
 0x1c8   : > { %v6632_v57 = vld [vmem:[%s15195_s5 + $0x11f8] sm:$0xff] }
 0x1c9   : > { %8137 = vmatpush1.bf16.msra.mxu1 %v8136_v6  ;;  %8193 = vmatpush1.bf16.msra.mxu0 %v8192_v7  ;;  %v6560_v6 = vld [vmem:[%s15195_s5 + $0xfd8] sm:$0xff] }
 0x1ca   : > { %8139 = vmatprep.subr.bf16.mxu1 %v8138_v10  ;;  %8195 = vmatprep.subr.bf16.mxu0 %v8194_v11  ;;  %v6620_v7 = vld [vmem:[%s15195_s5 + $0x1198] sm:$0xff]  ;;  %v8156_v11 = vpack.c.bf16 %v6555_v61, %v6553_v60  ;;  %v8158_v15 = vpack.c.bf16 %v6560_v6, %v6558_v3  ;;  %v8224_v60 = vpack.c.bf16 %v6629_v54, %v6627_v53  ;;  %v6569_v61 = vld [vmem:[%s15195_s5 + $0x1020] sm:$0xff] }
 0x1cb   : > { %v8214_v16 = vpack.c.bf16 %v6622_v8, %v6620_v7  ;;  %v6633_v3 = vld [vmem:[%s15195_s5 + $0x1200] sm:$0xff]  ;;  %v8172_v6 = vpack.c.bf16 %v6571_v1, %v6569_v61  ;;  %v6574_v8 = vld [vmem:[%s15195_s5 + $0x1048] sm:$0x1]  ;;  %v6656_v61 = vld [vmem:[%s15195_s5 + $0x1298] sm:$0xff] }
 0x1cc   : > { %v8228_v7 = vpack.c.bf16 %v6633_v3, %v6631_v2  ;;  %v6649_v54 = vld [vmem:[%s15195_s5 + $0x1260] sm:$0xff] }
 0x1cd   : > { %8141 = vmatpush1.bf16.msra.mxu1 %v8140_v18  ;;  %8197 = vmatpush1.bf16.msra.mxu0 %v8196_v19  ;;  %v6621_v18 = vld [vmem:[%s15195_s5 + $0x11a0] sm:$0xff]  ;;  %v6562_v19 = vld [vmem:[%s15195_s5 + $0xfe8] sm:$0xff] }
 0x1ce   : > { %8143 = vmatprep.subr.bf16.mxu1 %v8142_v22  ;;  %8199 = vmatprep.subr.bf16.mxu0 %v8198_v23  ;;  %v6564_v22 = vld [vmem:[%s15195_s5 + $0xff8] sm:$0xff]  ;;  %v6653_v3 = vld [vmem:[%s15195_s5 + $0x1280] sm:$0xff] }
 0x1cf   : > { %v6624_v23 = vld [vmem:[%s15195_s5 + $0x11b8] sm:$0xff] }
 0x1d0   : > { %v8218_v38 = vpack.c.bf16 %v6626_v24, %v6624_v23  ;;  %v6705_v23 = vld [vmem:[%s15195_s5 + $0x1400] sm:$0xff] }
 0x1d1   : > { %8145 = vmatpush1.bf16.msra.mxu1 %v8144_v31  ;;  %8201 = vmatpush1.bf16.msra.mxu0 %v8200_v32  ;;  %v8216_v31 = vpack.c.bf16 %v6621_v18, %v6619_v17  ;;  %v6635_v17 = vld [vmem:[%s15195_s5 + $0x1210] sm:$0x1]  ;;  %v6641_v18 = vld [vmem:[%s15195_s5 + $0x1220] sm:$0xff] }
 0x1d2   : > { %8147 = vmatprep.subr.bf16.mxu1 %v8146_v36  ;;  %8203 = vmatprep.subr.bf16.mxu0 %v8202_v37  ;;  %v6563_v36 = vld [vmem:[%s15195_s5 + $0xff0] sm:$0xff]  ;;  %v8162_v37 = vpack.c.bf16 %v6564_v22, %v6562_v19 }
 0x1d3   : > { %v6643_v19 = vld [vmem:[%s15195_s5 + $0x1230] sm:$0xff] }
 0x1d4   : > { %v6703_v22 = vld [vmem:[%s15195_s5 + $0x13f0] sm:$0xff] }
 0x1d5   : > { %8149 = vmatpush1.bf16.msra.mxu1 %v8148_v44  ;;  %8205 = vmatpush1.bf16.msra.mxu0 %v8204_v45  ;;  %v6630_v44 = vld [vmem:[%s15195_s5 + $0x11e8] sm:$0xff]  ;;  %v8164_v45 = vpack.c.bf16 %v6563_v36, %v6561_v35  ;;  %v6648_v35 = vld [vmem:[%s15195_s5 + $0x1258] sm:$0xff]  ;;  %v8288_v39 = vpack.c.bf16 %v6705_v23, %v6703_v22  ;;  %v6659_v22 = vld [vmem:[%s15195_s5 + $0x12b0] sm:$0xff] }
 0x1d6   : > { %8151 = vmatprep.subr.bf16.mxu1 %v8150_v49  ;;  %8207 = vmatprep.subr.bf16.mxu0 %v8206_v50  ;;  %v6567_v49 = vld [vmem:[%s15195_s5 + $0x1010] sm:$0xff]  ;;  %v8166_v50 = vpack.c.bf16 %v6568_v42, %v6566_v41  ;;  %v8222_v52 = vpack.c.bf16 %v6630_v44, %v6628_v43  ;;  %v6708_v36 = vld [vmem:[%s15195_s5 + $0x1418] sm:$0xff]  ;;  %v6709_v43 = vld [vmem:[%s15195_s5 + $0x1420] sm:$0xff] }
 0x1d7   : > { %v11485_v4 = vpop.f32.mrb[0].mxu1  ;;  %v11487_v5 = vpop.f32.mrb[4].mxu0  ;;  %v6647_v41 = vld [vmem:[%s15195_s5 + $0x1250] sm:$0xff]  ;;  %v6650_v44 = vld [vmem:[%s15195_s5 + $0x1268] sm:$0xff] }
 0x1d8   : > { %v11498_v9 = vpop.f32.mrb[1].mxu1  ;;  %v11500_v10 = vpop.f32.mrb[5].mxu0  ;;  %v6707_v42 = vld [vmem:[%s15195_s5 + $0x1410] sm:$0xff] }
 0x1d9   : > { %8153 = vmatpush1.bf16.msra.mxu1 %v8152_v58  ;;  %8209 = vmatpush1.bf16.msra.mxu0 %v8208_v59  ;;  %v6634_v58 = vld [vmem:[%s15195_s5 + $0x1208] sm:$0xff]  ;;  %v8168_v59 = vpack.c.bf16 %v6567_v49, %v6565_v48  ;;  %v6652_v48 = vld [vmem:[%s15195_s5 + $0x1278] sm:$0xff]  ;;  %v8292_v53 = vpack.c.bf16 %v6709_v43, %v6707_v42  ;;  %v6663_v42 = vld [vmem:[%s15195_s5 + $0x12d0] sm:$0xff] }
 0x1da   : > { %8155 = vmatprep.subr.bf16.mxu1 %v8154_v62  ;;  %8211 = vmatprep.subr.bf16.mxu0 %v8210_v63  ;;  %v8170_v62 = vpack.c.bf16 %v6572_v56, %v6570_v55  ;;  %v8226_v63 = vpack.c.bf16 %v6634_v58, %v6632_v57  ;;  %v6712_v49 = vld [vmem:[%s15195_s5 + $0x1438] sm:$0xff]  ;;  %v6651_v55 = vld [vmem:[%s15195_s5 + $0x1270] sm:$0xff]  ;;  %v8238_v56 = vpack.c.bf16 %v6652_v48, %v6650_v44  ;;  %v6666_v48 = vld [vmem:[%s15195_s5 + $0x12e8] sm:$0xff] }
 0x1db   : > { %v11517_v20 = vpop.f32.mrb[2].mxu1  ;;  %v11519_v21 = vpop.f32.mrb[6].mxu0  ;;  %v6711_v58 = vld [vmem:[%s15195_s5 + $0x1430] sm:$0xff]  ;;  %v8240_v1 = vpack.c.bf16 %v6651_v55, %v6649_v54  ;;  %v6665_v55 = vld [vmem:[%s15195_s5 + $0x12e0] sm:$0xff] }
 0x1dc   : > { %v8568_v26 = vpack.c.bf16 %v11517_v20, %v11485_v4  ;;  %v8572_v27 = vpack.c.bf16 %v11519_v21, %v11487_v5  ;;  %v11534_v29 = vpop.f32.mrb[3].mxu1  ;;  %v11536_v30 = vpop.f32.mrb[7].mxu0 }
 0x1dd   : > { %8157 = vmatpush1.bf16.msra.mxu1 %v8156_v11  ;;  %8213 = vmatpush1.bf16.msra.mxu0 %v8212_v12  ;;  %v8566_v32 = vpack.c.bf16 %v11534_v29, %v11498_v9  ;;  %v8570_v34 = vpack.c.bf16 %v11536_v30, %v11500_v10  ;;  %v6636_v11 = vld [vmem:[%s15195_s5 + $0x1218] sm:$0x1]  ;;  %v6642_v12 = vld [vmem:[%s15195_s5 + $0x1228] sm:$0xff] }
 0x1de   : > { %8159 = vmatprep.subr.bf16.mxu1 %v8158_v15  ;;  %8215 = vmatprep.subr.bf16.mxu0 %v8214_v16  ;;  %v6706_v15 = vld [vmem:[%s15195_s5 + $0x1408] sm:$0xff]  ;;  %v6573_v16 = vld [vmem:[%s15195_s5 + $0x1040] sm:$0x1]  ;;  %v8230_v24 = vpack.c.bf16 %v6644_v13, %v6642_v12 }
 0x1df   : > { %v6717_v12 = vld [vmem:[%s15195_s5 + $0x1460] sm:$0xff]  ;;  %v6658_v13 = vld [vmem:[%s15195_s5 + $0x12a8] sm:$0xff] }
 0x1e1   : > { %8161 = vmatpush1.bf16.msra.mxu1 %v8160_v25  ;;  %8217 = vmatpush1.bf16.msra.mxu0 %v8216_v31  ;;  %v8286_v25 = vpack.c.bf16 %v6706_v15, %v6704_v14  ;;  %v6646_v31 = vld [vmem:[%s15195_s5 + $0x1248] sm:$0xff]  ;;  %v6660_v14 = vld [vmem:[%s15195_s5 + $0x12b8] sm:$0xff] }
 0x1e2   : > { %8163 = vmatprep.subr.bf16.mxu1 %v8162_v37  ;;  %8219 = vmatprep.subr.bf16.mxu0 %v8218_v38  ;;  %v6710_v37 = vld [vmem:[%s15195_s5 + $0x1428] sm:$0xff]  ;;  %v8232_v38 = vpack.c.bf16 %v6643_v19, %v6641_v18  ;;  %v6720_v15 = vld [vmem:[%s15195_s5 + $0x1478] sm:$0xff]  ;;  %v6657_v19 = vld [vmem:[%s15195_s5 + $0x12a0] sm:$0xff]  ;;  %v8246_v23 = vpack.c.bf16 %v6660_v14, %v6658_v13 }
 0x1e3   : > { %v6733_v13 = vld [vmem:[%s15195_s5 + $0x14e0] sm:$0xff]  ;;  %v6674_v14 = vld [vmem:[%s15195_s5 + $0x1328] sm:$0xff] }
 0x1e5   : > { %8165 = vmatpush1.bf16.msra.mxu1 %v8164_v45  ;;  %8221 = vmatpush1.bf16.msra.mxu0 %v8220_v47  ;;  %v8234_v45 = vpack.c.bf16 %v6648_v35, %v6646_v31  ;;  %v8290_v47 = vpack.c.bf16 %v6710_v37, %v6708_v36  ;;  %v6721_v31 = vld [vmem:[%s15195_s5 + $0x1480] sm:$0xff]  ;;  %v6662_v35 = vld [vmem:[%s15195_s5 + $0x12c8] sm:$0xff]  ;;  %v6664_v36 = vld [vmem:[%s15195_s5 + $0x12d8] sm:$0xff] }
 0x1e6   : > { %8167 = vmatprep.subr.bf16.mxu1 %v8166_v50  ;;  %8223 = vmatprep.subr.bf16.mxu0 %v8222_v52  ;;  %v6714_v50 = vld [vmem:[%s15195_s5 + $0x1448] sm:$0xff]  ;;  %v8236_v52 = vpack.c.bf16 %v6647_v41, %v6645_v40  ;;  %v6724_v37 = vld [vmem:[%s15195_s5 + $0x1498] sm:$0xff]  ;;  %v6661_v41 = vld [vmem:[%s15195_s5 + $0x12c0] sm:$0xff]  ;;  %v8250_v43 = vpack.c.bf16 %v6664_v36, %v6662_v35 }
 0x1e7   : > { %v8294_v57 = vpack.c.bf16 %v6714_v50, %v6712_v49  ;;  %v6668_v49 = vld [vmem:[%s15195_s5 + $0x12f8] sm:$0xff]  ;;  %v6737_v35 = vld [vmem:[%s15195_s5 + $0x1500] sm:$0xff]  ;;  %v6678_v36 = vld [vmem:[%s15195_s5 + $0x1348] sm:$0xff] }
 0x1e8   : > { %v6728_v50 = vld [vmem:[%s15195_s5 + $0x14b8] sm:$0xff] }
 0x1e9   : > { %8169 = vmatpush1.bf16.msra.mxu1 %v8168_v59  ;;  %8225 = vmatpush1.bf16.msra.mxu0 %v8224_v60  ;;  %v6713_v59 = vld [vmem:[%s15195_s5 + $0x1440] sm:$0xff]  ;;  %v6654_v60 = vld [vmem:[%s15195_s5 + $0x1288] sm:$0xff] }
 0x1ea   : > { %8171 = vmatprep.subr.bf16.mxu1 %v8170_v62  ;;  %8227 = vmatprep.subr.bf16.mxu0 %v8226_v63  ;;  %v6716_v62 = vld [vmem:[%s15195_s5 + $0x1458] sm:$0xff]  ;;  %v6718_v63 = vld [vmem:[%s15195_s5 + $0x1468] sm:$0xff]  ;;  %v8296_v2 = vpack.c.bf16 %v6713_v59, %v6711_v58  ;;  %v6727_v59 = vld [vmem:[%s15195_s5 + $0x14b0] sm:$0xff] }
 0x1ed   : > { %8173 = vmatpush1.bf16.msra.mxu1 %v8172_v6  ;;  %8229 = vmatpush1.bf16.msra.mxu0 %v8228_v7  ;;  %v6655_v6 = vld [vmem:[%s15195_s5 + $0x1290] sm:$0xff]  ;;  %v8242_v7 = vpack.c.bf16 %v6656_v61, %v6654_v60  ;;  %v6729_v60 = vld [vmem:[%s15195_s5 + $0x14c0] sm:$0xff]  ;;  %v6670_v61 = vld [vmem:[%s15195_s5 + $0x1308] sm:$0xff] }
 0x1ee   : > { %6575 = vmatprep.subr.msk.mxu1 %vm536_vm1, %v6574_v8  ;;  %6637 = vmatprep.subr.msk.mxu0 %vm536_vm1, %v6636_v11  ;;  %v8298_v8 = vpack.c.bf16 %v6718_v63, %v6716_v62  ;;  %v6715_v11 = vld [vmem:[%s15195_s5 + $0x1450] sm:$0xff]  ;;  %v6672_v62 = vld [vmem:[%s15195_s5 + $0x1318] sm:$0xff] }
 0x1ef   : > { %v8300_v18 = vpack.c.bf16 %v6717_v12, %v6715_v11  ;;  %v6732_v63 = vld [vmem:[%s15195_s5 + $0x14d8] sm:$0xff]  ;;  %v6731_v12 = vld [vmem:[%s15195_s5 + $0x14d0] sm:$0xff] }
 0x1f1   : > { %6576 = vmatpush1.msk.msra.mxu1 %vm536_vm1, %v6573_v16  ;;  %6638 = vmatpush1.msk.msra.mxu0 %vm536_vm1, %v6635_v17  ;;  %v6722_v16 = vld [vmem:[%s15195_s5 + $0x1488] sm:$0xff]  ;;  %v8244_v17 = vpack.c.bf16 %v6655_v6, %v6653_v3  ;;  %v8312_v3 = vpack.c.bf16 %v6729_v60, %v6727_v59  ;;  %v6669_v6 = vld [vmem:[%s15195_s5 + $0x1300] sm:$0xff] }
 0x1f2   : > { %1744 = vmatmul.mubr.f32.vlgmr.msra.gmra.mrb[16].mxu1 %v10167_v33  ;;  %1886 = vmatmul.mubr.f32.vlgmr.msra.gmra.mrb[20].mxu0 %v10167_v33 }
 0x1f3   : > { %8231 = vmatprep.subr.bf16.mxu1 %v8230_v24  ;;  %8287 = vmatprep.subr.bf16.mxu0 %v8286_v25  ;;  %v8302_v24 = vpack.c.bf16 %v6722_v16, %v6720_v15  ;;  %v6719_v25 = vld [vmem:[%s15195_s5 + $0x1470] sm:$0xff]  ;;  %v6676_v15 = vld [vmem:[%s15195_s5 + $0x1338] sm:$0xff] }
 0x1f4   : > { %6578 = vmatprep.mubr.msk.f32.mxu1 %vm529_vm2, %v10196_v46  ;;  %6640 = vmatprep.mubr.msk.f32.mxu0 %vm529_vm2, %v10196_v46  ;;  %v8304_v40 = vpack.c.bf16 %v6721_v31, %v6719_v25  ;;  %v6736_v16 = vld [vmem:[%s15195_s5 + $0x14f8] sm:$0xff]  ;;  %v6735_v31 = vld [vmem:[%s15195_s5 + $0x14f0] sm:$0xff] }
 0x1f5   : > { %8233 = vmatpush1.bf16.msra.mxu1 %v8232_v38  ;;  %8289 = vmatpush1.bf16.msra.mxu0 %v8288_v39  ;;  %v6726_v38 = vld [vmem:[%s15195_s5 + $0x14a8] sm:$0xff]  ;;  %v8248_v39 = vpack.c.bf16 %v6659_v22, %v6657_v19  ;;  %v8316_v19 = vpack.c.bf16 %v6733_v13, %v6731_v12  ;;  %v6673_v22 = vld [vmem:[%s15195_s5 + $0x1320] sm:$0xff] }
 0x1f6   : > { %1750 = vmatmul.mubr.f32.gmra.mrb[18].mxu1 %v10204_v51  ;;  %1892 = vmatmul.mubr.f32.gmra.mrb[22].mxu0 %v10204_v51  ;;  %v8306_v44 = vpack.c.bf16 %v6726_v38, %v6724_v37  ;;  %v6680_v37 = vld [vmem:[%s15195_s5 + $0x1358] sm:$0xff]  ;;  %v6686_v13 = vld [vmem:[%s15195_s5 + $0x1388] sm:$0xff] }
 0x1f7   : > { %8235 = vmatprep.subr.bf16.mxu1 %v8234_v45  ;;  %8291 = vmatprep.subr.bf16.mxu0 %v8290_v47  ;;  %v6723_v45 = vld [vmem:[%s15195_s5 + $0x1490] sm:$0xff]  ;;  %v6725_v47 = vld [vmem:[%s15195_s5 + $0x14a0] sm:$0xff]  ;;  %v6740_v38 = vld [vmem:[%s15195_s5 + $0x1518] sm:$0xff] }
 0x1f8   : > { %6701 = vmatprep.mubr.msk.f32.mxu1 %vm529_vm2, %v10162_v28  ;;  %6763 = vmatprep.mubr.msk.f32.mxu0 %vm529_vm2, %v10162_v28  ;;  %v8308_v54 = vpack.c.bf16 %v6725_v47, %v6723_v45  ;;  %v6679_v45 = vld [vmem:[%s15195_s5 + $0x1350] sm:$0xff] }
 0x1f9   : > { %8237 = vmatpush1.bf16.msra.mxu1 %v8236_v52  ;;  %8293 = vmatpush1.bf16.msra.mxu0 %v8292_v53  ;;  %v6730_v52 = vld [vmem:[%s15195_s5 + $0x14c8] sm:$0xff]  ;;  %v8252_v53 = vpack.c.bf16 %v6663_v42, %v6661_v41  ;;  %v8320_v41 = vpack.c.bf16 %v6737_v35, %v6735_v31  ;;  %v6739_v47 = vld [vmem:[%s15195_s5 + $0x1510] sm:$0xff] }
 0x1fa   : > { %8239 = vmatprep.subr.bf16.mxu1 %v8238_v56  ;;  %8295 = vmatprep.subr.bf16.mxu0 %v8294_v57  ;;  %v6667_v56 = vld [vmem:[%s15195_s5 + $0x12f0] sm:$0xff]  ;;  %v8254_v57 = vpack.c.bf16 %v6668_v49, %v6666_v48  ;;  %v8310_v58 = vpack.c.bf16 %v6730_v52, %v6728_v50  ;;  %v8266_v48 = vpack.c.bf16 %v6680_v37, %v6678_v36  ;;  %v6741_v50 = vld [vmem:[%s15195_s5 + $0x1520] sm:$0xff]  ;;  %v6690_v37 = vld [vmem:[%s15195_s5 + $0x13a8] sm:$0xff] }
 0x1fb   : > { %v8324_v59 = vpack.c.bf16 %v6741_v50, %v6739_v47  ;;  %v6747_v35 = vld [vmem:[%s15195_s5 + $0x1550] sm:$0xff]  ;;  %v6749_v36 = vld [vmem:[%s15195_s5 + $0x1560] sm:$0xff] }
 0x1fc   : > { %v6691_v47 = vld [vmem:[%s15195_s5 + $0x13b0] sm:$0xff] }
 0x1fd   : > { %8241 = vmatpush1.bf16.msra.mxu1 %v8240_v1  ;;  %8297 = vmatpush1.bf16.msra.mxu0 %v8296_v2  ;;  %v6734_v1 = vld [vmem:[%s15195_s5 + $0x14e8] sm:$0xff]  ;;  %v8256_v2 = vpack.c.bf16 %v6667_v56, %v6665_v55  ;;  %v6684_v55 = vld [vmem:[%s15195_s5 + $0x1378] sm:$0xff]  ;;  %v6751_v50 = vld [vmem:[%s15195_s5 + $0x1570] sm:$0xff] }
 0x1fe   : > { %8243 = vmatprep.subr.bf16.mxu1 %v8242_v7  ;;  %8299 = vmatprep.subr.bf16.mxu0 %v8298_v8  ;;  %v6671_v7 = vld [vmem:[%s15195_s5 + $0x1310] sm:$0xff]  ;;  %v8258_v8 = vpack.c.bf16 %v6672_v62, %v6670_v61  ;;  %v8314_v11 = vpack.c.bf16 %v6734_v1, %v6732_v63  ;;  %v6744_v56 = vld [vmem:[%s15195_s5 + $0x1538] sm:$0xff]  ;;  %v6681_v63 = vld [vmem:[%s15195_s5 + $0x1360] sm:$0xff] }
 0x1ff   : > { %v6683_v1 = vld [vmem:[%s15195_s5 + $0x1370] sm:$0xff] }
 0x201   : > { %8245 = vmatpush1.bf16.msra.mxu1 %v8244_v17  ;;  %8301 = vmatpush1.bf16.msra.mxu0 %v8300_v18  ;;  %v6738_v17 = vld [vmem:[%s15195_s5 + $0x1508] sm:$0xff]  ;;  %v8260_v18 = vpack.c.bf16 %v6671_v7, %v6669_v6  ;;  %v6743_v7 = vld [vmem:[%s15195_s5 + $0x1530] sm:$0xff] }
 0x202   : > { %8247 = vmatprep.subr.bf16.mxu1 %v8246_v23  ;;  %8303 = vmatprep.subr.bf16.mxu0 %v8302_v24  ;;  %v6675_v23 = vld [vmem:[%s15195_s5 + $0x1330] sm:$0xff]  ;;  %v8262_v24 = vpack.c.bf16 %v6676_v15, %v6674_v14  ;;  %v8318_v25 = vpack.c.bf16 %v6738_v17, %v6736_v16  ;;  %v6688_v16 = vld [vmem:[%s15195_s5 + $0x1398] sm:$0xff] }
 0x203   : > { %v6748_v17 = vld [vmem:[%s15195_s5 + $0x1558] sm:$0xff] }
 0x205   : > { %8249 = vmatpush1.bf16.msra.mxu1 %v8248_v39  ;;  %8305 = vmatpush1.bf16.msra.mxu0 %v8304_v40  ;;  %v6742_v39 = vld [vmem:[%s15195_s5 + $0x1528] sm:$0xff]  ;;  %v8264_v40 = vpack.c.bf16 %v6675_v23, %v6673_v22  ;;  %v6685_v23 = vld [vmem:[%s15195_s5 + $0x1380] sm:$0xff] }
 0x206   : > { %8251 = vmatprep.subr.bf16.mxu1 %v8250_v43  ;;  %8307 = vmatprep.subr.bf16.mxu0 %v8306_v44  ;;  %v6677_v44 = vld [vmem:[%s15195_s5 + $0x1340] sm:$0xff]  ;;  %v8322_v49 = vpack.c.bf16 %v6742_v39, %v6740_v38  ;;  %v6692_v38 = vld [vmem:[%s15195_s5 + $0x13b8] sm:$0xff] }
 0x207   : > { %v6752_v39 = vld [vmem:[%s15195_s5 + $0x1578] sm:$0xff] }
 0x209   : > { %8253 = vmatpush1.bf16.msra.mxu1 %v8252_v53  ;;  %8309 = vmatpush1.bf16.msra.mxu0 %v8308_v54  ;;  %v6682_v54 = vld [vmem:[%s15195_s5 + $0x1368] sm:$0xff] }
 0x20a   : > { %8255 = vmatprep.subr.bf16.mxu1 %v8254_v57  ;;  %8311 = vmatprep.subr.bf16.mxu0 %v8310_v58  ;;  %v6746_v57 = vld [vmem:[%s15195_s5 + $0x1548] sm:$0xff]  ;;  %v8268_v58 = vpack.c.bf16 %v6679_v45, %v6677_v44  ;;  %v8270_v60 = vpack.c.bf16 %v6684_v55, %v6682_v54  ;;  %v8332_v44 = vpack.c.bf16 %v6749_v36, %v6747_v35  ;;  %v6689_v45 = vld [vmem:[%s15195_s5 + $0x13a0] sm:$0xff]  ;;  %v6759_v35 = vld [vmem:[%s15195_s5 + $0x15b0] sm:$0x1] }
 0x20b   : > { %v6753_v54 = vld [vmem:[%s15195_s5 + $0x1580] sm:$0xff]  ;;  %v6694_v55 = vld [vmem:[%s15195_s5 + $0x13c8] sm:$0xff] }
 0x20c   : > { %v6765_v36 = vld [vmem:[%s15195_s5 + $0x15c0] sm:$0xff] }
 0x20d   : > { %8257 = vmatpush1.bf16.msra.mxu1 %v8256_v2  ;;  %8313 = vmatpush1.bf16.msra.mxu0 %v8312_v3  ;;  %v8326_v2 = vpack.c.bf16 %v6746_v57, %v6744_v56  ;;  %v6696_v56 = vld [vmem:[%s15195_s5 + $0x13d8] sm:$0xff] }
 0x20e   : > { %8259 = vmatprep.subr.bf16.mxu1 %v8258_v8  ;;  %8315 = vmatprep.subr.bf16.mxu0 %v8314_v11  ;;  %v6745_v8 = vld [vmem:[%s15195_s5 + $0x1540] sm:$0xff]  ;;  %v6756_v57 = vld [vmem:[%s15195_s5 + $0x1598] sm:$0xff] }
 0x20f   : > { %v8328_v22 = vpack.c.bf16 %v6745_v8, %v6743_v7  ;;  %v6695_v7 = vld [vmem:[%s15195_s5 + $0x13d0] sm:$0xff] }
 0x210   : > { %v6755_v8 = vld [vmem:[%s15195_s5 + $0x1590] sm:$0xff] }
 0x211   : > { %8261 = vmatpush1.bf16.msra.mxu1 %v8260_v18  ;;  %8317 = vmatpush1.bf16.msra.mxu0 %v8316_v19  ;;  %v11858_v42 = vpop.f32.mrb[4].mxu1  ;;  %v11860_v43 = vpop.f32.mrb[8].mxu0  ;;  %v6750_v18 = vld [vmem:[%s15195_s5 + $0x1568] sm:$0xff]  ;;  %v8272_v19 = vpack.c.bf16 %v6683_v1, %v6681_v63  ;;  %v6693_v63 = vld [vmem:[%s15195_s5 + $0x13c0] sm:$0xff]  ;;  %v8282_v1 = vpack.c.bf16 %v6696_v56, %v6694_v55  ;;  %v6771_v55 = vld [vmem:[%s15195_s5 + $0x15f0] sm:$0xff] }
 0x212   : > { %8263 = vmatprep.subr.bf16.mxu1 %v8262_v24  ;;  %8319 = vmatprep.subr.bf16.mxu0 %v8318_v25  ;;  %v11874_v52 = vpop.f32.mrb[5].mxu1  ;;  %v11876_v53 = vpop.f32.mrb[9].mxu0  ;;  %v6687_v24 = vld [vmem:[%s15195_s5 + $0x1390] sm:$0xff]  ;;  %v8274_v25 = vpack.c.bf16 %v6688_v16, %v6686_v13  ;;  %v8330_v31 = vpack.c.bf16 %v6750_v18, %v6748_v17  ;;  %v6757_v13 = vld [vmem:[%s15195_s5 + $0x15a0] sm:$0xff]  ;;  %v8284_v16 = vpack.c.bf16 %v6695_v7, %v6693_v63  ;;  %v6698_v18 = vld [vmem:[%s15195_s5 + $0x13e8] sm:$0x1] }
 0x213   : > { %v8340_v17 = vpack.c.bf16 %v6757_v13, %v6755_v8  ;;  %v6831_v56 = vld [vmem:[%s15195_s5 + $0x17b0] sm:$0xff]  ;;  %v6776_v63 = vld [vmem:[%s15195_s5 + $0x1618] sm:$0xff]  ;;  %v6773_v13 = vld [vmem:[%s15195_s5 + $0x1600] sm:$0xff] }
 0x215   : > { %8265 = vmatpush1.bf16.msra.mxu1 %v8264_v40  ;;  %8321 = vmatpush1.bf16.msra.mxu0 %v8320_v41  ;;  %v11890_v61 = vpop.f32.mrb[6].mxu1  ;;  %v11892_v62 = vpop.f32.mrb[10].mxu0  ;;  %v6754_v40 = vld [vmem:[%s15195_s5 + $0x1588] sm:$0xff]  ;;  %v8276_v41 = vpack.c.bf16 %v6687_v24, %v6685_v23  ;;  %v6768_v23 = vld [vmem:[%s15195_s5 + $0x15d8] sm:$0xff] }
 0x216   : > { %8267 = vmatprep.subr.bf16.mxu1 %v8266_v48  ;;  %8323 = vmatprep.subr.bf16.mxu0 %v8322_v49  ;;  %v8576_v3 = vpack.c.bf16 %v11890_v61, %v11858_v42  ;;  %v8580_v6 = vpack.c.bf16 %v11892_v62, %v11860_v43  ;;  %v11910_v11 = vpop.f32.mrb[7].mxu1  ;;  %v11912_v12 = vpop.f32.mrb[11].mxu0  ;;  %v8278_v48 = vpack.c.bf16 %v6692_v38, %v6690_v37  ;;  %v6828_v24 = vld [vmem:[%s15195_s5 + $0x1798] sm:$0xff]  ;;  %v6767_v37 = vld [vmem:[%s15195_s5 + $0x15d0] sm:$0xff] }
 0x217   : > { %v8574_v14 = vpack.c.bf16 %v11910_v11, %v11874_v52  ;;  %v8578_v15 = vpack.c.bf16 %v11912_v12, %v11876_v53  ;;  %v8334_v49 = vpack.c.bf16 %v6754_v40, %v6752_v39  ;;  %v6827_v38 = vld [vmem:[%s15195_s5 + $0x1790] sm:$0xff]  ;;  %v6829_v39 = vld [vmem:[%s15195_s5 + $0x17a0] sm:$0xff] }
 0x219   : > { %8269 = vmatpush1.bf16.msra.mxu1 %v8268_v58  ;;  %8325 = vmatpush1.bf16.msra.mxu0 %v8324_v59  ;;  %v6758_v58 = vld [vmem:[%s15195_s5 + $0x15a8] sm:$0xff]  ;;  %v8280_v59 = vpack.c.bf16 %v6691_v47, %v6689_v45  ;;  %v6772_v45 = vld [vmem:[%s15195_s5 + $0x15f8] sm:$0xff] }
 0x21a   : > { %8271 = vmatprep.subr.bf16.mxu1 %v8270_v60  ;;  %8327 = vmatprep.subr.bf16.mxu0 %v8326_v2  ;;  %v8336_v60 = vpack.c.bf16 %v6753_v54, %v6751_v50  ;;  %v8338_v2 = vpack.c.bf16 %v6758_v58, %v6756_v57  ;;  %v6832_v47 = vld [vmem:[%s15195_s5 + $0x17b8] sm:$0xff]  ;;  %v8400_v50 = vpack.c.bf16 %v6829_v39, %v6827_v38  ;;  %v6769_v54 = vld [vmem:[%s15195_s5 + $0x15e0] sm:$0xff]  ;;  %v6774_v58 = vld [vmem:[%s15195_s5 + $0x1608] sm:$0xff] }
 0x21b   : > { %v6833_v57 = vld [vmem:[%s15195_s5 + $0x17c0] sm:$0xff]  ;;  %v8348_v7 = vpack.c.bf16 %v6771_v55, %v6769_v54  ;;  %v6779_v38 = vld [vmem:[%s15195_s5 + $0x1630] sm:$0xff] }
 0x21c   : > { %v8404_v8 = vpack.c.bf16 %v6833_v57, %v6831_v56  ;;  %v6781_v55 = vld [vmem:[%s15195_s5 + $0x1640] sm:$0xff]  ;;  %v6783_v56 = vld [vmem:[%s15195_s5 + $0x1650] sm:$0xff] }
 0x21d   : > { %8273 = vmatpush1.bf16.msra.mxu1 %v8272_v19  ;;  %8329 = vmatpush1.bf16.msra.mxu0 %v8328_v22  ;;  %v6760_v19 = vld [vmem:[%s15195_s5 + $0x15b8] sm:$0x1]  ;;  %v6766_v22 = vld [vmem:[%s15195_s5 + $0x15c8] sm:$0xff] }
 0x21e   : > { %8275 = vmatprep.subr.bf16.mxu1 %v8274_v25  ;;  %8331 = vmatprep.subr.bf16.mxu0 %v8330_v31  ;;  %v6830_v25 = vld [vmem:[%s15195_s5 + $0x17a8] sm:$0xff]  ;;  %v6697_v31 = vld [vmem:[%s15195_s5 + $0x13e0] sm:$0x1]  ;;  %v8342_v40 = vpack.c.bf16 %v6768_v23, %v6766_v22 }
 0x21f   : > { %v6837_v22 = vld [vmem:[%s15195_s5 + $0x17e0] sm:$0xff]  ;;  %v6778_v23 = vld [vmem:[%s15195_s5 + $0x1628] sm:$0xff] }
 0x221   : > { %8277 = vmatpush1.bf16.msra.mxu1 %v8276_v41  ;;  %8333 = vmatpush1.bf16.msra.mxu0 %v8332_v44  ;;  %v8398_v41 = vpack.c.bf16 %v6830_v25, %v6828_v24  ;;  %v6770_v44 = vld [vmem:[%s15195_s5 + $0x15e8] sm:$0xff]  ;;  %v6780_v24 = vld [vmem:[%s15195_s5 + $0x1638] sm:$0xff] }
 0x222   : > { %8279 = vmatprep.subr.bf16.mxu1 %v8278_v48  ;;  %8335 = vmatprep.subr.bf16.mxu0 %v8334_v49  ;;  %v6834_v48 = vld [vmem:[%s15195_s5 + $0x17c8] sm:$0xff]  ;;  %v8344_v49 = vpack.c.bf16 %v6767_v37, %v6765_v36  ;;  %v6840_v25 = vld [vmem:[%s15195_s5 + $0x17f8] sm:$0xff]  ;;  %v6777_v37 = vld [vmem:[%s15195_s5 + $0x1620] sm:$0xff]  ;;  %v8354_v39 = vpack.c.bf16 %v6780_v24, %v6778_v23 }
 0x223   : > { %v6849_v23 = vld [vmem:[%s15195_s5 + $0x1840] sm:$0xff]  ;;  %v6790_v24 = vld [vmem:[%s15195_s5 + $0x1688] sm:$0xff] }
 0x225   : > { %8281 = vmatpush1.bf16.msra.mxu1 %v8280_v59  ;;  %8337 = vmatpush1.bf16.msra.mxu0 %v8336_v60  ;;  %v8346_v59 = vpack.c.bf16 %v6772_v45, %v6770_v44  ;;  %v8402_v60 = vpack.c.bf16 %v6834_v48, %v6832_v47  ;;  %v6841_v44 = vld [vmem:[%s15195_s5 + $0x1800] sm:$0xff]  ;;  %v6782_v45 = vld [vmem:[%s15195_s5 + $0x1648] sm:$0xff]  ;;  %v6784_v47 = vld [vmem:[%s15195_s5 + $0x1658] sm:$0xff] }
 0x226   : > { %8283 = vmatprep.subr.bf16.mxu1 %v8282_v1  ;;  %8339 = vmatprep.subr.bf16.mxu0 %v8338_v2  ;;  %v6836_v1 = vld [vmem:[%s15195_s5 + $0x17d8] sm:$0xff]  ;;  %v6838_v2 = vld [vmem:[%s15195_s5 + $0x17e8] sm:$0xff]  ;;  %v8358_v57 = vpack.c.bf16 %v6784_v47, %v6782_v45  ;;  %v6853_v45 = vld [vmem:[%s15195_s5 + $0x1860] sm:$0xff] }
 0x227   : > { %v6844_v48 = vld [vmem:[%s15195_s5 + $0x1818] sm:$0xff]  ;;  %v6794_v47 = vld [vmem:[%s15195_s5 + $0x16a8] sm:$0xff] }
 0x229   : > { %8285 = vmatpush1.bf16.msra.mxu1 %v8284_v16  ;;  %8341 = vmatpush1.bf16.msra.mxu0 %v8340_v17  ;;  %v6775_v16 = vld [vmem:[%s15195_s5 + $0x1610] sm:$0xff]  ;;  %v8350_v17 = vpack.c.bf16 %v6776_v63, %v6774_v58  ;;  %v6786_v63 = vld [vmem:[%s15195_s5 + $0x1668] sm:$0xff] }
 0x22a   : > { %6699 = vmatprep.subr.msk.mxu1 %vm536_vm1, %v6698_v18  ;;  %6761 = vmatprep.subr.msk.mxu0 %vm536_vm1, %v6760_v19  ;;  %v8406_v18 = vpack.c.bf16 %v6838_v2, %v6836_v1  ;;  %v6835_v19 = vld [vmem:[%s15195_s5 + $0x17d0] sm:$0xff]  ;;  %v6788_v1 = vld [vmem:[%s15195_s5 + $0x1678] sm:$0xff] }
 0x22b   : > { %v8408_v36 = vpack.c.bf16 %v6837_v22, %v6835_v19  ;;  %v6848_v2 = vld [vmem:[%s15195_s5 + $0x1838] sm:$0xff]  ;;  %v6847_v22 = vld [vmem:[%s15195_s5 + $0x1830] sm:$0xff] }
 0x22d   : > { %6700 = vmatpush1.msk.msra.mxu1 %vm536_vm1, %v6697_v31  ;;  %6762 = vmatpush1.msk.msra.mxu0 %vm536_vm1, %v6759_v35  ;;  %v6842_v31 = vld [vmem:[%s15195_s5 + $0x1808] sm:$0xff]  ;;  %v8352_v35 = vpack.c.bf16 %v6775_v16, %v6773_v13  ;;  %v6785_v16 = vld [vmem:[%s15195_s5 + $0x1660] sm:$0xff] }
 0x22e   : > { %2028 = vmatmul.mubr.f32.vlgmr.msra.gmra.mrb[20].mxu1 %v10167_v33  ;;  %2170 = vmatmul.mubr.f32.vlgmr.msra.gmra.mrb[24].mxu0 %v10167_v33 }
 0x22f   : > { %8343 = vmatprep.subr.bf16.mxu1 %v8342_v40  ;;  %8399 = vmatprep.subr.bf16.mxu0 %v8398_v41  ;;  %v8410_v40 = vpack.c.bf16 %v6842_v31, %v6840_v25  ;;  %v6839_v41 = vld [vmem:[%s15195_s5 + $0x17f0] sm:$0xff]  ;;  %v6792_v25 = vld [vmem:[%s15195_s5 + $0x1698] sm:$0xff] }
 0x230   : > { %6702 = vmatprep.mubr.msk.f32.mxu1 %vm529_vm2, %v10196_v46  ;;  %6764 = vmatprep.mubr.msk.f32.mxu0 %vm529_vm2, %v10196_v46  ;;  %v8412_v54 = vpack.c.bf16 %v6841_v44, %v6839_v41  ;;  %v6852_v31 = vld [vmem:[%s15195_s5 + $0x1858] sm:$0xff]  ;;  %v6851_v44 = vld [vmem:[%s15195_s5 + $0x1850] sm:$0xff] }
 0x231   : > { %8345 = vmatpush1.bf16.msra.mxu1 %v8344_v49  ;;  %8401 = vmatpush1.bf16.msra.mxu0 %v8400_v50  ;;  %v6846_v49 = vld [vmem:[%s15195_s5 + $0x1828] sm:$0xff]  ;;  %v8356_v50 = vpack.c.bf16 %v6779_v38, %v6777_v37  ;;  %v8420_v37 = vpack.c.bf16 %v6849_v23, %v6847_v22  ;;  %v6789_v38 = vld [vmem:[%s15195_s5 + $0x1680] sm:$0xff]  ;;  %v6859_v23 = vld [vmem:[%s15195_s5 + $0x1890] sm:$0xff] }
 0x232   : > { %2034 = vmatmul.mubr.f32.gmra.mrb[22].mxu1 %v10204_v51  ;;  %2176 = vmatmul.mubr.f32.gmra.mrb[26].mxu0 %v10204_v51  ;;  %v8414_v58 = vpack.c.bf16 %v6846_v49, %v6844_v48  ;;  %v6796_v48 = vld [vmem:[%s15195_s5 + $0x16b8] sm:$0xff] }
 0x233   : > { %8347 = vmatprep.subr.bf16.mxu1 %v8346_v59  ;;  %8403 = vmatprep.subr.bf16.mxu0 %v8402_v60  ;;  %v6843_v59 = vld [vmem:[%s15195_s5 + $0x1810] sm:$0xff]  ;;  %v6845_v60 = vld [vmem:[%s15195_s5 + $0x1820] sm:$0xff]  ;;  %v6856_v49 = vld [vmem:[%s15195_s5 + $0x1878] sm:$0xff] }
 0x234   : > { %6825 = vmatprep.mubr.msk.f32.mxu1 %vm529_vm2, %v10162_v28  ;;  %6887 = vmatprep.mubr.msk.f32.mxu0 %vm529_vm2, %v10162_v28  ;;  %v8416_v13 = vpack.c.bf16 %v6845_v60, %v6843_v59  ;;  %v6855_v60 = vld [vmem:[%s15195_s5 + $0x1870] sm:$0xff] }
 0x235   : > { %8349 = vmatpush1.bf16.msra.mxu1 %v8348_v7  ;;  %8405 = vmatpush1.bf16.msra.mxu0 %v8404_v8  ;;  %v6850_v7 = vld [vmem:[%s15195_s5 + $0x1848] sm:$0xff]  ;;  %v8360_v8 = vpack.c.bf16 %v6783_v56, %v6781_v55  ;;  %v8424_v55 = vpack.c.bf16 %v6853_v45, %v6851_v44  ;;  %v6793_v56 = vld [vmem:[%s15195_s5 + $0x16a0] sm:$0xff]  ;;  %v6803_v44 = vld [vmem:[%s15195_s5 + $0x16f0] sm:$0xff] }
 0x236   : > { %8351 = vmatprep.subr.bf16.mxu1 %v8350_v17  ;;  %8407 = vmatprep.subr.bf16.mxu0 %v8406_v18  ;;  %v6787_v17 = vld [vmem:[%s15195_s5 + $0x1670] sm:$0xff]  ;;  %v8362_v18 = vpack.c.bf16 %v6788_v1, %v6786_v63  ;;  %v8418_v19 = vpack.c.bf16 %v6850_v7, %v6848_v2  ;;  %v6857_v63 = vld [vmem:[%s15195_s5 + $0x1880] sm:$0xff]  ;;  %v6798_v1 = vld [vmem:[%s15195_s5 + $0x16c8] sm:$0xff] }
 0x237   : > { %v6800_v2 = vld [vmem:[%s15195_s5 + $0x16d8] sm:$0xff]  ;;  %v6863_v45 = vld [vmem:[%s15195_s5 + $0x18b0] sm:$0xff] }
 0x238   : > { %v6860_v7 = vld [vmem:[%s15195_s5 + $0x1898] sm:$0xff] }
 0x239   : > { %8353 = vmatpush1.bf16.msra.mxu1 %v8352_v35  ;;  %8409 = vmatpush1.bf16.msra.mxu0 %v8408_v36  ;;  %v6854_v35 = vld [vmem:[%s15195_s5 + $0x1868] sm:$0xff]  ;;  %v8364_v36 = vpack.c.bf16 %v6787_v17, %v6785_v16  ;;  %v8428_v16 = vpack.c.bf16 %v6857_v63, %v6855_v60  ;;  %v6797_v17 = vld [vmem:[%s15195_s5 + $0x16c0] sm:$0xff] }
 0x23a   : > { %8355 = vmatprep.subr.bf16.mxu1 %v8354_v39  ;;  %8411 = vmatprep.subr.bf16.mxu0 %v8410_v40  ;;  %v6791_v39 = vld [vmem:[%s15195_s5 + $0x1690] sm:$0xff]  ;;  %v8366_v40 = vpack.c.bf16 %v6792_v25, %v6790_v24  ;;  %v8422_v41 = vpack.c.bf16 %v6854_v35, %v6852_v31  ;;  %v6861_v24 = vld [vmem:[%s15195_s5 + $0x18a0] sm:$0xff]  ;;  %v6802_v25 = vld [vmem:[%s15195_s5 + $0x16e8] sm:$0xff] }
 0x23b   : > { %v6804_v31 = vld [vmem:[%s15195_s5 + $0x16f8] sm:$0xff] }
 0x23c   : > { %v6864_v35 = vld [vmem:[%s15195_s5 + $0x18b8] sm:$0xff] }
 0x23d   : > { %8357 = vmatpush1.bf16.msra.mxu1 %v8356_v50  ;;  %8413 = vmatpush1.bf16.msra.mxu0 %v8412_v54  ;;  %v6858_v50 = vld [vmem:[%s15195_s5 + $0x1888] sm:$0xff]  ;;  %v8368_v54 = vpack.c.bf16 %v6791_v39, %v6789_v38  ;;  %v8432_v38 = vpack.c.bf16 %v6861_v24, %v6859_v23 }
 0x23e   : > { %8359 = vmatprep.subr.bf16.mxu1 %v8358_v57  ;;  %8415 = vmatprep.subr.bf16.mxu0 %v8414_v58  ;;  %v6795_v57 = vld [vmem:[%s15195_s5 + $0x16b0] sm:$0xff]  ;;  %v8370_v58 = vpack.c.bf16 %v6796_v48, %v6794_v47  ;;  %v8426_v59 = vpack.c.bf16 %v6858_v50, %v6856_v49  ;;  %v8378_v47 = vpack.c.bf16 %v6804_v31, %v6802_v25  ;;  %v6865_v49 = vld [vmem:[%s15195_s5 + $0x18c0] sm:$0xff]  ;;  %v6810_v24 = vld [vmem:[%s15195_s5 + $0x1728] sm:$0xff] }
 0x23f   : > { %v8436_v60 = vpack.c.bf16 %v6865_v49, %v6863_v45  ;;  %v6811_v45 = vld [vmem:[%s15195_s5 + $0x1730] sm:$0xff] }
 0x240   : > { %v6871_v49 = vld [vmem:[%s15195_s5 + $0x18f0] sm:$0xff] }
 0x241   : > { %8361 = vmatpush1.bf16.msra.mxu1 %v8360_v8  ;;  %8417 = vmatpush1.bf16.msra.mxu0 %v8416_v13  ;;  %v6862_v8 = vld [vmem:[%s15195_s5 + $0x18a8] sm:$0xff]  ;;  %v8372_v13 = vpack.c.bf16 %v6795_v57, %v6793_v56  ;;  %v6808_v56 = vld [vmem:[%s15195_s5 + $0x1718] sm:$0xff]  ;;  %v6995_v31 = vld [vmem:[%s15195_s5 + $0x1c90] sm:$0xff] }
 0x242   : > { %8363 = vmatprep.subr.bf16.mxu1 %v8362_v18  ;;  %8419 = vmatprep.subr.bf16.mxu0 %v8418_v19  ;;  %v6799_v18 = vld [vmem:[%s15195_s5 + $0x16d0] sm:$0xff]  ;;  %v8374_v19 = vpack.c.bf16 %v6800_v2, %v6798_v1  ;;  %v8430_v22 = vpack.c.bf16 %v6862_v8, %v6860_v7  ;;  %v6868_v57 = vld [vmem:[%s15195_s5 + $0x18d8] sm:$0xff]  ;;  %v6805_v7 = vld [vmem:[%s15195_s5 + $0x1700] sm:$0xff] }
 0x243   : > { %v6807_v8 = vld [vmem:[%s15195_s5 + $0x1710] sm:$0xff] }
 0x245   : > { %8365 = vmatpush1.bf16.msra.mxu1 %v8364_v36  ;;  %8421 = vmatpush1.bf16.msra.mxu0 %v8420_v37  ;;  %v6866_v36 = vld [vmem:[%s15195_s5 + $0x18c8] sm:$0xff]  ;;  %v8376_v37 = vpack.c.bf16 %v6799_v18, %v6797_v17  ;;  %v6867_v18 = vld [vmem:[%s15195_s5 + $0x18d0] sm:$0xff] }
 0x246   : > { %8367 = vmatprep.subr.bf16.mxu1 %v8366_v40  ;;  %8423 = vmatprep.subr.bf16.mxu0 %v8422_v41  ;;  %v6801_v41 = vld [vmem:[%s15195_s5 + $0x16e0] sm:$0xff]  ;;  %v8434_v48 = vpack.c.bf16 %v6866_v36, %v6864_v35  ;;  %v6812_v35 = vld [vmem:[%s15195_s5 + $0x1738] sm:$0xff] }
 0x247   : > { %v6872_v36 = vld [vmem:[%s15195_s5 + $0x18f8] sm:$0xff] }
 0x249   : > { %8369 = vmatpush1.bf16.msra.mxu1 %v8368_v54  ;;  %8425 = vmatpush1.bf16.msra.mxu0 %v8424_v55  ;;  %v6806_v55 = vld [vmem:[%s15195_s5 + $0x1708] sm:$0xff] }
 0x24a   : > { %8371 = vmatprep.subr.bf16.mxu1 %v8370_v58  ;;  %8427 = vmatprep.subr.bf16.mxu0 %v8426_v59  ;;  %v6870_v58 = vld [vmem:[%s15195_s5 + $0x18e8] sm:$0xff]  ;;  %v8380_v59 = vpack.c.bf16 %v6803_v44, %v6801_v41  ;;  %v8382_v63 = vpack.c.bf16 %v6808_v56, %v6806_v55  ;;  %v6809_v44 = vld [vmem:[%s15195_s5 + $0x1720] sm:$0xff] }
 0x24b   : > { %v6873_v55 = vld [vmem:[%s15195_s5 + $0x1900] sm:$0xff]  ;;  %v6814_v56 = vld [vmem:[%s15195_s5 + $0x1748] sm:$0xff] }
 0x24d   : > { %8373 = vmatpush1.bf16.msra.mxu1 %v8372_v13  ;;  %8429 = vmatpush1.bf16.msra.mxu0 %v8428_v16  ;;  %v12246_v39 = vpop.f32.mrb[8].mxu1  ;;  %v12248_v40 = vpop.f32.mrb[12].mxu0  ;;  %v8438_v13 = vpack.c.bf16 %v6870_v58, %v6868_v57  ;;  %v6816_v57 = vld [vmem:[%s15195_s5 + $0x1758] sm:$0xff] }
 0x24e   : > { %8375 = vmatprep.subr.bf16.mxu1 %v8374_v19  ;;  %8431 = vmatprep.subr.bf16.mxu0 %v8430_v22  ;;  %v12262_v50 = vpop.f32.mrb[9].mxu1  ;;  %v12264_v54 = vpop.f32.mrb[13].mxu0  ;;  %v6869_v19 = vld [vmem:[%s15195_s5 + $0x18e0] sm:$0xff]  ;;  %v6876_v58 = vld [vmem:[%s15195_s5 + $0x1918] sm:$0xff] }
 0x24f   : > { %v8440_v41 = vpack.c.bf16 %v6869_v19, %v6867_v18  ;;  %v6875_v19 = vld [vmem:[%s15195_s5 + $0x1910] sm:$0xff] }
 0x251   : > { %8377 = vmatpush1.bf16.msra.mxu1 %v8376_v37  ;;  %8433 = vmatpush1.bf16.msra.mxu0 %v8432_v38  ;;  %v12278_v1 = vpop.f32.mrb[10].mxu1  ;;  %v12280_v2 = vpop.f32.mrb[14].mxu0  ;;  %v6874_v37 = vld [vmem:[%s15195_s5 + $0x1908] sm:$0xff]  ;;  %v8384_v38 = vpack.c.bf16 %v6807_v8, %v6805_v7  ;;  %v6813_v7 = vld [vmem:[%s15195_s5 + $0x1740] sm:$0xff]  ;;  %v6815_v8 = vld [vmem:[%s15195_s5 + $0x1750] sm:$0xff] }
 0x252   : > { %8379 = vmatprep.subr.bf16.mxu1 %v8378_v47  ;;  %8435 = vmatprep.subr.bf16.mxu0 %v8434_v48  ;;  %v8584_v16 = vpack.c.bf16 %v12278_v1, %v12246_v39  ;;  %v12298_v22 = vpop.f32.mrb[11].mxu1  ;;  %v12300_v23 = vpop.f32.mrb[15].mxu0  ;;  %v8386_v47 = vpack.c.bf16 %v6812_v35, %v6810_v24  ;;  %v8442_v48 = vpack.c.bf16 %v6874_v37, %v6872_v36  ;;  %v6877_v24 = vld [vmem:[%s15195_s5 + $0x1920] sm:$0xff]  ;;  %v6818_v35 = vld [vmem:[%s15195_s5 + $0x1768] sm:$0xff]  ;;  %v6820_v36 = vld [vmem:[%s15195_s5 + $0x1778] sm:$0xff] }
 0x253   : > { %v8582_v25 = vpack.c.bf16 %v12298_v22, %v12262_v50  ;;  %v6880_v37 = vld [vmem:[%s15195_s5 + $0x1938] sm:$0xff]  ;;  %v2758_v1 = vld [vmem:[%s15194_s4] sm:$0xff] }
 0x254   : > { %2764 = vperm.xlu1 %9563, %v2758_v1   ;;  %v7014_v22 = vld [vmem:[%s15196_s6 + $0x98] sm:$0xff]  ;;  %v7039_v1 = vld [vmem:[%s15196_s6 + $0x150] sm:$0xff] }
 0x255   : > { %8381 = vmatpush1.bf16.msra.mxu1 %v8380_v59  ;;  %8437 = vmatpush1.bf16.msra.mxu0 %v8436_v60  ;;  %v6878_v59 = vld [vmem:[%s15195_s5 + $0x1928] sm:$0xff]  ;;  %v8388_v60 = vpack.c.bf16 %v6811_v45, %v6809_v44  ;;  %v8448_v44 = vpack.c.bf16 %v6877_v24, %v6875_v19  ;;  %v6817_v45 = vld [vmem:[%s15195_s5 + $0x1760] sm:$0xff]  ;;  %v6883_v19 = vld [vmem:[%s15195_s5 + $0x1950] sm:$0x1] }
 0x256   : > { %8383 = vmatprep.subr.bf16.mxu1 %v8382_v63  ;;  %8439 = vmatprep.subr.bf16.mxu0 %v8438_v13  ;;  %v8444_v63 = vpack.c.bf16 %v6873_v55, %v6871_v49  ;;  %v8390_v13 = vpack.c.bf16 %v6816_v57, %v6814_v56  ;;  %v8446_v18 = vpack.c.bf16 %v6878_v59, %v6876_v58  ;;  %v6819_v49 = vld [vmem:[%s15195_s5 + $0x1770] sm:$0xff]  ;;  %v6881_v56 = vld [vmem:[%s15195_s5 + $0x1940] sm:$0xff]  ;;  %v6822_v59 = vld [vmem:[%s15195_s5 + $0x1788] sm:$0x1] }
 0x257   : > { %v6879_v55 = vld [vmem:[%s15195_s5 + $0x1930] sm:$0xff]  ;;  %v8396_v57 = vpack.c.bf16 %v6819_v49, %v6817_v45  ;;  %v6889_v24 = vld [vmem:[%s15195_s5 + $0x1960] sm:$0xff]  ;;  %v6896_v45 = vld [vmem:[%s15195_s5 + $0x1998] sm:$0xff] }
 0x258   : > { %v8452_v58 = vpack.c.bf16 %v6881_v56, %v6879_v55  ;;  %v6893_v56 = vld [vmem:[%s15195_s5 + $0x1980] sm:$0xff] }
 0x259   : > { %8385 = vmatpush1.bf16.msra.mxu1 %v8384_v38  ;;  %8441 = vmatpush1.bf16.msra.mxu0 %v8440_v41  ;;  %v6882_v38 = vld [vmem:[%s15195_s5 + $0x1948] sm:$0xff]  ;;  %v8392_v41 = vpack.c.bf16 %v6815_v8, %v6813_v7  ;;  %v6892_v7 = vld [vmem:[%s15195_s5 + $0x1978] sm:$0xff] }
 0x25a   : > { %8387 = vmatprep.subr.bf16.mxu1 %v8386_v47  ;;  %8443 = vmatprep.subr.bf16.mxu0 %v8442_v48  ;;  %v8394_v47 = vpack.c.bf16 %v6820_v36, %v6818_v35  ;;  %v8450_v48 = vpack.c.bf16 %v6882_v38, %v6880_v37  ;;  %v6952_v8 = vld [vmem:[%s15195_s5 + $0x1b38] sm:$0xff]  ;;  %v6891_v35 = vld [vmem:[%s15195_s5 + $0x1970] sm:$0xff]  ;;  %v6953_v37 = vld [vmem:[%s15195_s5 + $0x1b40] sm:$0xff] }
 0x25b   : > { %v6951_v36 = vld [vmem:[%s15195_s5 + $0x1b30] sm:$0xff]  ;;  %v8456_v49 = vpack.c.bf16 %v6891_v35, %v6889_v24  ;;  %v6897_v35 = vld [vmem:[%s15195_s5 + $0x19a0] sm:$0xff] }
 0x25c   : > { %v8512_v55 = vpack.c.bf16 %v6953_v37, %v6951_v36  ;;  %v6899_v36 = vld [vmem:[%s15195_s5 + $0x19b0] sm:$0xff] }
 0x25d   : > { %8389 = vmatpush1.bf16.msra.mxu1 %v8388_v60  ;;  %8445 = vmatpush1.bf16.msra.mxu0 %v8444_v63  ;;  %v6884_v60 = vld [vmem:[%s15195_s5 + $0x1958] sm:$0x1]  ;;  %v6890_v63 = vld [vmem:[%s15195_s5 + $0x1968] sm:$0xff] }
 0x25e   : > { %8391 = vmatprep.subr.bf16.mxu1 %v8390_v13  ;;  %8447 = vmatprep.subr.bf16.mxu0 %v8446_v18  ;;  %v6954_v13 = vld [vmem:[%s15195_s5 + $0x1b48] sm:$0xff]  ;;  %v6821_v18 = vld [vmem:[%s15195_s5 + $0x1780] sm:$0x1]  ;;  %v8454_v38 = vpack.c.bf16 %v6892_v7, %v6890_v63 }
 0x261   : > { %8393 = vmatpush1.bf16.msra.mxu1 %v8392_v41  ;;  %8449 = vmatpush1.bf16.msra.mxu0 %v8448_v44  ;;  %v8510_v41 = vpack.c.bf16 %v6954_v13, %v6952_v8  ;;  %v6894_v44 = vld [vmem:[%s15195_s5 + $0x1988] sm:$0xff]  ;;  %v6900_v8 = vld [vmem:[%s15195_s5 + $0x19b8] sm:$0xff] }
 0x262   : > { %8395 = vmatprep.subr.bf16.mxu1 %v8394_v47  ;;  %8451 = vmatprep.subr.bf16.mxu0 %v8450_v48  ;;  %v6956_v47 = vld [vmem:[%s15195_s5 + $0x1b58] sm:$0xff]  ;;  %v6958_v48 = vld [vmem:[%s15195_s5 + $0x1b68] sm:$0xff]  ;;  %v8458_v63 = vpack.c.bf16 %v6896_v45, %v6894_v44  ;;  %v6961_v44 = vld [vmem:[%s15195_s5 + $0x1b80] sm:$0xff] }
 0x263   : > { %v8514_v7 = vpack.c.bf16 %v6958_v48, %v6956_v47  ;;  %v6960_v13 = vld [vmem:[%s15195_s5 + $0x1b78] sm:$0xff]  ;;  %v6902_v45 = vld [vmem:[%s15195_s5 + $0x19c8] sm:$0xff] }
 0x264   : > { %v6904_v47 = vld [vmem:[%s15195_s5 + $0x19d8] sm:$0xff] }
 0x265   : > { %8397 = vmatpush1.bf16.msra.mxu1 %v8396_v57  ;;  %8453 = vmatpush1.bf16.msra.mxu0 %v8452_v58  ;;  %v6895_v57 = vld [vmem:[%s15195_s5 + $0x1990] sm:$0xff]  ;;  %v6964_v48 = vld [vmem:[%s15195_s5 + $0x1b98] sm:$0xff] }
 0x266   : > { %6823 = vmatprep.subr.msk.mxu1 %vm536_vm1, %v6822_v59  ;;  %6885 = vmatprep.subr.msk.mxu0 %vm536_vm1, %v6884_v60  ;;  %v6955_v58 = vld [vmem:[%s15195_s5 + $0x1b50] sm:$0xff]  ;;  %v6957_v59 = vld [vmem:[%s15195_s5 + $0x1b60] sm:$0xff]  ;;  %v6898_v60 = vld [vmem:[%s15195_s5 + $0x19a8] sm:$0xff] }
 0x267   : > { %v8516_v24 = vpack.c.bf16 %v6957_v59, %v6955_v58  ;;  %v8462_v37 = vpack.c.bf16 %v6900_v8, %v6898_v60  ;;  %v6903_v58 = vld [vmem:[%s15195_s5 + $0x19d0] sm:$0xff]  ;;  %v8466_v59 = vpack.c.bf16 %v6904_v47, %v6902_v45  ;;  %v6908_v8 = vld [vmem:[%s15195_s5 + $0x19f8] sm:$0xff]  ;;  %v6910_v45 = vld [vmem:[%s15195_s5 + $0x1a08] sm:$0xff] }
 0x268   : > { %v6912_v47 = vld [vmem:[%s15195_s5 + $0x1a18] sm:$0xff] }
 0x269   : > { %6824 = vmatpush1.msk.msra.mxu1 %vm536_vm1, %v6821_v18  ;;  %6886 = vmatpush1.msk.msra.mxu0 %vm536_vm1, %v6883_v19  ;;  %v6962_v18 = vld [vmem:[%s15195_s5 + $0x1b88] sm:$0xff]  ;;  %v8460_v19 = vpack.c.bf16 %v6895_v57, %v6893_v56  ;;  %v6901_v57 = vld [vmem:[%s15195_s5 + $0x19c0] sm:$0xff] }
 0x26a   : > { %2312 = vmatmul.mubr.f32.vlgmr.msra.gmra.mrb[24].mxu1 %v10167_v33  ;;  %2454 = vmatmul.mubr.f32.vlgmr.msra.gmra.mrb[28].mxu0 %v10167_v33 }
 0x26b   : > { %8455 = vmatprep.subr.bf16.mxu1 %v8454_v38  ;;  %8511 = vmatprep.subr.bf16.mxu0 %v8510_v41  ;;  %v8518_v38 = vpack.c.bf16 %v6962_v18, %v6960_v13  ;;  %v6959_v41 = vld [vmem:[%s15195_s5 + $0x1b70] sm:$0xff]  ;;  %v6968_v13 = vld [vmem:[%s15195_s5 + $0x1bb8] sm:$0xff]  ;;  %v6970_v18 = vld [vmem:[%s15195_s5 + $0x1bc8] sm:$0xff] }
 0x26c   : > { %6826 = vmatprep.mubr.msk.f32.mxu1 %vm529_vm2, %v10196_v46  ;;  %6888 = vmatprep.mubr.msk.f32.mxu0 %vm529_vm2, %v10196_v46  ;;  %v8520_v56 = vpack.c.bf16 %v6961_v44, %v6959_v41  ;;  %v6967_v41 = vld [vmem:[%s15195_s5 + $0x1bb0] sm:$0xff]  ;;  %v6969_v44 = vld [vmem:[%s15195_s5 + $0x1bc0] sm:$0xff] }
 0x26d   : > { %8457 = vmatpush1.bf16.msra.mxu1 %v8456_v49  ;;  %8513 = vmatpush1.bf16.msra.mxu0 %v8512_v55  ;;  %v6966_v49 = vld [vmem:[%s15195_s5 + $0x1ba8] sm:$0xff]  ;;  %v8464_v55 = vpack.c.bf16 %v6899_v36, %v6897_v35  ;;  %v6905_v35 = vld [vmem:[%s15195_s5 + $0x19e0] sm:$0xff]  ;;  %v6907_v36 = vld [vmem:[%s15195_s5 + $0x19f0] sm:$0xff] }
 0x26e   : > { %2318 = vmatmul.mubr.f32.gmra.mrb[26].mxu1 %v10204_v51  ;;  %2460 = vmatmul.mubr.f32.gmra.mrb[30].mxu0 %v10204_v51  ;;  %v8522_v60 = vpack.c.bf16 %v6966_v49, %v6964_v48  ;;  %v6972_v48 = vld [vmem:[%s15195_s5 + $0x1bd8] sm:$0xff]  ;;  %v6974_v49 = vld [vmem:[%s15195_s5 + $0x1be8] sm:$0xff] }
 0x26f   : > { %8459 = vmatprep.subr.bf16.mxu1 %v8458_v63  ;;  %8515 = vmatprep.subr.bf16.mxu0 %v8514_v7  ;;  %v6965_v63 = vld [vmem:[%s15195_s5 + $0x1ba0] sm:$0xff]  ;;  %v6906_v7 = vld [vmem:[%s15195_s5 + $0x19e8] sm:$0xff] }
 0x270   : > { %6949 = vmatprep.mubr.msk.f32.mxu1 %vm529_vm2, %v10162_v28  ;;  %7011 = vmatprep.mubr.msk.f32.mxu0 %vm529_vm2, %v10162_v28  ;;  %v6963_v28 = vld [vmem:[%s15195_s5 + $0x1b90] sm:$0xff] }
 0x271   : > { %8461 = vmatpush1.bf16.msra.mxu1 %v8460_v19  ;;  %8517 = vmatpush1.bf16.msra.mxu0 %v8516_v24  ;;  %v8468_v19 = vpack.c.bf16 %v6903_v58, %v6901_v57  ;;  %v8524_v24 = vpack.c.bf16 %v6965_v63, %v6963_v28  ;;  %v6909_v57 = vld [vmem:[%s15195_s5 + $0x1a00] sm:$0xff]  ;;  %v6911_v58 = vld [vmem:[%s15195_s5 + $0x1a10] sm:$0xff] }
 0x272   : > { %8463 = vmatprep.subr.bf16.mxu1 %v8462_v37  ;;  %8519 = vmatprep.subr.bf16.mxu0 %v8518_v38  ;;  %v8470_v37 = vpack.c.bf16 %v6908_v8, %v6906_v7  ;;  %v8526_v38 = vpack.c.bf16 %v6970_v18, %v6968_v13  ;;  %v6971_v28 = vld [vmem:[%s15195_s5 + $0x1bd0] sm:$0xff]  ;;  %v6973_v63 = vld [vmem:[%s15195_s5 + $0x1be0] sm:$0xff]  ;;  %v6914_v7 = vld [vmem:[%s15195_s5 + $0x1a28] sm:$0xff] }
 0x273   : > { %v6916_v8 = vld [vmem:[%s15195_s5 + $0x1a38] sm:$0xff]  ;;  %v6978_v18 = vld [vmem:[%s15195_s5 + $0x1c08] sm:$0xff] }
 0x274   : > { %v6976_v13 = vld [vmem:[%s15195_s5 + $0x1bf8] sm:$0xff] }
 0x275   : > { %8465 = vmatpush1.bf16.msra.mxu1 %v8464_v55  ;;  %8521 = vmatpush1.bf16.msra.mxu0 %v8520_v56  ;;  %v8472_v55 = vpack.c.bf16 %v6907_v36, %v6905_v35  ;;  %v8528_v56 = vpack.c.bf16 %v6969_v44, %v6967_v41  ;;  %v6913_v35 = vld [vmem:[%s15195_s5 + $0x1a20] sm:$0xff]  ;;  %v6915_v36 = vld [vmem:[%s15195_s5 + $0x1a30] sm:$0xff] }
 0x276   : > { %8467 = vmatprep.subr.bf16.mxu1 %v8466_v59  ;;  %8523 = vmatprep.subr.bf16.mxu0 %v8522_v60  ;;  %v8474_v59 = vpack.c.bf16 %v6912_v47, %v6910_v45  ;;  %v8530_v60 = vpack.c.bf16 %v6974_v49, %v6972_v48  ;;  %v6975_v41 = vld [vmem:[%s15195_s5 + $0x1bf0] sm:$0xff]  ;;  %v6977_v44 = vld [vmem:[%s15195_s5 + $0x1c00] sm:$0xff]  ;;  %v6918_v45 = vld [vmem:[%s15195_s5 + $0x1a48] sm:$0xff] }
 0x277   : > { %v6920_v47 = vld [vmem:[%s15195_s5 + $0x1a58] sm:$0xff]  ;;  %v6982_v49 = vld [vmem:[%s15195_s5 + $0x1c28] sm:$0xff] }
 0x278   : > { %v6980_v48 = vld [vmem:[%s15195_s5 + $0x1c18] sm:$0xff] }
 0x279   : > { %8469 = vmatpush1.bf16.msra.mxu1 %v8468_v19  ;;  %8525 = vmatpush1.bf16.msra.mxu0 %v8524_v24  ;;  %v8476_v19 = vpack.c.bf16 %v6911_v58, %v6909_v57  ;;  %v8532_v24 = vpack.c.bf16 %v6973_v63, %v6971_v28  ;;  %v6917_v57 = vld [vmem:[%s15195_s5 + $0x1a40] sm:$0xff]  ;;  %v6919_v58 = vld [vmem:[%s15195_s5 + $0x1a50] sm:$0xff] }
 0x27a   : > { %8471 = vmatprep.subr.bf16.mxu1 %v8470_v37  ;;  %8527 = vmatprep.subr.bf16.mxu0 %v8526_v38  ;;  %v8478_v37 = vpack.c.bf16 %v6916_v8, %v6914_v7  ;;  %v8534_v38 = vpack.c.bf16 %v6978_v18, %v6976_v13  ;;  %v6979_v28 = vld [vmem:[%s15195_s5 + $0x1c10] sm:$0xff]  ;;  %v6981_v63 = vld [vmem:[%s15195_s5 + $0x1c20] sm:$0xff]  ;;  %v6922_v7 = vld [vmem:[%s15195_s5 + $0x1a68] sm:$0xff] }
 0x27b   : > { %v6924_v8 = vld [vmem:[%s15195_s5 + $0x1a78] sm:$0xff]  ;;  %v6986_v18 = vld [vmem:[%s15195_s5 + $0x1c48] sm:$0xff] }
 0x27c   : > { %v6984_v13 = vld [vmem:[%s15195_s5 + $0x1c38] sm:$0xff] }
 0x27d   : > { %8473 = vmatpush1.bf16.msra.mxu1 %v8472_v55  ;;  %8529 = vmatpush1.bf16.msra.mxu0 %v8528_v56  ;;  %v8480_v55 = vpack.c.bf16 %v6915_v36, %v6913_v35  ;;  %v8536_v56 = vpack.c.bf16 %v6977_v44, %v6975_v41  ;;  %v6921_v35 = vld [vmem:[%s15195_s5 + $0x1a60] sm:$0xff]  ;;  %v6923_v36 = vld [vmem:[%s15195_s5 + $0x1a70] sm:$0xff] }
 0x27e   : > { %8475 = vmatprep.subr.bf16.mxu1 %v8474_v59  ;;  %8531 = vmatprep.subr.bf16.mxu0 %v8530_v60  ;;  %v8482_v59 = vpack.c.bf16 %v6920_v47, %v6918_v45  ;;  %v8538_v60 = vpack.c.bf16 %v6982_v49, %v6980_v48  ;;  %v6983_v41 = vld [vmem:[%s15195_s5 + $0x1c30] sm:$0xff]  ;;  %v6985_v44 = vld [vmem:[%s15195_s5 + $0x1c40] sm:$0xff]  ;;  %v6926_v45 = vld [vmem:[%s15195_s5 + $0x1a88] sm:$0xff] }
 0x27f   : > { %v6928_v47 = vld [vmem:[%s15195_s5 + $0x1a98] sm:$0xff]  ;;  %v6990_v49 = vld [vmem:[%s15195_s5 + $0x1c68] sm:$0xff] }
 0x280   : > { %v6988_v48 = vld [vmem:[%s15195_s5 + $0x1c58] sm:$0xff] }
 0x281   : > { %8477 = vmatpush1.bf16.msra.mxu1 %v8476_v19  ;;  %8533 = vmatpush1.bf16.msra.mxu0 %v8532_v24  ;;  %v8484_v19 = vpack.c.bf16 %v6919_v58, %v6917_v57  ;;  %v8540_v24 = vpack.c.bf16 %v6981_v63, %v6979_v28  ;;  %v6987_v28 = vld [vmem:[%s15195_s5 + $0x1c50] sm:$0xff]  ;;  %v8490_v63 = vpack.c.bf16 %v6928_v47, %v6926_v45  ;;  %v6929_v47 = vld [vmem:[%s15195_s5 + $0x1aa0] sm:$0xff] }
 0x282   : > { %8479 = vmatprep.subr.bf16.mxu1 %v8478_v37  ;;  %8535 = vmatprep.subr.bf16.mxu0 %v8534_v38  ;;  %v8486_v37 = vpack.c.bf16 %v6924_v8, %v6922_v7  ;;  %v8542_v38 = vpack.c.bf16 %v6986_v18, %v6984_v13  ;;  %v8546_v7 = vpack.c.bf16 %v6990_v49, %v6988_v48  ;;  %v6989_v8 = vld [vmem:[%s15195_s5 + $0x1c60] sm:$0xff]  ;;  %v6931_v48 = vld [vmem:[%s15195_s5 + $0x1ab0] sm:$0xff] }
 0x283   : > { %v8496_v0 = vpack.c.bf16 %v6931_v48, %v6929_v47  ;;  %v6940_v47 = vld [vmem:[%s15195_s5 + $0x1af8] sm:$0xff]  ;;  %v7002_v48 = vld [vmem:[%s15195_s5 + $0x1cc8] sm:$0xff] }
 0x285   : > { %8481 = vmatpush1.bf16.msra.mxu1 %v8480_v55  ;;  %8537 = vmatpush1.bf16.msra.mxu0 %v8536_v56  ;;  %v8488_v55 = vpack.c.bf16 %v6923_v36, %v6921_v35  ;;  %v8544_v56 = vpack.c.bf16 %v6985_v44, %v6983_v41  ;;  %v6992_v35 = vld [vmem:[%s15195_s5 + $0x1c78] sm:$0xff]  ;;  %v6994_v36 = vld [vmem:[%s15195_s5 + $0x1c88] sm:$0xff] }
 0x286   : > { %8483 = vmatprep.subr.bf16.mxu1 %v8482_v59  ;;  %8539 = vmatprep.subr.bf16.mxu0 %v8538_v60  ;;  %v6925_v59 = vld [vmem:[%s15195_s5 + $0x1a80] sm:$0xff]  ;;  %v6927_v60 = vld [vmem:[%s15195_s5 + $0x1a90] sm:$0xff]  ;;  %v8550_v49 = vpack.c.bf16 %v6994_v36, %v6992_v35  ;;  %v6996_v35 = vld [vmem:[%s15195_s5 + $0x1c98] sm:$0xff] }
 0x287   : > { %v6998_v36 = vld [vmem:[%s15195_s5 + $0x1ca8] sm:$0xff] }
 0x288   : > { %v8554_v17 = vpack.c.bf16 %v6998_v36, %v6996_v35  ;;  %v6999_v36 = vld [vmem:[%s15195_s5 + $0x1cb0] sm:$0xff] }
 0x289   : > { %8485 = vmatpush1.bf16.msra.mxu1 %v8484_v19  ;;  %8541 = vmatpush1.bf16.msra.mxu0 %v8540_v24  ;;  %v12634_v57 = vpop.f32.mrb[12].mxu1  ;;  %v12636_v58 = vpop.f32.mrb[16].mxu0  ;;  %v6930_v19 = vld [vmem:[%s15195_s5 + $0x1aa8] sm:$0xff]  ;;  %v6932_v24 = vld [vmem:[%s15195_s5 + $0x1ab8] sm:$0xff] }
 0x28a   : > { %8487 = vmatprep.subr.bf16.mxu1 %v8486_v37  ;;  %8543 = vmatprep.subr.bf16.mxu0 %v8542_v38  ;;  %v12650_v13 = vpop.f32.mrb[13].mxu1  ;;  %v12652_v18 = vpop.f32.mrb[17].mxu0  ;;  %v8492_v37 = vpack.c.bf16 %v6927_v60, %v6925_v59  ;;  %v8548_v38 = vpack.c.bf16 %v6989_v8, %v6987_v28  ;;  %v8494_v41 = vpack.c.bf16 %v6932_v24, %v6930_v19  ;;  %v6991_v59 = vld [vmem:[%s15195_s5 + $0x1c70] sm:$0xff]  ;;  %v6993_v60 = vld [vmem:[%s15195_s5 + $0x1c80] sm:$0xff]  ;;  %v6936_v24 = vld [vmem:[%s15195_s5 + $0x1ad8] sm:$0xff] }
 0x28b   : > { %v6933_v19 = vld [vmem:[%s15195_s5 + $0x1ac0] sm:$0xff] }
 0x28d   : > { %8489 = vmatpush1.bf16.msra.mxu1 %v8488_v55  ;;  %8545 = vmatpush1.bf16.msra.mxu0 %v8544_v56  ;;  %v12666_v44 = vpop.f32.mrb[14].mxu1  ;;  %v12668_v45 = vpop.f32.mrb[18].mxu0  ;;  %v8552_v56 = vpack.c.bf16 %v6993_v60, %v6991_v59  ;;  %v6935_v55 = vld [vmem:[%s15195_s5 + $0x1ad0] sm:$0xff]  ;;  %v6937_v60 = vld [vmem:[%s15195_s5 + $0x1ae0] sm:$0xff] }
 0x28e   : > { %8491 = vmatprep.subr.bf16.mxu1 %v8490_v63  ;;  %8547 = vmatprep.subr.bf16.mxu0 %v8546_v7  ;;  %v12686_v28 = vpop.f32.mrb[15].mxu1  ;;  %v12688_v8 = vpop.f32.mrb[19].mxu0  ;;  %v6934_v63 = vld [vmem:[%s15195_s5 + $0x1ac8] sm:$0xff]  ;;  %v15208_v4 = vpack.c.bf16 %v12666_v44, %v12634_v57  ;;  %v15210_v9 = vpack.c.bf16 %v12668_v45, %v12636_v58  ;;  %v7015_v57 = vld [vmem:[%s15196_s6 + $0xa0] sm:$0xff]  ;;  %v7018_v44 = vld [vmem:[%s15196_s6 + $0xb8] sm:$0xff] }
 0x28f   : > { %v8498_v7 = vpack.c.bf16 %v6936_v24, %v6934_v63  ;;  %v6939_v63 = vld [vmem:[%s15195_s5 + $0x1af0] sm:$0xff]  ;;  %v15209_v5 = vpack.c.bf16 %v12688_v8, %v12652_v18  ;;  %v7016_v58 = vld [vmem:[%s15196_s6 + $0xa8] sm:$0xff]  ;;  %v2761_v45 = vld [vmem:[%s15194_s4 + $0x18] sm:$0xff] }
 0x290   : > { %v7017_v18 = vld [vmem:[%s15196_s6 + $0xb0] sm:$0xff]  ;;  %v7019_v8 = vld [vmem:[%s15196_s6 + $0xc0] sm:$0xff] }
 0x291   : > { %8493 = vmatpush1.bf16.msra.mxu1 %v8492_v37  ;;  %8549 = vmatpush1.bf16.msra.mxu0 %v8548_v38  ;;  %v6997_v37 = vld [vmem:[%s15195_s5 + $0x1ca0] sm:$0xff]  ;;  %v6938_v38 = vld [vmem:[%s15195_s5 + $0x1ae8] sm:$0xff] }
 0x292   : > { %8495 = vmatprep.subr.bf16.mxu1 %v8494_v41  ;;  %8551 = vmatprep.subr.bf16.mxu0 %v8550_v49  ;;  %v7000_v41 = vld [vmem:[%s15195_s5 + $0x1cb8] sm:$0xff]  ;;  %v8500_v49 = vpack.c.bf16 %v6935_v55, %v6933_v19  ;;  %v8556_v59 = vpack.c.bf16 %v6997_v37, %v6995_v31  ;;  %v8502_v24 = vpack.c.bf16 %v6940_v47, %v6938_v38  ;;  %v6942_v31 = vld [vmem:[%s15195_s5 + $0x1b08] sm:$0xff]  ;;  %v6941_v37 = vld [vmem:[%s15195_s5 + $0x1b00] sm:$0xff] }
 0x293   : > { %v8558_v35 = vpack.c.bf16 %v7002_v48, %v7000_v41  ;;  %v6944_v55 = vld [vmem:[%s15195_s5 + $0x1b18] sm:$0xff]  ;;  %v6943_v41 = vld [vmem:[%s15195_s5 + $0x1b10] sm:$0xff] }
 0x294   : > { %v8506_v38 = vpack.c.bf16 %v6944_v55, %v6942_v31  ;;  %v7003_v48 = vld [vmem:[%s15195_s5 + $0x1cd0] sm:$0xff] }
 0x295   : > { %8497 = vmatpush1.bf16.msra.mxu1 %v8496_v0  ;;  %8553 = vmatpush1.bf16.msra.mxu0 %v8552_v56  ;;  %v7001_v0 = vld [vmem:[%s15195_s5 + $0x1cc0] sm:$0xff]  ;;  %v7006_v56 = vld [vmem:[%s15195_s5 + $0x1ce8] sm:$0xff]  ;;  %v7021_v55 = vld [vmem:[%s15196_s6 + $0xd0] sm:$0xff] }
 0x296   : > { %8499 = vmatprep.subr.bf16.mxu1 %v8498_v7  ;;  %8555 = vmatprep.subr.bf16.mxu0 %v8554_v17  ;;  %v7004_v17 = vld [vmem:[%s15195_s5 + $0x1cd8] sm:$0xff]  ;;  %v8504_v7 = vpack.c.bf16 %v6939_v63, %v6937_v60  ;;  %v8560_v19 = vpack.c.bf16 %v7001_v0, %v6999_v36  ;;  %v6946_v63 = vld [vmem:[%s15195_s5 + $0x1b28] sm:$0x1]  ;;  %v7007_v36 = vld [vmem:[%s15195_s5 + $0x1cf0] sm:$0x1] }
 0x297   : > { %v8562_v47 = vpack.c.bf16 %v7006_v56, %v7004_v17  ;;  %v7020_v0 = vld [vmem:[%s15196_s6 + $0xc8] sm:$0xff]  ;;  %v7022_v17 = vld [vmem:[%s15196_s6 + $0xd8] sm:$0xff] }
 0x298   : > { %v8640_v31 = vpack.c.bf16 %v7020_v0, %v7019_v8  ;;  %v8643_v56 = vpack.c.bf16 %v7022_v17, %v7021_v55  ;;  %v7027_v0 = vld [vmem:[%s15196_s6 + $0x100] sm:$0xff]  ;;  %v7047_v55 = vld [vmem:[%s15196_s6 + $0x190] sm:$0xff] }
 0x299   : > { %8501 = vmatpush1.bf16.msra.mxu1 %v8500_v49  ;;  %8557 = vmatpush1.bf16.msra.mxu0 %v8556_v59  ;;  %v7005_v49 = vld [vmem:[%s15195_s5 + $0x1ce0] sm:$0xff]  ;;  %v8508_v59 = vpack.c.bf16 %v6943_v41, %v6941_v37 }
 0x29a   : > { %8503 = vmatprep.subr.bf16.mxu1 %v8502_v24  ;;  %8559 = vmatprep.subr.bf16.mxu0 %v8558_v35  ;;  %v8564_v60 = vpack.c.bf16 %v7005_v49, %v7003_v48  ;;  %v7008_v24 = vld [vmem:[%s15195_s5 + $0x1cf8] sm:$0x1]  ;;  %v6945_v35 = vld [vmem:[%s15195_s5 + $0x1b20] sm:$0x1] }
 0x29d   : > { %8505 = vmatpush1.bf16.msra.mxu1 %v8504_v7  ;;  %8561 = vmatpush1.bf16.msra.mxu0 %v8560_v19  ;;  %v7023_v7 = vld [vmem:[%s15196_s6 + $0xe0] sm:$0xff]  ;;  %v7024_v19 = vld [vmem:[%s15196_s6 + $0xe8] sm:$0xff] }
 0x29e   : > { %8507 = vmatprep.subr.bf16.mxu1 %v8506_v38  ;;  %8563 = vmatprep.subr.bf16.mxu0 %v8562_v47  ;;  %v8646_v37 = vpack.c.bf16 %v7024_v19, %v7023_v7  ;;  %v7025_v38 = vld [vmem:[%s15196_s6 + $0xf0] sm:$0xff]  ;;  %v7026_v47 = vld [vmem:[%s15196_s6 + $0xf8] sm:$0xff] }
 0x29f   : > { %v8649_v41 = vpack.c.bf16 %v7026_v47, %v7025_v38  ;;  %v7029_v19 = vld [vmem:[%s15196_s6 + $0x110] sm:$0xff]  ;;  %v7049_v38 = vld [vmem:[%s15196_s6 + $0x1a0] sm:$0xff] }
 0x2a1   : > { %8509 = vmatpush1.bf16.msra.mxu1 %v8508_v59  ;;  %8565 = vmatpush1.bf16.msra.mxu0 %v8564_v60 }
 0x2a2   : > { %6947 = vmatprep.subr.msk.mxu1 %vm536_vm1, %v6946_v63  ;;  %7009 = vmatprep.subr.msk.mxu0 %vm536_vm1, %v7008_v24 }
 0x2a5   : > { %6948 = vmatpush1.msk.msra.mxu1 %vm536_vm1, %v6945_v35  ;;  %7010 = vmatpush1.msk.msra.mxu0 %vm536_vm1, %v7007_v36 }
 0x2a6   : > { %2596 = vmatmul.mubr.f32.vlgmr.msra.gmra.mrb[28].mxu1 %v10167_v33  ;;  %2738 = vmatmul.mubr.f32.vlgmr.msra.gmra.mrb[32].mxu0 %v10167_v33  ;;  %v15205_v33 = vpack.c.bf16 %v12300_v23, %v12264_v54  ;;  %v2759_v23 = vld [vmem:[%s15194_s4 + $0x8] sm:$0xff] }
 0x2a7   : > { %8567 = vmatprep.subr.bf16.mxu1 %v8566_v32  ;;  %6950 = vmatprep.mubr.msk.f32.mxu1 %vm529_vm2, %v10196_v46 }
 0x2a8   : > { %7012 = vmatprep.mubr.msk.f32.mxu0 %vm529_vm2, %v10196_v46  ;;  %8569 = vmatpush1.bf16.msra.mxu1 %v8568_v26  ;;  %v15206_v46 = vpack.c.bf16 %v12280_v2, %v12248_v40  ;;  %v2751_v40 = vld [vmem:[%s15193_s3 + $0x8] sm:$0xff]  ;;  %v9630_v2 = vmov 0.0|0.0  }
 0x2a9   : > { %8571 = vmatprep.subr.bf16.mxu1 %v8570_v34  ;;  %8630 = vmatprep.subr.bf16.mxu0 %v9630_v2 }
 0x2aa   : > { %2602 = vmatmul.mubr.f32.gmra.mrb[30].mxu1 %v10204_v51  ;;  %2744 = vmatmul.mubr.f32.gmra.mrb[34].mxu0 %v10204_v51  ;;  %v15207_v51 = vpack.c.bf16 %v12686_v28, %v12650_v13  ;;  %v8634_v13 = vpack.c.bf16 %v7016_v58, %v7015_v57  ;;  %v8637_v28 = vpack.c.bf16 %v7018_v44, %v7017_v18  ;;  %v7042_v57 = vld [vmem:[%s15196_s6 + $0x168] sm:$0xff]  ;;  %v7044_v18 = vld [vmem:[%s15196_s6 + $0x178] sm:$0xff] }
 0x2ab   : > { %2846 = vmatprep.mubr.f32.mxu1 %v2751_v40  ;;  %2769 = vperm.xlu1 %9563, %v2759_v23   ;;  %v2754_v40 = vld [vmem:[%s15193_s3 + $0x20] sm:$0xff] }
 0x2ac   : > { %8573 = vmatpush1.bf16.msra.mxu1 %v8572_v27 }
 0x2ad   : > { %8575 = vmatprep.subr.bf16.mxu1 %v8574_v14 }
 0x2af   : > { %2779 = vperm.xlu1 %9563, %v2761_v45   ;;  %v7045_v45 = vld [vmem:[%s15196_s6 + $0x180] sm:$0xff] }
 0x2b0   : > { %8577 = vmatpush1.bf16.msra.mxu1 %v8576_v3 }
 0x2b1   : > { %8579 = vmatprep.subr.bf16.mxu1 %v8578_v15 }
 0x2b4   : > { %8581 = vmatpush1.bf16.msra.mxu1 %v8580_v6 }
 0x2b5   : > { %8583 = vmatprep.subr.bf16.mxu1 %v8582_v25 }
 0x2b8   : > { %8585 = vmatpush1.bf16.msra.mxu1 %v8584_v16  ;;  %v7013_v16 = vld [vmem:[%s15196_s6 + $0x90] sm:$0xff] }
 0x2b9   : > { %8587 = vmatprep.subr.bf16.mxu1 %v15205_v33  ;;  %v8631_v25 = vpack.c.bf16 %v7014_v22, %v7013_v16  ;;  %v7040_v16 = vld [vmem:[%s15196_s6 + $0x158] sm:$0xff]  ;;  %v2756_v22 = vld [vmem:[%s15193_s3 + $0x30] sm:$0xff] }
 0x2ba   : > { %v8694_v23 = vpack.c.bf16 %v7040_v16, %v7039_v1  ;;  %v7077_v1 = vld [vmem:[%s15196_s6 + $0x270] sm:$0xff]  ;;  %v7078_v16 = vld [vmem:[%s15196_s6 + $0x278] sm:$0xff] }
 0x2bb   : > { %8632 = vmatpush1.bf16.msra.mxu0 %v8631_v25  ;;  %v7041_v25 = vld [vmem:[%s15196_s6 + $0x160] sm:$0xff] }
 0x2bc   : > { %8589 = vmatpush1.bf16.msra.mxu1 %v15206_v46  ;;  %8633 = vmatprep.subr.bf16.mxu0 %v9630_v2  ;;  %v8697_v58 = vpack.c.bf16 %v7042_v57, %v7041_v25  ;;  %v2887_v25 = vld [vmem:[%s15196_s6 + $0x40] sm:$0xff]  ;;  %v2888_v57 = vld [vmem:[%s15196_s6 + $0x48] sm:$0xff] }
 0x2bd   : > { %8591 = vmatprep.subr.bf16.mxu1 %v15207_v51 }
 0x2bf   : > { %8635 = vmatpush1.bf16.msra.mxu0 %v8634_v13  ;;  %v7043_v13 = vld [vmem:[%s15196_s6 + $0x170] sm:$0xff] }
 0x2c0   : > { %8593 = vmatpush1.bf16.msra.mxu1 %v15208_v4  ;;  %8636 = vmatprep.subr.bf16.mxu0 %v9630_v2  ;;  %v8700_v44 = vpack.c.bf16 %v7044_v18, %v7043_v13  ;;  %v7080_v13 = vld [vmem:[%s15196_s6 + $0x288] sm:$0xff]  ;;  %v8670_v18 = vpack.c.bf16 %v2888_v57, %v2887_v25 }
 0x2c1   : > { %8595 = vmatprep.subr.bf16.mxu1 %v15209_v5 }
 0x2c3   : > { %8638 = vmatpush1.bf16.msra.mxu0 %v8637_v28  ;;  %v7046_v28 = vld [vmem:[%s15196_s6 + $0x188] sm:$0xff] }
 0x2c4   : > { %8597 = vmatpush1.bf16.msra.mxu1 %v15210_v9  ;;  %8639 = vmatprep.subr.bf16.mxu0 %v9630_v2  ;;  %v8703_v8 = vpack.c.bf16 %v7046_v28, %v7045_v45  ;;  %v2889_v45 = vld [vmem:[%s15196_s6 + $0x50] sm:$0xff]  ;;  %v2890_v28 = vld [vmem:[%s15196_s6 + $0x58] sm:$0xff] }
 0x2c5   : > { %v1745_v10 = vpop.f32.mrb[16].mxu1  ;;  %v1887_v20 = vpop.f32.mrb[20].mxu0 }
 0x2c6   : > { %v1747_v21 = vpop.f32.mrb[17].mxu1  ;;  %v1889_v26 = vpop.f32.mrb[21].mxu0 }
 0x2c7   : > { %8641 = vmatpush1.bf16.msra.mxu0 %v8640_v31  ;;  %v7028_v31 = vld [vmem:[%s15196_s6 + $0x108] sm:$0xff] }
 0x2c8   : > { %8642 = vmatprep.subr.bf16.mxu0 %v9630_v2  ;;  %v8652_v17 = vpack.c.bf16 %v7028_v31, %v7027_v0  ;;  %v7082_v0 = vld [vmem:[%s15196_s6 + $0x298] sm:$0xff]  ;;  %v8673_v31 = vpack.c.bf16 %v2890_v28, %v2889_v45 }
 0x2c9   : > { %v1751_v27 = vpop.f32.mrb[18].mxu1  ;;  %v1893_v29 = vpop.f32.mrb[22].mxu0 }
 0x2ca   : > { %v8600_v30 = vpack.c.bf16 %v1751_v27, %v1745_v10  ;;  %v8604_v32 = vpack.c.bf16 %v1893_v29, %v1887_v20  ;;  %v1753_v34 = vpop.f32.mrb[19].mxu1  ;;  %v1895_v42 = vpop.f32.mrb[23].mxu0 }
 0x2cb   : > { %v8598_v43 = vpack.c.bf16 %v1753_v34, %v1747_v21  ;;  %v8602_v52 = vpack.c.bf16 %v1895_v42, %v1889_v26  ;;  %8644 = vmatpush1.bf16.msra.mxu0 %v8643_v56  ;;  %v7048_v56 = vld [vmem:[%s15196_s6 + $0x198] sm:$0xff] }
 0x2cc   : > { %8645 = vmatprep.subr.bf16.mxu0 %v9630_v2  ;;  %v8706_v7 = vpack.c.bf16 %v7048_v56, %v7047_v55  ;;  %v2892_v56 = vld [vmem:[%s15196_s6 + $0x68] sm:$0xff] }
 0x2cd   : > { %8599 = vmatprep.subr.bf16.mxu1 %v8598_v43  ;;  %v7033_v43 = vld [vmem:[%s15196_s6 + $0x120] sm:$0xff] }
 0x2ce   : > { %8601 = vmatpush1.bf16.msra.mxu1 %v8600_v30 }
 0x2cf   : > { %8603 = vmatprep.subr.bf16.mxu1 %v8602_v52  ;;  %8647 = vmatpush1.bf16.msra.mxu0 %v8646_v37  ;;  %v7034_v52 = vld [vmem:[%s15196_s6 + $0x128] sm:$0xff]  ;;  %v7030_v37 = vld [vmem:[%s15196_s6 + $0x118] sm:$0xff] }
 0x2d0   : > { %8648 = vmatprep.subr.bf16.mxu0 %v9630_v2  ;;  %v8655_v47 = vpack.c.bf16 %v7030_v37, %v7029_v19  ;;  %v7084_v19 = vld [vmem:[%s15196_s6 + $0x2a8] sm:$0xff] }
 0x2d2   : > { %8605 = vmatpush1.bf16.msra.mxu1 %v8604_v32 }
 0x2d3   : > { %8650 = vmatpush1.bf16.msra.mxu0 %v8649_v41  ;;  %v7050_v41 = vld [vmem:[%s15196_s6 + $0x1a8] sm:$0xff] }
 0x2d4   : > { %8651 = vmatprep.subr.bf16.mxu0 %v9630_v2 }
 0x2d7   : > { %8653 = vmatpush1.bf16.msra.mxu0 %v8652_v17  ;;  %v2891_v17 = vld [vmem:[%s15196_s6 + $0x60] sm:$0xff] }
 0x2d8   : > { %8654 = vmatprep.subr.bf16.mxu0 %v9630_v2  ;;  %v8676_v37 = vpack.c.bf16 %v2892_v56, %v2891_v17 }
 0x2db   : > { %8656 = vmatpush1.bf16.msra.mxu0 %v8655_v47  ;;  %v2893_v47 = vld [vmem:[%s15196_s6 + $0x70] sm:$0xff] }
 0x2dc   : > { %8657 = vmatprep.subr.bf16.mxu0 %v9630_v2 }
 0x301   : > { %v2029_v53 = vpop.f32.mrb[20].mxu1  ;;  %v2171_v61 = vpop.f32.mrb[24].mxu0 }
 0x302   : > { %v2031_v62 = vpop.f32.mrb[21].mxu1  ;;  %v2173_v3 = vpop.f32.mrb[25].mxu0 }
 0x305   : > { %v2035_v6 = vpop.f32.mrb[22].mxu1  ;;  %v2177_v11 = vpop.f32.mrb[26].mxu0 }
 0x306   : > { %v8608_v12 = vpack.c.bf16 %v2035_v6, %v2029_v53  ;;  %v8612_v14 = vpack.c.bf16 %v2177_v11, %v2171_v61  ;;  %v2037_v15 = vpop.f32.mrb[23].mxu1  ;;  %v2179_v39 = vpop.f32.mrb[27].mxu0  ;;  %v2750_v53 = vld [vmem:[%s15193_s3] sm:$0xff]  ;;  %v8685_v61 = vpack.c.bf16 %v7034_v52, %v7033_v43  ;;  %v7036_v6 = vld [vmem:[%s15196_s6 + $0x138] sm:$0xff]  ;;  %v2752_v11 = vld [vmem:[%s15193_s3 + $0x10] sm:$0xff] }
 0x307   : > { %v8606_v50 = vpack.c.bf16 %v2037_v15, %v2031_v62  ;;  %v8610_v54 = vpack.c.bf16 %v2179_v39, %v2173_v3  ;;  %v2753_v62 = vld [vmem:[%s15193_s3 + $0x18] sm:$0xff]  ;;  %v7035_v3 = vld [vmem:[%s15196_s6 + $0x130] sm:$0xff]  ;;  %v7037_v15 = vld [vmem:[%s15196_s6 + $0x140] sm:$0xff] }
 0x308   : > { %v7038_v39 = vld [vmem:[%s15196_s6 + $0x148] sm:$0xff] }
 0x309   : > { %8607 = vmatprep.subr.bf16.mxu1 %v8606_v50  ;;  %v8691_v50 = vpack.c.bf16 %v7038_v39, %v7037_v15 }
 0x30a   : > { %8609 = vmatpush1.bf16.msra.mxu1 %v8608_v12  ;;  %v8688_v12 = vpack.c.bf16 %v7036_v6, %v7035_v3  ;;  %v2883_v3 = vld [vmem:[%s15196_s6 + $0x20] sm:$0xff]  ;;  %v2884_v6 = vld [vmem:[%s15196_s6 + $0x28] sm:$0xff] }
 0x30b   : > { %8611 = vmatprep.subr.bf16.mxu1 %v8610_v54  ;;  %v2757_v54 = vld [vmem:[%s15193_s3 + $0x38] sm:$0xff]  ;;  %v8664_v39 = vpack.c.bf16 %v2884_v6, %v2883_v3 }
 0x30e   : > { %8613 = vmatpush1.bf16.msra.mxu1 %v8612_v14  ;;  %v2755_v14 = vld [vmem:[%s15193_s3 + $0x28] sm:$0xff] }
 0x33d   : > { %v2313_v48 = vpop.f32.mrb[24].mxu1  ;;  %v2455_v49 = vpop.f32.mrb[28].mxu0 }
 0x33e   : > { %v2315_v59 = vpop.f32.mrb[25].mxu1  ;;  %v2457_v60 = vpop.f32.mrb[29].mxu0 }
 0x341   : > { %v2319_v63 = vpop.f32.mrb[26].mxu1  ;;  %v2461_v24 = vpop.f32.mrb[30].mxu0 }
 0x342   : > { %v8616_v35 = vpack.c.bf16 %v2319_v63, %v2313_v48  ;;  %v8620_v36 = vpack.c.bf16 %v2461_v24, %v2455_v49  ;;  %v2321_v33 = vpop.f32.mrb[27].mxu1  ;;  %v2463_v46 = vpop.f32.mrb[31].mxu0  ;;  %v8709_v48 = vpack.c.bf16 %v7050_v41, %v7049_v38  ;;  %v2894_v41 = vld [vmem:[%s15196_s6 + $0x78] sm:$0xff] }
 0x343   : > { %v8614_v51 = vpack.c.bf16 %v2321_v33, %v2315_v59  ;;  %v8618_v4 = vpack.c.bf16 %v2463_v46, %v2457_v60  ;;  %v2765_v49 = vpop.permute.xlu1 %2764  ;;  %v2880_v33 = vld [vmem:[%s15196_s6 + $0x8] sm:$0xff]  ;;  %v7071_v46 = vld [vmem:[%s15196_s6 + $0x240] sm:$0xff] }
 0x345   : > { %8615 = vmatprep.subr.bf16.mxu1 %v8614_v51  ;;  %v7072_v51 = vld [vmem:[%s15196_s6 + $0x248] sm:$0xff] }
 0x346   : > { %8617 = vmatpush1.bf16.msra.mxu1 %v8616_v35  ;;  %v2879_v35 = vld [vmem:[%s15196_s6] sm:$0xff] }
 0x347   : > { %8619 = vmatprep.subr.bf16.mxu1 %v8618_v4 }
 0x34a   : > { %8621 = vmatpush1.bf16.msra.mxu1 %v8620_v36 }
 0x379   : > { %v2597_v5 = vpop.f32.mrb[28].mxu1  ;;  %v2739_v9 = vpop.f32.mrb[32].mxu0 }
 0x37a   : > { %v2599_v10 = vpop.f32.mrb[29].mxu1  ;;  %v2741_v20 = vpop.f32.mrb[33].mxu0 }
 0x37d   : > { %v2603_v21 = vpop.f32.mrb[30].mxu1  ;;  %v2745_v26 = vpop.f32.mrb[34].mxu0 }
 0x37e   : > { %v8624_v27 = vpack.c.bf16 %v2603_v21, %v2597_v5  ;;  %v8628_v29 = vpack.c.bf16 %v2745_v26, %v2739_v9  ;;  %v2605_v30 = vpop.f32.mrb[31].mxu1  ;;  %v2747_v32 = vpop.f32.mrb[35].mxu0  ;;  %v8658_v21 = vpack.c.bf16 %v2880_v33, %v2879_v35  ;;  %v8739_v26 = vpack.c.bf16 %v7072_v51, %v7071_v46  ;;  %v7087_v35 = vld [vmem:[%s15196_s6 + $0x2c0] sm:$0xff]  ;;  %v7088_v33 = vld [vmem:[%s15196_s6 + $0x2c8] sm:$0xff] }
 0x37f   : > { %v8622_v34 = vpack.c.bf16 %v2605_v30, %v2599_v10  ;;  %v8626_v42 = vpack.c.bf16 %v2747_v32, %v2741_v20  ;;  %v2882_v32 = vld [vmem:[%s15196_s6 + $0x18] sm:$0xff]  ;;  %v8763_v51 = vpack.c.bf16 %v7088_v33, %v7087_v35  ;;  %v7068_v35 = vld [vmem:[%s15196_s6 + $0x230] sm:$0xff] }
 0x380   : > { %v7069_v33 = vld [vmem:[%s15196_s6 + $0x238] sm:$0xff] }
 0x381   : > { %8623 = vmatprep.subr.bf16.mxu1 %v8622_v34  ;;  %v7073_v34 = vld [vmem:[%s15196_s6 + $0x250] sm:$0xff] }
 0x382   : > { %8625 = vmatpush1.bf16.msra.mxu1 %v8624_v27  ;;  %v2881_v27 = vld [vmem:[%s15196_s6 + $0x10] sm:$0xff] }
 0x383   : > { %8627 = vmatprep.subr.bf16.mxu1 %v8626_v42  ;;  %v7074_v42 = vld [vmem:[%s15196_s6 + $0x258] sm:$0xff] }
 0x386   : > { %8629 = vmatpush1.bf16.msra.mxu1 %v8628_v29 }
 0x387   : > { %8684 = vmatprep.subr.bf16.mxu1 %v9630_v2 }
 0x389   : > { %2847 = vmatmul.mubr.f32.vlgmr.msra.gmra.mrb[32].mxu1 %v2750_v53 }
 0x38a   : > { %2852 = vmatprep.mubr.f32.mxu1 %v2753_v62  ;;  %8686 = vmatpush1.bf16.msra.mxu1 %v8685_v61  ;;  %v8661_v61 = vpack.c.bf16 %v2882_v32, %v2881_v27  ;;  %v8742_v62 = vpack.c.bf16 %v7074_v42, %v7073_v34  ;;  %v7054_v32 = vld [vmem:[%s15196_s6 + $0x1c0] sm:$0xff]  ;;  %v7055_v34 = vld [vmem:[%s15196_s6 + $0x1c8] sm:$0xff] }
 0x38b   : > { %8687 = vmatprep.subr.bf16.mxu1 %v9630_v2  ;;  %v8715_v3 = vpack.c.bf16 %v7055_v34, %v7054_v32 }
 0x38d   : > { %2853 = vmatmul.mubr.f32.gmra.mrb[34].mxu1 %v2752_v11  ;;  %v7075_v11 = vld [vmem:[%s15196_s6 + $0x260] sm:$0xff] }
 0x38e   : > { %2858 = vmatprep.mubr.f32.mxu1 %v2755_v14  ;;  %8689 = vmatpush1.bf16.msra.mxu1 %v8688_v12  ;;  %v7076_v12 = vld [vmem:[%s15196_s6 + $0x268] sm:$0xff] }
 0x38f   : > { %8690 = vmatprep.subr.bf16.mxu1 %v9630_v2 }
 0x391   : > { %2859 = vmatmul.mubr.f32.gmra.mrb[36].mxu1 %v2754_v40  ;;  %v8745_v40 = vpack.c.bf16 %v7076_v12, %v7075_v11  ;;  %v7056_v11 = vld [vmem:[%s15196_s6 + $0x1d0] sm:$0xff]  ;;  %v7057_v12 = vld [vmem:[%s15196_s6 + $0x1d8] sm:$0xff] }
 0x392   : > { %2864 = vmatprep.mubr.f32.mxu1 %v2757_v54  ;;  %8692 = vmatpush1.bf16.msra.mxu1 %v8691_v50  ;;  %v2885_v50 = vld [vmem:[%s15196_s6 + $0x30] sm:$0xff]  ;;  %v2886_v54 = vld [vmem:[%s15196_s6 + $0x38] sm:$0xff] }
 0x393   : > { %8693 = vmatprep.subr.bf16.mxu1 %v9630_v2 }
 0x395   : > { %2865 = vmatmul.mubr.f32.gmra.mrb[38].mxu1 %v2756_v22  ;;  %v8667_v22 = vpack.c.bf16 %v2886_v54, %v2885_v50  ;;  %v8718_v50 = vpack.c.bf16 %v7057_v12, %v7056_v11 }
 0x396   : > { %8695 = vmatpush1.bf16.msra.mxu1 %v8694_v23  ;;  %v8748_v23 = vpack.c.bf16 %v7078_v16, %v7077_v1  ;;  %v7058_v1 = vld [vmem:[%s15196_s6 + $0x1e0] sm:$0xff]  ;;  %v7059_v16 = vld [vmem:[%s15196_s6 + $0x1e8] sm:$0xff] }
 0x397   : > { %8696 = vmatprep.subr.bf16.mxu1 %v9630_v2  ;;  %v8721_v25 = vpack.c.bf16 %v7059_v16, %v7058_v1  ;;  %v7151_v1 = vld [vmem:[%s15196_s6 + $0x4a0] sm:$0xff]  ;;  %v7152_v16 = vld [vmem:[%s15196_s6 + $0x4a8] sm:$0xff] }
 0x39a   : > { %8698 = vmatpush1.bf16.msra.mxu1 %v8697_v58  ;;  %v7079_v58 = vld [vmem:[%s15196_s6 + $0x280] sm:$0xff] }
 0x39b   : > { %8699 = vmatprep.subr.bf16.mxu1 %v9630_v2 }
 0x39e   : > { %8701 = vmatpush1.bf16.msra.mxu1 %v8700_v44  ;;  %v8751_v44 = vpack.c.bf16 %v7080_v13, %v7079_v58  ;;  %v7060_v58 = vld [vmem:[%s15196_s6 + $0x1f0] sm:$0xff]  ;;  %v7061_v13 = vld [vmem:[%s15196_s6 + $0x1f8] sm:$0xff] }
 0x39f   : > { %8702 = vmatprep.subr.bf16.mxu1 %v9630_v2  ;;  %v8724_v45 = vpack.c.bf16 %v7061_v13, %v7060_v58  ;;  %v7153_v58 = vld [vmem:[%s15196_s6 + $0x4b0] sm:$0xff]  ;;  %v7154_v13 = vld [vmem:[%s15196_s6 + $0x4b8] sm:$0xff] }
 0x3a2   : > { %8704 = vmatpush1.bf16.msra.mxu1 %v8703_v8  ;;  %v7081_v8 = vld [vmem:[%s15196_s6 + $0x290] sm:$0xff] }
 0x3a3   : > { %8705 = vmatprep.subr.bf16.mxu1 %v9630_v2  ;;  %v8754_v55 = vpack.c.bf16 %v7082_v0, %v7081_v8  ;;  %v7062_v8 = vld [vmem:[%s15196_s6 + $0x200] sm:$0xff]  ;;  %v7063_v0 = vld [vmem:[%s15196_s6 + $0x208] sm:$0xff] }
 0x3a4   : > { %v8727_v17 = vpack.c.bf16 %v7063_v0, %v7062_v8  ;;  %v7155_v8 = vld [vmem:[%s15196_s6 + $0x4c0] sm:$0xff]  ;;  %v7156_v0 = vld [vmem:[%s15196_s6 + $0x4c8] sm:$0xff] }
 0x3a6   : > { %8707 = vmatpush1.bf16.msra.mxu1 %v8706_v7  ;;  %v7083_v7 = vld [vmem:[%s15196_s6 + $0x2a0] sm:$0xff] }
 0x3a7   : > { %8708 = vmatprep.subr.bf16.mxu1 %v9630_v2  ;;  %v8757_v38 = vpack.c.bf16 %v7084_v19, %v7083_v7  ;;  %v7064_v7 = vld [vmem:[%s15196_s6 + $0x210] sm:$0xff]  ;;  %v7065_v19 = vld [vmem:[%s15196_s6 + $0x218] sm:$0xff] }
 0x3aa   : > { %8710 = vmatpush1.bf16.msra.mxu1 %v8709_v48  ;;  %v7085_v48 = vld [vmem:[%s15196_s6 + $0x2b0] sm:$0xff] }
 0x3ab   : > { %8738 = vmatprep.subr.bf16.mxu1 %v9630_v2 }
 0x45c   : > { %v2848_v59 = vpop.f32.mrb[32].mxu1 }
 0x45d   : > { %v2849_v60 = vadd.f32 %v2848_v59, %v2765_v49  ;;  %v2850_v63 = vpop.f32.mrb[33].mxu1  ;;  %v8679_v59 = vpack.c.bf16 %v2894_v41, %v2893_v47  ;;  %v8730_v47 = vpack.c.bf16 %v7065_v19, %v7064_v7  ;;  %v7157_v7 = vld [vmem:[%s15196_s6 + $0x4d0] sm:$0xff]  ;;  %v7158_v19 = vld [vmem:[%s15196_s6 + $0x4d8] sm:$0xff] }
 0x45e   : > { %v2851_v24 = vadd.f32 %v2850_v63, %v2765_v49  ;;  %v7086_v49 = vld [vmem:[%s15196_s6 + $0x2b8] sm:$0xff]  ;;  %v2895_v63 = vld [vmem:[%s15196_s6 + $0x80] sm:$0xff] }
 0x45f   : > { %v13002_v36 = vmax.f32 %v2849_v60, 0.0  ;;  %v8760_v60 = vpack.c.bf16 %v7086_v49, %v7085_v48  ;;  %v7066_v48 = vld [vmem:[%s15196_s6 + $0x220] sm:$0xff]  ;;  %v7067_v49 = vld [vmem:[%s15196_s6 + $0x228] sm:$0xff] }
 0x460   : > { %v13013_v4 = vmax.f32 %v2851_v24, 0.0  ;;  %v13015_v5 = vpop.f32.mrb[34].mxu1  ;;  %v2896_v24 = vld [vmem:[%s15196_s6 + $0x88] sm:$0xff] }
 0x461   : > { %v13017_v9 = vpop.f32.mrb[35].mxu1  ;;  %v2918_v29 = vrot.slane %v13002_v36, 1  ;;  %v3085_v30 = vrot.slane %v13002_v36, 2  ;;  %v8682_v46 = vpack.c.bf16 %v2896_v24, %v2895_v63  ;;  %v8733_v63 = vpack.c.bf16 %v7067_v49, %v7066_v48  ;;  %v7159_v48 = vld [vmem:[%s15196_s6 + $0x4e0] sm:$0xff]  ;;  %v7160_v49 = vld [vmem:[%s15196_s6 + $0x4e8] sm:$0xff] }
 0x462   : > { %v2919_v10 = vrot.slane %v13013_v4, 1  ;;  %v3086_v20 = vrot.slane %v13013_v4, 2  ;;  %v3276_v53 = vrot.slane %v13013_v4, 4  ;;  %v3181_v42 = vrot.slane %v13013_v4, 3 }
 0x463   : > { %v3371_v11 = vrot.slane %v13013_v4, 5 }
 0x464   : > { %v13035_v43 = vpop.f32.mrb[36].mxu1  ;;  %7031 = vmatprep.mubr.msk.f32.mxu0 %vm2921_vm3, %v2919_v10  ;;  %7051 = vmatprep.mubr.msk.f32.mxu1 %vm2921_vm3, %v3086_v20  ;;  %v7052_v10 = vld [vmem:[%s15196_s6 + $0x1b0] sm:$0xff]  ;;  %v7053_v20 = vld [vmem:[%s15196_s6 + $0x1b8] sm:$0xff] }
 0x465   : > { %v13039_v52 = vpop.f32.mrb[37].mxu1  ;;  %2989 = vmatmul.mubr.f32.vlgmr.msra.gmra.mrb[36].mxu0 %v2918_v29  ;;  %3155 = vmatmul.mubr.f32.vlgmr.msra.gmra.mrb[40].mxu1 %v3085_v30  ;;  %v8712_v27 = vpack.c.bf16 %v7053_v20, %v7052_v10  ;;  %v3275_v29 = vrot.slane %v13002_v36, 4  ;;  %v8736_v10 = vpack.c.bf16 %v7069_v33, %v7068_v35  ;;  %v7161_v35 = vld [vmem:[%s15196_s6 + $0x4f0] sm:$0xff]  ;;  %v7162_v33 = vld [vmem:[%s15196_s6 + $0x4f8] sm:$0xff] }
 0x466   : > { %8659 = vmatpush1.bf16.msra.mxu0 %v8658_v21  ;;  %8740 = vmatpush1.bf16.msra.mxu1 %v8739_v26  ;;  %v7109_v21 = vld [vmem:[%s15196_s6 + $0x360] sm:$0xff]  ;;  %v7110_v26 = vld [vmem:[%s15196_s6 + $0x368] sm:$0xff] }
 0x467   : > { %7032 = vmatprep.mubr.msk.f32.mxu0 %vm2921_vm3, %v13013_v4  ;;  %7089 = vmatprep.mubr.msk.f32.mxu1 %vm2921_vm3, %v3276_v53  ;;  %v8793_v30 = vpack.c.bf16 %v7110_v26, %v7109_v21  ;;  %v7111_v53 = vld [vmem:[%s15196_s6 + $0x370] sm:$0xff]  ;;  %v7091_v26 = vld [vmem:[%s15196_s6 + $0x2d8] sm:$0xff] }
 0x468   : > { %v13057_v14 = vpop.f32.mrb[38].mxu1  ;;  %8660 = vmatprep.subr.bf16.mxu0 %v9630_v2  ;;  %8741 = vmatprep.subr.bf16.mxu1 %v9630_v2  ;;  %v7090_v21 = vld [vmem:[%s15196_s6 + $0x2d0] sm:$0xff] }
 0x469   : > { %v13061_v15 = vpop.f32.mrb[39].mxu1  ;;  %v8766_v34 = vpack.c.bf16 %v7091_v26, %v7090_v21  ;;  %v7163_v21 = vld [vmem:[%s15196_s6 + $0x500] sm:$0xff]  ;;  %v7164_v26 = vld [vmem:[%s15196_s6 + $0x508] sm:$0xff] }
 0x46a   : > { %8662 = vmatpush1.bf16.msra.mxu0 %v8661_v61  ;;  %8743 = vmatpush1.bf16.msra.mxu1 %v8742_v62  ;;  %v7112_v61 = vld [vmem:[%s15196_s6 + $0x378] sm:$0xff]  ;;  %v3466_v62 = vrot.slane %v13013_v4, 6 }
 0x46b   : > { %8663 = vmatprep.subr.bf16.mxu0 %v9630_v2  ;;  %8744 = vmatprep.subr.bf16.mxu1 %v9630_v2  ;;  %v8796_v6 = vpack.c.bf16 %v7112_v61, %v7111_v53  ;;  %v7092_v61 = vld [vmem:[%s15196_s6 + $0x2e0] sm:$0xff] }
 0x46e   : > { %8665 = vmatpush1.bf16.msra.mxu0 %v8664_v39  ;;  %8746 = vmatpush1.bf16.msra.mxu1 %v8745_v40  ;;  %v7113_v39 = vld [vmem:[%s15196_s6 + $0x380] sm:$0xff]  ;;  %v7114_v40 = vld [vmem:[%s15196_s6 + $0x388] sm:$0xff] }
 0x46f   : > { %8666 = vmatprep.subr.bf16.mxu0 %v9630_v2  ;;  %8747 = vmatprep.subr.bf16.mxu1 %v9630_v2  ;;  %v8799_v54 = vpack.c.bf16 %v7114_v40, %v7113_v39 }
 0x472   : > { %8668 = vmatpush1.bf16.msra.mxu0 %v8667_v22  ;;  %8749 = vmatpush1.bf16.msra.mxu1 %v8748_v23  ;;  %v7115_v22 = vld [vmem:[%s15196_s6 + $0x390] sm:$0xff]  ;;  %v7116_v23 = vld [vmem:[%s15196_s6 + $0x398] sm:$0xff] }
 0x473   : > { %8669 = vmatprep.subr.bf16.mxu0 %v9630_v2  ;;  %8750 = vmatprep.subr.bf16.mxu1 %v9630_v2  ;;  %v8802_v57 = vpack.c.bf16 %v7116_v23, %v7115_v22  ;;  %v8853_v23 = vpack.c.bf16 %v7152_v16, %v7151_v1  ;;  %v7132_v16 = vld [vmem:[%s15196_s6 + $0x410] sm:$0xff] }
 0x476   : > { %8671 = vmatpush1.bf16.msra.mxu0 %v8670_v18  ;;  %8752 = vmatpush1.bf16.msra.mxu1 %v8751_v44  ;;  %v7117_v18 = vld [vmem:[%s15196_s6 + $0x3a0] sm:$0xff]  ;;  %v7118_v44 = vld [vmem:[%s15196_s6 + $0x3a8] sm:$0xff] }
 0x477   : > { %8672 = vmatprep.subr.bf16.mxu0 %v9630_v2  ;;  %8753 = vmatprep.subr.bf16.mxu1 %v9630_v2  ;;  %v8805_v28 = vpack.c.bf16 %v7118_v44, %v7117_v18  ;;  %v8856_v44 = vpack.c.bf16 %v7154_v13, %v7153_v58  ;;  %v7134_v58 = vld [vmem:[%s15196_s6 + $0x420] sm:$0xff]  ;;  %v7135_v13 = vld [vmem:[%s15196_s6 + $0x428] sm:$0xff] }
 0x47a   : > { %8674 = vmatpush1.bf16.msra.mxu0 %v8673_v31  ;;  %8755 = vmatpush1.bf16.msra.mxu1 %v8754_v55  ;;  %v7119_v31 = vld [vmem:[%s15196_s6 + $0x3b0] sm:$0xff]  ;;  %v7120_v55 = vld [vmem:[%s15196_s6 + $0x3b8] sm:$0xff] }
 0x47b   : > { %8675 = vmatprep.subr.bf16.mxu0 %v9630_v2  ;;  %8756 = vmatprep.subr.bf16.mxu1 %v9630_v2  ;;  %v8808_v56 = vpack.c.bf16 %v7120_v55, %v7119_v31  ;;  %v8859_v55 = vpack.c.bf16 %v7156_v0, %v7155_v8  ;;  %v7136_v8 = vld [vmem:[%s15196_s6 + $0x430] sm:$0xff]  ;;  %v7137_v0 = vld [vmem:[%s15196_s6 + $0x438] sm:$0xff] }
 0x47e   : > { %8677 = vmatpush1.bf16.msra.mxu0 %v8676_v37  ;;  %8758 = vmatpush1.bf16.msra.mxu1 %v8757_v38  ;;  %v7121_v37 = vld [vmem:[%s15196_s6 + $0x3c0] sm:$0xff]  ;;  %v7122_v38 = vld [vmem:[%s15196_s6 + $0x3c8] sm:$0xff] }
 0x47f   : > { %8678 = vmatprep.subr.bf16.mxu0 %v9630_v2  ;;  %8759 = vmatprep.subr.bf16.mxu1 %v9630_v2  ;;  %v8811_v41 = vpack.c.bf16 %v7122_v38, %v7121_v37  ;;  %v8862_v38 = vpack.c.bf16 %v7158_v19, %v7157_v7  ;;  %v7138_v7 = vld [vmem:[%s15196_s6 + $0x440] sm:$0xff]  ;;  %v7139_v19 = vld [vmem:[%s15196_s6 + $0x448] sm:$0xff] }
 0x482   : > { %8680 = vmatpush1.bf16.msra.mxu0 %v8679_v59  ;;  %8761 = vmatpush1.bf16.msra.mxu1 %v8760_v60  ;;  %v7123_v59 = vld [vmem:[%s15196_s6 + $0x3d0] sm:$0xff]  ;;  %v7124_v60 = vld [vmem:[%s15196_s6 + $0x3d8] sm:$0xff] }
 0x483   : > { %8681 = vmatprep.subr.bf16.mxu0 %v9630_v2  ;;  %8762 = vmatprep.subr.bf16.mxu1 %v9630_v2  ;;  %v8814_v24 = vpack.c.bf16 %v7124_v60, %v7123_v59  ;;  %v8865_v60 = vpack.c.bf16 %v7160_v49, %v7159_v48  ;;  %v7140_v48 = vld [vmem:[%s15196_s6 + $0x450] sm:$0xff]  ;;  %v7141_v49 = vld [vmem:[%s15196_s6 + $0x458] sm:$0xff] }
 0x486   : > { %8683 = vmatpush1.bf16.msra.mxu0 %v8682_v46  ;;  %8764 = vmatpush1.bf16.msra.mxu1 %v8763_v51  ;;  %v7125_v46 = vld [vmem:[%s15196_s6 + $0x3e0] sm:$0xff]  ;;  %v7126_v51 = vld [vmem:[%s15196_s6 + $0x3e8] sm:$0xff] }
 0x487   : > { %8711 = vmatprep.subr.bf16.mxu0 %v9630_v2  ;;  %8792 = vmatprep.subr.bf16.mxu1 %v9630_v2  ;;  %v8817_v20 = vpack.c.bf16 %v7126_v51, %v7125_v46  ;;  %v8868_v51 = vpack.c.bf16 %v7162_v33, %v7161_v35  ;;  %v7142_v35 = vld [vmem:[%s15196_s6 + $0x460] sm:$0xff]  ;;  %v7143_v33 = vld [vmem:[%s15196_s6 + $0x468] sm:$0xff] }
 0x489   : > { %3061 = vmatmul.mubr.f32.vlgmr.msra.gmra.mrb[38].mxu0 %v13002_v36  ;;  %3345 = vmatmul.mubr.f32.vlgmr.msra.gmra.mrb[42].mxu1 %v3275_v29  ;;  %v7148_v29 = vld [vmem:[%s15196_s6 + $0x488] sm:$0xff] }
 0x48a   : > { %8713 = vmatpush1.bf16.msra.mxu0 %v8712_v27  ;;  %7070 = vmatprep.mubr.msk.f32.mxu0 %vm2921_vm3, %v3181_v42  ;;  %v7147_v27 = vld [vmem:[%s15196_s6 + $0x480] sm:$0xff]  ;;  %v3180_v42 = vrot.slane %v13002_v36, 3 }
 0x48b   : > { %8794 = vmatpush1.bf16.msra.mxu1 %v8793_v30  ;;  %7127 = vmatprep.mubr.msk.f32.mxu1 %vm2921_vm3, %v3466_v62  ;;  %v13293_v30 = vpop.permute.xlu1 %2769  ;;  %v8847_v53 = vpack.c.bf16 %v7148_v29, %v7147_v27  ;;  %v7093_v62 = vld [vmem:[%s15196_s6 + $0x2e8] sm:$0xff]  ;;  %v8871_v29 = vpack.c.bf16 %v7164_v26, %v7163_v21  ;;  %v7144_v21 = vld [vmem:[%s15196_s6 + $0x470] sm:$0xff]  ;;  %v7145_v26 = vld [vmem:[%s15196_s6 + $0x478] sm:$0xff] }
 0x48c   : > { %8714 = vmatprep.subr.bf16.mxu0 %v9630_v2  ;;  %8795 = vmatprep.subr.bf16.mxu1 %v9630_v2  ;;  %v2857_v32 = vadd.f32 %v13017_v9, %v13293_v30  ;;  %v7149_v9 = vld [vmem:[%s15196_s6 + $0x490] sm:$0xff]  ;;  %v8769_v39 = vpack.c.bf16 %v7093_v62, %v7092_v61  ;;  %v7186_v61 = vld [vmem:[%s15196_s6 + $0x5a8] sm:$0xff] }
 0x48e   : > { %8716 = vmatpush1.bf16.msra.mxu0 %v8715_v3  ;;  %v3465_v3 = vrot.slane %v13002_v36, 6  ;;  %v13314_v12 = vmax.f32 %v2857_v32, 0.0  ;;  %v7128_v32 = vld [vmem:[%s15196_s6 + $0x3f0] sm:$0xff] }
 0x48f   : > { %8797 = vmatpush1.bf16.msra.mxu1 %v8796_v6  ;;  %8717 = vmatprep.subr.bf16.mxu0 %v9630_v2  ;;  %v7150_v6 = vld [vmem:[%s15196_s6 + $0x498] sm:$0xff] }
 0x490   : > { %8798 = vmatprep.subr.bf16.mxu1 %v9630_v2  ;;  %v8850_v40 = vpack.c.bf16 %v7150_v6, %v7149_v9 }
 0x492   : > { %8719 = vmatpush1.bf16.msra.mxu0 %v8718_v50  ;;  %v7094_v50 = vld [vmem:[%s15196_s6 + $0x2f0] sm:$0xff] }
 0x493   : > { %8800 = vmatpush1.bf16.msra.mxu1 %v8799_v54  ;;  %8720 = vmatprep.subr.bf16.mxu0 %v9630_v2  ;;  %v7095_v54 = vld [vmem:[%s15196_s6 + $0x2f8] sm:$0xff] }
 0x494   : > { %8801 = vmatprep.subr.bf16.mxu1 %v9630_v2  ;;  %v8772_v22 = vpack.c.bf16 %v7095_v54, %v7094_v50  ;;  %v3845_v50 = vrot.slane %v13314_v12, 2 }
 0x496   : > { %8722 = vmatpush1.bf16.msra.mxu0 %v8721_v25  ;;  %v7096_v25 = vld [vmem:[%s15196_s6 + $0x300] sm:$0xff] }
 0x497   : > { %8803 = vmatpush1.bf16.msra.mxu1 %v8802_v57  ;;  %8723 = vmatprep.subr.bf16.mxu0 %v9630_v2  ;;  %v7097_v57 = vld [vmem:[%s15196_s6 + $0x308] sm:$0xff] }
 0x498   : > { %8804 = vmatprep.subr.bf16.mxu1 %v9630_v2  ;;  %v8775_v18 = vpack.c.bf16 %v7097_v57, %v7096_v25 }
 0x49a   : > { %8725 = vmatpush1.bf16.msra.mxu0 %v8724_v45  ;;  %v7098_v45 = vld [vmem:[%s15196_s6 + $0x310] sm:$0xff] }
 0x49b   : > { %8806 = vmatpush1.bf16.msra.mxu1 %v8805_v28  ;;  %8726 = vmatprep.subr.bf16.mxu0 %v9630_v2  ;;  %v7099_v28 = vld [vmem:[%s15196_s6 + $0x318] sm:$0xff] }
 0x49c   : > { %8807 = vmatprep.subr.bf16.mxu1 %v9630_v2  ;;  %v8778_v31 = vpack.c.bf16 %v7099_v28, %v7098_v45  ;;  %v8829_v45 = vpack.c.bf16 %v7135_v13, %v7134_v58  ;;  %v7172_v13 = vld [vmem:[%s15196_s6 + $0x540] sm:$0xff] }
 0x49e   : > { %8728 = vmatpush1.bf16.msra.mxu0 %v8727_v17  ;;  %v7100_v17 = vld [vmem:[%s15196_s6 + $0x320] sm:$0xff] }
 0x49f   : > { %8809 = vmatpush1.bf16.msra.mxu1 %v8808_v56  ;;  %8729 = vmatprep.subr.bf16.mxu0 %v9630_v2  ;;  %v7101_v56 = vld [vmem:[%s15196_s6 + $0x328] sm:$0xff] }
 0x4a0   : > { %8810 = vmatprep.subr.bf16.mxu1 %v9630_v2  ;;  %v8781_v37 = vpack.c.bf16 %v7101_v56, %v7100_v17  ;;  %v8832_v17 = vpack.c.bf16 %v7137_v0, %v7136_v8  ;;  %v7174_v0 = vld [vmem:[%s15196_s6 + $0x550] sm:$0xff] }
 0x4a2   : > { %8731 = vmatpush1.bf16.msra.mxu0 %v8730_v47  ;;  %v7102_v47 = vld [vmem:[%s15196_s6 + $0x330] sm:$0xff] }
 0x4a3   : > { %8812 = vmatpush1.bf16.msra.mxu1 %v8811_v41  ;;  %8732 = vmatprep.subr.bf16.mxu0 %v9630_v2  ;;  %v7103_v41 = vld [vmem:[%s15196_s6 + $0x338] sm:$0xff] }
 0x4a4   : > { %8813 = vmatprep.subr.bf16.mxu1 %v9630_v2  ;;  %v8784_v59 = vpack.c.bf16 %v7103_v41, %v7102_v47  ;;  %v8835_v47 = vpack.c.bf16 %v7139_v19, %v7138_v7  ;;  %v7176_v19 = vld [vmem:[%s15196_s6 + $0x560] sm:$0xff] }
 0x4a6   : > { %8734 = vmatpush1.bf16.msra.mxu0 %v8733_v63  ;;  %v7104_v63 = vld [vmem:[%s15196_s6 + $0x340] sm:$0xff] }
 0x4a7   : > { %8815 = vmatpush1.bf16.msra.mxu1 %v8814_v24  ;;  %8735 = vmatprep.subr.bf16.mxu0 %v9630_v2  ;;  %v7105_v24 = vld [vmem:[%s15196_s6 + $0x348] sm:$0xff] }
 0x4a8   : > { %8816 = vmatprep.subr.bf16.mxu1 %v9630_v2  ;;  %v8787_v46 = vpack.c.bf16 %v7105_v24, %v7104_v63  ;;  %v8838_v63 = vpack.c.bf16 %v7141_v49, %v7140_v48  ;;  %v7178_v49 = vld [vmem:[%s15196_s6 + $0x570] sm:$0xff] }
 0x4aa   : > { %8737 = vmatpush1.bf16.msra.mxu0 %v8736_v10  ;;  %v7106_v10 = vld [vmem:[%s15196_s6 + $0x350] sm:$0xff] }
 0x4ab   : > { %8818 = vmatpush1.bf16.msra.mxu1 %v8817_v20  ;;  %8765 = vmatprep.subr.bf16.mxu0 %v9630_v2  ;;  %v7107_v20 = vld [vmem:[%s15196_s6 + $0x358] sm:$0xff] }
 0x4ac   : > { %8846 = vmatprep.subr.bf16.mxu1 %v9630_v2  ;;  %v8790_v27 = vpack.c.bf16 %v7107_v20, %v7106_v10  ;;  %v8841_v10 = vpack.c.bf16 %v7143_v33, %v7142_v35  ;;  %v7180_v33 = vld [vmem:[%s15196_s6 + $0x580] sm:$0xff] }
 0x4ad   : > { %3250 = vmatmul.mubr.f32.vlgmr.msra.gmra.mrb[40].mxu0 %v3180_v42  ;;  %v2855_v42 = vadd.f32 %v13015_v5, %v13293_v30  ;;  %v7130_v5 = vld [vmem:[%s15196_s6 + $0x400] sm:$0xff]  ;;  %v7131_v30 = vld [vmem:[%s15196_s6 + $0x408] sm:$0xff] }
 0x4ae   : > { %3535 = vmatmul.mubr.f32.vlgmr.msra.gmra.mrb[44].mxu1 %v3465_v3  ;;  %8767 = vmatpush1.bf16.msra.mxu0 %v8766_v34  ;;  %v7129_v34 = vld [vmem:[%s15196_s6 + $0x3f8] sm:$0xff]  ;;  %v3370_v3 = vrot.slane %v13002_v36, 5  ;;  %v8823_v54 = vpack.c.bf16 %v7131_v30, %v7130_v5  ;;  %v7168_v30 = vld [vmem:[%s15196_s6 + $0x520] sm:$0xff] }
 0x4af   : > { %7108 = vmatprep.mubr.msk.f32.mxu0 %vm2921_vm3, %v3371_v11  ;;  %8848 = vmatpush1.bf16.msra.mxu1 %v8847_v53  ;;  %v7185_v53 = vld [vmem:[%s15196_s6 + $0x5a0] sm:$0xff]  ;;  %v8820_v62 = vpack.c.bf16 %v7129_v34, %v7128_v32  ;;  %v13441_v6 = vmax.f32 %v2855_v42, 0.0  ;;  %v7187_v11 = vld [vmem:[%s15196_s6 + $0x5b0] sm:$0xff]  ;;  %v8844_v32 = vpack.c.bf16 %v7145_v26, %v7144_v21 }
 0x4b0   : > { %7165 = vmatprep.mubr.msk.f32.mxu1 %vm2921_vm3, %v13314_v12  ;;  %8768 = vmatprep.subr.bf16.mxu0 %v9630_v2  ;;  %v8901_v9 = vpack.c.bf16 %v7186_v61, %v7185_v53  ;;  %v7166_v42 = vld [vmem:[%s15196_s6 + $0x510] sm:$0xff]  ;;  %v7167_v53 = vld [vmem:[%s15196_s6 + $0x518] sm:$0xff]  ;;  %v7223_v61 = vld [vmem:[%s15196_s6 + $0x6c0] sm:$0xff] }
 0x4b1   : > { %8849 = vmatprep.subr.bf16.mxu1 %v9630_v2  ;;  %v7182_v26 = vld [vmem:[%s15196_s6 + $0x590] sm:$0xff] }
 0x4b2   : > { %8770 = vmatpush1.bf16.msra.mxu0 %v8769_v39  ;;  %v7188_v39 = vld [vmem:[%s15196_s6 + $0x5b8] sm:$0xff] }
 0x4b3   : > { %8851 = vmatpush1.bf16.msra.mxu1 %v8850_v40  ;;  %8771 = vmatprep.subr.bf16.mxu0 %v9630_v2  ;;  %v3561_v40 = vrot.slane %v13013_v4, 7  ;;  %v8904_v1 = vpack.c.bf16 %v7188_v39, %v7187_v11  ;;  %v7189_v4 = vld [vmem:[%s15196_s6 + $0x5c0] sm:$0xff]  ;;  %v7169_v11 = vld [vmem:[%s15196_s6 + $0x528] sm:$0xff]  ;;  %v3844_v39 = vrot.slane %v13441_v6, 2 }
 0x4b4   : > { %8852 = vmatprep.subr.bf16.mxu1 %v9630_v2 }
 0x4b6   : > { %8773 = vmatpush1.bf16.msra.mxu0 %v8772_v22  ;;  %v7133_v22 = vld [vmem:[%s15196_s6 + $0x418] sm:$0xff] }
 0x4b7   : > { %8854 = vmatpush1.bf16.msra.mxu1 %v8853_v23  ;;  %8774 = vmatprep.subr.bf16.mxu0 %v9630_v2  ;;  %v7190_v23 = vld [vmem:[%s15196_s6 + $0x5c8] sm:$0xff]  ;;  %v8826_v25 = vpack.c.bf16 %v7133_v22, %v7132_v16  ;;  %v7170_v22 = vld [vmem:[%s15196_s6 + $0x530] sm:$0xff] }
 0x4b8   : > { %8855 = vmatprep.subr.bf16.mxu1 %v9630_v2  ;;  %v8907_v57 = vpack.c.bf16 %v7190_v23, %v7189_v4  ;;  %v7171_v4 = vld [vmem:[%s15196_s6 + $0x538] sm:$0xff]  ;;  %v7227_v23 = vld [vmem:[%s15196_s6 + $0x6e0] sm:$0xff] }
 0x4ba   : > { %8776 = vmatpush1.bf16.msra.mxu0 %v8775_v18  ;;  %v7191_v18 = vld [vmem:[%s15196_s6 + $0x5d0] sm:$0xff] }
 0x4bb   : > { %8857 = vmatpush1.bf16.msra.mxu1 %v8856_v44  ;;  %8777 = vmatprep.subr.bf16.mxu0 %v9630_v2  ;;  %v7192_v44 = vld [vmem:[%s15196_s6 + $0x5d8] sm:$0xff] }
 0x4bc   : > { %8858 = vmatprep.subr.bf16.mxu1 %v9630_v2  ;;  %v8910_v28 = vpack.c.bf16 %v7192_v44, %v7191_v18  ;;  %v7173_v18 = vld [vmem:[%s15196_s6 + $0x548] sm:$0xff]  ;;  %v7229_v44 = vld [vmem:[%s15196_s6 + $0x6f0] sm:$0xff] }
 0x4be   : > { %8779 = vmatpush1.bf16.msra.mxu0 %v8778_v31  ;;  %v7193_v31 = vld [vmem:[%s15196_s6 + $0x5e0] sm:$0xff] }
 0x4bf   : > { %8860 = vmatpush1.bf16.msra.mxu1 %v8859_v55  ;;  %8780 = vmatprep.subr.bf16.mxu0 %v9630_v2  ;;  %v7194_v55 = vld [vmem:[%s15196_s6 + $0x5e8] sm:$0xff] }
 0x4c0   : > { %8861 = vmatprep.subr.bf16.mxu1 %v9630_v2  ;;  %v8913_v56 = vpack.c.bf16 %v7194_v55, %v7193_v31  ;;  %v7175_v31 = vld [vmem:[%s15196_s6 + $0x558] sm:$0xff]  ;;  %v7231_v55 = vld [vmem:[%s15196_s6 + $0x700] sm:$0xff] }
 0x4c2   : > { %8782 = vmatpush1.bf16.msra.mxu0 %v8781_v37  ;;  %v7195_v37 = vld [vmem:[%s15196_s6 + $0x5f0] sm:$0xff] }
 0x4c3   : > { %8863 = vmatpush1.bf16.msra.mxu1 %v8862_v38  ;;  %8783 = vmatprep.subr.bf16.mxu0 %v9630_v2  ;;  %v7196_v38 = vld [vmem:[%s15196_s6 + $0x5f8] sm:$0xff] }
 0x4c4   : > { %8864 = vmatprep.subr.bf16.mxu1 %v9630_v2  ;;  %v8916_v41 = vpack.c.bf16 %v7196_v38, %v7195_v37  ;;  %v7177_v37 = vld [vmem:[%s15196_s6 + $0x568] sm:$0xff]  ;;  %v7233_v38 = vld [vmem:[%s15196_s6 + $0x710] sm:$0xff] }
 0x4c6   : > { %8785 = vmatpush1.bf16.msra.mxu0 %v8784_v59  ;;  %v7197_v59 = vld [vmem:[%s15196_s6 + $0x600] sm:$0xff] }
 0x4c7   : > { %8866 = vmatpush1.bf16.msra.mxu1 %v8865_v60  ;;  %8786 = vmatprep.subr.bf16.mxu0 %v9630_v2  ;;  %v7198_v60 = vld [vmem:[%s15196_s6 + $0x608] sm:$0xff] }
 0x4c8   : > { %8867 = vmatprep.subr.bf16.mxu1 %v9630_v2  ;;  %v8919_v24 = vpack.c.bf16 %v7198_v60, %v7197_v59  ;;  %v7179_v59 = vld [vmem:[%s15196_s6 + $0x578] sm:$0xff]  ;;  %v7235_v60 = vld [vmem:[%s15196_s6 + $0x720] sm:$0xff] }
 0x4ca   : > { %8788 = vmatpush1.bf16.msra.mxu0 %v8787_v46  ;;  %v7199_v46 = vld [vmem:[%s15196_s6 + $0x610] sm:$0xff] }
 0x4cb   : > { %8869 = vmatpush1.bf16.msra.mxu1 %v8868_v51  ;;  %8789 = vmatprep.subr.bf16.mxu0 %v9630_v2  ;;  %v7200_v51 = vld [vmem:[%s15196_s6 + $0x618] sm:$0xff] }
 0x4cc   : > { %8870 = vmatprep.subr.bf16.mxu1 %v9630_v2  ;;  %v8922_v20 = vpack.c.bf16 %v7200_v51, %v7199_v46  ;;  %v7181_v46 = vld [vmem:[%s15196_s6 + $0x588] sm:$0xff]  ;;  %v7237_v51 = vld [vmem:[%s15196_s6 + $0x730] sm:$0xff] }
 0x4ce   : > { %8791 = vmatpush1.bf16.msra.mxu0 %v8790_v27  ;;  %v7201_v27 = vld [vmem:[%s15196_s6 + $0x620] sm:$0xff] }
 0x4cf   : > { %8872 = vmatpush1.bf16.msra.mxu1 %v8871_v29  ;;  %8819 = vmatprep.subr.bf16.mxu0 %v9630_v2  ;;  %v7202_v29 = vld [vmem:[%s15196_s6 + $0x628] sm:$0xff] }
 0x4d0   : > { %8900 = vmatprep.subr.bf16.mxu1 %v9630_v2  ;;  %v8925_v34 = vpack.c.bf16 %v7202_v29, %v7201_v27  ;;  %v7183_v27 = vld [vmem:[%s15196_s6 + $0x598] sm:$0xff]  ;;  %v7239_v29 = vld [vmem:[%s15196_s6 + $0x740] sm:$0xff] }
 0x4d1   : > { %3440 = vmatmul.mubr.f32.vlgmr.msra.gmra.mrb[42].mxu0 %v3370_v3  ;;  %v8874_v3 = vpack.c.bf16 %v7167_v53, %v7166_v42  ;;  %v7204_v53 = vld [vmem:[%s15196_s6 + $0x630] sm:$0xff] }
 0x4d2   : > { %3723 = vmatmul.mubr.f32.vlgmr.msra.gmra.mrb[46].mxu1 %v13441_v6  ;;  %8821 = vmatpush1.bf16.msra.mxu0 %v8820_v62  ;;  %v7224_v62 = vld [vmem:[%s15196_s6 + $0x6c8] sm:$0xff] }
 0x4d3   : > { %7146 = vmatprep.mubr.msk.f32.mxu0 %vm2921_vm3, %v3561_v40  ;;  %8902 = vmatpush1.bf16.msra.mxu1 %v8901_v9  ;;  %v3560_v9 = vrot.slane %v13002_v36, 7  ;;  %v8955_v5 = vpack.c.bf16 %v7224_v62, %v7223_v61  ;;  %v7225_v40 = vld [vmem:[%s15196_s6 + $0x6d0] sm:$0xff]  ;;  %v7226_v36 = vld [vmem:[%s15196_s6 + $0x6d8] sm:$0xff]  ;;  %v7261_v62 = vld [vmem:[%s15196_s6 + $0x7e0] sm:$0xff] }
 0x4d4   : > { %7203 = vmatprep.mubr.msk.f32.mxu1 %vm2921_vm3, %v3845_v50  ;;  %8822 = vmatprep.subr.bf16.mxu0 %v9630_v2  ;;  %v3750_v50 = vrot.slane %v13314_v12, 1  ;;  %v8958_v16 = vpack.c.bf16 %v7226_v36, %v7225_v40  ;;  %v7205_v61 = vld [vmem:[%s15196_s6 + $0x638] sm:$0xff]  ;;  %v4034_v40 = vrot.slane %v13441_v6, 4  ;;  %v7263_v36 = vld [vmem:[%s15196_s6 + $0x7f0] sm:$0xff] }
 0x4d5   : > { %8903 = vmatprep.subr.bf16.mxu1 %v9630_v2 }
 0x4d6   : > { %8824 = vmatpush1.bf16.msra.mxu0 %v8823_v54  ;;  %v4035_v54 = vrot.slane %v13314_v12, 4 }
 0x4d7   : > { %8905 = vmatpush1.bf16.msra.mxu1 %v8904_v1  ;;  %8825 = vmatprep.subr.bf16.mxu0 %v9630_v2  ;;  %v8877_v1 = vpack.c.bf16 %v7169_v11, %v7168_v30  ;;  %v7206_v11 = vld [vmem:[%s15196_s6 + $0x640] sm:$0xff] }
 0x4d8   : > { %8906 = vmatprep.subr.bf16.mxu1 %v9630_v2 }
 0x4da   : > { %8827 = vmatpush1.bf16.msra.mxu0 %v8826_v25  ;;  %v7228_v25 = vld [vmem:[%s15196_s6 + $0x6e8] sm:$0xff] }
 0x4db   : > { %8908 = vmatpush1.bf16.msra.mxu1 %v8907_v57  ;;  %8828 = vmatprep.subr.bf16.mxu0 %v9630_v2  ;;  %v8880_v57 = vpack.c.bf16 %v7171_v4, %v7170_v22  ;;  %v8961_v58 = vpack.c.bf16 %v7228_v25, %v7227_v23  ;;  %v7208_v4 = vld [vmem:[%s15196_s6 + $0x650] sm:$0xff]  ;;  %v7209_v23 = vld [vmem:[%s15196_s6 + $0x658] sm:$0xff]  ;;  %v7265_v25 = vld [vmem:[%s15196_s6 + $0x800] sm:$0xff] }
 0x4dc   : > { %8909 = vmatprep.subr.bf16.mxu1 %v9630_v2 }
 0x4de   : > { %8830 = vmatpush1.bf16.msra.mxu0 %v8829_v45  ;;  %v7230_v45 = vld [vmem:[%s15196_s6 + $0x6f8] sm:$0xff] }
 0x4df   : > { %8911 = vmatpush1.bf16.msra.mxu1 %v8910_v28  ;;  %8831 = vmatprep.subr.bf16.mxu0 %v9630_v2  ;;  %v8883_v28 = vpack.c.bf16 %v7173_v18, %v7172_v13  ;;  %v8964_v8 = vpack.c.bf16 %v7230_v45, %v7229_v44  ;;  %v7210_v18 = vld [vmem:[%s15196_s6 + $0x660] sm:$0xff]  ;;  %v7211_v44 = vld [vmem:[%s15196_s6 + $0x668] sm:$0xff]  ;;  %v7267_v45 = vld [vmem:[%s15196_s6 + $0x810] sm:$0xff] }
 0x4e0   : > { %8912 = vmatprep.subr.bf16.mxu1 %v9630_v2 }
 0x4e2   : > { %8833 = vmatpush1.bf16.msra.mxu0 %v8832_v17  ;;  %v7232_v17 = vld [vmem:[%s15196_s6 + $0x708] sm:$0xff] }
 0x4e3   : > { %8914 = vmatpush1.bf16.msra.mxu1 %v8913_v56  ;;  %8834 = vmatprep.subr.bf16.mxu0 %v9630_v2  ;;  %v8886_v56 = vpack.c.bf16 %v7175_v31, %v7174_v0  ;;  %v8967_v7 = vpack.c.bf16 %v7232_v17, %v7231_v55  ;;  %v7212_v31 = vld [vmem:[%s15196_s6 + $0x670] sm:$0xff]  ;;  %v7213_v55 = vld [vmem:[%s15196_s6 + $0x678] sm:$0xff]  ;;  %v7269_v17 = vld [vmem:[%s15196_s6 + $0x820] sm:$0xff] }
 0x4e4   : > { %8915 = vmatprep.subr.bf16.mxu1 %v9630_v2 }
 0x4e6   : > { %8836 = vmatpush1.bf16.msra.mxu0 %v8835_v47  ;;  %v7234_v47 = vld [vmem:[%s15196_s6 + $0x718] sm:$0xff] }
 0x4e7   : > { %8917 = vmatpush1.bf16.msra.mxu1 %v8916_v41  ;;  %8837 = vmatprep.subr.bf16.mxu0 %v9630_v2  ;;  %v8889_v41 = vpack.c.bf16 %v7177_v37, %v7176_v19  ;;  %v8970_v48 = vpack.c.bf16 %v7234_v47, %v7233_v38  ;;  %v7214_v37 = vld [vmem:[%s15196_s6 + $0x680] sm:$0xff]  ;;  %v7215_v38 = vld [vmem:[%s15196_s6 + $0x688] sm:$0xff]  ;;  %v7271_v47 = vld [vmem:[%s15196_s6 + $0x830] sm:$0xff] }
 0x4e8   : > { %8918 = vmatprep.subr.bf16.mxu1 %v9630_v2 }
 0x4ea   : > { %8839 = vmatpush1.bf16.msra.mxu0 %v8838_v63  ;;  %v7236_v63 = vld [vmem:[%s15196_s6 + $0x728] sm:$0xff] }
 0x4eb   : > { %8920 = vmatpush1.bf16.msra.mxu1 %v8919_v24  ;;  %8840 = vmatprep.subr.bf16.mxu0 %v9630_v2  ;;  %v8892_v24 = vpack.c.bf16 %v7179_v59, %v7178_v49  ;;  %v8973_v35 = vpack.c.bf16 %v7236_v63, %v7235_v60  ;;  %v7216_v59 = vld [vmem:[%s15196_s6 + $0x690] sm:$0xff]  ;;  %v7217_v60 = vld [vmem:[%s15196_s6 + $0x698] sm:$0xff]  ;;  %v7273_v63 = vld [vmem:[%s15196_s6 + $0x840] sm:$0xff] }
 0x4ec   : > { %8921 = vmatprep.subr.bf16.mxu1 %v9630_v2 }
 0x4ee   : > { %8842 = vmatpush1.bf16.msra.mxu0 %v8841_v10  ;;  %v7238_v10 = vld [vmem:[%s15196_s6 + $0x738] sm:$0xff] }
 0x4ef   : > { %8923 = vmatpush1.bf16.msra.mxu1 %v8922_v20  ;;  %8843 = vmatprep.subr.bf16.mxu0 %v9630_v2  ;;  %v8895_v20 = vpack.c.bf16 %v7181_v46, %v7180_v33  ;;  %v8976_v21 = vpack.c.bf16 %v7238_v10, %v7237_v51  ;;  %v7218_v46 = vld [vmem:[%s15196_s6 + $0x6a0] sm:$0xff]  ;;  %v7219_v51 = vld [vmem:[%s15196_s6 + $0x6a8] sm:$0xff]  ;;  %v7275_v10 = vld [vmem:[%s15196_s6 + $0x850] sm:$0xff] }
 0x4f0   : > { %8924 = vmatprep.subr.bf16.mxu1 %v9630_v2 }
 0x4f2   : > { %8845 = vmatpush1.bf16.msra.mxu0 %v8844_v32  ;;  %v7240_v32 = vld [vmem:[%s15196_s6 + $0x748] sm:$0xff] }
 0x4f3   : > { %8926 = vmatpush1.bf16.msra.mxu1 %v8925_v34  ;;  %8873 = vmatprep.subr.bf16.mxu0 %v9630_v2  ;;  %v8898_v34 = vpack.c.bf16 %v7183_v27, %v7182_v26  ;;  %v8979_v42 = vpack.c.bf16 %v7240_v32, %v7239_v29  ;;  %v7220_v27 = vld [vmem:[%s15196_s6 + $0x6b0] sm:$0xff]  ;;  %v7221_v29 = vld [vmem:[%s15196_s6 + $0x6b8] sm:$0xff]  ;;  %v7277_v32 = vld [vmem:[%s15196_s6 + $0x860] sm:$0xff] }
 0x4f4   : > { %8954 = vmatprep.subr.bf16.mxu1 %v9630_v2 }
 0x4f5   : > { %3630 = vmatmul.mubr.f32.vlgmr.msra.gmra.mrb[44].mxu0 %v3560_v9  ;;  %v8928_v9 = vpack.c.bf16 %v7205_v61, %v7204_v53  ;;  %v13817_v53 = vpop.permute.xlu0 %2774 }
 0x4f6   : > { %3914 = vmatmul.mubr.f32.vlgmr.msra.gmra.mrb[48].mxu1 %v3844_v39  ;;  %8875 = vmatpush1.bf16.msra.mxu0 %v8874_v3  ;;  %v7262_v3 = vld [vmem:[%s15196_s6 + $0x7e8] sm:$0xff] }
 0x4f7   : > { %7184 = vmatprep.mubr.msk.f32.mxu0 %vm2921_vm3, %v3750_v50  ;;  %8956 = vmatpush1.bf16.msra.mxu1 %v8955_v5  ;;  %v3749_v5 = vrot.slane %v13441_v6, 1  ;;  %v9009_v30 = vpack.c.bf16 %v7262_v3, %v7261_v62  ;;  %v7207_v39 = vld [vmem:[%s15196_s6 + $0x648] sm:$0xff]  ;;  %v7264_v50 = vld [vmem:[%s15196_s6 + $0x7f8] sm:$0xff]  ;;  %v7242_v62 = vld [vmem:[%s15196_s6 + $0x750] sm:$0xff] }
 0x4f8   : > { %7241 = vmatprep.mubr.msk.f32.mxu1 %vm2921_vm3, %v4035_v54  ;;  %8876 = vmatprep.subr.bf16.mxu0 %v9630_v2  ;;  %v3940_v54 = vrot.slane %v13314_v12, 3  ;;  %v9012_v22 = vpack.c.bf16 %v7264_v50, %v7263_v36  ;;  %v7243_v3 = vld [vmem:[%s15196_s6 + $0x758] sm:$0xff]  ;;  %v2863_v36 = vadd.f32 %v13039_v52, %v13817_v53  ;;  %v7301_v52 = vld [vmem:[%s15196_s6 + $0x910] sm:$0xff] }
 0x4f9   : > { %8957 = vmatprep.subr.bf16.mxu1 %v9630_v2  ;;  %v8982_v50 = vpack.c.bf16 %v7243_v3, %v7242_v62  ;;  %v7258_v62 = vld [vmem:[%s15196_s6 + $0x7d0] sm:$0xff]  ;;  %v7259_v3 = vld [vmem:[%s15196_s6 + $0x7d8] sm:$0xff] }
 0x4fa   : > { %8878 = vmatpush1.bf16.msra.mxu0 %v8877_v1  ;;  %v4225_v1 = vrot.slane %v13314_v12, 6 }
 0x4fb   : > { %8959 = vmatpush1.bf16.msra.mxu1 %v8958_v16  ;;  %8879 = vmatprep.subr.bf16.mxu0 %v9630_v2  ;;  %v8931_v16 = vpack.c.bf16 %v7207_v39, %v7206_v11  ;;  %v7300_v11 = vld [vmem:[%s15196_s6 + $0x908] sm:$0xff] }
 0x4fc   : > { %8960 = vmatprep.subr.bf16.mxu1 %v9630_v2 }
 0x4fe   : > { %8881 = vmatpush1.bf16.msra.mxu0 %v8880_v57  ;;  %v7266_v57 = vld [vmem:[%s15196_s6 + $0x808] sm:$0xff] }
 0x4ff   : > { %8962 = vmatpush1.bf16.msra.mxu1 %v8961_v58  ;;  %8882 = vmatprep.subr.bf16.mxu0 %v9630_v2  ;;  %v8934_v58 = vpack.c.bf16 %v7209_v23, %v7208_v4  ;;  %v9015_v13 = vpack.c.bf16 %v7266_v57, %v7265_v25  ;;  %v4224_v4 = vrot.slane %v13441_v6, 6  ;;  %v7302_v23 = vld [vmem:[%s15196_s6 + $0x918] sm:$0xff]  ;;  %v4130_v25 = vrot.slane %v13314_v12, 5 }
 0x500   : > { %8963 = vmatprep.subr.bf16.mxu1 %v9630_v2  ;;  %v13856_v57 = vmax.f32 %v2863_v36, 0.0  ;;  %v7280_v36 = vld [vmem:[%s15196_s6 + $0x870] sm:$0xff] }
 0x502   : > { %8884 = vmatpush1.bf16.msra.mxu0 %v8883_v28  ;;  %v7268_v28 = vld [vmem:[%s15196_s6 + $0x818] sm:$0xff] }
 0x503   : > { %8965 = vmatpush1.bf16.msra.mxu1 %v8964_v8  ;;  %8885 = vmatprep.subr.bf16.mxu0 %v9630_v2  ;;  %v8937_v8 = vpack.c.bf16 %v7211_v44, %v7210_v18  ;;  %v9018_v0 = vpack.c.bf16 %v7268_v28, %v7267_v45  ;;  %v7246_v18 = vld [vmem:[%s15196_s6 + $0x770] sm:$0xff]  ;;  %v7247_v44 = vld [vmem:[%s15196_s6 + $0x778] sm:$0xff]  ;;  %v7303_v45 = vld [vmem:[%s15196_s6 + $0x920] sm:$0xff] }
 0x504   : > { %8966 = vmatprep.subr.bf16.mxu1 %v9630_v2  ;;  %v7304_v28 = vld [vmem:[%s15196_s6 + $0x928] sm:$0xff] }
 0x506   : > { %8887 = vmatpush1.bf16.msra.mxu0 %v8886_v56  ;;  %v7270_v56 = vld [vmem:[%s15196_s6 + $0x828] sm:$0xff] }
 0x507   : > { %8968 = vmatpush1.bf16.msra.mxu1 %v8967_v7  ;;  %8888 = vmatprep.subr.bf16.mxu0 %v9630_v2  ;;  %v8940_v7 = vpack.c.bf16 %v7213_v55, %v7212_v31  ;;  %v9021_v19 = vpack.c.bf16 %v7270_v56, %v7269_v17  ;;  %v7248_v31 = vld [vmem:[%s15196_s6 + $0x780] sm:$0xff]  ;;  %v7249_v55 = vld [vmem:[%s15196_s6 + $0x788] sm:$0xff]  ;;  %v7305_v17 = vld [vmem:[%s15196_s6 + $0x930] sm:$0xff] }
 0x508   : > { %8969 = vmatprep.subr.bf16.mxu1 %v9630_v2  ;;  %v7306_v56 = vld [vmem:[%s15196_s6 + $0x938] sm:$0xff] }
 0x50a   : > { %8890 = vmatpush1.bf16.msra.mxu0 %v8889_v41  ;;  %v7272_v41 = vld [vmem:[%s15196_s6 + $0x838] sm:$0xff] }
 0x50b   : > { %8971 = vmatpush1.bf16.msra.mxu1 %v8970_v48  ;;  %8891 = vmatprep.subr.bf16.mxu0 %v9630_v2  ;;  %v8943_v48 = vpack.c.bf16 %v7215_v38, %v7214_v37  ;;  %v9024_v49 = vpack.c.bf16 %v7272_v41, %v7271_v47  ;;  %v7250_v37 = vld [vmem:[%s15196_s6 + $0x790] sm:$0xff]  ;;  %v7251_v38 = vld [vmem:[%s15196_s6 + $0x798] sm:$0xff]  ;;  %v7307_v47 = vld [vmem:[%s15196_s6 + $0x940] sm:$0xff] }
 0x50c   : > { %8972 = vmatprep.subr.bf16.mxu1 %v9630_v2  ;;  %v7308_v41 = vld [vmem:[%s15196_s6 + $0x948] sm:$0xff] }
 0x50e   : > { %8893 = vmatpush1.bf16.msra.mxu0 %v8892_v24  ;;  %v7274_v24 = vld [vmem:[%s15196_s6 + $0x848] sm:$0xff] }
 0x50f   : > { %8974 = vmatpush1.bf16.msra.mxu1 %v8973_v35  ;;  %8894 = vmatprep.subr.bf16.mxu0 %v9630_v2  ;;  %v8946_v35 = vpack.c.bf16 %v7217_v60, %v7216_v59  ;;  %v9027_v33 = vpack.c.bf16 %v7274_v24, %v7273_v63  ;;  %v7252_v59 = vld [vmem:[%s15196_s6 + $0x7a0] sm:$0xff]  ;;  %v7253_v60 = vld [vmem:[%s15196_s6 + $0x7a8] sm:$0xff]  ;;  %v7309_v63 = vld [vmem:[%s15196_s6 + $0x950] sm:$0xff] }
 0x510   : > { %8975 = vmatprep.subr.bf16.mxu1 %v9630_v2  ;;  %v7310_v24 = vld [vmem:[%s15196_s6 + $0x958] sm:$0xff] }
 0x512   : > { %8896 = vmatpush1.bf16.msra.mxu0 %v8895_v20  ;;  %v7276_v20 = vld [vmem:[%s15196_s6 + $0x858] sm:$0xff] }
 0x513   : > { %8977 = vmatpush1.bf16.msra.mxu1 %v8976_v21  ;;  %8897 = vmatprep.subr.bf16.mxu0 %v9630_v2  ;;  %v8949_v21 = vpack.c.bf16 %v7219_v51, %v7218_v46  ;;  %v9030_v26 = vpack.c.bf16 %v7276_v20, %v7275_v10  ;;  %v7254_v46 = vld [vmem:[%s15196_s6 + $0x7b0] sm:$0xff]  ;;  %v7255_v51 = vld [vmem:[%s15196_s6 + $0x7b8] sm:$0xff]  ;;  %v7311_v10 = vld [vmem:[%s15196_s6 + $0x960] sm:$0xff] }
 0x514   : > { %8978 = vmatprep.subr.bf16.mxu1 %v9630_v2  ;;  %v7312_v20 = vld [vmem:[%s15196_s6 + $0x968] sm:$0xff] }
 0x516   : > { %8899 = vmatpush1.bf16.msra.mxu0 %v8898_v34  ;;  %v7278_v34 = vld [vmem:[%s15196_s6 + $0x868] sm:$0xff] }
 0x517   : > { %8980 = vmatpush1.bf16.msra.mxu1 %v8979_v42  ;;  %8927 = vmatprep.subr.bf16.mxu0 %v9630_v2  ;;  %v8952_v42 = vpack.c.bf16 %v7221_v29, %v7220_v27  ;;  %v9033_v61 = vpack.c.bf16 %v7278_v34, %v7277_v32  ;;  %v7256_v27 = vld [vmem:[%s15196_s6 + $0x7c0] sm:$0xff]  ;;  %v7257_v29 = vld [vmem:[%s15196_s6 + $0x7c8] sm:$0xff]  ;;  %v7313_v32 = vld [vmem:[%s15196_s6 + $0x970] sm:$0xff] }
 0x518   : > { %9008 = vmatprep.subr.bf16.mxu1 %v9630_v2  ;;  %v7314_v34 = vld [vmem:[%s15196_s6 + $0x978] sm:$0xff] }
 0x519   : > { %3819 = vmatmul.mubr.f32.vlgmr.msra.gmra.mrb[46].mxu0 %v3749_v5 }
 0x51a   : > { %4104 = vmatmul.mubr.f32.vlgmr.msra.gmra.mrb[50].mxu1 %v4034_v40  ;;  %8929 = vmatpush1.bf16.msra.mxu0 %v8928_v9 }
 0x51b   : > { %7222 = vmatprep.mubr.msk.f32.mxu0 %vm2921_vm3, %v3940_v54  ;;  %9010 = vmatpush1.bf16.msra.mxu1 %v9009_v30  ;;  %v7299_v30 = vld [vmem:[%s15196_s6 + $0x900] sm:$0xff]  ;;  %v3939_v54 = vrot.slane %v13441_v6, 3 }
 0x51c   : > { %7279 = vmatprep.mubr.msk.f32.mxu1 %vm2921_vm3, %v4225_v1  ;;  %8930 = vmatprep.subr.bf16.mxu0 %v9630_v2  ;;  %v9063_v1 = vpack.c.bf16 %v7300_v11, %v7299_v30  ;;  %v7315_v30 = vld [vmem:[%s15196_s6 + $0x980] sm:$0xff]  ;;  %v7316_v11 = vld [vmem:[%s15196_s6 + $0x988] sm:$0xff] }
 0x51d   : > { %9011 = vmatprep.subr.bf16.mxu1 %v9630_v2 }
 0x51e   : > { %8932 = vmatpush1.bf16.msra.mxu0 %v8931_v16  ;;  %v7244_v16 = vld [vmem:[%s15196_s6 + $0x760] sm:$0xff] }
 0x51f   : > { %9013 = vmatpush1.bf16.msra.mxu1 %v9012_v22  ;;  %8933 = vmatprep.subr.bf16.mxu0 %v9630_v2  ;;  %v7245_v22 = vld [vmem:[%s15196_s6 + $0x768] sm:$0xff] }
 0x520   : > { %9014 = vmatprep.subr.bf16.mxu1 %v9630_v2 }
 0x522   : > { %8935 = vmatpush1.bf16.msra.mxu0 %v8934_v58  ;;  %v8985_v58 = vpack.c.bf16 %v7245_v22, %v7244_v16  ;;  %v7337_v22 = vld [vmem:[%s15196_s6 + $0xa20] sm:$0xff] }
 0x523   : > { %9016 = vmatpush1.bf16.msra.mxu1 %v9015_v13  ;;  %8936 = vmatprep.subr.bf16.mxu0 %v9630_v2  ;;  %v9066_v13 = vpack.c.bf16 %v7302_v23, %v7301_v52 }
 0x524   : > { %9017 = vmatprep.subr.bf16.mxu1 %v9630_v2 }
 0x526   : > { %8938 = vmatpush1.bf16.msra.mxu0 %v8937_v8  ;;  %v8988_v8 = vpack.c.bf16 %v7247_v44, %v7246_v18  ;;  %v7283_v18 = vld [vmem:[%s15196_s6 + $0x888] sm:$0xff] }
 0x527   : > { %9019 = vmatpush1.bf16.msra.mxu1 %v9018_v0  ;;  %8939 = vmatprep.subr.bf16.mxu0 %v9630_v2  ;;  %v9069_v0 = vpack.c.bf16 %v7304_v28, %v7303_v45  ;;  %v7339_v45 = vld [vmem:[%s15196_s6 + $0xa30] sm:$0xff]  ;;  %v7340_v28 = vld [vmem:[%s15196_s6 + $0xa38] sm:$0xff] }
 0x528   : > { %9020 = vmatprep.subr.bf16.mxu1 %v9630_v2 }
 0x52a   : > { %8941 = vmatpush1.bf16.msra.mxu0 %v8940_v7  ;;  %v8991_v7 = vpack.c.bf16 %v7249_v55, %v7248_v31  ;;  %v9120_v31 = vpack.c.bf16 %v7340_v28, %v7339_v45  ;;  %v7284_v55 = vld [vmem:[%s15196_s6 + $0x890] sm:$0xff] }
 0x52b   : > { %9022 = vmatpush1.bf16.msra.mxu1 %v9021_v19  ;;  %8942 = vmatprep.subr.bf16.mxu0 %v9630_v2  ;;  %v9072_v19 = vpack.c.bf16 %v7306_v56, %v7305_v17  ;;  %v7285_v17 = vld [vmem:[%s15196_s6 + $0x898] sm:$0xff]  ;;  %v7342_v56 = vld [vmem:[%s15196_s6 + $0xa48] sm:$0xff] }
 0x52c   : > { %9023 = vmatprep.subr.bf16.mxu1 %v9630_v2 }
 0x52e   : > { %8944 = vmatpush1.bf16.msra.mxu0 %v8943_v48  ;;  %v8994_v48 = vpack.c.bf16 %v7251_v38, %v7250_v37  ;;  %v7286_v37 = vld [vmem:[%s15196_s6 + $0x8a0] sm:$0xff]  ;;  %v7287_v38 = vld [vmem:[%s15196_s6 + $0x8a8] sm:$0xff] }
 0x52f   : > { %9025 = vmatpush1.bf16.msra.mxu1 %v9024_v49  ;;  %8945 = vmatprep.subr.bf16.mxu0 %v9630_v2  ;;  %v9075_v49 = vpack.c.bf16 %v7308_v41, %v7307_v47  ;;  %v7343_v47 = vld [vmem:[%s15196_s6 + $0xa50] sm:$0xff]  ;;  %v7344_v41 = vld [vmem:[%s15196_s6 + $0xa58] sm:$0xff] }
 0x530   : > { %9026 = vmatprep.subr.bf16.mxu1 %v9630_v2 }
 0x532   : > { %8947 = vmatpush1.bf16.msra.mxu0 %v8946_v35  ;;  %v8997_v35 = vpack.c.bf16 %v7253_v60, %v7252_v59  ;;  %v7288_v59 = vld [vmem:[%s15196_s6 + $0x8b0] sm:$0xff]  ;;  %v7289_v60 = vld [vmem:[%s15196_s6 + $0x8b8] sm:$0xff] }
 0x533   : > { %9028 = vmatpush1.bf16.msra.mxu1 %v9027_v33  ;;  %8948 = vmatprep.subr.bf16.mxu0 %v9630_v2  ;;  %v9078_v33 = vpack.c.bf16 %v7310_v24, %v7309_v63  ;;  %v7345_v63 = vld [vmem:[%s15196_s6 + $0xa60] sm:$0xff]  ;;  %v7346_v24 = vld [vmem:[%s15196_s6 + $0xa68] sm:$0xff] }
 0x534   : > { %9029 = vmatprep.subr.bf16.mxu1 %v9630_v2 }
 0x536   : > { %8950 = vmatpush1.bf16.msra.mxu0 %v8949_v21  ;;  %v9000_v21 = vpack.c.bf16 %v7255_v51, %v7254_v46  ;;  %v7290_v46 = vld [vmem:[%s15196_s6 + $0x8c0] sm:$0xff]  ;;  %v7291_v51 = vld [vmem:[%s15196_s6 + $0x8c8] sm:$0xff] }
 0x537   : > { %9031 = vmatpush1.bf16.msra.mxu1 %v9030_v26  ;;  %8951 = vmatprep.subr.bf16.mxu0 %v9630_v2  ;;  %v9081_v26 = vpack.c.bf16 %v7312_v20, %v7311_v10  ;;  %v7347_v10 = vld [vmem:[%s15196_s6 + $0xa70] sm:$0xff]  ;;  %v7348_v20 = vld [vmem:[%s15196_s6 + $0xa78] sm:$0xff] }
 0x538   : > { %v13826_v9 = vpop.f32.mrb[36].mxu0  ;;  %v13828_v5 = vpop.f32.mrb[40].mxu1  ;;  %9032 = vmatprep.subr.bf16.mxu1 %v9630_v2 }
 0x539   : > { %v2992_v39 = vpop.f32.mrb[37].mxu0  ;;  %v3158_v40 = vpop.f32.mrb[41].mxu1 }
 0x53a   : > { %8953 = vmatpush1.bf16.msra.mxu0 %v8952_v42  ;;  %v9003_v42 = vpack.c.bf16 %v7257_v29, %v7256_v27  ;;  %v9006_v39 = vpack.c.bf16 %v7259_v3, %v7258_v62  ;;  %v9087_v40 = vpack.c.bf16 %v7316_v11, %v7315_v30  ;;  %v7292_v27 = vld [vmem:[%s15196_s6 + $0x8d0] sm:$0xff]  ;;  %v7293_v29 = vld [vmem:[%s15196_s6 + $0x8d8] sm:$0xff]  ;;  %v7294_v62 = vld [vmem:[%s15196_s6 + $0x8e0] sm:$0xff] }
 0x53b   : > { %9034 = vmatpush1.bf16.msra.mxu1 %v9033_v61  ;;  %8981 = vmatprep.subr.bf16.mxu0 %v9630_v2  ;;  %v9084_v61 = vpack.c.bf16 %v7314_v34, %v7313_v32  ;;  %v7349_v32 = vld [vmem:[%s15196_s6 + $0xa80] sm:$0xff]  ;;  %v7350_v34 = vld [vmem:[%s15196_s6 + $0xa88] sm:$0xff]  ;;  %v7351_v30 = vld [vmem:[%s15196_s6 + $0xa90] sm:$0xff] }
 0x53c   : > { %9062 = vmatprep.subr.bf16.mxu1 %v9630_v2  ;;  %v7295_v3 = vld [vmem:[%s15196_s6 + $0x8e8] sm:$0xff]  ;;  %v7352_v11 = vld [vmem:[%s15196_s6 + $0xa98] sm:$0xff] }
 0x53d   : > { %4009 = vmatmul.mubr.f32.vlgmr.msra.gmra.mrb[48].mxu0 %v3939_v54  ;;  %v2861_v54 = vadd.f32 %v13035_v43, %v13817_v53  ;;  %v4129_v43 = vrot.slane %v13441_v6, 5 }
 0x53e   : > { %4294 = vmatmul.mubr.f32.vlgmr.msra.gmra.mrb[52].mxu1 %v4224_v4  ;;  %8983 = vmatpush1.bf16.msra.mxu0 %v8982_v50  ;;  %v7281_v50 = vld [vmem:[%s15196_s6 + $0x878] sm:$0xff]  ;;  %v7338_v4 = vld [vmem:[%s15196_s6 + $0xa28] sm:$0xff] }
 0x53f   : > { %7260 = vmatprep.mubr.msk.f32.mxu0 %vm2921_vm3, %v4130_v25  ;;  %9064 = vmatpush1.bf16.msra.mxu1 %v9063_v1  ;;  %v9117_v53 = vpack.c.bf16 %v7338_v4, %v7337_v22  ;;  %v13989_v44 = vmax.f32 %v2861_v54, 0.0  ;;  %v7353_v54 = vld [vmem:[%s15196_s6 + $0xaa0] sm:$0xff] }
 0x540   : > { %7317 = vmatprep.mubr.msk.f32.mxu1 %vm2921_vm3, %v13856_v57  ;;  %8984 = vmatprep.subr.bf16.mxu0 %v9630_v2 }
 0x541   : > { %9065 = vmatprep.subr.bf16.mxu1 %v9630_v2 }
 0x542   : > { %8986 = vmatpush1.bf16.msra.mxu0 %v8985_v58  ;;  %v9036_v58 = vpack.c.bf16 %v7281_v50, %v7280_v36  ;;  %v7296_v36 = vld [vmem:[%s15196_s6 + $0x8f0] sm:$0xff]  ;;  %v7297_v50 = vld [vmem:[%s15196_s6 + $0x8f8] sm:$0xff] }
 0x543   : > { %9067 = vmatpush1.bf16.msra.mxu1 %v9066_v13  ;;  %8987 = vmatprep.subr.bf16.mxu0 %v9630_v2  ;;  %v7282_v13 = vld [vmem:[%s15196_s6 + $0x880] sm:$0xff]  ;;  %v9060_v22 = vpack.c.bf16 %v7297_v50, %v7296_v36  ;;  %v7333_v36 = vld [vmem:[%s15196_s6 + $0xa08] sm:$0xff]  ;;  %v7389_v50 = vld [vmem:[%s15196_s6 + $0xbb0] sm:$0xff] }
 0x544   : > { %9068 = vmatprep.subr.bf16.mxu1 %v9630_v2 }
 0x546   : > { %8989 = vmatpush1.bf16.msra.mxu0 %v8988_v8  ;;  %v4320_v8 = vrot.slane %v13314_v12, 7  ;;  %v7341_v12 = vld [vmem:[%s15196_s6 + $0xa40] sm:$0xff] }
 0x547   : > { %9070 = vmatpush1.bf16.msra.mxu1 %v9069_v0  ;;  %8990 = vmatprep.subr.bf16.mxu0 %v9630_v2  ;;  %v9039_v0 = vpack.c.bf16 %v7283_v18, %v7282_v13 }
 0x548   : > { %9071 = vmatprep.subr.bf16.mxu1 %v9630_v2 }
 0x54a   : > { %8992 = vmatpush1.bf16.msra.mxu0 %v8991_v7  ;;  %v9042_v7 = vpack.c.bf16 %v7285_v17, %v7284_v55  ;;  %v4603_v55 = vrot.slane %v13989_v44, 2  ;;  %v7378_v17 = vld [vmem:[%s15196_s6 + $0xb58] sm:$0xff] }
 0x54b   : > { %9073 = vmatpush1.bf16.msra.mxu1 %v9072_v19  ;;  %8993 = vmatprep.subr.bf16.mxu0 %v9630_v2  ;;  %v9123_v19 = vpack.c.bf16 %v7342_v56, %v7341_v12  ;;  %v4509_v12 = vrot.slane %v13856_v57, 1 }
 0x54c   : > { %9074 = vmatprep.subr.bf16.mxu1 %v9630_v2 }
 0x54e   : > { %8995 = vmatpush1.bf16.msra.mxu0 %v8994_v48  ;;  %v9045_v48 = vpack.c.bf16 %v7287_v38, %v7286_v37  ;;  %v7323_v37 = vld [vmem:[%s15196_s6 + $0x9b8] sm:$0xff]  ;;  %v7379_v38 = vld [vmem:[%s15196_s6 + $0xb60] sm:$0xff] }
 0x54f   : > { %9076 = vmatpush1.bf16.msra.mxu1 %v9075_v49  ;;  %8996 = vmatprep.subr.bf16.mxu0 %v9630_v2  ;;  %v9126_v49 = vpack.c.bf16 %v7344_v41, %v7343_v47  ;;  %v7380_v47 = vld [vmem:[%s15196_s6 + $0xb68] sm:$0xff] }
 0x550   : > { %9077 = vmatprep.subr.bf16.mxu1 %v9630_v2 }
 0x552   : > { %8998 = vmatpush1.bf16.msra.mxu0 %v8997_v35  ;;  %v9048_v35 = vpack.c.bf16 %v7289_v60, %v7288_v59  ;;  %v7325_v59 = vld [vmem:[%s15196_s6 + $0x9c8] sm:$0xff]  ;;  %v7381_v60 = vld [vmem:[%s15196_s6 + $0xb70] sm:$0xff] }
 0x553   : > { %9079 = vmatpush1.bf16.msra.mxu1 %v9078_v33  ;;  %8999 = vmatprep.subr.bf16.mxu0 %v9630_v2  ;;  %v9129_v33 = vpack.c.bf16 %v7346_v24, %v7345_v63  ;;  %v7382_v63 = vld [vmem:[%s15196_s6 + $0xb78] sm:$0xff] }
 0x554   : > { %9080 = vmatprep.subr.bf16.mxu1 %v9630_v2 }
 0x556   : > { %9001 = vmatpush1.bf16.msra.mxu0 %v9000_v21  ;;  %v9051_v21 = vpack.c.bf16 %v7291_v51, %v7290_v46  ;;  %v7327_v46 = vld [vmem:[%s15196_s6 + $0x9d8] sm:$0xff]  ;;  %v7383_v51 = vld [vmem:[%s15196_s6 + $0xb80] sm:$0xff] }
 0x557   : > { %9082 = vmatpush1.bf16.msra.mxu1 %v9081_v26  ;;  %9002 = vmatprep.subr.bf16.mxu0 %v9630_v2  ;;  %v9132_v26 = vpack.c.bf16 %v7348_v20, %v7347_v10  ;;  %v7384_v10 = vld [vmem:[%s15196_s6 + $0xb88] sm:$0xff] }
 0x558   : > { %9083 = vmatprep.subr.bf16.mxu1 %v9630_v2 }
 0x55a   : > { %9004 = vmatpush1.bf16.msra.mxu0 %v9003_v42  ;;  %v9054_v42 = vpack.c.bf16 %v7293_v29, %v7292_v27  ;;  %v7329_v27 = vld [vmem:[%s15196_s6 + $0x9e8] sm:$0xff]  ;;  %v7385_v29 = vld [vmem:[%s15196_s6 + $0xb90] sm:$0xff] }
 0x55b   : > { %9085 = vmatpush1.bf16.msra.mxu1 %v9084_v61  ;;  %9005 = vmatprep.subr.bf16.mxu0 %v9630_v2  ;;  %v9135_v61 = vpack.c.bf16 %v7350_v34, %v7349_v32  ;;  %v7386_v32 = vld [vmem:[%s15196_s6 + $0xb98] sm:$0xff] }
 0x55c   : > { %v3062_v1 = vpop.f32.mrb[38].mxu0  ;;  %v13968_v16 = vpop.f32.mrb[42].mxu1  ;;  %9086 = vmatprep.subr.bf16.mxu1 %v9630_v2 }
 0x55d   : > { %v3063_v52 = vadd.f32 %v3062_v1, %v13826_v9  ;;  %v3064_v23 = vpop.f32.mrb[39].mxu0  ;;  %v3348_v25 = vpop.f32.mrb[43].mxu1  ;;  %v7354_v1 = vld [vmem:[%s15196_s6 + $0xaa8] sm:$0xff] }
 0x55e   : > { %9007 = vmatpush1.bf16.msra.mxu0 %v9006_v39  ;;  %v9057_v39 = vpack.c.bf16 %v7295_v3, %v7294_v62  ;;  %v9141_v4 = vpack.c.bf16 %v7354_v1, %v7353_v54  ;;  %v7319_v23 = vld [vmem:[%s15196_s6 + $0x998] sm:$0xff]  ;;  %v7387_v3 = vld [vmem:[%s15196_s6 + $0xba0] sm:$0xff] }
 0x55f   : > { %9088 = vmatpush1.bf16.msra.mxu1 %v9087_v40  ;;  %9035 = vmatprep.subr.bf16.mxu0 %v9630_v2  ;;  %v13987_v9 = vadd.f32 %v13828_v5, %v3063_v52  ;;  %v4604_v5 = vrot.slane %v13856_v57, 2  ;;  %v9138_v40 = vpack.c.bf16 %v7352_v11, %v7351_v30  ;;  %v7318_v52 = vld [vmem:[%s15196_s6 + $0x990] sm:$0xff]  ;;  %v7331_v62 = vld [vmem:[%s15196_s6 + $0x9f8] sm:$0xff]  ;;  %v7388_v30 = vld [vmem:[%s15196_s6 + $0xba8] sm:$0xff] }
 0x560   : > { %9116 = vmatprep.subr.bf16.mxu1 %v9630_v2  ;;  %v9090_v28 = vpack.c.bf16 %v7319_v23, %v7318_v52  ;;  %v7390_v54 = vld [vmem:[%s15196_s6 + $0xbb8] sm:$0xff]  ;;  %v7391_v23 = vld [vmem:[%s15196_s6 + $0xbc0] sm:$0xff] }
 0x561   : > { %4199 = vmatmul.mubr.f32.vlgmr.msra.gmra.mrb[50].mxu0 %v4129_v43  ;;  %v7376_v43 = vld [vmem:[%s15196_s6 + $0xb48] sm:$0xff]  ;;  %v7335_v52 = vld [vmem:[%s15196_s6 + $0xa18] sm:$0xff] }
 0x562   : > { %4482 = vmatmul.mubr.f32.vlgmr.msra.gmra.mrb[54].mxu1 %v13989_v44  ;;  %9037 = vmatpush1.bf16.msra.mxu0 %v9036_v58  ;;  %v7375_v58 = vld [vmem:[%s15196_s6 + $0xb40] sm:$0xff] }
 0x563   : > { %7298 = vmatprep.mubr.msk.f32.mxu0 %vm2921_vm3, %v4320_v8  ;;  %9118 = vmatpush1.bf16.msra.mxu1 %v9117_v53  ;;  %v4319_v8 = vrot.slane %v13441_v6, 7  ;;  %v7377_v6 = vld [vmem:[%s15196_s6 + $0xb50] sm:$0xff] }
 0x564   : > { %7355 = vmatprep.mubr.msk.f32.mxu1 %vm2921_vm3, %v4604_v5  ;;  %9038 = vmatprep.subr.bf16.mxu0 %v9630_v2  ;;  %v9171_v5 = vpack.c.bf16 %v7376_v43, %v7375_v58 }
 0x565   : > { %9119 = vmatprep.subr.bf16.mxu1 %v9630_v2 }
 0x566   : > { %9040 = vmatpush1.bf16.msra.mxu0 %v9039_v0  ;;  %v7320_v0 = vld [vmem:[%s15196_s6 + $0x9a0] sm:$0xff] }
 0x567   : > { %9121 = vmatpush1.bf16.msra.mxu1 %v9120_v31  ;;  %9041 = vmatprep.subr.bf16.mxu0 %v9630_v2 }
 0x568   : > { %9122 = vmatprep.subr.bf16.mxu1 %v9630_v2 }
 0x56a   : > { %9043 = vmatpush1.bf16.msra.mxu0 %v9042_v7  ;;  %v9174_v7 = vpack.c.bf16 %v7378_v17, %v7377_v6  ;;  %v4508_v17 = vrot.slane %v13989_v44, 1 }
 0x56b   : > { %9124 = vmatpush1.bf16.msra.mxu1 %v9123_v19  ;;  %9044 = vmatprep.subr.bf16.mxu0 %v9630_v2  ;;  %v7322_v19 = vld [vmem:[%s15196_s6 + $0x9b0] sm:$0xff] }
 0x56c   : > { %9125 = vmatprep.subr.bf16.mxu1 %v9630_v2  ;;  %v9096_v41 = vpack.c.bf16 %v7323_v37, %v7322_v19  ;;  %v7415_v19 = vld [vmem:[%s15196_s6 + $0xc70] sm:$0xff]  ;;  %v7416_v37 = vld [vmem:[%s15196_s6 + $0xc78] sm:$0xff] }
 0x56e   : > { %9046 = vmatpush1.bf16.msra.mxu0 %v9045_v48  ;;  %v9177_v48 = vpack.c.bf16 %v7380_v47, %v7379_v38  ;;  %v4699_v38 = vrot.slane %v13856_v57, 3 }
 0x56f   : > { %9127 = vmatpush1.bf16.msra.mxu1 %v9126_v49  ;;  %9047 = vmatprep.subr.bf16.mxu0 %v9630_v2  ;;  %v7324_v49 = vld [vmem:[%s15196_s6 + $0x9c0] sm:$0xff] }
 0x570   : > { %9128 = vmatprep.subr.bf16.mxu1 %v9630_v2  ;;  %v9099_v24 = vpack.c.bf16 %v7325_v59, %v7324_v49  ;;  %v7361_v49 = vld [vmem:[%s15196_s6 + $0xad8] sm:$0xff]  ;;  %v7417_v59 = vld [vmem:[%s15196_s6 + $0xc80] sm:$0xff] }
 0x572   : > { %9049 = vmatpush1.bf16.msra.mxu0 %v9048_v35  ;;  %v9180_v35 = vpack.c.bf16 %v7382_v63, %v7381_v60  ;;  %v7418_v60 = vld [vmem:[%s15196_s6 + $0xc88] sm:$0xff] }
 0x573   : > { %9130 = vmatpush1.bf16.msra.mxu1 %v9129_v33  ;;  %9050 = vmatprep.subr.bf16.mxu0 %v9630_v2  ;;  %v7326_v33 = vld [vmem:[%s15196_s6 + $0x9d0] sm:$0xff] }
 0x574   : > { %9131 = vmatprep.subr.bf16.mxu1 %v9630_v2  ;;  %v9102_v20 = vpack.c.bf16 %v7327_v46, %v7326_v33  ;;  %v7363_v33 = vld [vmem:[%s15196_s6 + $0xae8] sm:$0xff]  ;;  %v7419_v46 = vld [vmem:[%s15196_s6 + $0xc90] sm:$0xff] }
 0x576   : > { %9052 = vmatpush1.bf16.msra.mxu0 %v9051_v21  ;;  %v9183_v21 = vpack.c.bf16 %v7384_v10, %v7383_v51  ;;  %v7420_v51 = vld [vmem:[%s15196_s6 + $0xc98] sm:$0xff] }
 0x577   : > { %9133 = vmatpush1.bf16.msra.mxu1 %v9132_v26  ;;  %9053 = vmatprep.subr.bf16.mxu0 %v9630_v2  ;;  %v7328_v26 = vld [vmem:[%s15196_s6 + $0x9e0] sm:$0xff] }
 0x578   : > { %9134 = vmatprep.subr.bf16.mxu1 %v9630_v2  ;;  %v9105_v34 = vpack.c.bf16 %v7329_v27, %v7328_v26  ;;  %v7365_v26 = vld [vmem:[%s15196_s6 + $0xaf8] sm:$0xff]  ;;  %v7421_v27 = vld [vmem:[%s15196_s6 + $0xca0] sm:$0xff] }
 0x57a   : > { %9055 = vmatpush1.bf16.msra.mxu0 %v9054_v42  ;;  %v9186_v42 = vpack.c.bf16 %v7386_v32, %v7385_v29  ;;  %v7422_v29 = vld [vmem:[%s15196_s6 + $0xca8] sm:$0xff] }
 0x57b   : > { %9136 = vmatpush1.bf16.msra.mxu1 %v9135_v61  ;;  %9056 = vmatprep.subr.bf16.mxu0 %v9630_v2  ;;  %v7330_v61 = vld [vmem:[%s15196_s6 + $0x9f0] sm:$0xff] }
 0x57c   : > { %9137 = vmatprep.subr.bf16.mxu1 %v9630_v2  ;;  %v9108_v11 = vpack.c.bf16 %v7331_v62, %v7330_v61  ;;  %v7367_v61 = vld [vmem:[%s15196_s6 + $0xb08] sm:$0xff]  ;;  %v7423_v62 = vld [vmem:[%s15196_s6 + $0xcb0] sm:$0xff] }
 0x57e   : > { %9058 = vmatpush1.bf16.msra.mxu0 %v9057_v39  ;;  %v9189_v39 = vpack.c.bf16 %v7388_v30, %v7387_v3  ;;  %v7424_v3 = vld [vmem:[%s15196_s6 + $0xcb8] sm:$0xff] }
 0x57f   : > { %9139 = vmatpush1.bf16.msra.mxu1 %v9138_v40  ;;  %9059 = vmatprep.subr.bf16.mxu0 %v9630_v2  ;;  %v7332_v40 = vld [vmem:[%s15196_s6 + $0xa00] sm:$0xff] }
 0x580   : > { %v3251_v25 = vpop.f32.mrb[40].mxu0  ;;  %9140 = vmatprep.subr.bf16.mxu1 %v9630_v2  ;;  %v9111_v1 = vpack.c.bf16 %v7333_v36, %v7332_v40  ;;  %v7369_v40 = vld [vmem:[%s15196_s6 + $0xb18] sm:$0xff]  ;;  %v7425_v36 = vld [vmem:[%s15196_s6 + $0xcc0] sm:$0xff] }
 0x581   : > { %v3255_v53 = vadd.f32 %v3251_v25, %v13987_v9  ;;  %v14116_v13 = vpop.f32.mrb[44].mxu1  ;;  %v3253_v18 = vpop.f32.mrb[41].mxu0  ;;  %v7321_v9 = vld [vmem:[%s15196_s6 + $0x9a8] sm:$0xff] }
 0x582   : > { %v3538_v45 = vpop.f32.mrb[45].mxu1  ;;  %9061 = vmatpush1.bf16.msra.mxu0 %v9060_v22  ;;  %v9093_v56 = vpack.c.bf16 %v7321_v9, %v7320_v0  ;;  %v9192_v22 = vpack.c.bf16 %v7390_v54, %v7389_v50  ;;  %v7392_v25 = vld [vmem:[%s15196_s6 + $0xbc8] sm:$0xff]  ;;  %v7357_v18 = vld [vmem:[%s15196_s6 + $0xab8] sm:$0xff] }
 0x583   : > { %9142 = vmatpush1.bf16.msra.mxu1 %v9141_v4  ;;  %9089 = vmatprep.subr.bf16.mxu0 %v9630_v2  ;;  %v14127_v31 = vadd.f32 %v13968_v16, %v3255_v53  ;;  %v4794_v16 = vrot.slane %v13856_v57, 4  ;;  %v7334_v4 = vld [vmem:[%s15196_s6 + $0xa10] sm:$0xff]  ;;  %v9195_v43 = vpack.c.bf16 %v7392_v25, %v7391_v23  ;;  %v7426_v50 = vld [vmem:[%s15196_s6 + $0xcc8] sm:$0xff]  ;;  %v7428_v23 = vld [vmem:[%s15196_s6 + $0xcd8] sm:$0xff] }
 0x584   : > { %9170 = vmatprep.subr.bf16.mxu1 %v9630_v2  ;;  %v9114_v58 = vpack.c.bf16 %v7335_v52, %v7334_v4  ;;  %v7356_v53 = vld [vmem:[%s15196_s6 + $0xab0] sm:$0xff]  ;;  %v7371_v4 = vld [vmem:[%s15196_s6 + $0xb28] sm:$0xff] }
 0x585   : > { %4389 = vmatmul.mubr.f32.vlgmr.msra.gmra.mrb[52].mxu0 %v4319_v8  ;;  %v7414_v8 = vld [vmem:[%s15196_s6 + $0xc68] sm:$0xff]  ;;  %v9144_v6 = vpack.c.bf16 %v7357_v18, %v7356_v53  ;;  %v7427_v52 = vld [vmem:[%s15196_s6 + $0xcd0] sm:$0xff]  ;;  %v7373_v53 = vld [vmem:[%s15196_s6 + $0xb38] sm:$0xff] }
 0x586   : > { %4673 = vmatmul.mubr.f32.vlgmr.msra.gmra.mrb[56].mxu1 %v4603_v55  ;;  %9091 = vmatpush1.bf16.msra.mxu0 %v9090_v28  ;;  %v7413_v28 = vld [vmem:[%s15196_s6 + $0xc60] sm:$0xff] }
 0x587   : > { %7336 = vmatprep.mubr.msk.f32.mxu0 %vm2921_vm3, %v4509_v12  ;;  %9172 = vmatpush1.bf16.msra.mxu1 %v9171_v5  ;;  %v9225_v12 = vpack.c.bf16 %v7414_v8, %v7413_v28  ;;  %v7429_v18 = vld [vmem:[%s15196_s6 + $0xce0] sm:$0xff] }
 0x588   : > { %7393 = vmatprep.mubr.msk.f32.mxu1 %vm2921_vm3, %v4794_v16  ;;  %9092 = vmatprep.subr.bf16.mxu0 %v9630_v2  ;;  %v7358_v16 = vld [vmem:[%s15196_s6 + $0xac0] sm:$0xff] }
 0x589   : > { %9173 = vmatprep.subr.bf16.mxu1 %v9630_v2 }
 0x58a   : > { %9094 = vmatpush1.bf16.msra.mxu0 %v9093_v56 }
 0x58b   : > { %9175 = vmatpush1.bf16.msra.mxu1 %v9174_v7  ;;  %9095 = vmatprep.subr.bf16.mxu0 %v9630_v2  ;;  %v4793_v7 = vrot.slane %v13989_v44, 4 }
 0x58c   : > { %9176 = vmatprep.subr.bf16.mxu1 %v9630_v2 }
 0x58e   : > { %9097 = vmatpush1.bf16.msra.mxu0 %v9096_v41  ;;  %v9228_v41 = vpack.c.bf16 %v7416_v37, %v7415_v19 }
 0x58f   : > { %9178 = vmatpush1.bf16.msra.mxu1 %v9177_v48  ;;  %9098 = vmatprep.subr.bf16.mxu0 %v9630_v2  ;;  %v7360_v48 = vld [vmem:[%s15196_s6 + $0xad0] sm:$0xff] }
 0x590   : > { %9179 = vmatprep.subr.bf16.mxu1 %v9630_v2  ;;  %v9150_v63 = vpack.c.bf16 %v7361_v49, %v7360_v48  ;;  %v7453_v49 = vld [vmem:[%s15196_s6 + $0xd90] sm:$0xff] }
 0x592   : > { %9100 = vmatpush1.bf16.msra.mxu0 %v9099_v24  ;;  %v9231_v24 = vpack.c.bf16 %v7418_v60, %v7417_v59  ;;  %v7454_v59 = vld [vmem:[%s15196_s6 + $0xd98] sm:$0xff]  ;;  %v4889_v60 = vrot.slane %v13856_v57, 5 }
 0x593   : > { %9181 = vmatpush1.bf16.msra.mxu1 %v9180_v35  ;;  %9101 = vmatprep.subr.bf16.mxu0 %v9630_v2  ;;  %v7362_v35 = vld [vmem:[%s15196_s6 + $0xae0] sm:$0xff] }
 0x594   : > { %9182 = vmatprep.subr.bf16.mxu1 %v9630_v2  ;;  %v9153_v10 = vpack.c.bf16 %v7363_v33, %v7362_v35  ;;  %v7398_v35 = vld [vmem:[%s15196_s6 + $0xbf0] sm:$0xff]  ;;  %v7399_v33 = vld [vmem:[%s15196_s6 + $0xbf8] sm:$0xff] }
 0x596   : > { %9103 = vmatpush1.bf16.msra.mxu0 %v9102_v20  ;;  %v9234_v20 = vpack.c.bf16 %v7420_v51, %v7419_v46  ;;  %v7455_v46 = vld [vmem:[%s15196_s6 + $0xda0] sm:$0xff]  ;;  %v7456_v51 = vld [vmem:[%s15196_s6 + $0xda8] sm:$0xff] }
 0x597   : > { %9184 = vmatpush1.bf16.msra.mxu1 %v9183_v21  ;;  %9104 = vmatprep.subr.bf16.mxu0 %v9630_v2  ;;  %v7364_v21 = vld [vmem:[%s15196_s6 + $0xaf0] sm:$0xff] }
 0x598   : > { %9185 = vmatprep.subr.bf16.mxu1 %v9630_v2  ;;  %v9156_v32 = vpack.c.bf16 %v7365_v26, %v7364_v21  ;;  %v7400_v21 = vld [vmem:[%s15196_s6 + $0xc00] sm:$0xff]  ;;  %v7401_v26 = vld [vmem:[%s15196_s6 + $0xc08] sm:$0xff] }
 0x59a   : > { %9106 = vmatpush1.bf16.msra.mxu0 %v9105_v34  ;;  %v9237_v34 = vpack.c.bf16 %v7422_v29, %v7421_v27  ;;  %v7457_v27 = vld [vmem:[%s15196_s6 + $0xdb0] sm:$0xff]  ;;  %v7458_v29 = vld [vmem:[%s15196_s6 + $0xdb8] sm:$0xff] }
 0x59b   : > { %9187 = vmatpush1.bf16.msra.mxu1 %v9186_v42  ;;  %9107 = vmatprep.subr.bf16.mxu0 %v9630_v2  ;;  %v7366_v42 = vld [vmem:[%s15196_s6 + $0xb00] sm:$0xff] }
 0x59c   : > { %9188 = vmatprep.subr.bf16.mxu1 %v9630_v2  ;;  %v9159_v30 = vpack.c.bf16 %v7367_v61, %v7366_v42  ;;  %v7402_v42 = vld [vmem:[%s15196_s6 + $0xc10] sm:$0xff]  ;;  %v7403_v61 = vld [vmem:[%s15196_s6 + $0xc18] sm:$0xff] }
 0x59e   : > { %9109 = vmatpush1.bf16.msra.mxu0 %v9108_v11  ;;  %v9240_v11 = vpack.c.bf16 %v7424_v3, %v7423_v62  ;;  %v7459_v62 = vld [vmem:[%s15196_s6 + $0xdc0] sm:$0xff]  ;;  %v7460_v3 = vld [vmem:[%s15196_s6 + $0xdc8] sm:$0xff] }
 0x59f   : > { %9190 = vmatpush1.bf16.msra.mxu1 %v9189_v39  ;;  %9110 = vmatprep.subr.bf16.mxu0 %v9630_v2  ;;  %v7368_v39 = vld [vmem:[%s15196_s6 + $0xb10] sm:$0xff] }
 0x5a0   : > { %9191 = vmatprep.subr.bf16.mxu1 %v9630_v2  ;;  %v9162_v54 = vpack.c.bf16 %v7369_v40, %v7368_v39  ;;  %v7404_v39 = vld [vmem:[%s15196_s6 + $0xc20] sm:$0xff]  ;;  %v7405_v40 = vld [vmem:[%s15196_s6 + $0xc28] sm:$0xff] }
 0x5a2   : > { %9112 = vmatpush1.bf16.msra.mxu0 %v9111_v1  ;;  %v9243_v1 = vpack.c.bf16 %v7426_v50, %v7425_v36  ;;  %v7461_v36 = vld [vmem:[%s15196_s6 + $0xdd0] sm:$0xff]  ;;  %v7462_v50 = vld [vmem:[%s15196_s6 + $0xdd8] sm:$0xff] }
 0x5a3   : > { %9193 = vmatpush1.bf16.msra.mxu1 %v9192_v22  ;;  %9113 = vmatprep.subr.bf16.mxu0 %v9630_v2  ;;  %v7370_v22 = vld [vmem:[%s15196_s6 + $0xb20] sm:$0xff] }
 0x5a4   : > { %v3441_v45 = vpop.f32.mrb[42].mxu0  ;;  %9194 = vmatprep.subr.bf16.mxu1 %v9630_v2  ;;  %v9165_v25 = vpack.c.bf16 %v7371_v4, %v7370_v22  ;;  %v7406_v22 = vld [vmem:[%s15196_s6 + $0xc30] sm:$0xff]  ;;  %v7407_v4 = vld [vmem:[%s15196_s6 + $0xc38] sm:$0xff] }
 0x5a5   : > { %v3445_v5 = vadd.f32 %v3441_v45, %v14127_v31  ;;  %v14254_v0 = vpop.f32.mrb[46].mxu1  ;;  %v3443_v9 = vpop.f32.mrb[43].mxu0  ;;  %v7359_v31 = vld [vmem:[%s15196_s6 + $0xac8] sm:$0xff] }
 0x5a6   : > { %v3726_v55 = vpop.f32.mrb[47].mxu1  ;;  %9115 = vmatpush1.bf16.msra.mxu0 %v9114_v58  ;;  %v9147_v47 = vpack.c.bf16 %v7359_v31, %v7358_v16  ;;  %v9246_v58 = vpack.c.bf16 %v7428_v23, %v7427_v52  ;;  %v7430_v45 = vld [vmem:[%s15196_s6 + $0xce8] sm:$0xff]  ;;  %v7395_v9 = vld [vmem:[%s15196_s6 + $0xbd8] sm:$0xff]  ;;  %v7463_v52 = vld [vmem:[%s15196_s6 + $0xde0] sm:$0xff] }
 0x5a7   : > { %9196 = vmatpush1.bf16.msra.mxu1 %v9195_v43  ;;  %9143 = vmatprep.subr.bf16.mxu0 %v9630_v2  ;;  %v14265_v56 = vadd.f32 %v14116_v13, %v3445_v5  ;;  %v4984_v13 = vrot.slane %v13856_v57, 6  ;;  %v7372_v43 = vld [vmem:[%s15196_s6 + $0xb30] sm:$0xff]  ;;  %v9249_v8 = vpack.c.bf16 %v7430_v45, %v7429_v18  ;;  %v14384_v55 = vpop.permute.xlu1 %2779  ;;  %v7464_v23 = vld [vmem:[%s15196_s6 + $0xde8] sm:$0xff]  ;;  %v7466_v45 = vld [vmem:[%s15196_s6 + $0xdf8] sm:$0xff] }
 0x5a8   : > { %9224 = vmatprep.subr.bf16.mxu1 %v9630_v2  ;;  %v9168_v28 = vpack.c.bf16 %v7373_v53, %v7372_v43  ;;  %v7394_v5 = vld [vmem:[%s15196_s6 + $0xbd0] sm:$0xff]  ;;  %v2869_v19 = vadd.f32 %v13061_v15, %v14384_v55  ;;  %v4983_v15 = vrot.slane %v13989_v44, 6  ;;  %v7408_v43 = vld [vmem:[%s15196_s6 + $0xc40] sm:$0xff]  ;;  %v7409_v53 = vld [vmem:[%s15196_s6 + $0xc48] sm:$0xff] }
 0x5a9   : > { %4578 = vmatmul.mubr.f32.vlgmr.msra.gmra.mrb[54].mxu0 %v4508_v17  ;;  %v7451_v17 = vld [vmem:[%s15196_s6 + $0xd80] sm:$0xff]  ;;  %v7465_v18 = vld [vmem:[%s15196_s6 + $0xdf0] sm:$0xff] }
 0x5aa   : > { %4863 = vmatmul.mubr.f32.vlgmr.msra.gmra.mrb[58].mxu1 %v4793_v7  ;;  %9145 = vmatpush1.bf16.msra.mxu0 %v9144_v6 }
 0x5ab   : > { %7374 = vmatprep.mubr.msk.f32.mxu0 %vm2921_vm3, %v4699_v38  ;;  %9226 = vmatpush1.bf16.msra.mxu1 %v9225_v12  ;;  %v7452_v12 = vld [vmem:[%s15196_s6 + $0xd88] sm:$0xff]  ;;  %v9198_v38 = vpack.c.bf16 %v7395_v9, %v7394_v5  ;;  %v7410_v5 = vld [vmem:[%s15196_s6 + $0xc50] sm:$0xff]  ;;  %v7411_v9 = vld [vmem:[%s15196_s6 + $0xc58] sm:$0xff] }
 0x5ac   : > { %7431 = vmatprep.mubr.msk.f32.mxu1 %vm2921_vm3, %v4984_v13  ;;  %9146 = vmatprep.subr.bf16.mxu0 %v9630_v2  ;;  %v4698_v13 = vrot.slane %v13989_v44, 3 }
 0x5ad   : > { %9227 = vmatprep.subr.bf16.mxu1 %v9630_v2 }
 0x5ae   : > { %9148 = vmatpush1.bf16.msra.mxu0 %v9147_v47  ;;  %v9279_v47 = vpack.c.bf16 %v7452_v12, %v7451_v17  ;;  %v7468_v17 = vld [vmem:[%s15196_s6 + $0xe08] sm:$0xff]  ;;  %v9222_v12 = vpack.c.bf16 %v7411_v9, %v7410_v5  ;;  %v7503_v5 = vld [vmem:[%s15196_s6 + $0xf10] sm:$0xff]  ;;  %v7504_v9 = vld [vmem:[%s15196_s6 + $0xf18] sm:$0xff] }
 0x5af   : > { %9229 = vmatpush1.bf16.msra.mxu1 %v9228_v41  ;;  %9149 = vmatprep.subr.bf16.mxu0 %v9630_v2  ;;  %v7396_v41 = vld [vmem:[%s15196_s6 + $0xbe0] sm:$0xff] }
 0x5b0   : > { %9230 = vmatprep.subr.bf16.mxu1 %v9630_v2 }
 0x5b2   : > { %9151 = vmatpush1.bf16.msra.mxu0 %v9150_v63  ;;  %v14418_v63 = vmax.f32 %v2869_v19, 0.0  ;;  %v7433_v19 = vld [vmem:[%s15196_s6 + $0xcf8] sm:$0xff] }
 0x5b3   : > { %9232 = vmatpush1.bf16.msra.mxu1 %v9231_v24  ;;  %9152 = vmatprep.subr.bf16.mxu0 %v9630_v2  ;;  %v9282_v24 = vpack.c.bf16 %v7454_v59, %v7453_v49 }
 0x5b4   : > { %9233 = vmatprep.subr.bf16.mxu1 %v9630_v2 }
 0x5b6   : > { %9154 = vmatpush1.bf16.msra.mxu0 %v9153_v10  ;;  %v9204_v10 = vpack.c.bf16 %v7399_v33, %v7398_v35  ;;  %v7491_v35 = vld [vmem:[%s15196_s6 + $0xeb0] sm:$0xff]  ;;  %v7492_v33 = vld [vmem:[%s15196_s6 + $0xeb8] sm:$0xff] }
 0x5b7   : > { %9235 = vmatpush1.bf16.msra.mxu1 %v9234_v20  ;;  %9155 = vmatprep.subr.bf16.mxu0 %v9630_v2  ;;  %v9285_v20 = vpack.c.bf16 %v7456_v51, %v7455_v46  ;;  %v5079_v46 = vrot.slane %v13856_v57, 7  ;;  %v7493_v57 = vld [vmem:[%s15196_s6 + $0xec0] sm:$0xff] }
 0x5b8   : > { %9236 = vmatprep.subr.bf16.mxu1 %v9630_v2 }
 0x5ba   : > { %9157 = vmatpush1.bf16.msra.mxu0 %v9156_v32  ;;  %v9207_v32 = vpack.c.bf16 %v7401_v26, %v7400_v21  ;;  %v7437_v21 = vld [vmem:[%s15196_s6 + $0xd18] sm:$0xff]  ;;  %v7494_v26 = vld [vmem:[%s15196_s6 + $0xec8] sm:$0xff] }
 0x5bb   : > { %9238 = vmatpush1.bf16.msra.mxu1 %v9237_v34  ;;  %9158 = vmatprep.subr.bf16.mxu0 %v9630_v2  ;;  %v9288_v34 = vpack.c.bf16 %v7458_v29, %v7457_v27  ;;  %v9339_v29 = vpack.c.bf16 %v7494_v26, %v7493_v57  ;;  %v7474_v26 = vld [vmem:[%s15196_s6 + $0xe30] sm:$0xff] }
 0x5bc   : > { %9239 = vmatprep.subr.bf16.mxu1 %v9630_v2 }
 0x5be   : > { %9160 = vmatpush1.bf16.msra.mxu0 %v9159_v30  ;;  %v9210_v30 = vpack.c.bf16 %v7403_v61, %v7402_v42  ;;  %v7495_v42 = vld [vmem:[%s15196_s6 + $0xed0] sm:$0xff]  ;;  %v7496_v61 = vld [vmem:[%s15196_s6 + $0xed8] sm:$0xff] }
 0x5bf   : > { %9241 = vmatpush1.bf16.msra.mxu1 %v9240_v11  ;;  %9161 = vmatprep.subr.bf16.mxu0 %v9630_v2  ;;  %v9291_v11 = vpack.c.bf16 %v7460_v3, %v7459_v62  ;;  %v9342_v3 = vpack.c.bf16 %v7496_v61, %v7495_v42  ;;  %v7476_v61 = vld [vmem:[%s15196_s6 + $0xe40] sm:$0xff] }
 0x5c0   : > { %9242 = vmatprep.subr.bf16.mxu1 %v9630_v2 }
 0x5c2   : > { %9163 = vmatpush1.bf16.msra.mxu0 %v9162_v54  ;;  %v9213_v54 = vpack.c.bf16 %v7405_v40, %v7404_v39  ;;  %v7497_v39 = vld [vmem:[%s15196_s6 + $0xee0] sm:$0xff]  ;;  %v7498_v40 = vld [vmem:[%s15196_s6 + $0xee8] sm:$0xff] }
 0x5c3   : > { %9244 = vmatpush1.bf16.msra.mxu1 %v9243_v1  ;;  %9164 = vmatprep.subr.bf16.mxu0 %v9630_v2  ;;  %v9294_v1 = vpack.c.bf16 %v7462_v50, %v7461_v36  ;;  %v9345_v50 = vpack.c.bf16 %v7498_v40, %v7497_v39  ;;  %v7478_v40 = vld [vmem:[%s15196_s6 + $0xe50] sm:$0xff] }
 0x5c4   : > { %9245 = vmatprep.subr.bf16.mxu1 %v9630_v2 }
 0x5c6   : > { %9166 = vmatpush1.bf16.msra.mxu0 %v9165_v25  ;;  %v9216_v25 = vpack.c.bf16 %v7407_v4, %v7406_v22  ;;  %v7499_v22 = vld [vmem:[%s15196_s6 + $0xef0] sm:$0xff]  ;;  %v7500_v4 = vld [vmem:[%s15196_s6 + $0xef8] sm:$0xff] }
 0x5c7   : > { %9247 = vmatpush1.bf16.msra.mxu1 %v9246_v58  ;;  %9167 = vmatprep.subr.bf16.mxu0 %v9630_v2  ;;  %v9297_v58 = vpack.c.bf16 %v7464_v23, %v7463_v52  ;;  %v9348_v23 = vpack.c.bf16 %v7500_v4, %v7499_v22  ;;  %v7480_v4 = vld [vmem:[%s15196_s6 + $0xe60] sm:$0xff] }
 0x5c8   : > { %v3631_v6 = vpop.f32.mrb[44].mxu0  ;;  %9248 = vmatprep.subr.bf16.mxu1 %v9630_v2 }
 0x5c9   : > { %v3635_v16 = vadd.f32 %v3631_v6, %v14265_v56  ;;  %v14394_v31 = vpop.f32.mrb[48].mxu1  ;;  %v3633_v7 = vpop.f32.mrb[45].mxu0  ;;  %v7397_v56 = vld [vmem:[%s15196_s6 + $0xbe8] sm:$0xff]  ;;  %v7467_v6 = vld [vmem:[%s15196_s6 + $0xe00] sm:$0xff] }
 0x5ca   : > { %v3917_v37 = vpop.f32.mrb[49].mxu1  ;;  %9169 = vmatpush1.bf16.msra.mxu0 %v9168_v28  ;;  %v9219_v28 = vpack.c.bf16 %v7409_v53, %v7408_v43  ;;  %v7432_v7 = vld [vmem:[%s15196_s6 + $0xcf0] sm:$0xff]  ;;  %v7501_v43 = vld [vmem:[%s15196_s6 + $0xf00] sm:$0xff]  ;;  %v7502_v53 = vld [vmem:[%s15196_s6 + $0xf08] sm:$0xff] }
 0x5cb   : > { %9250 = vmatpush1.bf16.msra.mxu1 %v9249_v8  ;;  %9197 = vmatprep.subr.bf16.mxu0 %v9630_v2  ;;  %v14407_v48 = vadd.f32 %v14254_v0, %v3635_v16  ;;  %v9201_v0 = vpack.c.bf16 %v7397_v56, %v7396_v41  ;;  %v9300_v8 = vpack.c.bf16 %v7466_v45, %v7465_v18 }
 0x5cc   : > { %9278 = vmatprep.subr.bf16.mxu1 %v9630_v2  ;;  %v9303_v16 = vpack.c.bf16 %v7468_v17, %v7467_v6  ;;  %v2867_v37 = vadd.f32 %v13057_v14, %v14384_v55  ;;  %v9252_v59 = vpack.c.bf16 %v7433_v19, %v7432_v7  ;;  %v4888_v14 = vrot.slane %v13989_v44, 5  ;;  %v7505_v7 = vld [vmem:[%s15196_s6 + $0xf20] sm:$0xff]  ;;  %v7506_v19 = vld [vmem:[%s15196_s6 + $0xf28] sm:$0xff] }
 0x5cd   : > { %4768 = vmatmul.mubr.f32.vlgmr.msra.gmra.mrb[56].mxu0 %v4698_v13  ;;  %v7489_v13 = vld [vmem:[%s15196_s6 + $0xea0] sm:$0xff]  ;;  %v9351_v45 = vpack.c.bf16 %v7502_v53, %v7501_v43  ;;  %v9354_v17 = vpack.c.bf16 %v7504_v9, %v7503_v5  ;;  %v7482_v53 = vld [vmem:[%s15196_s6 + $0xe70] sm:$0xff] }
 0x5ce   : > { %5053 = vmatmul.mubr.f32.vlgmr.msra.gmra.mrb[60].mxu1 %v4983_v15  ;;  %9199 = vmatpush1.bf16.msra.mxu0 %v9198_v38  ;;  %v7484_v9 = vld [vmem:[%s15196_s6 + $0xe80] sm:$0xff] }
 0x5cf   : > { %7412 = vmatprep.mubr.msk.f32.mxu0 %vm2921_vm3, %v4889_v60  ;;  %9280 = vmatpush1.bf16.msra.mxu1 %v9279_v47  ;;  %v7490_v47 = vld [vmem:[%s15196_s6 + $0xea8] sm:$0xff]  ;;  %v7434_v60 = vld [vmem:[%s15196_s6 + $0xd00] sm:$0xff] }
 0x5d0   : > { %7469 = vmatprep.mubr.msk.f32.mxu1 %vm2921_vm3, %v14418_v63  ;;  %9200 = vmatprep.subr.bf16.mxu0 %v9630_v2  ;;  %v9333_v55 = vpack.c.bf16 %v7490_v47, %v7489_v13  ;;  %v7470_v13 = vld [vmem:[%s15196_s6 + $0xe10] sm:$0xff]  ;;  %v7471_v47 = vld [vmem:[%s15196_s6 + $0xe18] sm:$0xff] }
 0x5d1   : > { %9281 = vmatprep.subr.bf16.mxu1 %v9630_v2 }
 0x5d2   : > { %9202 = vmatpush1.bf16.msra.mxu0 %v9201_v0 }
 0x5d3   : > { %9283 = vmatpush1.bf16.msra.mxu1 %v9282_v24  ;;  %9203 = vmatprep.subr.bf16.mxu0 %v9630_v2  ;;  %v14551_v24 = vmax.f32 %v2867_v37, 0.0 }
 0x5d4   : > { %9284 = vmatprep.subr.bf16.mxu1 %v9630_v2 }
 0x5d6   : > { %9205 = vmatpush1.bf16.msra.mxu0 %v9204_v10  ;;  %v9336_v10 = vpack.c.bf16 %v7492_v33, %v7491_v35  ;;  %v5078_v35 = vrot.slane %v13989_v44, 7  ;;  %v7529_v44 = vld [vmem:[%s15196_s6 + $0xfd0] sm:$0xff] }
 0x5d7   : > { %9286 = vmatpush1.bf16.msra.mxu1 %v9285_v20  ;;  %9206 = vmatprep.subr.bf16.mxu0 %v9630_v2  ;;  %v7436_v20 = vld [vmem:[%s15196_s6 + $0xd10] sm:$0xff] }
 0x5d8   : > { %9287 = vmatprep.subr.bf16.mxu1 %v9630_v2  ;;  %v9258_v27 = vpack.c.bf16 %v7437_v21, %v7436_v20  ;;  %v5268_v20 = vrot.slane %v14418_v63, 1 }
 0x5da   : > { %9208 = vmatpush1.bf16.msra.mxu0 %v9207_v32  ;;  %v7438_v32 = vld [vmem:[%s15196_s6 + $0xd20] sm:$0xff] }
 0x5db   : > { %9289 = vmatpush1.bf16.msra.mxu1 %v9288_v34  ;;  %9209 = vmatprep.subr.bf16.mxu0 %v9630_v2  ;;  %v7439_v34 = vld [vmem:[%s15196_s6 + $0xd28] sm:$0xff] }
 0x5dc   : > { %9290 = vmatprep.subr.bf16.mxu1 %v9630_v2  ;;  %v9261_v62 = vpack.c.bf16 %v7439_v34, %v7438_v32  ;;  %v7532_v32 = vld [vmem:[%s15196_s6 + $0xfe8] sm:$0xff] }
 0x5de   : > { %9211 = vmatpush1.bf16.msra.mxu0 %v9210_v30  ;;  %v7440_v30 = vld [vmem:[%s15196_s6 + $0xd30] sm:$0xff] }
 0x5df   : > { %9292 = vmatpush1.bf16.msra.mxu1 %v9291_v11  ;;  %9212 = vmatprep.subr.bf16.mxu0 %v9630_v2  ;;  %v7441_v11 = vld [vmem:[%s15196_s6 + $0xd38] sm:$0xff] }
 0x5e0   : > { %9293 = vmatprep.subr.bf16.mxu1 %v9630_v2  ;;  %v9264_v36 = vpack.c.bf16 %v7441_v11, %v7440_v30  ;;  %v7534_v30 = vld [vmem:[%s15196_s6 + $0xff8] sm:$0xff] }
 0x5e2   : > { %9214 = vmatpush1.bf16.msra.mxu0 %v9213_v54  ;;  %v7442_v54 = vld [vmem:[%s15196_s6 + $0xd40] sm:$0xff] }
 0x5e3   : > { %9295 = vmatpush1.bf16.msra.mxu1 %v9294_v1  ;;  %9215 = vmatprep.subr.bf16.mxu0 %v9630_v2  ;;  %v7443_v1 = vld [vmem:[%s15196_s6 + $0xd48] sm:$0xff] }
 0x5e4   : > { %9296 = vmatprep.subr.bf16.mxu1 %v9630_v2  ;;  %v9267_v52 = vpack.c.bf16 %v7443_v1, %v7442_v54  ;;  %v7536_v54 = vld [vmem:[%s15196_s6 + $0x1008] sm:$0xff] }
 0x5e6   : > { %9217 = vmatpush1.bf16.msra.mxu0 %v9216_v25  ;;  %v7444_v25 = vld [vmem:[%s15196_s6 + $0xd50] sm:$0xff] }
 0x5e7   : > { %9298 = vmatpush1.bf16.msra.mxu1 %v9297_v58  ;;  %9218 = vmatprep.subr.bf16.mxu0 %v9630_v2  ;;  %v7445_v58 = vld [vmem:[%s15196_s6 + $0xd58] sm:$0xff] }
 0x5e8   : > { %9299 = vmatprep.subr.bf16.mxu1 %v9630_v2  ;;  %v9270_v18 = vpack.c.bf16 %v7445_v58, %v7444_v25  ;;  %v7538_v25 = vld [vmem:[%s15196_s6 + $0x1018] sm:$0xff] }
 0x5ea   : > { %9220 = vmatpush1.bf16.msra.mxu0 %v9219_v28  ;;  %v7446_v28 = vld [vmem:[%s15196_s6 + $0xd60] sm:$0xff] }
 0x5eb   : > { %9301 = vmatpush1.bf16.msra.mxu1 %v9300_v8  ;;  %9221 = vmatprep.subr.bf16.mxu0 %v9630_v2  ;;  %v7447_v8 = vld [vmem:[%s15196_s6 + $0xd68] sm:$0xff] }
 0x5ec   : > { %v3820_v38 = vpop.f32.mrb[46].mxu0  ;;  %9302 = vmatprep.subr.bf16.mxu1 %v9630_v2  ;;  %v9273_v6 = vpack.c.bf16 %v7447_v8, %v7446_v28  ;;  %v7540_v28 = vld [vmem:[%s15196_s6 + $0x1028] sm:$0xff] }
 0x5ed   : > { %v3824_v41 = vadd.f32 %v3820_v38, %v14407_v48  ;;  %v14538_v56 = vpop.f32.mrb[50].mxu1  ;;  %v3822_v15 = vpop.f32.mrb[47].mxu0  ;;  %v7435_v48 = vld [vmem:[%s15196_s6 + $0xd08] sm:$0xff]  ;;  %v9357_v38 = vpack.c.bf16 %v7506_v19, %v7505_v7  ;;  %v7486_v19 = vld [vmem:[%s15196_s6 + $0xe90] sm:$0xff] }
 0x5ee   : > { %v4107_v49 = vpop.f32.mrb[51].mxu1  ;;  %9223 = vmatpush1.bf16.msra.mxu0 %v9222_v12  ;;  %v9255_v51 = vpack.c.bf16 %v7435_v48, %v7434_v60  ;;  %v7448_v12 = vld [vmem:[%s15196_s6 + $0xd70] sm:$0xff]  ;;  %v7527_v15 = vld [vmem:[%s15196_s6 + $0xfc0] sm:$0xff]  ;;  %v9306_v48 = vpack.c.bf16 %v7471_v47, %v7470_v13  ;;  %v7544_v13 = vld [vmem:[%s15196_s6 + $0x1048] sm:$0xff] }
 0x5ef   : > { %9304 = vmatpush1.bf16.msra.mxu1 %v9303_v16  ;;  %9251 = vmatprep.subr.bf16.mxu0 %v9630_v2  ;;  %v14549_v0 = vadd.f32 %v14394_v31, %v3824_v41  ;;  %v5363_v31 = vrot.slane %v14418_v63, 2  ;;  %v7449_v16 = vld [vmem:[%s15196_s6 + $0xd78] sm:$0xff]  ;;  %v7528_v49 = vld [vmem:[%s15196_s6 + $0xfc8] sm:$0xff] }
 0x5f0   : > { %9332 = vmatprep.subr.bf16.mxu1 %v9630_v2  ;;  %v9276_v37 = vpack.c.bf16 %v7449_v16, %v7448_v12  ;;  %v9387_v33 = vpack.c.bf16 %v7528_v49, %v7527_v15  ;;  %v7542_v12 = vld [vmem:[%s15196_s6 + $0x1038] sm:$0xff]  ;;  %v7508_v15 = vld [vmem:[%s15196_s6 + $0xf30] sm:$0xff] }
 0x5f1   : > { %4958 = vmatmul.mubr.f32.vlgmr.msra.gmra.mrb[58].mxu0 %v4888_v14  ;;  %v7509_v49 = vld [vmem:[%s15196_s6 + $0xf38] sm:$0xff] }
 0x5f2   : > { %5241 = vmatmul.mubr.f32.vlgmr.msra.gmra.mrb[62].mxu1 %v14551_v24  ;;  %9253 = vmatpush1.bf16.msra.mxu0 %v9252_v59 }
 0x5f3   : > { %7450 = vmatprep.mubr.msk.f32.mxu0 %vm2921_vm3, %v5079_v46  ;;  %9334 = vmatpush1.bf16.msra.mxu1 %v9333_v55  ;;  %v7472_v46 = vld [vmem:[%s15196_s6 + $0xe20] sm:$0xff] }
 0x5f4   : > { %7507 = vmatprep.mubr.msk.f32.mxu1 %vm2921_vm3, %v5363_v31  ;;  %9254 = vmatprep.subr.bf16.mxu0 %v9630_v2 }
 0x5f5   : > { %9335 = vmatprep.subr.bf16.mxu1 %v9630_v2 }
 0x5f6   : > { %9256 = vmatpush1.bf16.msra.mxu0 %v9255_v51  ;;  %v5362_v51 = vrot.slane %v14551_v24, 2 }
 0x5f7   : > { %9337 = vmatpush1.bf16.msra.mxu1 %v9336_v10  ;;  %9257 = vmatprep.subr.bf16.mxu0 %v9630_v2  ;;  %v7530_v10 = vld [vmem:[%s15196_s6 + $0xfd8] sm:$0xff] }
 0x5f8   : > { %9338 = vmatprep.subr.bf16.mxu1 %v9630_v2  ;;  %v9390_v57 = vpack.c.bf16 %v7530_v10, %v7529_v44  ;;  %v7510_v10 = vld [vmem:[%s15196_s6 + $0xf40] sm:$0xff] }
 0x5fa   : > { %9259 = vmatpush1.bf16.msra.mxu0 %v9258_v27  ;;  %v7475_v27 = vld [vmem:[%s15196_s6 + $0xe38] sm:$0xff] }
 0x5fb   : > { %9340 = vmatpush1.bf16.msra.mxu1 %v9339_v29  ;;  %9260 = vmatprep.subr.bf16.mxu0 %v9630_v2  ;;  %v7531_v29 = vld [vmem:[%s15196_s6 + $0xfe0] sm:$0xff]  ;;  %v9312_v34 = vpack.c.bf16 %v7475_v27, %v7474_v26  ;;  %v5458_v26 = vrot.slane %v14418_v63, 3 }
 0x5fc   : > { %9341 = vmatprep.subr.bf16.mxu1 %v9630_v2  ;;  %v9393_v42 = vpack.c.bf16 %v7532_v32, %v7531_v29  ;;  %v7512_v32 = vld [vmem:[%s15196_s6 + $0xf50] sm:$0xff] }
 0x5fe   : > { %9262 = vmatpush1.bf16.msra.mxu0 %v9261_v62  ;;  %v7477_v62 = vld [vmem:[%s15196_s6 + $0xe48] sm:$0xff] }
 0x5ff   : > { %9343 = vmatpush1.bf16.msra.mxu1 %v9342_v3  ;;  %9263 = vmatprep.subr.bf16.mxu0 %v9630_v2  ;;  %v7533_v3 = vld [vmem:[%s15196_s6 + $0xff0] sm:$0xff]  ;;  %v9315_v11 = vpack.c.bf16 %v7477_v62, %v7476_v61  ;;  %v7570_v61 = vld [vmem:[%s15196_s6 + $0x1108] sm:$0xff] }
 0x600   : > { %9344 = vmatprep.subr.bf16.mxu1 %v9630_v2  ;;  %v9396_v39 = vpack.c.bf16 %v7534_v30, %v7533_v3  ;;  %v7514_v30 = vld [vmem:[%s15196_s6 + $0xf60] sm:$0xff] }
 0x602   : > { %9265 = vmatpush1.bf16.msra.mxu0 %v9264_v36  ;;  %v7479_v36 = vld [vmem:[%s15196_s6 + $0xe58] sm:$0xff] }
 0x603   : > { %9346 = vmatpush1.bf16.msra.mxu1 %v9345_v50  ;;  %9266 = vmatprep.subr.bf16.mxu0 %v9630_v2  ;;  %v7535_v50 = vld [vmem:[%s15196_s6 + $0x1000] sm:$0xff]  ;;  %v9318_v1 = vpack.c.bf16 %v7479_v36, %v7478_v40  ;;  %v7572_v40 = vld [vmem:[%s15196_s6 + $0x1118] sm:$0xff] }
 0x604   : > { %9347 = vmatprep.subr.bf16.mxu1 %v9630_v2  ;;  %v9399_v22 = vpack.c.bf16 %v7536_v54, %v7535_v50  ;;  %v7516_v54 = vld [vmem:[%s15196_s6 + $0xf70] sm:$0xff] }
 0x606   : > { %9268 = vmatpush1.bf16.msra.mxu0 %v9267_v52  ;;  %v7481_v52 = vld [vmem:[%s15196_s6 + $0xe68] sm:$0xff] }
 0x607   : > { %9349 = vmatpush1.bf16.msra.mxu1 %v9348_v23  ;;  %9269 = vmatprep.subr.bf16.mxu0 %v9630_v2  ;;  %v7537_v23 = vld [vmem:[%s15196_s6 + $0x1010] sm:$0xff]  ;;  %v9321_v58 = vpack.c.bf16 %v7481_v52, %v7480_v4  ;;  %v7574_v4 = vld [vmem:[%s15196_s6 + $0x1128] sm:$0xff] }
 0x608   : > { %9350 = vmatprep.subr.bf16.mxu1 %v9630_v2  ;;  %v9402_v43 = vpack.c.bf16 %v7538_v25, %v7537_v23  ;;  %v7518_v25 = vld [vmem:[%s15196_s6 + $0xf80] sm:$0xff] }
 0x60a   : > { %9271 = vmatpush1.bf16.msra.mxu0 %v9270_v18  ;;  %v7483_v18 = vld [vmem:[%s15196_s6 + $0xe78] sm:$0xff] }
 0x60b   : > { %9352 = vmatpush1.bf16.msra.mxu1 %v9351_v45  ;;  %9272 = vmatprep.subr.bf16.mxu0 %v9630_v2  ;;  %v7539_v45 = vld [vmem:[%s15196_s6 + $0x1020] sm:$0xff]  ;;  %v9324_v8 = vpack.c.bf16 %v7483_v18, %v7482_v53  ;;  %v7576_v53 = vld [vmem:[%s15196_s6 + $0x1138] sm:$0xff] }
 0x60c   : > { %9353 = vmatprep.subr.bf16.mxu1 %v9630_v2  ;;  %v9405_v5 = vpack.c.bf16 %v7540_v28, %v7539_v45  ;;  %v7520_v28 = vld [vmem:[%s15196_s6 + $0xf90] sm:$0xff] }
 0x60e   : > { %9274 = vmatpush1.bf16.msra.mxu0 %v9273_v6  ;;  %v7485_v6 = vld [vmem:[%s15196_s6 + $0xe88] sm:$0xff] }
 0x60f   : > { %9355 = vmatpush1.bf16.msra.mxu1 %v9354_v17  ;;  %9275 = vmatprep.subr.bf16.mxu0 %v9630_v2  ;;  %v7541_v17 = vld [vmem:[%s15196_s6 + $0x1030] sm:$0xff]  ;;  %v9327_v16 = vpack.c.bf16 %v7485_v6, %v7484_v9  ;;  %v7578_v9 = vld [vmem:[%s15196_s6 + $0x1148] sm:$0xff] }
 0x610   : > { %v4010_v41 = vpop.f32.mrb[48].mxu0  ;;  %9356 = vmatprep.subr.bf16.mxu1 %v9630_v2  ;;  %v9408_v7 = vpack.c.bf16 %v7542_v12, %v7541_v17  ;;  %v7522_v12 = vld [vmem:[%s15196_s6 + $0xfa0] sm:$0xff] }
 0x611   : > { %v4014_v59 = vadd.f32 %v4010_v41, %v14549_v0  ;;  %v14678_v14 = vpop.f32.mrb[52].mxu1  ;;  %v4012_v55 = vpop.f32.mrb[49].mxu0  ;;  %v7473_v0 = vld [vmem:[%s15196_s6 + $0xe28] sm:$0xff] }
 0x612   : > { %v4297_v60 = vpop.f32.mrb[53].mxu1  ;;  %9277 = vmatpush1.bf16.msra.mxu0 %v9276_v37  ;;  %v9309_v21 = vpack.c.bf16 %v7473_v0, %v7472_v46  ;;  %v7487_v37 = vld [vmem:[%s15196_s6 + $0xe98] sm:$0xff]  ;;  %v7565_v55 = vld [vmem:[%s15196_s6 + $0x10e0] sm:$0xff]  ;;  %v9360_v0 = vpack.c.bf16 %v7509_v49, %v7508_v15  ;;  %v7582_v15 = vld [vmem:[%s15196_s6 + $0x1168] sm:$0xff] }
 0x613   : > { %9358 = vmatpush1.bf16.msra.mxu1 %v9357_v38  ;;  %9305 = vmatprep.subr.bf16.mxu0 %v9630_v2  ;;  %v14689_v31 = vadd.f32 %v14538_v56, %v4014_v59  ;;  %v5553_v56 = vrot.slane %v14418_v63, 4  ;;  %v7543_v38 = vld [vmem:[%s15196_s6 + $0x1040] sm:$0xff]  ;;  %v9330_v47 = vpack.c.bf16 %v7487_v37, %v7486_v19  ;;  %v7566_v60 = vld [vmem:[%s15196_s6 + $0x10e8] sm:$0xff]  ;;  %v7580_v19 = vld [vmem:[%s15196_s6 + $0x1158] sm:$0xff] }
 0x614   : > { %9386 = vmatprep.subr.bf16.mxu1 %v9630_v2  ;;  %v9411_v41 = vpack.c.bf16 %v7544_v13, %v7543_v38  ;;  %v9441_v44 = vpack.c.bf16 %v7566_v60, %v7565_v55  ;;  %v7524_v13 = vld [vmem:[%s15196_s6 + $0xfb0] sm:$0xff]  ;;  %v7547_v60 = vld [vmem:[%s15196_s6 + $0x1058] sm:$0xff] }
 0x615   : > { %5148 = vmatmul.mubr.f32.vlgmr.msra.gmra.mrb[60].mxu0 %v5078_v35  ;;  %v7546_v55 = vld [vmem:[%s15196_s6 + $0x1050] sm:$0xff] }
 0x616   : > { %5432 = vmatmul.mubr.f32.vlgmr.msra.gmra.mrb[64].mxu1 %v5362_v51  ;;  %9307 = vmatpush1.bf16.msra.mxu0 %v9306_v48  ;;  %v5267_v51 = vrot.slane %v14551_v24, 1 }
 0x617   : > { %7488 = vmatprep.mubr.msk.f32.mxu0 %vm2921_vm3, %v5268_v20  ;;  %9388 = vmatpush1.bf16.msra.mxu1 %v9387_v33 }
 0x618   : > { %7545 = vmatprep.mubr.msk.f32.mxu1 %vm2921_vm3, %v5553_v56  ;;  %9308 = vmatprep.subr.bf16.mxu0 %v9630_v2  ;;  %v5552_v56 = vrot.slane %v14551_v24, 4 }
 0x619   : > { %9389 = vmatprep.subr.bf16.mxu1 %v9630_v2 }
 0x61a   : > { %9310 = vmatpush1.bf16.msra.mxu0 %v9309_v21  ;;  %v7567_v21 = vld [vmem:[%s15196_s6 + $0x10f0] sm:$0xff] }
 0x61b   : > { %9391 = vmatpush1.bf16.msra.mxu1 %v9390_v57  ;;  %9311 = vmatprep.subr.bf16.mxu0 %v9630_v2  ;;  %v7568_v57 = vld [vmem:[%s15196_s6 + $0x10f8] sm:$0xff] }
 0x61c   : > { %9392 = vmatprep.subr.bf16.mxu1 %v9630_v2  ;;  %v9444_v29 = vpack.c.bf16 %v7568_v57, %v7567_v21  ;;  %v5742_v21 = vrot.slane %v14551_v24, 6  ;;  %v5648_v57 = vrot.slane %v14418_v63, 5 }
 0x61e   : > { %9313 = vmatpush1.bf16.msra.mxu0 %v9312_v34  ;;  %v7513_v34 = vld [vmem:[%s15196_s6 + $0xf58] sm:$0xff] }
 0x61f   : > { %9394 = vmatpush1.bf16.msra.mxu1 %v9393_v42  ;;  %9314 = vmatprep.subr.bf16.mxu0 %v9630_v2  ;;  %v7569_v42 = vld [vmem:[%s15196_s6 + $0x1100] sm:$0xff]  ;;  %v9366_v62 = vpack.c.bf16 %v7513_v34, %v7512_v32  ;;  %v7553_v32 = vld [vmem:[%s15196_s6 + $0x1088] sm:$0xff] }
 0x620   : > { %9395 = vmatprep.subr.bf16.mxu1 %v9630_v2  ;;  %v9447_v3 = vpack.c.bf16 %v7570_v61, %v7569_v42  ;;  %v7554_v42 = vld [vmem:[%s15196_s6 + $0x1090] sm:$0xff]  ;;  %v7555_v61 = vld [vmem:[%s15196_s6 + $0x1098] sm:$0xff] }
 0x622   : > { %9316 = vmatpush1.bf16.msra.mxu0 %v9315_v11  ;;  %v7515_v11 = vld [vmem:[%s15196_s6 + $0xf68] sm:$0xff] }
 0x623   : > { %9397 = vmatpush1.bf16.msra.mxu1 %v9396_v39  ;;  %9317 = vmatprep.subr.bf16.mxu0 %v9630_v2  ;;  %v7571_v39 = vld [vmem:[%s15196_s6 + $0x1110] sm:$0xff]  ;;  %v9369_v36 = vpack.c.bf16 %v7515_v11, %v7514_v30  ;;  %v7557_v30 = vld [vmem:[%s15196_s6 + $0x10a8] sm:$0xff] }
 0x624   : > { %9398 = vmatprep.subr.bf16.mxu1 %v9630_v2  ;;  %v9450_v50 = vpack.c.bf16 %v7572_v40, %v7571_v39  ;;  %v7558_v39 = vld [vmem:[%s15196_s6 + $0x10b0] sm:$0xff]  ;;  %v7559_v40 = vld [vmem:[%s15196_s6 + $0x10b8] sm:$0xff] }
 0x626   : > { %9319 = vmatpush1.bf16.msra.mxu0 %v9318_v1  ;;  %v7517_v1 = vld [vmem:[%s15196_s6 + $0xf78] sm:$0xff] }
 0x627   : > { %9400 = vmatpush1.bf16.msra.mxu1 %v9399_v22  ;;  %9320 = vmatprep.subr.bf16.mxu0 %v9630_v2  ;;  %v7573_v22 = vld [vmem:[%s15196_s6 + $0x1120] sm:$0xff]  ;;  %v9372_v52 = vpack.c.bf16 %v7517_v1, %v7516_v54  ;;  %v7561_v54 = vld [vmem:[%s15196_s6 + $0x10c8] sm:$0xff] }
 0x628   : > { %9401 = vmatprep.subr.bf16.mxu1 %v9630_v2  ;;  %v9453_v23 = vpack.c.bf16 %v7574_v4, %v7573_v22  ;;  %v7562_v22 = vld [vmem:[%s15196_s6 + $0x10d0] sm:$0xff]  ;;  %v7563_v4 = vld [vmem:[%s15196_s6 + $0x10d8] sm:$0xff] }
 0x62a   : > { %9322 = vmatpush1.bf16.msra.mxu0 %v9321_v58  ;;  %v7519_v58 = vld [vmem:[%s15196_s6 + $0xf88] sm:$0xff] }
 0x62b   : > { %9403 = vmatpush1.bf16.msra.mxu1 %v9402_v43  ;;  %9323 = vmatprep.subr.bf16.mxu0 %v9630_v2  ;;  %v7575_v43 = vld [vmem:[%s15196_s6 + $0x1130] sm:$0xff]  ;;  %v9375_v18 = vpack.c.bf16 %v7519_v58, %v7518_v25  ;;  %v7585_v25 = vld [vmem:[%s15196_s6 + $0x1178] sm:$0xff] }
 0x62c   : > { %9404 = vmatprep.subr.bf16.mxu1 %v9630_v2  ;;  %v9456_v45 = vpack.c.bf16 %v7576_v53, %v7575_v43 }
 0x62e   : > { %9325 = vmatpush1.bf16.msra.mxu0 %v9324_v8  ;;  %v7521_v8 = vld [vmem:[%s15196_s6 + $0xf98] sm:$0xff] }
 0x62f   : > { %9406 = vmatpush1.bf16.msra.mxu1 %v9405_v5  ;;  %9326 = vmatprep.subr.bf16.mxu0 %v9630_v2  ;;  %v7577_v5 = vld [vmem:[%s15196_s6 + $0x1140] sm:$0xff]  ;;  %v9378_v6 = vpack.c.bf16 %v7521_v8, %v7520_v28  ;;  %v5647_v8 = vrot.slane %v14551_v24, 5 }
 0x630   : > { %9407 = vmatprep.subr.bf16.mxu1 %v9630_v2  ;;  %v9459_v17 = vpack.c.bf16 %v7578_v9, %v7577_v5  ;;  %v7586_v5 = vld [vmem:[%s15196_s6 + $0x1180] sm:$0xff]  ;;  %v7587_v9 = vld [vmem:[%s15196_s6 + $0x1188] sm:$0xff] }
 0x632   : > { %9328 = vmatpush1.bf16.msra.mxu0 %v9327_v16  ;;  %v7523_v16 = vld [vmem:[%s15196_s6 + $0xfa8] sm:$0xff] }
 0x633   : > { %9409 = vmatpush1.bf16.msra.mxu1 %v9408_v7  ;;  %9329 = vmatprep.subr.bf16.mxu0 %v9630_v2  ;;  %v7579_v7 = vld [vmem:[%s15196_s6 + $0x1150] sm:$0xff]  ;;  %v9381_v37 = vpack.c.bf16 %v7523_v16, %v7522_v12  ;;  %v9471_v12 = vpack.c.bf16 %v7587_v9, %v7586_v5  ;;  %v5928_v5 = vld [vmem:[%s15198_s8 + $0x60] sm:$0xff]  ;;  %v5929_v9 = vld [vmem:[%s15198_s8 + $0x68] sm:$0xff] }
 0x634   : > { %v4200_v59 = vpop.f32.mrb[50].mxu0  ;;  %9410 = vmatprep.subr.bf16.mxu1 %v9630_v2  ;;  %v9462_v38 = vpack.c.bf16 %v7580_v19, %v7579_v7  ;;  %v7588_v16 = vld [vmem:[%s15196_s6 + $0x1190] sm:$0xff]  ;;  %v7589_v7 = vld [vmem:[%s15196_s6 + $0x1198] sm:$0xff] }
 0x635   : > { %v4204_v48 = vadd.f32 %v4200_v59, %v14689_v31  ;;  %v14816_v35 = vpop.f32.mrb[54].mxu1  ;;  %v4202_v33 = vpop.f32.mrb[51].mxu0  ;;  %v7511_v31 = vld [vmem:[%s15196_s6 + $0xf48] sm:$0xff]  ;;  %v9474_v19 = vpack.c.bf16 %v7589_v7, %v7588_v16  ;;  %v15211_v7 = vmov 0.0  }
 0x636   : > { %v4485_v46 = vpop.f32.mrb[55].mxu1  ;;  %9331 = vmatpush1.bf16.msra.mxu0 %v9330_v47  ;;  %v9363_v27 = vpack.c.bf16 %v7511_v31, %v7510_v10  ;;  %v7525_v47 = vld [vmem:[%s15196_s6 + $0xfb8] sm:$0xff]  ;;  %v5457_v10 = vrot.slane %v14551_v24, 3  ;;  %v7548_v31 = vld [vmem:[%s15196_s6 + $0x1060] sm:$0xff] }
 0x637   : > { %9412 = vmatpush1.bf16.msra.mxu1 %v9411_v41  ;;  %9359 = vmatprep.subr.bf16.mxu0 %v9630_v2  ;;  %v14827_v20 = vadd.f32 %v14678_v14, %v4204_v48  ;;  %v5743_v14 = vrot.slane %v14418_v63, 6  ;;  %v7581_v41 = vld [vmem:[%s15196_s6 + $0x1160] sm:$0xff]  ;;  %v9384_v49 = vpack.c.bf16 %v7525_v47, %v7524_v13  ;;  %v7592_v13 = vld [vmem:[%s15196_s6 + $0x11b0] sm:$0xff]  ;;  %v7593_v47 = vld [vmem:[%s15196_s6 + $0x11b8] sm:$0xff] }
 0x638   : > { %9440 = vmatprep.subr.bf16.mxu1 %v9630_v2  ;;  %v9465_v59 = vpack.c.bf16 %v7582_v15, %v7581_v41  ;;  %v9480_v41 = vpack.c.bf16 %v7593_v47, %v7592_v13  ;;  %v7594_v15 = vld [vmem:[%s15196_s6 + $0x11c0] sm:$0xff] }
 0x639   : > { %5337 = vmatmul.mubr.f32.vlgmr.msra.gmra.mrb[62].mxu0 %v5267_v51 }
 0x63a   : > { %5622 = vmatmul.mubr.f32.vlgmr.msra.gmra.mrb[66].mxu1 %v5552_v56  ;;  %9361 = vmatpush1.bf16.msra.mxu0 %v9360_v0  ;;  %v7549_v56 = vld [vmem:[%s15196_s6 + $0x1068] sm:$0xff] }
 0x63b   : > { %7526 = vmatprep.mubr.msk.f32.mxu0 %vm2921_vm3, %v5458_v26  ;;  %9442 = vmatpush1.bf16.msra.mxu1 %v9441_v44  ;;  %v9414_v44 = vpack.c.bf16 %v7547_v60, %v7546_v55  ;;  %v9417_v26 = vpack.c.bf16 %v7549_v56, %v7548_v31  ;;  %v7596_v55 = vld [vmem:[%s15196_s6 + $0x11d0] sm:$0xff]  ;;  %v7597_v60 = vld [vmem:[%s15196_s6 + $0x11d8] sm:$0xff] }
 0x63c   : > { %7583 = vmatprep.mubr.msk.f32.mxu1 %vm2921_vm3, %v5743_v14  ;;  %9362 = vmatprep.subr.bf16.mxu0 %v9630_v2  ;;  %v7550_v14 = vld [vmem:[%s15196_s6 + $0x1070] sm:$0xff] }
 0x63d   : > { %9443 = vmatprep.subr.bf16.mxu1 %v9630_v2 }
 0x63e   : > { %9364 = vmatpush1.bf16.msra.mxu0 %v9363_v27 }
 0x63f   : > { %9445 = vmatpush1.bf16.msra.mxu1 %v9444_v29  ;;  %9365 = vmatprep.subr.bf16.mxu0 %v9630_v2  ;;  %v7552_v29 = vld [vmem:[%s15196_s6 + $0x1080] sm:$0xff] }
 0x640   : > { %9446 = vmatprep.subr.bf16.mxu1 %v9630_v2  ;;  %v9423_v34 = vpack.c.bf16 %v7553_v32, %v7552_v29 }
 0x642   : > { %9367 = vmatpush1.bf16.msra.mxu0 %v9366_v62  ;;  %v9426_v62 = vpack.c.bf16 %v7555_v61, %v7554_v42  ;;  %v5916_v61 = vld [vmem:[%s15198_s8] sm:$0xff] }
 0x643   : > { %9448 = vmatpush1.bf16.msra.mxu1 %v9447_v3  ;;  %9368 = vmatprep.subr.bf16.mxu0 %v9630_v2  ;;  %v7556_v3 = vld [vmem:[%s15196_s6 + $0x10a0] sm:$0xff] }
 0x644   : > { %9449 = vmatprep.subr.bf16.mxu1 %v9630_v2  ;;  %v9429_v11 = vpack.c.bf16 %v7557_v30, %v7556_v3  ;;  %v5919_v30 = vld [vmem:[%s15198_s8 + $0x18] sm:$0xff] }
 0x646   : > { %9370 = vmatpush1.bf16.msra.mxu0 %v9369_v36  ;;  %v9432_v36 = vpack.c.bf16 %v7559_v40, %v7558_v39  ;;  %v5920_v39 = vld [vmem:[%s15198_s8 + $0x20] sm:$0xff]  ;;  %v5921_v40 = vld [vmem:[%s15198_s8 + $0x28] sm:$0xff] }
 0x647   : > { %9451 = vmatpush1.bf16.msra.mxu1 %v9450_v50  ;;  %9371 = vmatprep.subr.bf16.mxu0 %v9630_v2  ;;  %v7560_v50 = vld [vmem:[%s15196_s6 + $0x10c0] sm:$0xff] }
 0x648   : > { %9452 = vmatprep.subr.bf16.mxu1 %v9630_v2  ;;  %v9435_v1 = vpack.c.bf16 %v7561_v54, %v7560_v50  ;;  %v5922_v50 = vld [vmem:[%s15198_s8 + $0x30] sm:$0xff]  ;;  %v5923_v54 = vld [vmem:[%s15198_s8 + $0x38] sm:$0xff] }
 0x64a   : > { %9373 = vmatpush1.bf16.msra.mxu0 %v9372_v52  ;;  %v9438_v52 = vpack.c.bf16 %v7563_v4, %v7562_v22  ;;  %v5924_v22 = vld [vmem:[%s15198_s8 + $0x40] sm:$0xff]  ;;  %v5925_v4 = vld [vmem:[%s15198_s8 + $0x48] sm:$0xff] }
 0x64b   : > { %9454 = vmatpush1.bf16.msra.mxu1 %v9453_v23  ;;  %9374 = vmatprep.subr.bf16.mxu0 %v9630_v2  ;;  %v7584_v23 = vld [vmem:[%s15196_s6 + $0x1170] sm:$0xff] }
 0x64c   : > { %9455 = vmatprep.subr.bf16.mxu1 %v9630_v2  ;;  %v9468_v28 = vpack.c.bf16 %v7585_v25, %v7584_v23  ;;  %v5926_v23 = vld [vmem:[%s15198_s8 + $0x50] sm:$0xff]  ;;  %v5927_v25 = vld [vmem:[%s15198_s8 + $0x58] sm:$0xff] }
 0x64e   : > { %9376 = vmatpush1.bf16.msra.mxu0 %v9375_v18 }
 0x64f   : > { %9457 = vmatpush1.bf16.msra.mxu1 %v9456_v45  ;;  %9377 = vmatprep.subr.bf16.mxu0 %v9630_v2 }
 0x650   : > { %9458 = vmatprep.subr.bf16.mxu1 %v9630_v2 }
 0x652   : > { %9379 = vmatpush1.bf16.msra.mxu0 %v9378_v6 }
 0x653   : > { %9460 = vmatpush1.bf16.msra.mxu1 %v9459_v17  ;;  %9380 = vmatprep.subr.bf16.mxu0 %v9630_v2  ;;  %v5838_v17 = vrot.slane %v14418_v63, 7  ;;  %v7590_v63 = vld [vmem:[%s15196_s6 + $0x11a0] sm:$0xff] }
 0x654   : > { %9461 = vmatprep.subr.bf16.mxu1 %v9630_v2 }
 0x656   : > { %9382 = vmatpush1.bf16.msra.mxu0 %v9381_v37  ;;  %v7591_v37 = vld [vmem:[%s15196_s6 + $0x11a8] sm:$0xff] }
 0x657   : > { %9463 = vmatpush1.bf16.msra.mxu1 %v9462_v38  ;;  %9383 = vmatprep.subr.bf16.mxu0 %v9630_v2  ;;  %v9477_v38 = vpack.c.bf16 %v7591_v37, %v7590_v63 }
 0x658   : > { %v4390_v48 = vpop.f32.mrb[52].mxu0  ;;  %9464 = vmatprep.subr.bf16.mxu1 %v9630_v2 }
 0x659   : > { %v4394_v33 = vadd.f32 %v4390_v48, %v14827_v20  ;;  %v14948_v46 = vpop.f32.mrb[56].mxu1  ;;  %v4392_v0 = vpop.f32.mrb[53].mxu0  ;;  %v9486_v48 = vpack.c.bf16 %v7597_v60, %v7596_v55 }
 0x65a   : > { %v4676_v51 = vpop.f32.mrb[57].mxu1  ;;  %9385 = vmatpush1.bf16.msra.mxu0 %v9384_v49  ;;  %v7595_v49 = vld [vmem:[%s15196_s6 + $0x11c8] sm:$0xff] }
 0x65b   : > { %9466 = vmatpush1.bf16.msra.mxu1 %v9465_v59  ;;  %9413 = vmatprep.subr.bf16.mxu0 %v9630_v2  ;;  %v4487_v20 = vadd.f32 %v14816_v35, %v4394_v33  ;;  %v7551_v35 = vld [vmem:[%s15196_s6 + $0x1078] sm:$0xff]  ;;  %v9483_v59 = vpack.c.bf16 %v7595_v49, %v7594_v15  ;;  %v7598_v33 = vld [vmem:[%s15196_s6 + $0x11e0] sm:$0xff]  ;;  %v7600_v51 = vld [vmem:[%s15196_s6 + $0x11f0] sm:$0xff] }
 0x65c   : > { %9494 = vmatprep.subr.bf16.mxu1 %v9630_v2  ;;  %v9420_v27 = vpack.c.bf16 %v7551_v35, %v7550_v14 }
 0x65d   : > { %5527 = vmatmul.mubr.f32.vlgmr.msra.gmra.mrb[64].mxu0 %v5457_v10 }
 0x65e   : > { %5812 = vmatmul.mubr.f32.vlgmr.msra.gmra.mrb[68].mxu1 %v5742_v21  ;;  %9415 = vmatpush1.bf16.msra.mxu0 %v9414_v44  ;;  %v7601_v44 = vld [vmem:[%s15196_s6 + $0x11f8] sm:$0xff] }
 0x65f   : > { %7564 = vmatprep.mubr.msk.f32.mxu0 %vm2921_vm3, %v5648_v57  ;;  %9416 = vmatprep.subr.bf16.mxu0 %v9630_v2  ;;  %v9492_v10 = vpack.c.bf16 %v7601_v44, %v7600_v51  ;;  %v5913_v51 = vld [vmem:[%s15197_s7] sm:$0x1] }
 0x660   : > { %7655 = vmatprep.mubr.msk.f32.mxu1 %vm9631_vm4, %v15211_v7 }
 0x662   : > { %9418 = vmatpush1.bf16.msra.mxu0 %v9417_v26  ;;  %v5837_v26 = vrot.slane %v14551_v24, 7  ;;  %v5918_v24 = vld [vmem:[%s15198_s8 + $0x10] sm:$0xff] }
 0x663   : > { %9419 = vmatprep.subr.bf16.mxu0 %v9630_v2 }
 0x666   : > { %9421 = vmatpush1.bf16.msra.mxu0 %v9420_v27 }
 0x667   : > { %9422 = vmatprep.subr.bf16.mxu0 %v9630_v2 }
 0x66a   : > { %9424 = vmatpush1.bf16.msra.mxu0 %v9423_v34 }
 0x66b   : > { %9425 = vmatprep.subr.bf16.mxu0 %v9630_v2 }
 0x66e   : > { %9427 = vmatpush1.bf16.msra.mxu0 %v9426_v62  ;;  %v5917_v62 = vld [vmem:[%s15198_s8 + $0x8] sm:$0xff] }
 0x66f   : > { %9428 = vmatprep.subr.bf16.mxu0 %v9630_v2  ;;  %v9495_v3 = vpack.c.bf16 %v5917_v62, %v5916_v61 }
 0x671   : > { %9496 = vmatpush3.bf16.msra.mxu1 %v9495_v3 }
 0x672   : > { %9430 = vmatpush1.bf16.msra.mxu0 %v9429_v11  ;;  %v9498_v11 = vpack.c.bf16 %v5919_v30, %v5918_v24  ;;  %9497 = vmatprep.subr.bf16.mxu1 %v9630_v2 }
 0x673   : > { %9431 = vmatprep.subr.bf16.mxu0 %v9630_v2 }
 0x675   : > { %9499 = vmatpush3.bf16.msra.mxu1 %v9498_v11 }
 0x676   : > { %9433 = vmatpush1.bf16.msra.mxu0 %v9432_v36  ;;  %v9501_v36 = vpack.c.bf16 %v5921_v40, %v5920_v39  ;;  %9500 = vmatprep.subr.bf16.mxu1 %v9630_v2 }
 0x677   : > { %9434 = vmatprep.subr.bf16.mxu0 %v9630_v2 }
 0x679   : > { %9502 = vmatpush3.bf16.msra.mxu1 %v9501_v36 }
 0x67a   : > { %9436 = vmatpush1.bf16.msra.mxu0 %v9435_v1  ;;  %v9504_v1 = vpack.c.bf16 %v5923_v54, %v5922_v50  ;;  %9503 = vmatprep.subr.bf16.mxu1 %v9630_v2 }
 0x67b   : > { %9437 = vmatprep.subr.bf16.mxu0 %v9630_v2 }
 0x67c   : > { %v4579_v58 = vpop.f32.mrb[54].mxu0 }
 0x67d   : > { %v4583_v43 = vadd.f32 %v4579_v58, %v4487_v20  ;;  %v4864_v53 = vpop.f32.mrb[58].mxu1  ;;  %v4581_v18 = vpop.f32.mrb[55].mxu0  ;;  %9505 = vmatpush3.bf16.msra.mxu1 %v9504_v1 }
 0x67e   : > { %v4866_v45 = vpop.f32.mrb[59].mxu1  ;;  %9439 = vmatpush1.bf16.msra.mxu0 %v9438_v52  ;;  %v9507_v52 = vpack.c.bf16 %v5925_v4, %v5924_v22  ;;  %9506 = vmatprep.subr.bf16.mxu1 %v9630_v2 }
 0x67f   : > { %9467 = vmatprep.subr.bf16.mxu0 %v9630_v2  ;;  %v4678_v6 = vadd.f32 %v14948_v46, %v4583_v43  ;;  %v7599_v46 = vld [vmem:[%s15196_s6 + $0x11e8] sm:$0xff]  ;;  %v9510_v43 = vpack.c.bf16 %v5927_v25, %v5926_v23 }
 0x680   : > { %v9489_v0 = vpack.c.bf16 %v7599_v46, %v7598_v33 }
 0x681   : > { %5717 = vmatmul.mubr.f32.vlgmr.msra.gmra.mrb[66].mxu0 %v5647_v8  ;;  %9508 = vmatpush3.bf16.msra.mxu1 %v9507_v52 }
 0x682   : > { %9469 = vmatpush1.bf16.msra.mxu0 %v9468_v28  ;;  %7602 = vmatprep.mubr.msk.f32.mxu0 %vm2921_vm3, %v5838_v17  ;;  %v5930_v17 = vld [vmem:[%s15198_s8 + $0x70] sm:$0xff] }
 0x683   : > { %9470 = vmatprep.subr.bf16.mxu0 %v9630_v2  ;;  %9509 = vmatprep.subr.bf16.mxu1 %v9630_v2 }
 0x685   : > { %9511 = vmatpush3.bf16.msra.mxu1 %v9510_v43 }
 0x686   : > { %9472 = vmatpush1.bf16.msra.mxu0 %v9471_v12  ;;  %9512 = vmatprep.subr.bf16.mxu1 %v9630_v2  ;;  %v5931_v12 = vld [vmem:[%s15198_s8 + $0x78] sm:$0xff] }
 0x687   : > { %9473 = vmatprep.subr.bf16.mxu0 %v9630_v2  ;;  %v9516_v16 = vpack.c.bf16 %v5931_v12, %v5930_v17 }
 0x68a   : > { %9475 = vmatpush1.bf16.msra.mxu0 %v9474_v19 }
 0x68b   : > { %9476 = vmatprep.subr.bf16.mxu0 %v9630_v2 }
 0x68e   : > { %9478 = vmatpush1.bf16.msra.mxu0 %v9477_v38 }
 0x68f   : > { %9479 = vmatprep.subr.bf16.mxu0 %v9630_v2 }
 0x692   : > { %9481 = vmatpush1.bf16.msra.mxu0 %v9480_v41 }
 0x693   : > { %9482 = vmatprep.subr.bf16.mxu0 %v9630_v2 }
 0x696   : > { %9484 = vmatpush1.bf16.msra.mxu0 %v9483_v59 }
 0x697   : > { %9485 = vmatprep.subr.bf16.mxu0 %v9630_v2 }
 0x69a   : > { %9487 = vmatpush1.bf16.msra.mxu0 %v9486_v48 }
 0x69b   : > { %9488 = vmatprep.subr.bf16.mxu0 %v9630_v2 }
 0x69e   : > { %9490 = vmatpush1.bf16.msra.mxu0 %v9489_v0 }
 0x69f   : > { %9491 = vmatprep.subr.bf16.mxu0 %v9630_v2 }
 0x6a0   : > { %v4769_v31 = vpop.f32.mrb[56].mxu0 }
 0x6a1   : > { %v4773_v56 = vadd.f32 %v4769_v31, %v4678_v6  ;;  %v5054_v20 = vpop.f32.mrb[60].mxu1  ;;  %v4771_v21 = vpop.f32.mrb[57].mxu0  ;;  %v9513_v6 = vpack.c.bf16 %v5929_v9, %v5928_v5 }
 0x6a2   : > { %v5056_v57 = vpop.f32.mrb[61].mxu1  ;;  %9493 = vmatpush1.bf16.msra.mxu0 %v9492_v10 }
 0x6a3   : > { %v4868_v14 = vadd.f32 %v4864_v53, %v4773_v56  ;;  %9514 = vmatpush3.bf16.msra.mxu1 %v9513_v6 }
 0x6a4   : > { %9515 = vmatprep.subr.bf16.mxu1 %v9630_v2 }
 0x6a5   : > { %5907 = vmatmul.mubr.f32.vlgmr.msra.gmra.mrb[68].mxu0 %v5837_v26 }
 0x6a7   : > { %9517 = vmatpush3.bf16.msra.mxu1 %v9516_v16 }
 0x6c4   : > { %v4959_v35 = vpop.f32.mrb[58].mxu0 }
 0x6c5   : > { %v4963_v27 = vadd.f32 %v4959_v35, %v4868_v14  ;;  %v5242_v29 = vpop.f32.mrb[62].mxu1  ;;  %v4961_v32 = vpop.f32.mrb[59].mxu0 }
 0x6c6   : > { %v5244_v34 = vpop.f32.mrb[63].mxu1 }
 0x6c7   : > { %v5058_v42 = vadd.f32 %v5054_v20, %v4963_v27  ;;  %v5932_v20 = vld [vmem:[%s15199_s9] sm:$0x1] }
 0x6e8   : > { %v5149_v58 = vpop.f32.mrb[60].mxu0 }
 0x6e9   : > { %v5153_v53 = vadd.f32 %v5149_v58, %v5058_v42  ;;  %v5433_v18 = vpop.f32.mrb[64].mxu1  ;;  %v5151_v45 = vpop.f32.mrb[61].mxu0 }
 0x6ea   : > { %v5435_v28 = vpop.f32.mrb[65].mxu1 }
 0x6eb   : > { %v5246_v8 = vadd.f32 %v5242_v29, %v5153_v53 }
 0x70c   : > { %v5338_v19 = vpop.f32.mrb[62].mxu0 }
 0x70d   : > { %v5342_v63 = vadd.f32 %v5338_v19, %v5246_v8  ;;  %v5623_v37 = vpop.f32.mrb[66].mxu1  ;;  %v5340_v38 = vpop.f32.mrb[63].mxu0 }
 0x70e   : > { %v5625_v13 = vpop.f32.mrb[67].mxu1 }
 0x70f   : > { %v5437_v47 = vadd.f32 %v5433_v18, %v5342_v63 }
 0x730   : > { %v5528_v41 = vpop.f32.mrb[64].mxu0 }
 0x731   : > { %v5532_v15 = vadd.f32 %v5528_v41, %v5437_v47  ;;  %v5813_v49 = vpop.f32.mrb[68].mxu1  ;;  %v5530_v59 = vpop.f32.mrb[65].mxu0 }
 0x732   : > { %v5815_v55 = vpop.f32.mrb[69].mxu1 }
 0x733   : > { %v5627_v60 = vadd.f32 %v5623_v37, %v5532_v15 }
 0x754   : > { %v5718_v48 = vpop.f32.mrb[66].mxu0 }
 0x755   : > { %v5722_v33 = vadd.f32 %v5718_v48, %v5627_v60  ;;  %v5720_v46 = vpop.f32.mrb[67].mxu0 }
 0x757   : > { %v5817_v0 = vadd.f32 %v5813_v49, %v5722_v33 }
 0x778   : > { %v5908_v2 = vpop.f32.mrb[68].mxu0 }
 0x779   : > { %v5912_v44 = vadd.f32 %v5908_v2, %v5817_v0  ;;  %v5910_v10 = vpop.f32.mrb[69].mxu0 }
 0x77b   : > { %v5914_v31 = vadd.f32 %v5913_v51, %v5912_v44 }
 0x77d   : > { %v5915_v56 = vmax.f32 %v5914_v31, 0.0 }
 0x77f   : > { %7656 = vmatmul.mubr.f32.vlgmr.msra.gmra.mrb[70].mxu1 %v5915_v56 }
 0x852   : > { %v5999_v21 = vpop.f32.mrb[70].mxu1 }
 0x853   : > { %v6000_v57 = vadd.f32 %v5999_v21, %v5932_v20  ;;  %v7657_v26 = vpop.f32.mrb[71].mxu1 }
 0x855   : > { %6003 = vst [vmem:[%s351_s25] sm:$0x1] %v6000_v57 }
 0x856   : > { %9577 = shalt.err (!%p9574_p3)
}
 0x857   : > { %s9578_s18 = scalar_lea.hbm %s15148_s20, 16  ;;  %s9582_s25 = scalar_lea.hbm %s15200_s10, 32 }
 0x858   : > { %p9579_p4 = scmp.ne.s32.totalorder %s15148_s20, %s9578_s18  ;;  %p9583_p9 = scmp.lt.u32.totalorder %s15148_s20, %s15200_s10 }
 0x859   : > { %p9584_p10 = scmp.lt.u32.totalorder %s9582_s25, %s9578_s18  ;;  %p9586_p12 = scmp.lt.u32.totalorder %s9578_s18, %s15148_s20 }
 0x85a   : > { %p9580_p7 = pnand %p9579_p4, %p9726_p5 }
 0x85b   : > { %p9585_p11 = por %p9584_p10, %p9583_p9 }
 0x85c   : > { %p9581_p8 = pneg %p9580_p7 }
 0x85d   : > { %p9587_p13 = por %p9586_p12, %p9585_p11 }
 0x85f   : > { %p9588_p0 = pnand %p9587_p13, %p9581_p8 }
 0x861   : > { %9591 = shalt.err (!%p9588_p0)
}
 0x862   : > { %9519 = dma.vmem_to_hbm [thread:$0]  (%p9726_p5), %s15150_s26, 16, %s15148_s20, %s6005_s30  }
 0x863 PF: > { %p9525_p1 = scmp.ge.s32.totalorder %s9626_s16, 2  ;;  %s6029_s11 = sand.u32 1, %s9614_s13  }
 0x864   : > { %s6030_s17 = scalar_lea.sflag [#allocation3], %s6029_s11 }
 0x865   : > { %p9522_p2 = pnand %p9525_p1, %p9730_p6 }
 0x867   : > { %9609 = dma.done.wait (!%p9522_p2), %s6030_s17, 16  }
 0x868   : > { %9611 = vsyncadd (!%p9522_p2), %s6030_s17, 4294967280  ;;  %s15212_s12 = sld [smem:[#allocation5_spill]]  ;;  %p20_p3 = scmp.ge.s32.totalorder %s9713_s19, 4  }
 0x869   : > { %s15213_s13 = smov %s9618_s14  ;;  %s15214_s14 = smov %s9622_s15 }
 0x86a   : > { %s15216_s16 = smov %s9713_s19  ;;  %22 = sbr.rel (!%p20_p3) target bundleno = 3 (0x3), region = 141 }
 0x86e   : > { %s15215_s15 = smov %s15212_s12 }
 0x871   :  { %6034 = vsyncpa [#allocation3], 1 }
 0x872   :  { %6036 = vsyncpa [#allocation3 + $0x1], 1 }

</bundles_post_ra>
